<compile_context>
chip_gen: v7x
topology: tpu7x:2x2x1
jax: 0.10.0
libtpu: 0.0.40
codegen_flags: <defaults>
</compile_context>

<pallas_src>
import functools

import numpy as np
import jax
import jax.numpy as jnp
from jax.experimental import pallas as pl
from jax.experimental.pallas import tpu as pltpu

LANE = 128


def _round_up(x, m):
    return ((x + m - 1) // m) * m


# -----------------------------------------------------------------------------
# Pallas kernel: full GRU mapping (r / z / h gates + update) for one
# (batch, N1-tile) grid point.
# -----------------------------------------------------------------------------
def _gru_kernel(L, S, TN, Cin, Dl, widths, transpose_out,
                x_ref, p1_ref, w0_ref, b0_ref, wfuse_ref, wfro_ref, *rest):
    # rest = (W_1, b_1, ..., W_{L-1}, b_{L-1}, out_ref); W_l / b_l pack r|z|h.
    out_ref = rest[-1]
    wtail = [rest[2 * i] for i in range(L - 1)]
    btail = [rest[2 * i + 1] for i in range(L - 1)]

    f32, bf16 = jnp.float32, jnp.bfloat16
    M0 = widths[1]

    def leaky(v):                                # LeakyReLU(0.1), f32 in/out
        return jnp.maximum(v, 0.1 * v)

    x2 = x_ref[0].reshape(S * TN, Cin)           # bf16, natural Cin lanes
    p1 = p1_ref[0]                               # f32,  [TN, Dl]

    # fuse_r | fuse_z fused into a single matmul on p1 (K = Dl).
    fuse = jnp.dot(p1.astype(bf16), wfuse_ref[...],
                   preferred_element_type=f32)   # [TN, 2*M0]

    # fused layer-0 conv for all three gates: x @ [W_r0 | W_z0 | W_h0].
    # K = Cin stays unpadded; Mosaic pads the operand tiles in VMEM for free.
    y0 = jnp.dot(x2, w0_ref[...], preferred_element_type=f32) + b0_ref[...]
    y0 = y0.reshape(S, TN, 3 * M0)

    def tail(t, col, final_act, do_pool):
        # t: [S, TN, widths[1]] bf16 (layer-0 already activated).
        pooled = False
        if do_pool and L == 2:                   # pool after layer L-2 == 0
            t = jnp.max(t, axis=0)               # [TN, C]
            pooled = True
        for l in range(1, L):
            ci, co = widths[l], widths[l + 1]
            w = wtail[l - 1][:, col * co:(col + 1) * co]
            b = btail[l - 1][:, col * co:(col + 1) * co]
            if pooled:
                y = jnp.dot(t, w, preferred_element_type=f32) + b
            else:
                y = jnp.dot(t.reshape(S * TN, ci), w,
                            preferred_element_type=f32) + b
                y = y.reshape(S, TN, co)
            t = final_act(y) if l == L - 1 else leaky(y).astype(bf16)
            if do_pool and l == L - 2:
                t = jnp.max(t, axis=0)
                pooled = True
        return t                                 # last-layer output is f32

    # ---- r gate; pe computed right after so r's live range stays short ----
    r = leaky(y0[:, :, 0:M0] + fuse[None, :, 0:M0]).astype(bf16)
    r = tail(r, 0, jax.nn.sigmoid, do_pool=False)            # [S, TN, D1p] f32
    rp = r[:, :, :Dl] * p1[None, :, :]                       # [S, TN, Dl]
    pe = jnp.dot(rp.reshape(S * TN, Dl).astype(bf16), wfro_ref[...],
                 preferred_element_type=f32).reshape(S, TN, M0)

    # ---- z gate ----
    z = leaky(y0[:, :, M0:2 * M0] + fuse[None, :, M0:2 * M0]).astype(bf16)
    z = tail(z, 1, jax.nn.sigmoid, do_pool=True)             # [TN, D1p]

    # ---- h candidate (use_relu=False -> tanh on the last layer) ----
    h = leaky(y0[:, :, 2 * M0:3 * M0] + pe).astype(bf16)
    h = tail(h, 2, jnp.tanh, do_pool=True)                   # [TN, D1p]

    # ---- GRU blend (f32); write the tile pre-transposed when requested ----
    zl, hl = z[:, :Dl], h[:, :Dl]
    out = (1.0 - zl) * p1 + zl * hl                          # [TN, Dl]
    if transpose_out:
        out_ref[0] = jnp.transpose(out)                      # [Dl, TN]
    else:
        out_ref[0] = out


# -----------------------------------------------------------------------------
# Glue: KNN grouping (square_distance + top-k + gather), plain JAX.  Gathers
# directly into the kernel layout and casts to bf16 before the concat so the
# grouped features are materialized once in HBM.
# -----------------------------------------------------------------------------
def knn_group(xyz1, xyz2, points1, points2, nsample):
    # xyz1 [B,3,N1], xyz2 [B,3,N2], points1 [B,D1,N1], points2 [B,D2,N2]
    x1 = jnp.transpose(xyz1, (0, 2, 1))              # [B, N1, 3]
    x2 = jnp.transpose(xyz2, (0, 2, 1))              # [B, N2, 3]
    sqr = (jnp.sum(x1 * x1, -1, keepdims=True)
           + jnp.sum(x2 * x2, -1)[:, None, :]
           - 2.0 * jnp.einsum('bnc,bmc->bnm', x1, x2))        # [B, N1, N2]
    _, knn_idx = jax.lax.top_k(-sqr, nsample)                 # [B, N1, S]
    idx = jnp.transpose(knn_idx, (0, 2, 1))                   # [B, S, N1]

    gather = jax.vmap(lambda pts, i: pts[i])                  # over batch
    nb_xyz = gather(x2, idx)                                  # [B, S, N1, 3]
    direction = (nb_xyz - x1[:, None, :, :]).astype(jnp.bfloat16)
    grouped_p2 = gather(jnp.transpose(points2, (0, 2, 1)),
                        idx).astype(jnp.bfloat16)             # [B, S, N1, D2]
    new_points = jnp.concatenate([grouped_p2, direction], axis=-1)  # bf16
    p1t = jnp.transpose(points1, (0, 2, 1)).astype(jnp.float32)     # [B, N1, D1]
    return new_points, p1t


# -----------------------------------------------------------------------------
# Generation-aware tuning knobs + adaptive N1 tiling.
# -----------------------------------------------------------------------------
def _device_defaults():
    try:
        kind = jax.devices()[0].device_kind.lower()
    except Exception:
        kind = ""
    if "v5" in kind or "v6" in kind:
        # 128 MiB VMEM generations: bigger tiles + higher scoped-VMEM limit.
        return 512, 100 * 1024 * 1024
    # v7x (64 MiB / TC) or unknown: conservative budget.
    return 256, 44 * 1024 * 1024


def _choose_tile(N1, B, tile_n1):
    # Adaptive TN: keep N1 padding small, keep TN a multiple of 16 (bf16
    # sublane packing) or of 128 when multi-tile, and give a 2-TC v7x chip at
    # least two grid tiles when B == 1.
    if N1 <= tile_n1 and (B >= 2 or N1 <= 256):
        tn = max(16, _round_up(N1, 16))
        return tn, tn
    n_tiles = max(2 if B == 1 else 1, -(-N1 // tile_n1))
    tn = _round_up(-(-N1 // n_tiles), LANE)
    return tn, _round_up(N1, tn)


# -----------------------------------------------------------------------------
# Pallas wrapper: pack weights, tile over (B, N1), emit transposed output.
# -----------------------------------------------------------------------------
def gru_forward_pallas(new_points, p1t, params, mlp,
                       tile_n1=None, vmem_limit=None):
    B, S, N1, Cin = new_points.shape
    D1 = p1t.shape[-1]
    L = len(mlp)
    assert L >= 2, "GRUMappingNoGCN requires len(mlp) >= 2 (neighbour max-pool)"
    assert mlp[-1] == D1, "mlp[-1] must equal latent_channel (GRU blend shapes)"

    if tile_n1 is None or vmem_limit is None:
        dflt_tile, dflt_vmem = _device_defaults()
        tile_n1 = tile_n1 or dflt_tile
        vmem_limit = vmem_limit or dflt_vmem

    # Hidden widths padded to 128 lanes (free slicing of the packed weights);
    # Cin and the latent width stay natural (Dl only rounded to sublane 8).
    widths = (Cin,) + tuple(_round_up(c, LANE) for c in mlp)
    M0 = widths[1]
    D1k = _round_up(D1, 8)

    TN, N1p = _choose_tile(N1, B, tile_n1)

    x = new_points.astype(jnp.bfloat16)
    p1 = p1t.astype(jnp.float32)
    if N1p != N1:
        x = jnp.pad(x, ((0, 0), (0, 0), (0, N1p - N1), (0, 0)))
        p1 = jnp.pad(p1, ((0, 0), (0, N1p - N1), (0, 0)))
    if D1k != D1:
        p1 = jnp.pad(p1, ((0, 0), (0, 0), (0, D1k - D1)))

    def padw(w, ci, co):
        return jnp.pad(w, ((0, ci - w.shape[0]), (0, co - w.shape[1])))

    def padb(b, co):
        return jnp.pad(b, ((0, 0), (0, co - b.shape[1])))

    r_ws, r_bs = params['r']
    z_ws, z_bs = params['z']
    h_ws, h_bs = params['h']

    # Fused layer-0 weight/bias for r|z|h (K stays at natural Cin) and fused
    # fuse_r|fuse_z / fuse_r_o (K stays at the 8-rounded latent width).
    w0 = jnp.concatenate([padw(r_ws[0], Cin, M0), padw(z_ws[0], Cin, M0),
                          padw(h_ws[0], Cin, M0)], axis=1).astype(jnp.bfloat16)
    b0 = jnp.concatenate([padb(r_bs[0], M0), padb(z_bs[0], M0),
                          padb(h_bs[0], M0)], axis=1).astype(jnp.float32)
    wfuse = jnp.concatenate([padw(params['fuse_r'], D1k, M0),
                             padw(params['fuse_z'], D1k, M0)],
                            axis=1).astype(jnp.bfloat16)
    wfro = padw(params['fuse_r_o'], D1k, M0).astype(jnp.bfloat16)

    tail_args = []
    for l in range(1, L):
        ci, co = widths[l], widths[l + 1]
        wl = jnp.concatenate([padw(r_ws[l], ci, co), padw(z_ws[l], ci, co),
                              padw(h_ws[l], ci, co)], axis=1).astype(jnp.bfloat16)
        bl = jnp.concatenate([padb(r_bs[l], co), padb(z_bs[l], co),
                              padb(h_bs[l], co)], axis=1).astype(jnp.float32)
        tail_args += [wl, bl]

    args = [x, p1, w0, b0, wfuse, wfro] + tail_args
    grid = (B, N1p // TN)

    # Advisory cost hint so XLA schedules the knn glue and the kernel well.
    flops = 2 * B * N1p * (S * Cin * 3 * M0 + D1k * 2 * M0 + S * D1k * M0)
    for l in range(1, L):
        ci, co = widths[l], widths[l + 1]
        flops += 2 * B * N1p * ci * co * (S + 2 * (S if l < L - 1 else 1))
    transcendentals = B * N1p * (S + 2) * widths[-1]
    bytes_accessed = int(x.size * 2 + p1.size * 4 + B * D1k * N1p * 4
                         + sum(int(np.prod(a.shape)) * a.dtype.itemsize
                               for a in args[2:]))
    cost = pl.CostEstimate(flops=int(flops),
                           transcendentals=int(transcendentals),
                           bytes_accessed=bytes_accessed)

    def run(single_buffer_weights, transpose_in_kernel):
        kernel = functools.partial(_gru_kernel, L, S, TN, Cin, D1k, widths,
                                   transpose_in_kernel)

        def const_spec(a):
            nd = a.ndim
            idx = lambda b, n, _nd=nd: (0,) * _nd
            if single_buffer_weights:
                # Weight/bias block index never changes: keep ONE VMEM copy.
                return pl.BlockSpec(a.shape, idx, pipeline_mode=pl.Buffered(1))
            return pl.BlockSpec(a.shape, idx)

        in_specs = [
            pl.BlockSpec((1, S, TN, Cin), lambda b, n: (b, 0, n, 0)),
            pl.BlockSpec((1, TN, D1k), lambda b, n: (b, n, 0)),
        ] + [const_spec(a) for a in args[2:]]

        if transpose_in_kernel:
            out_shape = jax.ShapeDtypeStruct((B, D1k, N1p), jnp.float32)
            out_spec = pl.BlockSpec((1, D1k, TN), lambda b, n: (b, 0, n))
        else:
            out_shape = jax.ShapeDtypeStruct((B, N1p, D1k), jnp.float32)
            out_spec = pl.BlockSpec((1, TN, D1k), lambda b, n: (b, n, 0))

        out = pl.pallas_call(
            kernel,
            out_shape=out_shape,
            grid=grid,
            in_specs=in_specs,
            out_specs=out_spec,
            compiler_params=pltpu.CompilerParams(
                dimension_semantics=("parallel", "parallel"),
                vmem_limit_bytes=vmem_limit),
            cost_estimate=cost,
        )(*args)

        if transpose_in_kernel:
            if D1k != D1 or N1p != N1:
                out = out[:, :D1, :N1]
            return out                                   # [B, D1, N1]
        return jnp.transpose(out[:, :N1, :D1], (0, 2, 1))

    # Prefer single-buffered weights + fused output transpose; fall back to
    # more conservative configurations if this jax/libtpu rejects either.
    attempts = ((True, True), (True, False), (False, True), (False, False))
    out, last_err = None, None
    for single_buf, fused_t in attempts:
        try:
            out = run(single_buf, fused_t)
            break
        except Exception as err:   # noqa: BLE001 - retry with safer config
            last_err = err
    if out is None:
        raise last_err
    return out


def gru_mapping_no_gcn(xyz1, xyz2, points1, points2, params, nsample, mlp):
    # TODO(synk): radius/QueryAndGroup, mlp2 and bn branches of the module are
    # not exercised here (radius=None, mlp2=None, bn=False in this config).
    new_points, p1t = knn_group(xyz1, xyz2, points1, points2, nsample)
    return gru_forward_pallas(new_points, p1t, params, mlp)


# -----------------------------------------------------------------------------
# Deterministic parameter init (shapes follow GRUMappingNoGCN.__init__;
# mlp2=None, bn=False, use_leaky=True, use_relu=False, radius=None).
# -----------------------------------------------------------------------------
def init_params(key, in_channel, latent_channel, mlp):
    cin = in_channel + 3
    keys = iter(jax.random.split(key, 128))

    def w(shape, scale=0.1):
        return scale * jax.random.normal(next(keys), shape, dtype=jnp.float32)

    params = {
        'fuse_r': w((latent_channel, mlp[0])),     # Conv1d, bias=False
        'fuse_z': w((latent_channel, mlp[0])),     # Conv1d, bias=False
        'fuse_r_o': w((latent_channel, mlp[0])),   # Conv2d, bias=False
    }
    for branch in ('r', 'z', 'h'):
        last = cin
        ws, bs = [], []
        for out_c in mlp:
            ws.append(w((last, out_c)))            # Conv2d 1x1 weight (transposed)
            bs.append(w((1, out_c)))               # Conv2d bias
            last = out_c
        params[branch] = (ws, bs)
    return params


# -----------------------------------------------------------------------------
# Pure-JAX reference (same math, channel-last, same bf16-operand matmuls).
# -----------------------------------------------------------------------------
def ref_forward(x_bsnc, p1t, params, mlp):
    L = len(mlp)
    bf16, f32 = jnp.bfloat16, jnp.float32

    def mm4(t, w):
        return jnp.einsum('bsnc,co->bsno', t.astype(bf16), w.astype(bf16),
                          preferred_element_type=f32)

    def mm3(t, w):
        return jnp.einsum('bnc,co->bno', t.astype(bf16), w.astype(bf16),
                          preferred_element_type=f32)

    def leaky(v):
        return jnp.maximum(v, 0.1 * v)

    fuse_r = mm3(p1t, params['fuse_r'])
    fuse_z = mm3(p1t, params['fuse_z'])

    r = x_bsnc
    ws, bs = params['r']
    for i in range(L):
        r = mm4(r, ws[i]) + bs[i][0]
        if i == 0:
            r = r + fuse_r[:, None]
        r = jax.nn.sigmoid(r) if i == L - 1 else leaky(r)

    z = x_bsnc
    ws, bs = params['z']
    for i in range(L):
        z = (mm4(z, ws[i]) if z.ndim == 4 else mm3(z, ws[i])) + bs[i][0]
        if i == 0:
            z = z + fuse_z[:, None]
        z = jax.nn.sigmoid(z) if i == L - 1 else leaky(z)
        if i == L - 2:
            z = jnp.max(z, axis=1)                 # pool over nsample
    # z: [B, N1, D1]

    pe = mm4(r * p1t[:, None], params['fuse_r_o'])

    h = x_bsnc
    ws, bs = params['h']
    for i in range(L):
        h = (mm4(h, ws[i]) if h.ndim == 4 else mm3(h, ws[i])) + bs[i][0]
        if i == 0:
            h = h + pe
        h = jnp.tanh(h) if i == L - 1 else leaky(h)
        if i == L - 2:
            h = jnp.max(h, axis=1)
    # h: [B, N1, D1]

    out = (1.0 - z) * p1t + z * h                  # [B, N1, D1]
    return jnp.transpose(out, (0, 2, 1))           # [B, D1, N1]


if __name__ == "__main__":
    B, N1, N2 = 2, 16, 32
    D1, D2 = 32, 16          # latent_channel = D1, in_channel = D2
    nsample = 8
    mlp = [32, 32]           # mlp[-1] must equal D1 (required by module math)

    key = jax.random.PRNGKey(0)
    ks = jax.random.split(key, 5)
    xyz1 = jax.random.normal(ks[0], (B, 3, N1), jnp.float32)
    xyz2 = jax.random.normal(ks[1], (B, 3, N2), jnp.float32)
    points1 = jax.random.normal(ks[2], (B, D1, N1), jnp.float32)
    points2 = jax.random.normal(ks[3], (B, D2, N2), jnp.float32)
    params = init_params(ks[4], D2, D1, mlp)

    out = gru_mapping_no_gcn(xyz1, xyz2, points1, points2, params, nsample, mlp)
    out = jax.block_until_ready(out)
    assert out.shape == (B, D1, N1)

    # Correctness check vs. plain-JAX reference (same bf16 matmul operands).
    new_points, p1t = knn_group(xyz1, xyz2, points1, points2, nsample)
    ref = jax.block_until_ready(ref_forward(new_points, p1t, params, mlp))
    np.testing.assert_allclose(np.asarray(out), np.asarray(ref),
                               rtol=1e-2, atol=1e-2)

    print("KERNEL_OK")
</pallas_src>

<mosaic_0001>
module attributes {stable_mosaic.version = 11 : i64} {
  func.func @_gru_kernel(%arg0: i32, %arg1: i32, %arg2: memref<1x8x16x19xbf16, #tpu.memory_space<vmem>>, %arg3: memref<1x16x32xf32, #tpu.memory_space<vmem>>, %arg4: memref<19x384xbf16, #tpu.memory_space<vmem>>, %arg5: memref<1x384xf32, #tpu.memory_space<vmem>>, %arg6: memref<32x256xbf16, #tpu.memory_space<vmem>>, %arg7: memref<32x128xbf16, #tpu.memory_space<vmem>>, %arg8: memref<128x384xbf16, #tpu.memory_space<vmem>>, %arg9: memref<1x384xf32, #tpu.memory_space<vmem>>, %arg10: memref<1x32x16xf32, #tpu.memory_space<vmem>>) attributes {dimension_semantics = [#tpu.dimension_semantics<parallel>, #tpu.dimension_semantics<parallel>], iteration_bounds = array<i64: 2, 1>, scalar_prefetch = 0 : i64, scratch_operands = 0 : i64, tpu.core_type = #tpu.core_type<tc>, window_params = [{transform_indices = @transform_0, window_bounds = array<i64: 1, 8, 16, 19>}, {transform_indices = @transform_1, window_bounds = array<i64: 1, 16, 32>}, {pipeline_mode = #tpu.pipeline_mode<synchronous>, transform_indices = @transform_2, window_bounds = array<i64: 19, 384>}, {pipeline_mode = #tpu.pipeline_mode<synchronous>, transform_indices = @transform_3, window_bounds = array<i64: 1, 384>}, {pipeline_mode = #tpu.pipeline_mode<synchronous>, transform_indices = @transform_4, window_bounds = array<i64: 32, 256>}, {pipeline_mode = #tpu.pipeline_mode<synchronous>, transform_indices = @transform_5, window_bounds = array<i64: 32, 128>}, {pipeline_mode = #tpu.pipeline_mode<synchronous>, transform_indices = @transform_6, window_bounds = array<i64: 128, 384>}, {pipeline_mode = #tpu.pipeline_mode<synchronous>, transform_indices = @transform_7, window_bounds = array<i64: 1, 384>}, {transform_indices = @transform_8, window_bounds = array<i64: 1, 32, 16>}]} {
    %c0 = arith.constant 0 : index
    %c0_0 = arith.constant 0 : index
    %c0_1 = arith.constant 0 : index
    %c0_2 = arith.constant 0 : index
    %0 = vector.load %arg2[%c0, %c0_0, %c0_1, %c0_2] : memref<1x8x16x19xbf16, #tpu.memory_space<vmem>>, vector<1x8x16x19xbf16>
    %1 = vector.shape_cast %0 : vector<1x8x16x19xbf16> to vector<8x16x19xbf16>
    %2 = vector.shape_cast %1 : vector<8x16x19xbf16> to vector<128x19xbf16>
    %c0_3 = arith.constant 0 : index
    %c0_4 = arith.constant 0 : index
    %c0_5 = arith.constant 0 : index
    %3 = vector.load %arg3[%c0_3, %c0_4, %c0_5] : memref<1x16x32xf32, #tpu.memory_space<vmem>>, vector<1x16x32xf32>
    %4 = vector.shape_cast %3 : vector<1x16x32xf32> to vector<16x32xf32>
    %5 = arith.truncf %4 : vector<16x32xf32> to vector<16x32xbf16>
    %c0_6 = arith.constant 0 : index
    %c0_7 = arith.constant 0 : index
    %6 = vector.load %arg6[%c0_6, %c0_7] : memref<32x256xbf16, #tpu.memory_space<vmem>>, vector<32x256xbf16>
    %cst = arith.constant dense<0.000000e+00> : vector<16x256xf32>
    %7 = tpu.matmul %5, %6, %cst {dimension_numbers = #tpu.dot_dimension_numbers<[1], [0], [0], [1], [0, 0, 1, 1], [], []>} : vector<16x32xbf16>, vector<32x256xbf16>, vector<16x256xf32> -> vector<16x256xf32>
    %c0_8 = arith.constant 0 : index
    %c0_9 = arith.constant 0 : index
    %8 = vector.load %arg4[%c0_8, %c0_9] : memref<19x384xbf16, #tpu.memory_space<vmem>>, vector<19x384xbf16>
    %cst_10 = arith.constant dense<0.000000e+00> : vector<128x384xf32>
    %9 = tpu.matmul %2, %8, %cst_10 {dimension_numbers = #tpu.dot_dimension_numbers<[1], [0], [0], [1], [0, 0, 1, 1], [], []>} : vector<128x19xbf16>, vector<19x384xbf16>, vector<128x384xf32> -> vector<128x384xf32>
    %c0_11 = arith.constant 0 : index
    %c0_12 = arith.constant 0 : index
    %10 = vector.load %arg5[%c0_11, %c0_12] : memref<1x384xf32, #tpu.memory_space<vmem>>, vector<1x384xf32>
    %11 = vector.broadcast %10 : vector<1x384xf32> to vector<128x384xf32>
    %12 = arith.addf %9, %11 : vector<128x384xf32>
    %13 = vector.shape_cast %12 : vector<128x384xf32> to vector<8x16x384xf32>
    %14 = vector.extract_strided_slice %13 {offsets = [0, 0, 0], sizes = [8, 16, 128], strides = [1, 1, 1]} : vector<8x16x384xf32> to vector<8x16x128xf32>
    %15 = vector.extract_strided_slice %7 {offsets = [0, 0], sizes = [16, 128], strides = [1, 1]} : vector<16x256xf32> to vector<16x128xf32>
    %16 = vector.shape_cast %15 : vector<16x128xf32> to vector<1x16x128xf32>
    %17 = vector.broadcast %16 : vector<1x16x128xf32> to vector<8x16x128xf32>
    %18 = arith.addf %14, %17 : vector<8x16x128xf32>
    %cst_13 = arith.constant 1.000000e-01 : f32
    %19 = vector.broadcast %cst_13 : f32 to vector<8x16x128xf32>
    %20 = arith.mulf %19, %18 : vector<8x16x128xf32>
    %21 = arith.maximumf %18, %20 : vector<8x16x128xf32>
    %22 = arith.truncf %21 : vector<8x16x128xf32> to vector<8x16x128xbf16>
    %c0_14 = arith.constant 0 : index
    %c0_15 = arith.constant 0 : index
    %23 = vector.load %arg8[%c0_14, %c0_15] : memref<128x384xbf16, #tpu.memory_space<vmem>>, vector<128x128xbf16>
    %c0_16 = arith.constant 0 : index
    %c0_17 = arith.constant 0 : index
    %24 = vector.load %arg9[%c0_16, %c0_17] : memref<1x384xf32, #tpu.memory_space<vmem>>, vector<1x128xf32>
    %25 = vector.shape_cast %22 : vector<8x16x128xbf16> to vector<128x128xbf16>
    %cst_18 = arith.constant dense<0.000000e+00> : vector<128x128xf32>
    %26 = tpu.matmul %25, %23, %cst_18 {dimension_numbers = #tpu.dot_dimension_numbers<[1], [0], [0], [1], [0, 0, 1, 1], [], []>} : vector<128x128xbf16>, vector<128x128xbf16>, vector<128x128xf32> -> vector<128x128xf32>
    %27 = vector.broadcast %24 : vector<1x128xf32> to vector<128x128xf32>
    %28 = arith.addf %26, %27 : vector<128x128xf32>
    %29 = vector.shape_cast %28 : vector<128x128xf32> to vector<8x16x128xf32>
    %30 = arith.negf %29 : vector<8x16x128xf32>
    %31 = math.exp %30 : vector<8x16x128xf32>
    %cst_19 = arith.constant 1.000000e+00 : f32
    %32 = vector.broadcast %cst_19 : f32 to vector<8x16x128xf32>
    %33 = arith.addf %32, %31 : vector<8x16x128xf32>
    %34 = arith.divf %32, %33 : vector<8x16x128xf32>
    %35 = vector.extract_strided_slice %34 {offsets = [0, 0, 0], sizes = [8, 16, 32], strides = [1, 1, 1]} : vector<8x16x128xf32> to vector<8x16x32xf32>
    %36 = vector.shape_cast %4 : vector<16x32xf32> to vector<1x16x32xf32>
    %37 = vector.broadcast %36 : vector<1x16x32xf32> to vector<8x16x32xf32>
    %38 = arith.mulf %35, %37 : vector<8x16x32xf32>
    %39 = vector.shape_cast %38 : vector<8x16x32xf32> to vector<128x32xf32>
    %40 = arith.truncf %39 : vector<128x32xf32> to vector<128x32xbf16>
    %c0_20 = arith.constant 0 : index
    %c0_21 = arith.constant 0 : index
    %41 = vector.load %arg7[%c0_20, %c0_21] : memref<32x128xbf16, #tpu.memory_space<vmem>>, vector<32x128xbf16>
    %cst_22 = arith.constant dense<0.000000e+00> : vector<128x128xf32>
    %42 = tpu.matmul %40, %41, %cst_22 {dimension_numbers = #tpu.dot_dimension_numbers<[1], [0], [0], [1], [0, 0, 1, 1], [], []>} : vector<128x32xbf16>, vector<32x128xbf16>, vector<128x128xf32> -> vector<128x128xf32>
    %43 = vector.shape_cast %42 : vector<128x128xf32> to vector<8x16x128xf32>
    %44 = vector.extract_strided_slice %13 {offsets = [0, 0, 128], sizes = [8, 16, 128], strides = [1, 1, 1]} : vector<8x16x384xf32> to vector<8x16x128xf32>
    %45 = vector.extract_strided_slice %7 {offsets = [0, 128], sizes = [16, 128], strides = [1, 1]} : vector<16x256xf32> to vector<16x128xf32>
    %46 = vector.shape_cast %45 : vector<16x128xf32> to vector<1x16x128xf32>
    %47 = vector.broadcast %46 : vector<1x16x128xf32> to vector<8x16x128xf32>
    %48 = arith.addf %44, %47 : vector<8x16x128xf32>
    %cst_23 = arith.constant 1.000000e-01 : f32
    %49 = vector.broadcast %cst_23 : f32 to vector<8x16x128xf32>
    %50 = arith.mulf %49, %48 : vector<8x16x128xf32>
    %51 = arith.maximumf %48, %50 : vector<8x16x128xf32>
    %52 = arith.truncf %51 : vector<8x16x128xf32> to vector<8x16x128xbf16>
    %cst_24 = arith.constant dense<0xFF80> : vector<16x128xbf16>
    %53 = vector.multi_reduction <maximumf>, %52, %cst_24 [0] : vector<8x16x128xbf16> to vector<16x128xbf16>
    %c0_25 = arith.constant 0 : index
    %c128 = arith.constant 128 : index
    %54 = vector.load %arg8[%c0_25, %c128] : memref<128x384xbf16, #tpu.memory_space<vmem>>, vector<128x128xbf16>
    %c0_26 = arith.constant 0 : index
    %c128_27 = arith.constant 128 : index
    %55 = vector.load %arg9[%c0_26, %c128_27] : memref<1x384xf32, #tpu.memory_space<vmem>>, vector<1x128xf32>
    %cst_28 = arith.constant dense<0.000000e+00> : vector<16x128xf32>
    %56 = tpu.matmul %53, %54, %cst_28 {dimension_numbers = #tpu.dot_dimension_numbers<[1], [0], [0], [1], [0, 0, 1, 1], [], []>} : vector<16x128xbf16>, vector<128x128xbf16>, vector<16x128xf32> -> vector<16x128xf32>
    %57 = vector.broadcast %55 : vector<1x128xf32> to vector<16x128xf32>
    %58 = arith.addf %56, %57 : vector<16x128xf32>
    %59 = arith.negf %58 : vector<16x128xf32>
    %60 = math.exp %59 : vector<16x128xf32>
    %cst_29 = arith.constant 1.000000e+00 : f32
    %61 = vector.broadcast %cst_29 : f32 to vector<16x128xf32>
    %62 = arith.addf %61, %60 : vector<16x128xf32>
    %63 = arith.divf %61, %62 : vector<16x128xf32>
    %64 = vector.extract_strided_slice %13 {offsets = [0, 0, 256], sizes = [8, 16, 128], strides = [1, 1, 1]} : vector<8x16x384xf32> to vector<8x16x128xf32>
    %65 = arith.addf %64, %43 : vector<8x16x128xf32>
    %cst_30 = arith.constant 1.000000e-01 : f32
    %66 = vector.broadcast %cst_30 : f32 to vector<8x16x128xf32>
    %67 = arith.mulf %66, %65 : vector<8x16x128xf32>
    %68 = arith.maximumf %65, %67 : vector<8x16x128xf32>
    %69 = arith.truncf %68 : vector<8x16x128xf32> to vector<8x16x128xbf16>
    %cst_31 = arith.constant dense<0xFF80> : vector<16x128xbf16>
    %70 = vector.multi_reduction <maximumf>, %69, %cst_31 [0] : vector<8x16x128xbf16> to vector<16x128xbf16>
    %c0_32 = arith.constant 0 : index
    %c256 = arith.constant 256 : index
    %71 = vector.load %arg8[%c0_32, %c256] : memref<128x384xbf16, #tpu.memory_space<vmem>>, vector<128x128xbf16>
    %c0_33 = arith.constant 0 : index
    %c256_34 = arith.constant 256 : index
    %72 = vector.load %arg9[%c0_33, %c256_34] : memref<1x384xf32, #tpu.memory_space<vmem>>, vector<1x128xf32>
    %cst_35 = arith.constant dense<0.000000e+00> : vector<16x128xf32>
    %73 = tpu.matmul %70, %71, %cst_35 {dimension_numbers = #tpu.dot_dimension_numbers<[1], [0], [0], [1], [0, 0, 1, 1], [], []>} : vector<16x128xbf16>, vector<128x128xbf16>, vector<16x128xf32> -> vector<16x128xf32>
    %74 = vector.broadcast %72 : vector<1x128xf32> to vector<16x128xf32>
    %75 = arith.addf %73, %74 : vector<16x128xf32>
    %76 = math.tanh %75 : vector<16x128xf32>
    %77 = vector.extract_strided_slice %63 {offsets = [0, 0], sizes = [16, 32], strides = [1, 1]} : vector<16x128xf32> to vector<16x32xf32>
    %78 = vector.extract_strided_slice %76 {offsets = [0, 0], sizes = [16, 32], strides = [1, 1]} : vector<16x128xf32> to vector<16x32xf32>
    %cst_36 = arith.constant 1.000000e+00 : f32
    %79 = vector.broadcast %cst_36 : f32 to vector<16x32xf32>
    %80 = arith.subf %79, %77 : vector<16x32xf32>
    %81 = arith.mulf %80, %4 : vector<16x32xf32>
    %82 = arith.mulf %77, %78 : vector<16x32xf32>
    %83 = arith.addf %81, %82 : vector<16x32xf32>
    %84 = tpu.transpose %83, [1, 0] : vector<16x32xf32> -> vector<32x16xf32>
    %c0_37 = arith.constant 0 : index
    %c0_38 = arith.constant 0 : index
    %c0_39 = arith.constant 0 : index
    %85 = vector.load %arg10[%c0_37, %c0_38, %c0_39] : memref<1x32x16xf32, #tpu.memory_space<vmem>>, vector<1x32x16xf32>
    %86 = vector.shape_cast %85 : vector<1x32x16xf32> to vector<32x16xf32>
    %87 = vector.shape_cast %84 : vector<32x16xf32> to vector<1x32x16xf32>
    tpu.vector_store %arg10[%c0_37, %c0_38, %c0_39], %87 {strides = array<i32>} : memref<1x32x16xf32, #tpu.memory_space<vmem>>, vector<1x32x16xf32>,
    return
  }
  func.func @transform_0(%arg0: i32, %arg1: i32) -> (i32, i32, i32, i32) {
    %c0_i32 = arith.constant 0 : i32
    %c0_i32_0 = arith.constant 0 : i32
    %c0_i32_1 = arith.constant 0 : i32
    return %arg0, %c0_i32, %arg1, %c0_i32_0 : i32, i32, i32, i32
  }
  func.func @transform_1(%arg0: i32, %arg1: i32) -> (i32, i32, i32) {
    %c0_i32 = arith.constant 0 : i32
    %c0_i32_0 = arith.constant 0 : i32
    return %arg0, %arg1, %c0_i32 : i32, i32, i32
  }
  func.func @transform_2(%arg0: i32, %arg1: i32) -> (i32, i32) {
    %c0_i32 = arith.constant 0 : i32
    %c0_i32_0 = arith.constant 0 : i32
    %c0_i32_1 = arith.constant 0 : i32
    return %c0_i32, %c0_i32_0 : i32, i32
  }
  func.func @transform_3(%arg0: i32, %arg1: i32) -> (i32, i32) {
    %c0_i32 = arith.constant 0 : i32
    %c0_i32_0 = arith.constant 0 : i32
    %c0_i32_1 = arith.constant 0 : i32
    return %c0_i32, %c0_i32_0 : i32, i32
  }
  func.func @transform_4(%arg0: i32, %arg1: i32) -> (i32, i32) {
    %c0_i32 = arith.constant 0 : i32
    %c0_i32_0 = arith.constant 0 : i32
    %c0_i32_1 = arith.constant 0 : i32
    return %c0_i32, %c0_i32_0 : i32, i32
  }
  func.func @transform_5(%arg0: i32, %arg1: i32) -> (i32, i32) {
    %c0_i32 = arith.constant 0 : i32
    %c0_i32_0 = arith.constant 0 : i32
    %c0_i32_1 = arith.constant 0 : i32
    return %c0_i32, %c0_i32_0 : i32, i32
  }
  func.func @transform_6(%arg0: i32, %arg1: i32) -> (i32, i32) {
    %c0_i32 = arith.constant 0 : i32
    %c0_i32_0 = arith.constant 0 : i32
    %c0_i32_1 = arith.constant 0 : i32
    return %c0_i32, %c0_i32_0 : i32, i32
  }
  func.func @transform_7(%arg0: i32, %arg1: i32) -> (i32, i32) {
    %c0_i32 = arith.constant 0 : i32
    %c0_i32_0 = arith.constant 0 : i32
    %c0_i32_1 = arith.constant 0 : i32
    return %c0_i32, %c0_i32_0 : i32, i32
  }
  func.func @transform_8(%arg0: i32, %arg1: i32) -> (i32, i32, i32) {
    %c0_i32 = arith.constant 0 : i32
    %c0_i32_0 = arith.constant 0 : i32
    return %arg0, %c0_i32, %arg1 : i32, i32, i32
  }
}

module attributes {stable_mosaic.version = 11 : i64} {
  func.func @_gru_kernel(%arg0: i32, %arg1: i32, %arg2: memref<1x8x16x19xbf16, #tpu.memory_space<vmem>>, %arg3: memref<1x16x32xf32, #tpu.memory_space<vmem>>, %arg4: memref<19x384xbf16, #tpu.memory_space<vmem>>, %arg5: memref<1x384xf32, #tpu.memory_space<vmem>>, %arg6: memref<32x256xbf16, #tpu.memory_space<vmem>>, %arg7: memref<32x128xbf16, #tpu.memory_space<vmem>>, %arg8: memref<128x384xbf16, #tpu.memory_space<vmem>>, %arg9: memref<1x384xf32, #tpu.memory_space<vmem>>, %arg10: memref<1x16x32xf32, #tpu.memory_space<vmem>>) attributes {dimension_semantics = [#tpu.dimension_semantics<parallel>, #tpu.dimension_semantics<parallel>], iteration_bounds = array<i64: 2, 1>, scalar_prefetch = 0 : i64, scratch_operands = 0 : i64, tpu.core_type = #tpu.core_type<tc>, window_params = [{transform_indices = @transform_0, window_bounds = array<i64: 1, 8, 16, 19>}, {transform_indices = @transform_1, window_bounds = array<i64: 1, 16, 32>}, {pipeline_mode = #tpu.pipeline_mode<synchronous>, transform_indices = @transform_2, window_bounds = array<i64: 19, 384>}, {pipeline_mode = #tpu.pipeline_mode<synchronous>, transform_indices = @transform_3, window_bounds = array<i64: 1, 384>}, {pipeline_mode = #tpu.pipeline_mode<synchronous>, transform_indices = @transform_4, window_bounds = array<i64: 32, 256>}, {pipeline_mode = #tpu.pipeline_mode<synchronous>, transform_indices = @transform_5, window_bounds = array<i64: 32, 128>}, {pipeline_mode = #tpu.pipeline_mode<synchronous>, transform_indices = @transform_6, window_bounds = array<i64: 128, 384>}, {pipeline_mode = #tpu.pipeline_mode<synchronous>, transform_indices = @transform_7, window_bounds = array<i64: 1, 384>}, {transform_indices = @transform_8, window_bounds = array<i64: 1, 16, 32>}]} {
    %c0 = arith.constant 0 : index
    %c0_0 = arith.constant 0 : index
    %c0_1 = arith.constant 0 : index
    %c0_2 = arith.constant 0 : index
    %0 = vector.load %arg2[%c0, %c0_0, %c0_1, %c0_2] : memref<1x8x16x19xbf16, #tpu.memory_space<vmem>>, vector<1x8x16x19xbf16>
    %1 = vector.shape_cast %0 : vector<1x8x16x19xbf16> to vector<8x16x19xbf16>
    %2 = vector.shape_cast %1 : vector<8x16x19xbf16> to vector<128x19xbf16>
    %c0_3 = arith.constant 0 : index
    %c0_4 = arith.constant 0 : index
    %c0_5 = arith.constant 0 : index
    %3 = vector.load %arg3[%c0_3, %c0_4, %c0_5] : memref<1x16x32xf32, #tpu.memory_space<vmem>>, vector<1x16x32xf32>
    %4 = vector.shape_cast %3 : vector<1x16x32xf32> to vector<16x32xf32>
    %5 = arith.truncf %4 : vector<16x32xf32> to vector<16x32xbf16>
    %c0_6 = arith.constant 0 : index
    %c0_7 = arith.constant 0 : index
    %6 = vector.load %arg6[%c0_6, %c0_7] : memref<32x256xbf16, #tpu.memory_space<vmem>>, vector<32x256xbf16>
    %cst = arith.constant dense<0.000000e+00> : vector<16x256xf32>
    %7 = tpu.matmul %5, %6, %cst {dimension_numbers = #tpu.dot_dimension_numbers<[1], [0], [0], [1], [0, 0, 1, 1], [], []>} : vector<16x32xbf16>, vector<32x256xbf16>, vector<16x256xf32> -> vector<16x256xf32>
    %c0_8 = arith.constant 0 : index
    %c0_9 = arith.constant 0 : index
    %8 = vector.load %arg4[%c0_8, %c0_9] : memref<19x384xbf16, #tpu.memory_space<vmem>>, vector<19x384xbf16>
    %cst_10 = arith.constant dense<0.000000e+00> : vector<128x384xf32>
    %9 = tpu.matmul %2, %8, %cst_10 {dimension_numbers = #tpu.dot_dimension_numbers<[1], [0], [0], [1], [0, 0, 1, 1], [], []>} : vector<128x19xbf16>, vector<19x384xbf16>, vector<128x384xf32> -> vector<128x384xf32>
    %c0_11 = arith.constant 0 : index
    %c0_12 = arith.constant 0 : index
    %10 = vector.load %arg5[%c0_11, %c0_12] : memref<1x384xf32, #tpu.memory_space<vmem>>, vector<1x384xf32>
    %11 = vector.broadcast %10 : vector<1x384xf32> to vector<128x384xf32>
    %12 = arith.addf %9, %11 : vector<128x384xf32>
    %13 = vector.shape_cast %12 : vector<128x384xf32> to vector<8x16x384xf32>
    %14 = vector.extract_strided_slice %13 {offsets = [0, 0, 0], sizes = [8, 16, 128], strides = [1, 1, 1]} : vector<8x16x384xf32> to vector<8x16x128xf32>
    %15 = vector.extract_strided_slice %7 {offsets = [0, 0], sizes = [16, 128], strides = [1, 1]} : vector<16x256xf32> to vector<16x128xf32>
    %16 = vector.shape_cast %15 : vector<16x128xf32> to vector<1x16x128xf32>
    %17 = vector.broadcast %16 : vector<1x16x128xf32> to vector<8x16x128xf32>
    %18 = arith.addf %14, %17 : vector<8x16x128xf32>
    %cst_13 = arith.constant 1.000000e-01 : f32
    %19 = vector.broadcast %cst_13 : f32 to vector<8x16x128xf32>
    %20 = arith.mulf %19, %18 : vector<8x16x128xf32>
    %21 = arith.maximumf %18, %20 : vector<8x16x128xf32>
    %22 = arith.truncf %21 : vector<8x16x128xf32> to vector<8x16x128xbf16>
    %c0_14 = arith.constant 0 : index
    %c0_15 = arith.constant 0 : index
    %23 = vector.load %arg8[%c0_14, %c0_15] : memref<128x384xbf16, #tpu.memory_space<vmem>>, vector<128x128xbf16>
    %c0_16 = arith.constant 0 : index
    %c0_17 = arith.constant 0 : index
    %24 = vector.load %arg9[%c0_16, %c0_17] : memref<1x384xf32, #tpu.memory_space<vmem>>, vector<1x128xf32>
    %25 = vector.shape_cast %22 : vector<8x16x128xbf16> to vector<128x128xbf16>
    %cst_18 = arith.constant dense<0.000000e+00> : vector<128x128xf32>
    %26 = tpu.matmul %25, %23, %cst_18 {dimension_numbers = #tpu.dot_dimension_numbers<[1], [0], [0], [1], [0, 0, 1, 1], [], []>} : vector<128x128xbf16>, vector<128x128xbf16>, vector<128x128xf32> -> vector<128x128xf32>
    %27 = vector.broadcast %24 : vector<1x128xf32> to vector<128x128xf32>
    %28 = arith.addf %26, %27 : vector<128x128xf32>
    %29 = vector.shape_cast %28 : vector<128x128xf32> to vector<8x16x128xf32>
    %30 = arith.negf %29 : vector<8x16x128xf32>
    %31 = math.exp %30 : vector<8x16x128xf32>
    %cst_19 = arith.constant 1.000000e+00 : f32
    %32 = vector.broadcast %cst_19 : f32 to vector<8x16x128xf32>
    %33 = arith.addf %32, %31 : vector<8x16x128xf32>
    %34 = arith.divf %32, %33 : vector<8x16x128xf32>
    %35 = vector.extract_strided_slice %34 {offsets = [0, 0, 0], sizes = [8, 16, 32], strides = [1, 1, 1]} : vector<8x16x128xf32> to vector<8x16x32xf32>
    %36 = vector.shape_cast %4 : vector<16x32xf32> to vector<1x16x32xf32>
    %37 = vector.broadcast %36 : vector<1x16x32xf32> to vector<8x16x32xf32>
    %38 = arith.mulf %35, %37 : vector<8x16x32xf32>
    %39 = vector.shape_cast %38 : vector<8x16x32xf32> to vector<128x32xf32>
    %40 = arith.truncf %39 : vector<128x32xf32> to vector<128x32xbf16>
    %c0_20 = arith.constant 0 : index
    %c0_21 = arith.constant 0 : index
    %41 = vector.load %arg7[%c0_20, %c0_21] : memref<32x128xbf16, #tpu.memory_space<vmem>>, vector<32x128xbf16>
    %cst_22 = arith.constant dense<0.000000e+00> : vector<128x128xf32>
    %42 = tpu.matmul %40, %41, %cst_22 {dimension_numbers = #tpu.dot_dimension_numbers<[1], [0], [0], [1], [0, 0, 1, 1], [], []>} : vector<128x32xbf16>, vector<32x128xbf16>, vector<128x128xf32> -> vector<128x128xf32>
    %43 = vector.shape_cast %42 : vector<128x128xf32> to vector<8x16x128xf32>
    %44 = vector.extract_strided_slice %13 {offsets = [0, 0, 128], sizes = [8, 16, 128], strides = [1, 1, 1]} : vector<8x16x384xf32> to vector<8x16x128xf32>
    %45 = vector.extract_strided_slice %7 {offsets = [0, 128], sizes = [16, 128], strides = [1, 1]} : vector<16x256xf32> to vector<16x128xf32>
    %46 = vector.shape_cast %45 : vector<16x128xf32> to vector<1x16x128xf32>
    %47 = vector.broadcast %46 : vector<1x16x128xf32> to vector<8x16x128xf32>
    %48 = arith.addf %44, %47 : vector<8x16x128xf32>
    %cst_23 = arith.constant 1.000000e-01 : f32
    %49 = vector.broadcast %cst_23 : f32 to vector<8x16x128xf32>
    %50 = arith.mulf %49, %48 : vector<8x16x128xf32>
    %51 = arith.maximumf %48, %50 : vector<8x16x128xf32>
    %52 = arith.truncf %51 : vector<8x16x128xf32> to vector<8x16x128xbf16>
    %cst_24 = arith.constant dense<0xFF80> : vector<16x128xbf16>
    %53 = vector.multi_reduction <maximumf>, %52, %cst_24 [0] : vector<8x16x128xbf16> to vector<16x128xbf16>
    %c0_25 = arith.constant 0 : index
    %c128 = arith.constant 128 : index
    %54 = vector.load %arg8[%c0_25, %c128] : memref<128x384xbf16, #tpu.memory_space<vmem>>, vector<128x128xbf16>
    %c0_26 = arith.constant 0 : index
    %c128_27 = arith.constant 128 : index
    %55 = vector.load %arg9[%c0_26, %c128_27] : memref<1x384xf32, #tpu.memory_space<vmem>>, vector<1x128xf32>
    %cst_28 = arith.constant dense<0.000000e+00> : vector<16x128xf32>
    %56 = tpu.matmul %53, %54, %cst_28 {dimension_numbers = #tpu.dot_dimension_numbers<[1], [0], [0], [1], [0, 0, 1, 1], [], []>} : vector<16x128xbf16>, vector<128x128xbf16>, vector<16x128xf32> -> vector<16x128xf32>
    %57 = vector.broadcast %55 : vector<1x128xf32> to vector<16x128xf32>
    %58 = arith.addf %56, %57 : vector<16x128xf32>
    %59 = arith.negf %58 : vector<16x128xf32>
    %60 = math.exp %59 : vector<16x128xf32>
    %cst_29 = arith.constant 1.000000e+00 : f32
    %61 = vector.broadcast %cst_29 : f32 to vector<16x128xf32>
    %62 = arith.addf %61, %60 : vector<16x128xf32>
    %63 = arith.divf %61, %62 : vector<16x128xf32>
    %64 = vector.extract_strided_slice %13 {offsets = [0, 0, 256], sizes = [8, 16, 128], strides = [1, 1, 1]} : vector<8x16x384xf32> to vector<8x16x128xf32>
    %65 = arith.addf %64, %43 : vector<8x16x128xf32>
    %cst_30 = arith.constant 1.000000e-01 : f32
    %66 = vector.broadcast %cst_30 : f32 to vector<8x16x128xf32>
    %67 = arith.mulf %66, %65 : vector<8x16x128xf32>
    %68 = arith.maximumf %65, %67 : vector<8x16x128xf32>
    %69 = arith.truncf %68 : vector<8x16x128xf32> to vector<8x16x128xbf16>
    %cst_31 = arith.constant dense<0xFF80> : vector<16x128xbf16>
    %70 = vector.multi_reduction <maximumf>, %69, %cst_31 [0] : vector<8x16x128xbf16> to vector<16x128xbf16>
    %c0_32 = arith.constant 0 : index
    %c256 = arith.constant 256 : index
    %71 = vector.load %arg8[%c0_32, %c256] : memref<128x384xbf16, #tpu.memory_space<vmem>>, vector<128x128xbf16>
    %c0_33 = arith.constant 0 : index
    %c256_34 = arith.constant 256 : index
    %72 = vector.load %arg9[%c0_33, %c256_34] : memref<1x384xf32, #tpu.memory_space<vmem>>, vector<1x128xf32>
    %cst_35 = arith.constant dense<0.000000e+00> : vector<16x128xf32>
    %73 = tpu.matmul %70, %71, %cst_35 {dimension_numbers = #tpu.dot_dimension_numbers<[1], [0], [0], [1], [0, 0, 1, 1], [], []>} : vector<16x128xbf16>, vector<128x128xbf16>, vector<16x128xf32> -> vector<16x128xf32>
    %74 = vector.broadcast %72 : vector<1x128xf32> to vector<16x128xf32>
    %75 = arith.addf %73, %74 : vector<16x128xf32>
    %76 = math.tanh %75 : vector<16x128xf32>
    %77 = vector.extract_strided_slice %63 {offsets = [0, 0], sizes = [16, 32], strides = [1, 1]} : vector<16x128xf32> to vector<16x32xf32>
    %78 = vector.extract_strided_slice %76 {offsets = [0, 0], sizes = [16, 32], strides = [1, 1]} : vector<16x128xf32> to vector<16x32xf32>
    %cst_36 = arith.constant 1.000000e+00 : f32
    %79 = vector.broadcast %cst_36 : f32 to vector<16x32xf32>
    %80 = arith.subf %79, %77 : vector<16x32xf32>
    %81 = arith.mulf %80, %4 : vector<16x32xf32>
    %82 = arith.mulf %77, %78 : vector<16x32xf32>
    %83 = arith.addf %81, %82 : vector<16x32xf32>
    %c0_37 = arith.constant 0 : index
    %c0_38 = arith.constant 0 : index
    %c0_39 = arith.constant 0 : index
    %84 = vector.load %arg10[%c0_37, %c0_38, %c0_39] : memref<1x16x32xf32, #tpu.memory_space<vmem>>, vector<1x16x32xf32>
    %85 = vector.shape_cast %84 : vector<1x16x32xf32> to vector<16x32xf32>
    %86 = vector.shape_cast %83 : vector<16x32xf32> to vector<1x16x32xf32>
    tpu.vector_store %arg10[%c0_37, %c0_38, %c0_39], %86 {strides = array<i32>} : memref<1x16x32xf32, #tpu.memory_space<vmem>>, vector<1x16x32xf32>,
    return
  }
  func.func @transform_0(%arg0: i32, %arg1: i32) -> (i32, i32, i32, i32) {
    %c0_i32 = arith.constant 0 : i32
    %c0_i32_0 = arith.constant 0 : i32
    %c0_i32_1 = arith.constant 0 : i32
    return %arg0, %c0_i32, %arg1, %c0_i32_0 : i32, i32, i32, i32
  }
  func.func @transform_1(%arg0: i32, %arg1: i32) -> (i32, i32, i32) {
    %c0_i32 = arith.constant 0 : i32
    %c0_i32_0 = arith.constant 0 : i32
    return %arg0, %arg1, %c0_i32 : i32, i32, i32
  }
  func.func @transform_2(%arg0: i32, %arg1: i32) -> (i32, i32) {
    %c0_i32 = arith.constant 0 : i32
    %c0_i32_0 = arith.constant 0 : i32
    %c0_i32_1 = arith.constant 0 : i32
    return %c0_i32, %c0_i32_0 : i32, i32
  }
  func.func @transform_3(%arg0: i32, %arg1: i32) -> (i32, i32) {
    %c0_i32 = arith.constant 0 : i32
    %c0_i32_0 = arith.constant 0 : i32
    %c0_i32_1 = arith.constant 0 : i32
    return %c0_i32, %c0_i32_0 : i32, i32
  }
  func.func @transform_4(%arg0: i32, %arg1: i32) -> (i32, i32) {
    %c0_i32 = arith.constant 0 : i32
    %c0_i32_0 = arith.constant 0 : i32
    %c0_i32_1 = arith.constant 0 : i32
    return %c0_i32, %c0_i32_0 : i32, i32
  }
  func.func @transform_5(%arg0: i32, %arg1: i32) -> (i32, i32) {
    %c0_i32 = arith.constant 0 : i32
    %c0_i32_0 = arith.constant 0 : i32
    %c0_i32_1 = arith.constant 0 : i32
    return %c0_i32, %c0_i32_0 : i32, i32
  }
  func.func @transform_6(%arg0: i32, %arg1: i32) -> (i32, i32) {
    %c0_i32 = arith.constant 0 : i32
    %c0_i32_0 = arith.constant 0 : i32
    %c0_i32_1 = arith.constant 0 : i32
    return %c0_i32, %c0_i32_0 : i32, i32
  }
  func.func @transform_7(%arg0: i32, %arg1: i32) -> (i32, i32) {
    %c0_i32 = arith.constant 0 : i32
    %c0_i32_0 = arith.constant 0 : i32
    %c0_i32_1 = arith.constant 0 : i32
    return %c0_i32, %c0_i32_0 : i32, i32
  }
  func.func @transform_8(%arg0: i32, %arg1: i32) -> (i32, i32, i32) {
    %c0_i32 = arith.constant 0 : i32
    %c0_i32_0 = arith.constant 0 : i32
    return %arg0, %arg1, %c0_i32 : i32, i32, i32
  }
}

module attributes {stable_mosaic.version = 11 : i64} {
  func.func @_gru_kernel(%arg0: i32, %arg1: i32, %arg2: memref<1x8x16x19xbf16, #tpu.memory_space<vmem>>, %arg3: memref<1x16x32xf32, #tpu.memory_space<vmem>>, %arg4: memref<19x384xbf16, #tpu.memory_space<vmem>>, %arg5: memref<1x384xf32, #tpu.memory_space<vmem>>, %arg6: memref<32x256xbf16, #tpu.memory_space<vmem>>, %arg7: memref<32x128xbf16, #tpu.memory_space<vmem>>, %arg8: memref<128x384xbf16, #tpu.memory_space<vmem>>, %arg9: memref<1x384xf32, #tpu.memory_space<vmem>>, %arg10: memref<1x32x16xf32, #tpu.memory_space<vmem>>) attributes {dimension_semantics = [#tpu.dimension_semantics<parallel>, #tpu.dimension_semantics<parallel>], iteration_bounds = array<i64: 2, 1>, scalar_prefetch = 0 : i64, scratch_operands = 0 : i64, tpu.core_type = #tpu.core_type<tc>, window_params = [{transform_indices = @transform_0, window_bounds = array<i64: 1, 8, 16, 19>}, {transform_indices = @transform_1, window_bounds = array<i64: 1, 16, 32>}, {pipeline_mode = #tpu.pipeline_mode<synchronous>, transform_indices = @transform_2, window_bounds = array<i64: 19, 384>}, {pipeline_mode = #tpu.pipeline_mode<synchronous>, transform_indices = @transform_3, window_bounds = array<i64: 1, 384>}, {pipeline_mode = #tpu.pipeline_mode<synchronous>, transform_indices = @transform_4, window_bounds = array<i64: 32, 256>}, {pipeline_mode = #tpu.pipeline_mode<synchronous>, transform_indices = @transform_5, window_bounds = array<i64: 32, 128>}, {pipeline_mode = #tpu.pipeline_mode<synchronous>, transform_indices = @transform_6, window_bounds = array<i64: 128, 384>}, {pipeline_mode = #tpu.pipeline_mode<synchronous>, transform_indices = @transform_7, window_bounds = array<i64: 1, 384>}, {transform_indices = @transform_8, window_bounds = array<i64: 1, 32, 16>}]} {
    %c0 = arith.constant 0 : index
    %c0_0 = arith.constant 0 : index
    %c0_1 = arith.constant 0 : index
    %c0_2 = arith.constant 0 : index
    %0 = vector.load %arg2[%c0, %c0_0, %c0_1, %c0_2] : memref<1x8x16x19xbf16, #tpu.memory_space<vmem>>, vector<1x8x16x19xbf16>
    %1 = vector.shape_cast %0 : vector<1x8x16x19xbf16> to vector<8x16x19xbf16>
    %2 = vector.shape_cast %1 : vector<8x16x19xbf16> to vector<128x19xbf16>
    %c0_3 = arith.constant 0 : index
    %c0_4 = arith.constant 0 : index
    %c0_5 = arith.constant 0 : index
    %3 = vector.load %arg3[%c0_3, %c0_4, %c0_5] : memref<1x16x32xf32, #tpu.memory_space<vmem>>, vector<1x16x32xf32>
    %4 = vector.shape_cast %3 : vector<1x16x32xf32> to vector<16x32xf32>
    %5 = arith.truncf %4 : vector<16x32xf32> to vector<16x32xbf16>
    %c0_6 = arith.constant 0 : index
    %c0_7 = arith.constant 0 : index
    %6 = vector.load %arg6[%c0_6, %c0_7] : memref<32x256xbf16, #tpu.memory_space<vmem>>, vector<32x256xbf16>
    %cst = arith.constant dense<0.000000e+00> : vector<16x256xf32>
    %7 = tpu.matmul %5, %6, %cst {dimension_numbers = #tpu.dot_dimension_numbers<[1], [0], [0], [1], [0, 0, 1, 1], [], []>} : vector<16x32xbf16>, vector<32x256xbf16>, vector<16x256xf32> -> vector<16x256xf32>
    %c0_8 = arith.constant 0 : index
    %c0_9 = arith.constant 0 : index
    %8 = vector.load %arg4[%c0_8, %c0_9] : memref<19x384xbf16, #tpu.memory_space<vmem>>, vector<19x384xbf16>
    %cst_10 = arith.constant dense<0.000000e+00> : vector<128x384xf32>
    %9 = tpu.matmul %2, %8, %cst_10 {dimension_numbers = #tpu.dot_dimension_numbers<[1], [0], [0], [1], [0, 0, 1, 1], [], []>} : vector<128x19xbf16>, vector<19x384xbf16>, vector<128x384xf32> -> vector<128x384xf32>
    %c0_11 = arith.constant 0 : index
    %c0_12 = arith.constant 0 : index
    %10 = vector.load %arg5[%c0_11, %c0_12] : memref<1x384xf32, #tpu.memory_space<vmem>>, vector<1x384xf32>
    %11 = vector.broadcast %10 : vector<1x384xf32> to vector<128x384xf32>
    %12 = arith.addf %9, %11 : vector<128x384xf32>
    %13 = vector.shape_cast %12 : vector<128x384xf32> to vector<8x16x384xf32>
    %14 = vector.extract_strided_slice %13 {offsets = [0, 0, 0], sizes = [8, 16, 128], strides = [1, 1, 1]} : vector<8x16x384xf32> to vector<8x16x128xf32>
    %15 = vector.extract_strided_slice %7 {offsets = [0, 0], sizes = [16, 128], strides = [1, 1]} : vector<16x256xf32> to vector<16x128xf32>
    %16 = vector.shape_cast %15 : vector<16x128xf32> to vector<1x16x128xf32>
    %17 = vector.broadcast %16 : vector<1x16x128xf32> to vector<8x16x128xf32>
    %18 = arith.addf %14, %17 : vector<8x16x128xf32>
    %cst_13 = arith.constant 1.000000e-01 : f32
    %19 = vector.broadcast %cst_13 : f32 to vector<8x16x128xf32>
    %20 = arith.mulf %19, %18 : vector<8x16x128xf32>
    %21 = arith.maximumf %18, %20 : vector<8x16x128xf32>
    %22 = arith.truncf %21 : vector<8x16x128xf32> to vector<8x16x128xbf16>
    %c0_14 = arith.constant 0 : index
    %c0_15 = arith.constant 0 : index
    %23 = vector.load %arg8[%c0_14, %c0_15] : memref<128x384xbf16, #tpu.memory_space<vmem>>, vector<128x128xbf16>
    %c0_16 = arith.constant 0 : index
    %c0_17 = arith.constant 0 : index
    %24 = vector.load %arg9[%c0_16, %c0_17] : memref<1x384xf32, #tpu.memory_space<vmem>>, vector<1x128xf32>
    %25 = vector.shape_cast %22 : vector<8x16x128xbf16> to vector<128x128xbf16>
    %cst_18 = arith.constant dense<0.000000e+00> : vector<128x128xf32>
    %26 = tpu.matmul %25, %23, %cst_18 {dimension_numbers = #tpu.dot_dimension_numbers<[1], [0], [0], [1], [0, 0, 1, 1], [], []>} : vector<128x128xbf16>, vector<128x128xbf16>, vector<128x128xf32> -> vector<128x128xf32>
    %27 = vector.broadcast %24 : vector<1x128xf32> to vector<128x128xf32>
    %28 = arith.addf %26, %27 : vector<128x128xf32>
    %29 = vector.shape_cast %28 : vector<128x128xf32> to vector<8x16x128xf32>
    %30 = arith.negf %29 : vector<8x16x128xf32>
    %31 = math.exp %30 : vector<8x16x128xf32>
    %cst_19 = arith.constant 1.000000e+00 : f32
    %32 = vector.broadcast %cst_19 : f32 to vector<8x16x128xf32>
    %33 = arith.addf %32, %31 : vector<8x16x128xf32>
    %34 = arith.divf %32, %33 : vector<8x16x128xf32>
    %35 = vector.extract_strided_slice %34 {offsets = [0, 0, 0], sizes = [8, 16, 32], strides = [1, 1, 1]} : vector<8x16x128xf32> to vector<8x16x32xf32>
    %36 = vector.shape_cast %4 : vector<16x32xf32> to vector<1x16x32xf32>
    %37 = vector.broadcast %36 : vector<1x16x32xf32> to vector<8x16x32xf32>
    %38 = arith.mulf %35, %37 : vector<8x16x32xf32>
    %39 = vector.shape_cast %38 : vector<8x16x32xf32> to vector<128x32xf32>
    %40 = arith.truncf %39 : vector<128x32xf32> to vector<128x32xbf16>
    %c0_20 = arith.constant 0 : index
    %c0_21 = arith.constant 0 : index
    %41 = vector.load %arg7[%c0_20, %c0_21] : memref<32x128xbf16, #tpu.memory_space<vmem>>, vector<32x128xbf16>
    %cst_22 = arith.constant dense<0.000000e+00> : vector<128x128xf32>
    %42 = tpu.matmul %40, %41, %cst_22 {dimension_numbers = #tpu.dot_dimension_numbers<[1], [0], [0], [1], [0, 0, 1, 1], [], []>} : vector<128x32xbf16>, vector<32x128xbf16>, vector<128x128xf32> -> vector<128x128xf32>
    %43 = vector.shape_cast %42 : vector<128x128xf32> to vector<8x16x128xf32>
    %44 = vector.extract_strided_slice %13 {offsets = [0, 0, 128], sizes = [8, 16, 128], strides = [1, 1, 1]} : vector<8x16x384xf32> to vector<8x16x128xf32>
    %45 = vector.extract_strided_slice %7 {offsets = [0, 128], sizes = [16, 128], strides = [1, 1]} : vector<16x256xf32> to vector<16x128xf32>
    %46 = vector.shape_cast %45 : vector<16x128xf32> to vector<1x16x128xf32>
    %47 = vector.broadcast %46 : vector<1x16x128xf32> to vector<8x16x128xf32>
    %48 = arith.addf %44, %47 : vector<8x16x128xf32>
    %cst_23 = arith.constant 1.000000e-01 : f32
    %49 = vector.broadcast %cst_23 : f32 to vector<8x16x128xf32>
    %50 = arith.mulf %49, %48 : vector<8x16x128xf32>
    %51 = arith.maximumf %48, %50 : vector<8x16x128xf32>
    %52 = arith.truncf %51 : vector<8x16x128xf32> to vector<8x16x128xbf16>
    %cst_24 = arith.constant dense<0xFF80> : vector<16x128xbf16>
    %53 = vector.multi_reduction <maximumf>, %52, %cst_24 [0] : vector<8x16x128xbf16> to vector<16x128xbf16>
    %c0_25 = arith.constant 0 : index
    %c128 = arith.constant 128 : index
    %54 = vector.load %arg8[%c0_25, %c128] : memref<128x384xbf16, #tpu.memory_space<vmem>>, vector<128x128xbf16>
    %c0_26 = arith.constant 0 : index
    %c128_27 = arith.constant 128 : index
    %55 = vector.load %arg9[%c0_26, %c128_27] : memref<1x384xf32, #tpu.memory_space<vmem>>, vector<1x128xf32>
    %cst_28 = arith.constant dense<0.000000e+00> : vector<16x128xf32>
    %56 = tpu.matmul %53, %54, %cst_28 {dimension_numbers = #tpu.dot_dimension_numbers<[1], [0], [0], [1], [0, 0, 1, 1], [], []>} : vector<16x128xbf16>, vector<128x128xbf16>, vector<16x128xf32> -> vector<16x128xf32>
    %57 = vector.broadcast %55 : vector<1x128xf32> to vector<16x128xf32>
    %58 = arith.addf %56, %57 : vector<16x128xf32>
    %59 = arith.negf %58 : vector<16x128xf32>
    %60 = math.exp %59 : vector<16x128xf32>
    %cst_29 = arith.constant 1.000000e+00 : f32
    %61 = vector.broadcast %cst_29 : f32 to vector<16x128xf32>
    %62 = arith.addf %61, %60 : vector<16x128xf32>
    %63 = arith.divf %61, %62 : vector<16x128xf32>
    %64 = vector.extract_strided_slice %13 {offsets = [0, 0, 256], sizes = [8, 16, 128], strides = [1, 1, 1]} : vector<8x16x384xf32> to vector<8x16x128xf32>
    %65 = arith.addf %64, %43 : vector<8x16x128xf32>
    %cst_30 = arith.constant 1.000000e-01 : f32
    %66 = vector.broadcast %cst_30 : f32 to vector<8x16x128xf32>
    %67 = arith.mulf %66, %65 : vector<8x16x128xf32>
    %68 = arith.maximumf %65, %67 : vector<8x16x128xf32>
    %69 = arith.truncf %68 : vector<8x16x128xf32> to vector<8x16x128xbf16>
    %cst_31 = arith.constant dense<0xFF80> : vector<16x128xbf16>
    %70 = vector.multi_reduction <maximumf>, %69, %cst_31 [0] : vector<8x16x128xbf16> to vector<16x128xbf16>
    %c0_32 = arith.constant 0 : index
    %c256 = arith.constant 256 : index
    %71 = vector.load %arg8[%c0_32, %c256] : memref<128x384xbf16, #tpu.memory_space<vmem>>, vector<128x128xbf16>
    %c0_33 = arith.constant 0 : index
    %c256_34 = arith.constant 256 : index
    %72 = vector.load %arg9[%c0_33, %c256_34] : memref<1x384xf32, #tpu.memory_space<vmem>>, vector<1x128xf32>
    %cst_35 = arith.constant dense<0.000000e+00> : vector<16x128xf32>
    %73 = tpu.matmul %70, %71, %cst_35 {dimension_numbers = #tpu.dot_dimension_numbers<[1], [0], [0], [1], [0, 0, 1, 1], [], []>} : vector<16x128xbf16>, vector<128x128xbf16>, vector<16x128xf32> -> vector<16x128xf32>
    %74 = vector.broadcast %72 : vector<1x128xf32> to vector<16x128xf32>
    %75 = arith.addf %73, %74 : vector<16x128xf32>
    %76 = math.tanh %75 : vector<16x128xf32>
    %77 = vector.extract_strided_slice %63 {offsets = [0, 0], sizes = [16, 32], strides = [1, 1]} : vector<16x128xf32> to vector<16x32xf32>
    %78 = vector.extract_strided_slice %76 {offsets = [0, 0], sizes = [16, 32], strides = [1, 1]} : vector<16x128xf32> to vector<16x32xf32>
    %cst_36 = arith.constant 1.000000e+00 : f32
    %79 = vector.broadcast %cst_36 : f32 to vector<16x32xf32>
    %80 = arith.subf %79, %77 : vector<16x32xf32>
    %81 = arith.mulf %80, %4 : vector<16x32xf32>
    %82 = arith.mulf %77, %78 : vector<16x32xf32>
    %83 = arith.addf %81, %82 : vector<16x32xf32>
    %84 = tpu.transpose %83, [1, 0] : vector<16x32xf32> -> vector<32x16xf32>
    %c0_37 = arith.constant 0 : index
    %c0_38 = arith.constant 0 : index
    %c0_39 = arith.constant 0 : index
    %85 = vector.load %arg10[%c0_37, %c0_38, %c0_39] : memref<1x32x16xf32, #tpu.memory_space<vmem>>, vector<1x32x16xf32>
    %86 = vector.shape_cast %85 : vector<1x32x16xf32> to vector<32x16xf32>
    %87 = vector.shape_cast %84 : vector<32x16xf32> to vector<1x32x16xf32>
    tpu.vector_store %arg10[%c0_37, %c0_38, %c0_39], %87 {strides = array<i32>} : memref<1x32x16xf32, #tpu.memory_space<vmem>>, vector<1x32x16xf32>,
    return
  }
  func.func @transform_0(%arg0: i32, %arg1: i32) -> (i32, i32, i32, i32) {
    %c0_i32 = arith.constant 0 : i32
    %c0_i32_0 = arith.constant 0 : i32
    %c0_i32_1 = arith.constant 0 : i32
    return %arg0, %c0_i32, %arg1, %c0_i32_0 : i32, i32, i32, i32
  }
  func.func @transform_1(%arg0: i32, %arg1: i32) -> (i32, i32, i32) {
    %c0_i32 = arith.constant 0 : i32
    %c0_i32_0 = arith.constant 0 : i32
    return %arg0, %arg1, %c0_i32 : i32, i32, i32
  }
  func.func @transform_2(%arg0: i32, %arg1: i32) -> (i32, i32) {
    %c0_i32 = arith.constant 0 : i32
    %c0_i32_0 = arith.constant 0 : i32
    %c0_i32_1 = arith.constant 0 : i32
    return %c0_i32, %c0_i32_0 : i32, i32
  }
  func.func @transform_3(%arg0: i32, %arg1: i32) -> (i32, i32) {
    %c0_i32 = arith.constant 0 : i32
    %c0_i32_0 = arith.constant 0 : i32
    %c0_i32_1 = arith.constant 0 : i32
    return %c0_i32, %c0_i32_0 : i32, i32
  }
  func.func @transform_4(%arg0: i32, %arg1: i32) -> (i32, i32) {
    %c0_i32 = arith.constant 0 : i32
    %c0_i32_0 = arith.constant 0 : i32
    %c0_i32_1 = arith.constant 0 : i32
    return %c0_i32, %c0_i32_0 : i32, i32
  }
  func.func @transform_5(%arg0: i32, %arg1: i32) -> (i32, i32) {
    %c0_i32 = arith.constant 0 : i32
    %c0_i32_0 = arith.constant 0 : i32
    %c0_i32_1 = arith.constant 0 : i32
    return %c0_i32, %c0_i32_0 : i32, i32
  }
  func.func @transform_6(%arg0: i32, %arg1: i32) -> (i32, i32) {
    %c0_i32 = arith.constant 0 : i32
    %c0_i32_0 = arith.constant 0 : i32
    %c0_i32_1 = arith.constant 0 : i32
    return %c0_i32, %c0_i32_0 : i32, i32
  }
  func.func @transform_7(%arg0: i32, %arg1: i32) -> (i32, i32) {
    %c0_i32 = arith.constant 0 : i32
    %c0_i32_0 = arith.constant 0 : i32
    %c0_i32_1 = arith.constant 0 : i32
    return %c0_i32, %c0_i32_0 : i32, i32
  }
  func.func @transform_8(%arg0: i32, %arg1: i32) -> (i32, i32, i32) {
    %c0_i32 = arith.constant 0 : i32
    %c0_i32_0 = arith.constant 0 : i32
    return %arg0, %c0_i32, %arg1 : i32, i32, i32
  }
}

module attributes {stable_mosaic.version = 11 : i64} {
  func.func @_gru_kernel(%arg0: i32, %arg1: i32, %arg2: memref<1x8x16x19xbf16, #tpu.memory_space<vmem>>, %arg3: memref<1x16x32xf32, #tpu.memory_space<vmem>>, %arg4: memref<19x384xbf16, #tpu.memory_space<vmem>>, %arg5: memref<1x384xf32, #tpu.memory_space<vmem>>, %arg6: memref<32x256xbf16, #tpu.memory_space<vmem>>, %arg7: memref<32x128xbf16, #tpu.memory_space<vmem>>, %arg8: memref<128x384xbf16, #tpu.memory_space<vmem>>, %arg9: memref<1x384xf32, #tpu.memory_space<vmem>>, %arg10: memref<1x16x32xf32, #tpu.memory_space<vmem>>) attributes {dimension_semantics = [#tpu.dimension_semantics<parallel>, #tpu.dimension_semantics<parallel>], iteration_bounds = array<i64: 2, 1>, scalar_prefetch = 0 : i64, scratch_operands = 0 : i64, tpu.core_type = #tpu.core_type<tc>, window_params = [{transform_indices = @transform_0, window_bounds = array<i64: 1, 8, 16, 19>}, {transform_indices = @transform_1, window_bounds = array<i64: 1, 16, 32>}, {pipeline_mode = #tpu.pipeline_mode<synchronous>, transform_indices = @transform_2, window_bounds = array<i64: 19, 384>}, {pipeline_mode = #tpu.pipeline_mode<synchronous>, transform_indices = @transform_3, window_bounds = array<i64: 1, 384>}, {pipeline_mode = #tpu.pipeline_mode<synchronous>, transform_indices = @transform_4, window_bounds = array<i64: 32, 256>}, {pipeline_mode = #tpu.pipeline_mode<synchronous>, transform_indices = @transform_5, window_bounds = array<i64: 32, 128>}, {pipeline_mode = #tpu.pipeline_mode<synchronous>, transform_indices = @transform_6, window_bounds = array<i64: 128, 384>}, {pipeline_mode = #tpu.pipeline_mode<synchronous>, transform_indices = @transform_7, window_bounds = array<i64: 1, 384>}, {transform_indices = @transform_8, window_bounds = array<i64: 1, 16, 32>}]} {
    %c0 = arith.constant 0 : index
    %c0_0 = arith.constant 0 : index
    %c0_1 = arith.constant 0 : index
    %c0_2 = arith.constant 0 : index
    %0 = vector.load %arg2[%c0, %c0_0, %c0_1, %c0_2] : memref<1x8x16x19xbf16, #tpu.memory_space<vmem>>, vector<1x8x16x19xbf16>
    %1 = vector.shape_cast %0 : vector<1x8x16x19xbf16> to vector<8x16x19xbf16>
    %2 = vector.shape_cast %1 : vector<8x16x19xbf16> to vector<128x19xbf16>
    %c0_3 = arith.constant 0 : index
    %c0_4 = arith.constant 0 : index
    %c0_5 = arith.constant 0 : index
    %3 = vector.load %arg3[%c0_3, %c0_4, %c0_5] : memref<1x16x32xf32, #tpu.memory_space<vmem>>, vector<1x16x32xf32>
    %4 = vector.shape_cast %3 : vector<1x16x32xf32> to vector<16x32xf32>
    %5 = arith.truncf %4 : vector<16x32xf32> to vector<16x32xbf16>
    %c0_6 = arith.constant 0 : index
    %c0_7 = arith.constant 0 : index
    %6 = vector.load %arg6[%c0_6, %c0_7] : memref<32x256xbf16, #tpu.memory_space<vmem>>, vector<32x256xbf16>
    %cst = arith.constant dense<0.000000e+00> : vector<16x256xf32>
    %7 = tpu.matmul %5, %6, %cst {dimension_numbers = #tpu.dot_dimension_numbers<[1], [0], [0], [1], [0, 0, 1, 1], [], []>} : vector<16x32xbf16>, vector<32x256xbf16>, vector<16x256xf32> -> vector<16x256xf32>
    %c0_8 = arith.constant 0 : index
    %c0_9 = arith.constant 0 : index
    %8 = vector.load %arg4[%c0_8, %c0_9] : memref<19x384xbf16, #tpu.memory_space<vmem>>, vector<19x384xbf16>
    %cst_10 = arith.constant dense<0.000000e+00> : vector<128x384xf32>
    %9 = tpu.matmul %2, %8, %cst_10 {dimension_numbers = #tpu.dot_dimension_numbers<[1], [0], [0], [1], [0, 0, 1, 1], [], []>} : vector<128x19xbf16>, vector<19x384xbf16>, vector<128x384xf32> -> vector<128x384xf32>
    %c0_11 = arith.constant 0 : index
    %c0_12 = arith.constant 0 : index
    %10 = vector.load %arg5[%c0_11, %c0_12] : memref<1x384xf32, #tpu.memory_space<vmem>>, vector<1x384xf32>
    %11 = vector.broadcast %10 : vector<1x384xf32> to vector<128x384xf32>
    %12 = arith.addf %9, %11 : vector<128x384xf32>
    %13 = vector.shape_cast %12 : vector<128x384xf32> to vector<8x16x384xf32>
    %14 = vector.extract_strided_slice %13 {offsets = [0, 0, 0], sizes = [8, 16, 128], strides = [1, 1, 1]} : vector<8x16x384xf32> to vector<8x16x128xf32>
    %15 = vector.extract_strided_slice %7 {offsets = [0, 0], sizes = [16, 128], strides = [1, 1]} : vector<16x256xf32> to vector<16x128xf32>
    %16 = vector.shape_cast %15 : vector<16x128xf32> to vector<1x16x128xf32>
    %17 = vector.broadcast %16 : vector<1x16x128xf32> to vector<8x16x128xf32>
    %18 = arith.addf %14, %17 : vector<8x16x128xf32>
    %cst_13 = arith.constant 1.000000e-01 : f32
    %19 = vector.broadcast %cst_13 : f32 to vector<8x16x128xf32>
    %20 = arith.mulf %19, %18 : vector<8x16x128xf32>
    %21 = arith.maximumf %18, %20 : vector<8x16x128xf32>
    %22 = arith.truncf %21 : vector<8x16x128xf32> to vector<8x16x128xbf16>
    %c0_14 = arith.constant 0 : index
    %c0_15 = arith.constant 0 : index
    %23 = vector.load %arg8[%c0_14, %c0_15] : memref<128x384xbf16, #tpu.memory_space<vmem>>, vector<128x128xbf16>
    %c0_16 = arith.constant 0 : index
    %c0_17 = arith.constant 0 : index
    %24 = vector.load %arg9[%c0_16, %c0_17] : memref<1x384xf32, #tpu.memory_space<vmem>>, vector<1x128xf32>
    %25 = vector.shape_cast %22 : vector<8x16x128xbf16> to vector<128x128xbf16>
    %cst_18 = arith.constant dense<0.000000e+00> : vector<128x128xf32>
    %26 = tpu.matmul %25, %23, %cst_18 {dimension_numbers = #tpu.dot_dimension_numbers<[1], [0], [0], [1], [0, 0, 1, 1], [], []>} : vector<128x128xbf16>, vector<128x128xbf16>, vector<128x128xf32> -> vector<128x128xf32>
    %27 = vector.broadcast %24 : vector<1x128xf32> to vector<128x128xf32>
    %28 = arith.addf %26, %27 : vector<128x128xf32>
    %29 = vector.shape_cast %28 : vector<128x128xf32> to vector<8x16x128xf32>
    %30 = arith.negf %29 : vector<8x16x128xf32>
    %31 = math.exp %30 : vector<8x16x128xf32>
    %cst_19 = arith.constant 1.000000e+00 : f32
    %32 = vector.broadcast %cst_19 : f32 to vector<8x16x128xf32>
    %33 = arith.addf %32, %31 : vector<8x16x128xf32>
    %34 = arith.divf %32, %33 : vector<8x16x128xf32>
    %35 = vector.extract_strided_slice %34 {offsets = [0, 0, 0], sizes = [8, 16, 32], strides = [1, 1, 1]} : vector<8x16x128xf32> to vector<8x16x32xf32>
    %36 = vector.shape_cast %4 : vector<16x32xf32> to vector<1x16x32xf32>
    %37 = vector.broadcast %36 : vector<1x16x32xf32> to vector<8x16x32xf32>
    %38 = arith.mulf %35, %37 : vector<8x16x32xf32>
    %39 = vector.shape_cast %38 : vector<8x16x32xf32> to vector<128x32xf32>
    %40 = arith.truncf %39 : vector<128x32xf32> to vector<128x32xbf16>
    %c0_20 = arith.constant 0 : index
    %c0_21 = arith.constant 0 : index
    %41 = vector.load %arg7[%c0_20, %c0_21] : memref<32x128xbf16, #tpu.memory_space<vmem>>, vector<32x128xbf16>
    %cst_22 = arith.constant dense<0.000000e+00> : vector<128x128xf32>
    %42 = tpu.matmul %40, %41, %cst_22 {dimension_numbers = #tpu.dot_dimension_numbers<[1], [0], [0], [1], [0, 0, 1, 1], [], []>} : vector<128x32xbf16>, vector<32x128xbf16>, vector<128x128xf32> -> vector<128x128xf32>
    %43 = vector.shape_cast %42 : vector<128x128xf32> to vector<8x16x128xf32>
    %44 = vector.extract_strided_slice %13 {offsets = [0, 0, 128], sizes = [8, 16, 128], strides = [1, 1, 1]} : vector<8x16x384xf32> to vector<8x16x128xf32>
    %45 = vector.extract_strided_slice %7 {offsets = [0, 128], sizes = [16, 128], strides = [1, 1]} : vector<16x256xf32> to vector<16x128xf32>
    %46 = vector.shape_cast %45 : vector<16x128xf32> to vector<1x16x128xf32>
    %47 = vector.broadcast %46 : vector<1x16x128xf32> to vector<8x16x128xf32>
    %48 = arith.addf %44, %47 : vector<8x16x128xf32>
    %cst_23 = arith.constant 1.000000e-01 : f32
    %49 = vector.broadcast %cst_23 : f32 to vector<8x16x128xf32>
    %50 = arith.mulf %49, %48 : vector<8x16x128xf32>
    %51 = arith.maximumf %48, %50 : vector<8x16x128xf32>
    %52 = arith.truncf %51 : vector<8x16x128xf32> to vector<8x16x128xbf16>
    %cst_24 = arith.constant dense<0xFF80> : vector<16x128xbf16>
    %53 = vector.multi_reduction <maximumf>, %52, %cst_24 [0] : vector<8x16x128xbf16> to vector<16x128xbf16>
    %c0_25 = arith.constant 0 : index
    %c128 = arith.constant 128 : index
    %54 = vector.load %arg8[%c0_25, %c128] : memref<128x384xbf16, #tpu.memory_space<vmem>>, vector<128x128xbf16>
    %c0_26 = arith.constant 0 : index
    %c128_27 = arith.constant 128 : index
    %55 = vector.load %arg9[%c0_26, %c128_27] : memref<1x384xf32, #tpu.memory_space<vmem>>, vector<1x128xf32>
    %cst_28 = arith.constant dense<0.000000e+00> : vector<16x128xf32>
    %56 = tpu.matmul %53, %54, %cst_28 {dimension_numbers = #tpu.dot_dimension_numbers<[1], [0], [0], [1], [0, 0, 1, 1], [], []>} : vector<16x128xbf16>, vector<128x128xbf16>, vector<16x128xf32> -> vector<16x128xf32>
    %57 = vector.broadcast %55 : vector<1x128xf32> to vector<16x128xf32>
    %58 = arith.addf %56, %57 : vector<16x128xf32>
    %59 = arith.negf %58 : vector<16x128xf32>
    %60 = math.exp %59 : vector<16x128xf32>
    %cst_29 = arith.constant 1.000000e+00 : f32
    %61 = vector.broadcast %cst_29 : f32 to vector<16x128xf32>
    %62 = arith.addf %61, %60 : vector<16x128xf32>
    %63 = arith.divf %61, %62 : vector<16x128xf32>
    %64 = vector.extract_strided_slice %13 {offsets = [0, 0, 256], sizes = [8, 16, 128], strides = [1, 1, 1]} : vector<8x16x384xf32> to vector<8x16x128xf32>
    %65 = arith.addf %64, %43 : vector<8x16x128xf32>
    %cst_30 = arith.constant 1.000000e-01 : f32
    %66 = vector.broadcast %cst_30 : f32 to vector<8x16x128xf32>
    %67 = arith.mulf %66, %65 : vector<8x16x128xf32>
    %68 = arith.maximumf %65, %67 : vector<8x16x128xf32>
    %69 = arith.truncf %68 : vector<8x16x128xf32> to vector<8x16x128xbf16>
    %cst_31 = arith.constant dense<0xFF80> : vector<16x128xbf16>
    %70 = vector.multi_reduction <maximumf>, %69, %cst_31 [0] : vector<8x16x128xbf16> to vector<16x128xbf16>
    %c0_32 = arith.constant 0 : index
    %c256 = arith.constant 256 : index
    %71 = vector.load %arg8[%c0_32, %c256] : memref<128x384xbf16, #tpu.memory_space<vmem>>, vector<128x128xbf16>
    %c0_33 = arith.constant 0 : index
    %c256_34 = arith.constant 256 : index
    %72 = vector.load %arg9[%c0_33, %c256_34] : memref<1x384xf32, #tpu.memory_space<vmem>>, vector<1x128xf32>
    %cst_35 = arith.constant dense<0.000000e+00> : vector<16x128xf32>
    %73 = tpu.matmul %70, %71, %cst_35 {dimension_numbers = #tpu.dot_dimension_numbers<[1], [0], [0], [1], [0, 0, 1, 1], [], []>} : vector<16x128xbf16>, vector<128x128xbf16>, vector<16x128xf32> -> vector<16x128xf32>
    %74 = vector.broadcast %72 : vector<1x128xf32> to vector<16x128xf32>
    %75 = arith.addf %73, %74 : vector<16x128xf32>
    %76 = math.tanh %75 : vector<16x128xf32>
    %77 = vector.extract_strided_slice %63 {offsets = [0, 0], sizes = [16, 32], strides = [1, 1]} : vector<16x128xf32> to vector<16x32xf32>
    %78 = vector.extract_strided_slice %76 {offsets = [0, 0], sizes = [16, 32], strides = [1, 1]} : vector<16x128xf32> to vector<16x32xf32>
    %cst_36 = arith.constant 1.000000e+00 : f32
    %79 = vector.broadcast %cst_36 : f32 to vector<16x32xf32>
    %80 = arith.subf %79, %77 : vector<16x32xf32>
    %81 = arith.mulf %80, %4 : vector<16x32xf32>
    %82 = arith.mulf %77, %78 : vector<16x32xf32>
    %83 = arith.addf %81, %82 : vector<16x32xf32>
    %c0_37 = arith.constant 0 : index
    %c0_38 = arith.constant 0 : index
    %c0_39 = arith.constant 0 : index
    %84 = vector.load %arg10[%c0_37, %c0_38, %c0_39] : memref<1x16x32xf32, #tpu.memory_space<vmem>>, vector<1x16x32xf32>
    %85 = vector.shape_cast %84 : vector<1x16x32xf32> to vector<16x32xf32>
    %86 = vector.shape_cast %83 : vector<16x32xf32> to vector<1x16x32xf32>
    tpu.vector_store %arg10[%c0_37, %c0_38, %c0_39], %86 {strides = array<i32>} : memref<1x16x32xf32, #tpu.memory_space<vmem>>, vector<1x16x32xf32>,
    return
  }
  func.func @transform_0(%arg0: i32, %arg1: i32) -> (i32, i32, i32, i32) {
    %c0_i32 = arith.constant 0 : i32
    %c0_i32_0 = arith.constant 0 : i32
    %c0_i32_1 = arith.constant 0 : i32
    return %arg0, %c0_i32, %arg1, %c0_i32_0 : i32, i32, i32, i32
  }
  func.func @transform_1(%arg0: i32, %arg1: i32) -> (i32, i32, i32) {
    %c0_i32 = arith.constant 0 : i32
    %c0_i32_0 = arith.constant 0 : i32
    return %arg0, %arg1, %c0_i32 : i32, i32, i32
  }
  func.func @transform_2(%arg0: i32, %arg1: i32) -> (i32, i32) {
    %c0_i32 = arith.constant 0 : i32
    %c0_i32_0 = arith.constant 0 : i32
    %c0_i32_1 = arith.constant 0 : i32
    return %c0_i32, %c0_i32_0 : i32, i32
  }
  func.func @transform_3(%arg0: i32, %arg1: i32) -> (i32, i32) {
    %c0_i32 = arith.constant 0 : i32
    %c0_i32_0 = arith.constant 0 : i32
    %c0_i32_1 = arith.constant 0 : i32
    return %c0_i32, %c0_i32_0 : i32, i32
  }
  func.func @transform_4(%arg0: i32, %arg1: i32) -> (i32, i32) {
    %c0_i32 = arith.constant 0 : i32
    %c0_i32_0 = arith.constant 0 : i32
    %c0_i32_1 = arith.constant 0 : i32
    return %c0_i32, %c0_i32_0 : i32, i32
  }
  func.func @transform_5(%arg0: i32, %arg1: i32) -> (i32, i32) {
    %c0_i32 = arith.constant 0 : i32
    %c0_i32_0 = arith.constant 0 : i32
    %c0_i32_1 = arith.constant 0 : i32
    return %c0_i32, %c0_i32_0 : i32, i32
  }
  func.func @transform_6(%arg0: i32, %arg1: i32) -> (i32, i32) {
    %c0_i32 = arith.constant 0 : i32
    %c0_i32_0 = arith.constant 0 : i32
    %c0_i32_1 = arith.constant 0 : i32
    return %c0_i32, %c0_i32_0 : i32, i32
  }
  func.func @transform_7(%arg0: i32, %arg1: i32) -> (i32, i32) {
    %c0_i32 = arith.constant 0 : i32
    %c0_i32_0 = arith.constant 0 : i32
    %c0_i32_1 = arith.constant 0 : i32
    return %c0_i32, %c0_i32_0 : i32, i32
  }
  func.func @transform_8(%arg0: i32, %arg1: i32) -> (i32, i32, i32) {
    %c0_i32 = arith.constant 0 : i32
    %c0_i32_0 = arith.constant 0 : i32
    return %arg0, %arg1, %c0_i32 : i32, i32, i32
  }
}

</mosaic_0001>

<bundles_post_ra>
// kernel: tpu_custom_call.1
= control target key start
LH: loop header
LB: loop body
LE: loop exit
PB: predicated region body
PF: predicated region fallthrough
CT: control target
= control target key end

     0   :  { %s3339_s0 = inlined_call_operand.hbm [shape: bf16[2,8,16,19], index: 0, kind: input, shape index: {}]   ;;  %s3340_s1 = inlined_call_operand.hbm [shape: f32[2,16,32], index: 1, kind: input, shape index: {}]   ;;  %s3341_s2 = inlined_call_operand.hbm [shape: bf16[19,384], index: 2, kind: input, shape index: {}]   ;;  %s3342_s3 = inlined_call_operand.hbm [shape: f32[1,384], index: 3, kind: input, shape index: {}]   ;;  %s3343_s4 = inlined_call_operand.hbm [shape: bf16[32,256], index: 4, kind: input, shape index: {}]   ;;  %s3344_s5 = inlined_call_operand.vmem [shape: bf16[32,128], index: 5, kind: input, shape index: {}]   ;;  %s3345_s6 = inlined_call_operand.hbm [shape: bf16[128,384], index: 6, kind: input, shape index: {}]   ;;  %s3346_s7 = inlined_call_operand.vmem [shape: f32[1,384], index: 7, kind: input, shape index: {}]   ;;  %s3347_s8 = inlined_call_operand.vmem [shape: f32[2,32,16], index: 8, kind: output, shape index: {}]  }
   0x1   :  { %3358 = sst [smem:[#allocation18_spill]] %s3339_s0 }
   0x2   :  { %3359 = sst [smem:[#allocation19_spill]] %s3341_s2 }
   0x3   :  { %3360 = sst [smem:[#allocation20_spill]] %s3342_s3 }
   0x4   :  { %3361 = sst [smem:[#allocation21_spill]] %s3347_s8 }
   0x5   :  { %13 = vsyncpa [#allocation3], 0 }
   0x6   :  { %15 = vsyncpa [#allocation3 + $0x1], 0 }
   0x7   :  { %16 = vsyncpa [#allocation5], 0 }
   0x8   :  { %18 = vsyncpa [#allocation5 + $0x1], 0 }
   0x9   :  { %19 = vsyncpa [#allocation8], 0 }
   0xa   :  { %20 = vsyncpa [#allocation11], 0  ;;  %s2777_s27 = smov 0   ;;  %s2779_s28 = smov 0  }
   0xb   :  { %s2781_s29 = smov 0   ;;  %s2783_s30 = smov 0  }
   0xc   :  { %s2785_s9 = smov 0   ;;  %s2787_s10 = smov 0  }
   0xd LB: > { %3362 = sst [smem:[#allocation17_spill]] %s2706_s30  ;;  %s3350_s11 = sadd.s32 4294967295, %s2714_s10   ;;  %s2714_s10 = sphi %s2787_s10, %s26_s10   ;;  %s2710_s9 = sphi %s2785_s9, %s3388_s9   ;;  %s2706_s30 = sphi %s2783_s30, %s3387_s30   ;;  %s2702_s29 = sphi %s2781_s29, %s3386_s29   ;;  %s2698_s28 = sphi %s2779_s28, %s3385_s28   ;;  %s2694_s27 = sphi %s2777_s27, %s3384_s27  }
   0xe   : > { %p60_p0 = scmp.ne.s32.totalorder %s2698_s28, %s2694_s27  ;;  %p2809_p1 = scmp.eq.s32.totalorder %s3350_s11, 0 }
   0xf   : > { %p1926_p2 = scmp.ge.s32.totalorder %s2714_s10, 1  ;;  %p253_p3 = scmp.lt.s32.totalorder %s2714_s10, 3 }
  0x10   : > { %s3363_s12 = scalar_select %p2809_p1, 1, 0 }
  0x11   : > { %p2817_p4 = por %p2809_p1, %p60_p0  ;;  %p2821_p5 = pnand %p1926_p2, %p253_p3 }
  0x12   : > { %s2716_s15 = smov [#allocation6]   ;;  %s2717_s18 = smov [#allocation7]  }
  0x13   : > { %s3364_s13 = scalar_select %p2817_p4, 1, 0 }
  0x14   : > { %s3365_s14 = scalar_select %p2821_p5, 1, 0 }
  0x15   : > { %s265_s16 = sshll.u32 %s2716_s15, 4  ;;  %p2260_p6 = pneg %p2821_p5  ;;  %s2825_s16 = int_to_ptr.vmem [resolvable:$true] %s265_s16 }
  0x16   : > { %s279_s19 = sshll.u32 %s2717_s18, 4  ;;  %s2718_s20 = smov [#allocation9]   ;;  %s2835_s19 = int_to_ptr.vmem [resolvable:$true] %s279_s19 }
  0x17   : > { %p2831_p7 = pnand %p2260_p6, %p2809_p1  ;;  %s2837_s21 = sshll.u32 %s2718_s20, 4  ;;  %s290_s21 = int_to_ptr.vmem [resolvable:$true] %s2837_s21 }
  0x18   : > { %s3367_s2 = sld [smem:[#allocation19_spill]] }
  0x19   : > { %p2847_p9 = pneg %p2831_p7 }
  0x1e   : > { %s2476_s24 = scalar_lea.hbm %s3367_s2, 576 }
  0x1f   : > { %p2477_p8 = scmp.ne.s32.totalorder %s3367_s2, %s2476_s24  ;;  %p2483_p12 = scmp.lt.u32.totalorder %s2476_s24, %s3367_s2 }
  0x21   : > { %p2479_p10 = pnand %p2847_p9, %p2477_p8 }
  0x23   : > { %p2480_p11 = pneg %p2479_p10 }
  0x25   : > { %p2485_p13 = pnand %p2483_p12, %p2480_p11 }
  0x27   : > { %2488 = shalt.err (!%p2485_p13)
}
  0x28   : > { %s2489_s20 = scalar_lea.vmem %s2825_s16, 576  ;;  %p2497_p6 = scmp.lt.s32.totalorder %s2825_s16, %s2825_s16 }
  0x29   : > { %p2490_p0 = scmp.ne.s32.totalorder %s2825_s16, %s2489_s20  ;;  %p2498_p1 = scmp.lt.s32.totalorder %s2489_s20, %s2489_s20 }
  0x2b   : > { %p2492_p2 = pnand %p2490_p0, %p2847_p9  ;;  %p2499_p8 = por %p2498_p1, %p2497_p6 }
  0x2d   : > { %p2493_p3 = pneg %p2492_p2 }
  0x2f   : > { %p2500_p10 = pnand %p2499_p8, %p2493_p3 }
  0x31   : > { %2503 = shalt.err (!%p2500_p10)
}
  0x32   : > { %s3354_s22 = smov 192   ;;  %s3355_s23 = smov 12  }
  0x33   : > { %2263 = dma.hbm_to_vmem [thread:$0]  (!%p2831_p7), %s3367_s2, 576, %s2825_s16, [#allocation5], %s3354_s22, %s3354_s22, %s3355_s23  }
  0x34   : > { %s3369_s3 = sld [smem:[#allocation20_spill]] }
  0x3a   : > { %s2504_s18 = scalar_lea.hbm %s3369_s3, 48 }
  0x3b   : > { %p2505_p1 = scmp.ne.s32.totalorder %s3369_s3, %s2504_s18  ;;  %p2511_p13 = scmp.lt.u32.totalorder %s2504_s18, %s3369_s3 }
  0x3d   : > { %p2507_p11 = pnand %p2505_p1, %p2847_p9 }
  0x3f   : > { %p2508_p12 = pneg %p2507_p11 }
  0x41   : > { %p2513_p0 = pnand %p2511_p13, %p2508_p12 }
  0x43   : > { %2516 = shalt.err (!%p2513_p0)
}
  0x44   : > { %s2517_s16 = scalar_lea.vmem %s2835_s19, 48  ;;  %s2524_s11 = scalar_lea.vmem %s2835_s19, 64 }
  0x45   : > { %p2518_p2 = scmp.ne.s32.totalorder %s2835_s19, %s2517_s16  ;;  %p2525_p8 = scmp.lt.s32.totalorder %s2835_s19, %s2835_s19 }
  0x46   : > { %p2526_p10 = scmp.lt.s32.totalorder %s2524_s11, %s2517_s16 }
  0x47   : > { %p2520_p3 = pnand %p2518_p2, %p2847_p9 }
  0x48   : > { %p2527_p1 = por %p2526_p10, %p2525_p8 }
  0x49   : > { %p2521_p6 = pneg %p2520_p3 }
  0x4b   : > { %p2528_p11 = pnand %p2527_p1, %p2521_p6 }
  0x4d   : > { %2531 = shalt.err (!%p2528_p11)
}
  0x4e   : > { %2266 = dma.hbm_to_vmem [thread:$0]  (!%p2831_p7), %s3369_s3, 48, %s2835_s19, [#allocation8]  }
  0x4f   : > { %s2532_s26 = scalar_lea.hbm %s3343_s4, 512 }
  0x50   : > { %p2533_p12 = scmp.ne.s32.totalorder %s3343_s4, %s2532_s26  ;;  %p2539_p2 = scmp.lt.u32.totalorder %s2532_s26, %s3343_s4 }
  0x52   : > { %p2535_p13 = pnand %p2533_p12, %p2847_p9 }
  0x54   : > { %p2536_p0 = pneg %p2535_p13 }
  0x56   : > { %p2541_p3 = pnand %p2539_p2, %p2536_p0 }
  0x58   : > { %2544 = shalt.err (!%p2541_p3)
}
  0x59   : > { %s2545_s11 = scalar_lea.vmem %s290_s21, 512  ;;  %p2553_p1 = scmp.lt.s32.totalorder %s290_s21, %s290_s21 }
  0x5a   : > { %p2546_p6 = scmp.ne.s32.totalorder %s290_s21, %s2545_s11  ;;  %p2554_p11 = scmp.lt.s32.totalorder %s2545_s11, %s2545_s11 }
  0x5c   : > { %p2548_p8 = pnand %p2546_p6, %p2847_p9  ;;  %p2555_p4 = por %p2554_p11, %p2553_p1 }
  0x5e   : > { %p2549_p10 = pneg %p2548_p8 }
  0x60   : > { %p2556_p5 = pnand %p2555_p4, %p2549_p10 }
  0x62   : > { %2559 = shalt.err (!%p2556_p5)
}
  0x63   : > { %s3356_s19 = smov 128   ;;  %s3357_s8 = smov 8  }
  0x64   : > { %2269 = dma.hbm_to_vmem [thread:$0]  (!%p2831_p7), %s3343_s4, 512, %s290_s21, [#allocation8], %s3356_s19, %s3356_s19, %s3357_s8  }
  0x65   : > { %s2723_s25 = smov [#allocation10]   ;;  %s2560_s20 = scalar_lea.hbm %s3345_s6, 3072 }
  0x66   : > { %s305_s26 = sshll.u32 %s2723_s25, 4  ;;  %p2561_p4 = scmp.ne.s32.totalorder %s3345_s6, %s2560_s20  ;;  %s306_s26 = int_to_ptr.vmem [resolvable:$true] %s305_s26 }
  0x67   : > { %p2567_p13 = scmp.lt.u32.totalorder %s2560_s20, %s3345_s6 }
  0x68   : > { %p2563_p5 = pnand %p2561_p4, %p2847_p9 }
  0x6a   : > { %p2564_p12 = pneg %p2563_p5 }
  0x6c   : > { %p2569_p0 = pnand %p2567_p13, %p2564_p12 }
  0x6e   : > { %2572 = shalt.err (!%p2569_p0)
}
  0x6f   : > { %s2573_s21 = scalar_lea.vmem %s306_s26, 3072  ;;  %p2581_p8 = scmp.lt.s32.totalorder %s306_s26, %s306_s26 }
  0x70   : > { %p2574_p2 = scmp.ne.s32.totalorder %s306_s26, %s2573_s21  ;;  %p2582_p10 = scmp.lt.s32.totalorder %s2573_s21, %s2573_s21 }
  0x72   : > { %p2576_p3 = pnand %p2574_p2, %p2847_p9  ;;  %p2583_p1 = por %p2582_p10, %p2581_p8 }
  0x74   : > { %p2577_p6 = pneg %p2576_p3 }
  0x76   : > { %p2584_p11 = pnand %p2583_p1, %p2577_p6 }
  0x78   : > { %2587 = shalt.err (!%p2584_p11)
}
  0x79   : > { %s3370_s30 = smov 12   ;;  %s3371_s24 = smov 192  }
  0x7a   : > { %2272 = dma.hbm_to_vmem [thread:$0]  (!%p2831_p7), %s3345_s6, 3072, %s306_s26, [#allocation11], %s3371_s24, %s3371_s24, %s3370_s30  }
  0x7b   : > { %s38_s27 = sadd.s32 1, %s2710_s9  ;;  %s47_s25 = sadd.s32 1, %s2702_s29 }
  0x7c   : > { %p40_p9 = scmp.ge.s32.totalorder %s38_s27, 2  ;;  %p54_p4 = scmp.ne.s32.totalorder %s2702_s29, %s2698_s28 }
  0x7d   : > { %p55_p5 = scmp.eq.s32.totalorder %s2714_s10, 0  ;;  %p2284_p12 = scmp.lt.s32.totalorder %s2714_s10, 2 }
  0x7e   : > { %s3390_s27 = smov (%p40_p9, %s38_s27), 0  ;;  %s2947_s17 = sand.u32 1, %s2702_s29  }
  0x7f   : > { %p56_p13 = por %p55_p5, %p54_p4  ;;  %s42_s15 = ssub.s32 %s2710_s9, %s3390_s27 }
  0x80   : > { %p45_p0 = scmp.eq.s32.totalorder %s42_s15, 0  ;;  %s1932_s18 = sshll.u32 %s2947_s17, 6 }
  0x81   : > { %s2039_s26 = sshll.u32 %s2710_s9, 10  ;;  %s3372_s0 = sld [smem:[#allocation18_spill]] }
  0x82   : > { %s2954_s20 = scalar_select %p45_p0, %s2702_s29, %s47_s25  }
  0x83   : > { %s326_s30 = scalar_lea.vmem [#allocation2], %s1932_s18  ;;  %p2965_p7 = pnand %p2284_p12, %p56_p13 }
  0x84   : > { %s335_s24 = sshll.u32 %s326_s30, 4  ;;  %s323_s25 = scalar_lea.sflag [#allocation3], %s2947_s17  ;;  %s2961_s24 = int_to_ptr.vmem [resolvable:$true] %s335_s24 }
  0x85   : > { %p2590_p3 = pneg %p2965_p7 }
  0x87   : > { %s2959_s21 = scalar_lea.hbm %s3372_s0, %s2039_s26  ;;  %s2593_s16 = scalar_lea.hbm %s3372_s0, 2048 }
  0x88   : > { %s2588_s15 = scalar_lea.hbm %s2959_s21, 1024  ;;  %p2594_p10 = scmp.lt.u32.totalorder %s2959_s21, %s3372_s0 }
  0x89   : > { %p2589_p2 = scmp.ne.s32.totalorder %s2959_s21, %s2588_s15  ;;  %p2595_p1 = scmp.lt.u32.totalorder %s2593_s16, %s2588_s15 }
  0x8a   : > { %p2597_p9 = scmp.lt.u32.totalorder %s2588_s15, %s2959_s21 }
  0x8b   : > { %p2591_p6 = pnand %p2590_p3, %p2589_p2  ;;  %p2596_p11 = por %p2595_p1, %p2594_p10 }
  0x8d   : > { %p2592_p8 = pneg %p2591_p6  ;;  %p2598_p4 = por %p2597_p9, %p2596_p11 }
  0x8f   : > { %p2599_p5 = pnand %p2598_p4, %p2592_p8 }
  0x91   : > { %2602 = shalt.err (!%p2599_p5)
}
  0x92   : > { %s2603_s19 = scalar_lea.vmem %s2961_s24, 1024  ;;  %s2724_s18 = smov [#allocation2]  }
  0x93   : > { %p2604_p12 = scmp.ne.s32.totalorder %s2961_s24, %s2603_s19  ;;  %s2608_s26 = sshll.u32 %s2724_s18, 4  ;;  %s2609_s26 = int_to_ptr.vmem [resolvable:$false] %s2608_s26 }
  0x94   : > { %s2610_s11 = scalar_lea.vmem %s2609_s26, 2048  ;;  %p2611_p2 = scmp.lt.s32.totalorder %s2961_s24, %s2609_s26 }
  0x95   : > { %p2606_p13 = pnand %p2604_p12, %p2590_p3  ;;  %p2612_p6 = scmp.lt.s32.totalorder %s2610_s11, %s2603_s19 }
  0x97   : > { %p2607_p0 = pneg %p2606_p13  ;;  %p2613_p10 = por %p2612_p6, %p2611_p2 }
  0x99   : > { %p2614_p1 = pnand %p2613_p10, %p2607_p0 }
  0x9b   : > { %2617 = shalt.err (!%p2614_p1)
}
  0x9c   : > { %s2725_s15 = smov 64   ;;  %s2726_s16 = smov 4  }
  0x9d   : > { %2276 = dma.hbm_to_vmem [thread:$0]  (!%p2965_p7), %s2959_s21, 1024, %s2961_s24, %s323_s25, %s2725_s15, %s2725_s15, %s2726_s16  }
  0x9e   : > { %s1935_s30 = sshll.u32 %s2947_s17, 4  ;;  %s2040_s18 = sshll.u32 %s2710_s9, 8 }
  0x9f   : > { %s3003_s11 = scalar_lea.hbm %s3340_s1, %s2040_s18  ;;  %s349_s8 = scalar_lea.vmem [#allocation4], %s1935_s30 }
  0xa0   : > { %s358_s23 = sshll.u32 %s349_s8, 4  ;;  %s3374_s0 = sand.u32 1, %s2714_s10   ;;  %s3005_s23 = int_to_ptr.vmem [resolvable:$true] %s358_s23 }
  0xa1   : > { %s3009_s2 = scalar_lea.sflag [#allocation5], %s3374_s0  ;;  %s2618_s3 = scalar_lea.hbm %s3003_s11, 256 }
  0xa2   : > { %p2619_p8 = scmp.ne.s32.totalorder %s3003_s11, %s2618_s3  ;;  %s2623_s24 = scalar_lea.hbm %s3340_s1, 512 }
  0xa3   : > { %p2624_p4 = scmp.lt.u32.totalorder %s3003_s11, %s3340_s1  ;;  %p2625_p5 = scmp.lt.u32.totalorder %s2623_s24, %s2618_s3 }
  0xa4   : > { %p2621_p11 = pnand %p2619_p8, %p2590_p3  ;;  %p2627_p13 = scmp.lt.u32.totalorder %s2618_s3, %s3003_s11 }
  0xa5   : > { %p2626_p12 = por %p2625_p5, %p2624_p4 }
  0xa6   : > { %p2622_p9 = pneg %p2621_p11 }
  0xa7   : > { %p2628_p0 = por %p2627_p13, %p2626_p12 }
  0xa9   : > { %p2629_p2 = pnand %p2628_p0, %p2622_p9 }
  0xab   : > { %2632 = shalt.err (!%p2629_p2)
}
  0xac   : > { %s2633_s0 = scalar_lea.vmem %s3005_s23, 256  ;;  %s2727_s8 = smov [#allocation4]  }
  0xad   : > { %p2634_p6 = scmp.ne.s32.totalorder %s3005_s23, %s2633_s0  ;;  %s2638_s16 = sshll.u32 %s2727_s8, 4  ;;  %s2639_s16 = int_to_ptr.vmem [resolvable:$false] %s2638_s16 }
  0xae   : > { %s2640_s30 = scalar_lea.vmem %s2639_s16, 512  ;;  %p2641_p8 = scmp.lt.s32.totalorder %s3005_s23, %s2639_s16 }
  0xaf   : > { %p2636_p10 = pnand %p2634_p6, %p2590_p3  ;;  %p2642_p11 = scmp.lt.s32.totalorder %s2640_s30, %s2633_s0 }
  0xb1   : > { %p2637_p1 = pneg %p2636_p10  ;;  %p2643_p4 = por %p2642_p11, %p2641_p8 }
  0xb3   : > { %p2644_p5 = pnand %p2643_p4, %p2637_p1 }
  0xb5   : > { %2647 = shalt.err (!%p2644_p5)
}
  0xb6   : > { %s3375_s3 = smov 8   ;;  %s3376_s18 = smov 128  }
  0xb7   : > { %2279 = dma.hbm_to_vmem [thread:$0]  (!%p2965_p7), %s3003_s11, 256, %s3005_s23, %s3009_s2, %s3376_s18, %s3376_s18, %s3375_s3  }
  0xb8   : > { %p3377_p3 = scmp.ne.s32.totalorder %s3365_s14, 0 }
  0xb9   : > { %s372_s26 = sand.u32 (!%p3377_p3), 1, %s2698_s28   ;;  %p3378_p9 = scmp.ne.s32.totalorder (!%p3377_p3), %s3364_s13, 0 }
  0xba   : > { %370 = sbr.rel (%p3377_p3) target bundleno = 1348 (0x544), region = 52  ;;  %s1939_s19 = sshll.u32 (!%p3377_p3), %s372_s26, 6 }
  0xbb   : > { %s373_s17 = scalar_lea.sflag (!%p3377_p3), [#allocation3], %s372_s26  ;;  %s3041_s21 = scalar_lea.vmem (!%p3377_p3), [#allocation2], %s1939_s19 }
  0xc1   : > { %2673 = dma.done.wait (%p3378_p9), %s373_s17, 1024  }
  0xc2   : > { %2675 = vsyncadd (%p3378_p9), %s373_s17, 4294966272  ;;  %s3379_s22 = sadd.s32 4294967295, %s2714_s10   ;;  %s1940_s2 = sshll.u32 %s372_s26, 4 }
  0xc3   : > { %s381_s24 = sand.u32 1, %s3379_s22   ;;  %s3049_s14 = scalar_lea.vmem [#allocation4], %s1940_s2 }
  0xc4   : > { %s382_s23 = scalar_lea.sflag [#allocation5], %s381_s24 }
  0xc5   : > { %2677 = dma.done.wait (%p3378_p9), %s382_s23, 256  }
  0xc6   : > { %2679 = vsyncadd (%p3378_p9), %s382_s23, 4294967040  ;;  %p3380_p7 = scmp.ne.s32.totalorder %s3363_s12, 0 }
  0xc8   : > { %2681 = dma.done.wait (%p3380_p7), [#allocation5], 576  }
  0xc9   : > { %2683 = vsyncadd (%p3380_p7), [#allocation5], 4294966720 }
  0xca   : > { %2685 = dma.done.wait (%p3380_p7), [#allocation8], 560  }
  0xcb   : > { %2687 = vsyncadd (%p3380_p7), [#allocation8], 4294966736 }
  0xcc   : > { %2689 = dma.done.wait (%p3380_p7), [#allocation11], 3072  }
  0xcd   : > { %2691 = vsyncadd (%p3380_p7), [#allocation11], 4294964224  ;;  %v2728_v0 = vmov 0   ;;  %vm655_vm0 = vcmask 1040384   ;;  %vm656_vm1 = vcmask 1041408   ;;  %v2729_v1 = vmov 65535  }
  0xce   : > { %700 = vmatprep.mubr.bf16.mxu1 %v2728_v0  ;;  %532 = vmatprep.mubr.bf16.mxu0 %v2728_v0  ;;  %v657_v2 = vsel %vm655_vm0, 4294967295, %v2729_v1  ;;  %v2351_v3 = vld [vmem:[#allocation6 + $0x4] ss:$12 sps:$4 sm:$0xff]   ;;  %v2353_v4 = vld [vmem:[#allocation6] ss:$12 sps:$4 sm:$0xff]   ;;  %vm630_vm2 = vcmask 154624   ;;  %v551_v46 = vlaneseq }
  0xcf   : > { %v658_v5 = vsel %vm656_vm1, %v657_v2, 0  ;;  %668 = vmatprep.subr.bf16.mxu1 %v2351_v3  ;;  %v2354_v6 = vld [vmem:[#allocation9 + $0x4] ss:$8 sps:$4 sm:$0xff]   ;;  %v2356_v7 = vld [vmem:[#allocation9] ss:$8 sps:$4 sm:$0xff]   ;;  %v2362_v17 = vld [vmem:[%s3041_s21] sm:$0xff]  }
  0xd0   : > { %v547_v8 = vld [vmem:[#allocation6 + $0x18] sm:$0x33]  ;;  %669 = vmatpush1.bf16.msra.mxu1 %v2353_v4  ;;  %500 = vmatprep.subr.bf16.mxu0 %v2354_v6  ;;  %v3070_v15 = vld [vmem:[%s3049_s14] sm:$0xff]  ;;  %vm496_vm3 = vcmask 261120   ;;  %v2363_v21 = vld [vmem:[%s3041_s21 + $0x8] sm:$0xff]   ;;  %v2730_v38 = vmov 0.0  }
  0xd1   : > { %v1964_v9 = vcombine.high %v547_v8, %v547_v8  ;;  %v1963_v10 = vcombine.low %v547_v8, %v547_v8  ;;  %v2359_v11 = vld [vmem:[#allocation9 + $0x14] ss:$8 sps:$4 sm:$0xff]   ;;  %501 = vmatpush1.bf16.msra.mxu0 %v2356_v7  ;;  %v2361_v14 = vld [vmem:[#allocation9 + $0x10] ss:$8 sps:$4 sm:$0xff]   ;;  %v2370_v19 = vld [vmem:[#allocation6 + $0x8] ss:$12 sps:$4 sm:$0xff]  }
  0xd2   : > { %v3073_v16 = vld [vmem:[%s3049_s14 + $0x8] sm:$0xff]  ;;  %502 = vmatprep.subr.bf16.mxu0 %v2359_v11  ;;  %v2371_v20 = vld [vmem:[#allocation6 + $0x20] ss:$0 sps:$4 sm:$0x33]   ;;  %v2364_v25 = vld [vmem:[%s3041_s21 + $0x10] sm:$0xff]   ;;  %vm2731_vm4 = vmmov 0  }
  0xd3   : > { %v663_v12 = vand.u32 %v1964_v9, %v658_v5  ;;  %v660_v13 = vand.u32 %v1963_v10, %v658_v5  ;;  %v471_v18 = vpack.c.bf16 %v3073_v16, %v3070_v15  ;;  %v666_v22 = vand.u32 %v2371_v20, %v658_v5  ;;  %v2372_v23 = vld [vmem:[#allocation10] ss:$12 sps:$4 sm:$0xff]   ;;  %v2373_v24 = vld [vmem:[#allocation10 + $0x18] ss:$12 sps:$4 sm:$0xff]   ;;  %v2374_v26 = vld [vmem:[#allocation10 + $0x30] ss:$12 sps:$4 sm:$0xff]  }
  0xd4   : > { %v2365_v27 = vld [vmem:[%s3041_s21 + $0x18] sm:$0xff]   ;;  %v2366_v28 = vld [vmem:[%s3041_s21 + $0x20] sm:$0xff]   ;;  %v2367_v29 = vld [vmem:[%s3041_s21 + $0x28] sm:$0xff]   ;;  %v3120_v47 = vshrl.u32 %v551_v46, 7  ;;  %s3381_s18 = sld [smem:[#allocation17_spill]]  ;;  %vm1763_vm5 = vcmask 130048  }
  0xd5   : > { %670 = vmatprep.subr.bf16.mxu1 %v663_v12  ;;  %503 = vmatpush1.bf16.msra.mxu0 %v2361_v14  ;;  %v2368_v30 = vld [vmem:[%s3041_s21 + $0x30] sm:$0xff]   ;;  %v2369_v31 = vld [vmem:[%s3041_s21 + $0x38] sm:$0xff]   ;;  %v2377_v34 = vld [vmem:[#allocation10 + $0x78] ss:$12 sps:$4 sm:$0xff]   ;;  %s3382_s21 = sld [smem:[#allocation21_spill]] }
  0xd6   : > { %671 = vmatpush1.bf16.msra.mxu1 %v660_v13  ;;  %2096 = vmatprep.subr.bf16.mxu0 %v2370_v19  ;;  %v2375_v32 = vld [vmem:[#allocation10 + $0x48] ss:$12 sps:$4 sm:$0xff]   ;;  %v2376_v33 = vld [vmem:[#allocation10 + $0x60] ss:$12 sps:$4 sm:$0xff]   ;;  %v2378_v35 = vld [vmem:[#allocation10 + $0x90] ss:$12 sps:$4 sm:$0xff]  }
  0xd7   : > { %v2379_v36 = vld [vmem:[#allocation10 + $0xa8] ss:$12 sps:$4 sm:$0xff]   ;;  %v2380_v37 = vld [vmem:[#allocation10 + $0x4] ss:$12 sps:$4 sm:$0xff]   ;;  %2168 = vmatprep.subr.bf16.mxu1 %v2730_v38  ;;  %v2383_v41 = vld [vmem:[#allocation10 + $0x4c] ss:$12 sps:$4 sm:$0xff]  }
  0xd8   : > { %1951 = vmatmul.mubr.msk.bf16.vlgmr.msra.gmra.mrb[0].mxu0 %vm496_vm3, %v471_v18  ;;  %v2381_v39 = vld [vmem:[#allocation10 + $0x1c] ss:$12 sps:$4 sm:$0xff]   ;;  %v2382_v40 = vld [vmem:[#allocation10 + $0x34] ss:$12 sps:$4 sm:$0xff]   ;;  %v2384_v42 = vld [vmem:[#allocation10 + $0x64] ss:$12 sps:$4 sm:$0xff]  }
  0xd9   : > { %1966 = vmatmul.mubr.msk.bf16.vlgmr.msra.gmra.mrb[0].mxu1 %vm630_vm2, %v2362_v17  ;;  %2100 = vmatprep.mubr.msk.bf16.mxu0 %vm630_vm2, %v2362_v17  ;;  %v2385_v43 = vld [vmem:[#allocation10 + $0x7c] ss:$12 sps:$4 sm:$0xff]   ;;  %v2386_v44 = vld [vmem:[#allocation10 + $0x94] ss:$12 sps:$4 sm:$0xff]   ;;  %v2387_v45 = vld [vmem:[#allocation10 + $0xac] ss:$12 sps:$4 sm:$0xff]  }
  0xda   : > { %710 = vmatprep.mubr.bf16.mxu1 %v2728_v0  ;;  %2097 = vmatpush3.bf16.msra.mxu0 %v2370_v19  ;;  %v553_v48 = vsub.s32 0, %v3120_v47  ;;  %v3123_v49 = vld [vmem:[#allocation7] sm:$0x7]  ;;  %v557_v50 = vsub.s32 1, %v3120_v47  ;;  %p444_p12 = scmp.lt.s32.totalorder %s3381_s18, 1 }
  0xdb   : > { %2098 = vmatprep.subr.bf16.mxu0 %v666_v22  ;;  %2169 = vmatpush3.bf16.msra.mxu1 %v2380_v37 }
  0xdc   : > { %2170 = vmatprep.subr.bf16.mxu1 %v2730_v38  ;;  %v3127_v51 = vrot.slane %v3123_v49, %v553_v48  ;;  %v3130_v52 = vrot.slane %v3123_v49, %v557_v50  ;;  %s3392_s18 = smov (!%p444_p12, %s3381_s18), 1 }
  0xdd   : > { %s2041_s26 = sshll.u32 %s3392_s18, 5 }
  0xde   : > { %2099 = vmatpush3.bf16.msra.mxu0 %v666_v22  ;;  %s451_s22 = scalar_lea.vmem %s3382_s21, %s2041_s26 }
  0xdf   : > { %2116 = vmatprep.subr.bf16.mxu0 %v2372_v23  ;;  %2171 = vmatpush3.bf16.msra.mxu1 %v2381_v39 }
  0xe0   : > { %2172 = vmatprep.subr.bf16.mxu1 %v2730_v38 }
  0xe1   : > { %1967 = vmatmul.mubr.msk.bf16.gmra.mrb[4].mxu1 %vm630_vm2, %v2363_v21  ;;  %2101 = vmatmul.mubr.msk.bf16.vlgmr.msra.gmra.mrb[4].mxu0 %vm630_vm2, %v2363_v21 }
  0xe2   : > { %720 = vmatprep.mubr.bf16.mxu1 %v2728_v0  ;;  %2117 = vmatpush3.bf16.msra.mxu0 %v2372_v23 }
  0xe3   : > { %2104 = vmatprep.mubr.msk.bf16.mxu0 %vm630_vm2, %v2364_v25  ;;  %2118 = vmatprep.subr.bf16.mxu0 %v2373_v24 }
  0xe4   : > { %2173 = vmatpush3.bf16.msra.mxu1 %v2382_v40 }
  0xe5   : > { %2174 = vmatprep.subr.bf16.mxu1 %v2730_v38 }
  0xe6   : > { %2119 = vmatpush3.bf16.msra.mxu0 %v2373_v24 }
  0xe7   : > { %2120 = vmatprep.subr.bf16.mxu0 %v2374_v26 }
  0xe8   : > { %2175 = vmatpush3.bf16.msra.mxu1 %v2383_v41 }
  0xe9   : > { %1968 = vmatmul.mubr.msk.bf16.gmra.mrb[8].mxu1 %vm630_vm2, %v2364_v25  ;;  %2105 = vmatmul.mubr.msk.bf16.gmra.mrb[8].mxu0 %vm630_vm2, %v2365_v27 }
  0xea   : > { %730 = vmatprep.mubr.bf16.mxu1 %v2728_v0  ;;  %2121 = vmatpush3.bf16.msra.mxu0 %v2374_v26 }
  0xeb   : > { %2108 = vmatprep.mubr.msk.bf16.mxu0 %vm630_vm2, %v2366_v28  ;;  %2122 = vmatprep.subr.bf16.mxu0 %v2375_v32 }
  0xec   : > { %2176 = vmatprep.subr.bf16.mxu1 %v2730_v38 }
  0xed   : > { %2177 = vmatpush3.bf16.msra.mxu1 %v2384_v42 }
  0xee   : > { %2123 = vmatpush3.bf16.msra.mxu0 %v2375_v32  ;;  %2178 = vmatprep.subr.bf16.mxu1 %v2730_v38 }
  0xef   : > { %2124 = vmatprep.subr.bf16.mxu0 %v2376_v33 }
  0xf1   : > { %1969 = vmatmul.mubr.msk.bf16.gmra.mrb[12].mxu1 %vm630_vm2, %v2365_v27  ;;  %2109 = vmatmul.mubr.msk.bf16.gmra.mrb[12].mxu0 %vm630_vm2, %v2367_v29 }
  0xf2   : > { %740 = vmatprep.mubr.bf16.mxu1 %v2728_v0  ;;  %2112 = vmatprep.mubr.msk.bf16.mxu0 %vm630_vm2, %v2368_v30 }
  0xf3   : > { %2125 = vmatpush3.bf16.msra.mxu0 %v2376_v33  ;;  %2179 = vmatpush3.bf16.msra.mxu1 %v2385_v43 }
  0xf4   : > { %2126 = vmatprep.subr.bf16.mxu0 %v2377_v34  ;;  %2180 = vmatprep.subr.bf16.mxu1 %v2730_v38 }
  0xf7   : > { %2127 = vmatpush3.bf16.msra.mxu0 %v2377_v34  ;;  %2181 = vmatpush3.bf16.msra.mxu1 %v2386_v44 }
  0xf8   : > { %2128 = vmatprep.subr.bf16.mxu0 %v2378_v35  ;;  %2182 = vmatprep.subr.bf16.mxu1 %v2730_v38 }
  0xf9   : > { %1970 = vmatmul.mubr.msk.bf16.gmra.mrb[16].mxu1 %vm630_vm2, %v2366_v28  ;;  %2113 = vmatmul.mubr.msk.bf16.gmra.mrb[16].mxu0 %vm630_vm2, %v2369_v31 }
  0xfa   : > { %750 = vmatprep.mubr.bf16.mxu1 %v2728_v0 }
  0xfb   : > { %2129 = vmatpush3.bf16.msra.mxu0 %v2378_v35  ;;  %2183 = vmatpush3.bf16.msra.mxu1 %v2387_v45 }
  0xfc   : > { %2130 = vmatprep.subr.bf16.mxu0 %v2379_v36  ;;  %2188 = vmatprep.subr.bf16.mxu1 %v2730_v38 }
  0xff   : > { %2131 = vmatpush3.bf16.msra.mxu0 %v2379_v36 }
 0x101   : > { %1971 = vmatmul.mubr.msk.bf16.gmra.mrb[20].mxu1 %vm630_vm2, %v2367_v29 }
 0x102   : > { %760 = vmatprep.mubr.bf16.mxu1 %v2728_v0 }
 0x109   : > { %1972 = vmatmul.mubr.msk.bf16.gmra.mrb[24].mxu1 %vm630_vm2, %v2368_v30 }
 0x10a   : > { %770 = vmatprep.mubr.bf16.mxu1 %v2728_v0 }
 0x111   : > { %1973 = vmatmul.mubr.msk.bf16.gmra.mrb[28].mxu1 %vm630_vm2, %v2369_v31 }
 0x112   : > { %2184 = vmatprep.mubr.msk.bf16.mxu1 %vm2731_vm4, %v2730_v38 }
 0x1ab   : > { %v3133_v56 = vpop.f32.mrb[0].mxu0 }
 0x1ac   : > { %v702_v53 = vpop.f32.mrb[0].mxu1  ;;  %v3136_v59 = vpop.f32.mrb[1].mxu0 }
 0x1ad   : > { %v703_v54 = vadd.f32 %v702_v53, %v3127_v51  ;;  %v704_v55 = vpop.f32.mrb[1].mxu1  ;;  %v3139_v62 = vpop.f32.mrb[2].mxu0 }
 0x1ae   : > { %v705_v57 = vadd.f32 %v704_v55, %v3130_v52  ;;  %v706_v58 = vpop.f32.mrb[2].mxu1  ;;  %v3143_v1 = vpop.f32.mrb[3].mxu0 }
 0x1af   : > { %v707_v60 = vadd.f32 %v706_v58, %v3127_v51  ;;  %v708_v61 = vpop.f32.mrb[3].mxu1  ;;  %v878_v63 = vadd.f32 %v703_v54, %v3133_v56 }
 0x1b0   : > { %v709_v0 = vadd.f32 %v708_v61, %v3130_v52  ;;  %v1359_v2 = vadd.f32 %v705_v57, %v3136_v59 }
 0x1b1   : > { %v879_v3 = vadd.f32 %v707_v60, %v3139_v62  ;;  %v894_v4 = vmul.f32 0.1, %v878_v63 }
 0x1b2   : > { %v1360_v5 = vadd.f32 %v709_v0, %v3143_v1  ;;  %v1375_v6 = vmul.f32 0.1, %v1359_v2 }
 0x1b3   : > { %v895_v7 = vmul.f32 0.1, %v879_v3  ;;  %v910_v12 = vmax.f32 %v878_v63, %v894_v4 }
 0x1b4   : > { %v712_v8 = vpop.f32.mrb[4].mxu1  ;;  %v1376_v9 = vmul.f32 0.1, %v1360_v5  ;;  %v1391_v18 = vmax.f32 %v1359_v2, %v1375_v6 }
 0x1b5   : > { %v713_v10 = vadd.f32 %v712_v8, %v3127_v51  ;;  %v714_v11 = vpop.f32.mrb[5].mxu1  ;;  %v911_v13 = vmax.f32 %v879_v3, %v895_v7 }
 0x1b6   : > { %v715_v14 = vadd.f32 %v714_v11, %v3130_v52  ;;  %v716_v17 = vpop.f32.mrb[6].mxu1  ;;  %v1392_v19 = vmax.f32 %v1360_v5, %v1376_v9 }
 0x1b7   : > { %v880_v20 = vadd.f32 %v713_v10, %v3133_v56  ;;  %v717_v21 = vadd.f32 %v716_v17, %v3127_v51  ;;  %v718_v22 = vpop.f32.mrb[7].mxu1  ;;  %v926_v23 = vpack.c.bf16 %v911_v13, %v910_v12 }
 0x1b8   : > { %v1361_v24 = vadd.f32 %v715_v14, %v3136_v59  ;;  %v719_v25 = vadd.f32 %v718_v22, %v3130_v52  ;;  %v3154_v26 = vpack.c.bf16 %v1392_v19, %v1391_v18 }
 0x1b9   : > { %v896_v27 = vmul.f32 0.1, %v880_v20  ;;  %v881_v28 = vadd.f32 %v717_v21, %v3139_v62  ;;  %2132 = vmatprep.mubr.bf16.mxu0 %v926_v23 }
 0x1ba   : > { %v1377_v29 = vmul.f32 0.1, %v1361_v24  ;;  %v1362_v30 = vadd.f32 %v719_v25, %v3143_v1 }
 0x1bb   : > { %v897_v31 = vmul.f32 0.1, %v881_v28  ;;  %v912_v34 = vmax.f32 %v880_v20, %v896_v27 }
 0x1bc   : > { %v1378_v32 = vmul.f32 0.1, %v1362_v30  ;;  %v722_v33 = vpop.f32.mrb[8].mxu1  ;;  %v1393_v39 = vmax.f32 %v1361_v24, %v1377_v29 }
 0x1bd   : > { %v913_v35 = vmax.f32 %v881_v28, %v897_v31  ;;  %v723_v36 = vadd.f32 %v722_v33, %v3127_v51  ;;  %v724_v37 = vpop.f32.mrb[9].mxu1 }
 0x1be   : > { %v1394_v40 = vmax.f32 %v1362_v30, %v1378_v32  ;;  %v725_v41 = vadd.f32 %v724_v37, %v3130_v52  ;;  %v726_v42 = vpop.f32.mrb[10].mxu1 }
 0x1bf   : > { %v927_v43 = vpack.c.bf16 %v913_v35, %v912_v34  ;;  %v882_v44 = vadd.f32 %v723_v36, %v3133_v56  ;;  %v727_v45 = vadd.f32 %v726_v42, %v3127_v51  ;;  %v728_v46 = vpop.f32.mrb[11].mxu1 }
 0x1c0   : > { %v3162_v48 = vpack.c.bf16 %v1394_v40, %v1393_v39  ;;  %v1363_v50 = vadd.f32 %v725_v41, %v3136_v59  ;;  %v729_v53 = vadd.f32 %v728_v46, %v3130_v52 }
 0x1c1   : > { %v898_v54 = vmul.f32 0.1, %v882_v44  ;;  %v883_v55 = vadd.f32 %v727_v45, %v3139_v62  ;;  %2133 = vmatmul.mubr.bf16.vlgmr.msra.gmra.mrb[20].mxu0 %v927_v43 }
 0x1c2   : > { %v1379_v57 = vmul.f32 0.1, %v1363_v50  ;;  %v1364_v58 = vadd.f32 %v729_v53, %v3143_v1 }
 0x1c3   : > { %v899_v60 = vmul.f32 0.1, %v883_v55  ;;  %v914_v0 = vmax.f32 %v882_v44, %v898_v54 }
 0x1c4   : > { %v1380_v61 = vmul.f32 0.1, %v1364_v58  ;;  %v732_v63 = vpop.f32.mrb[12].mxu1  ;;  %v1395_v5 = vmax.f32 %v1363_v50, %v1379_v57 }
 0x1c5   : > { %v915_v2 = vmax.f32 %v883_v55, %v899_v60  ;;  %v733_v3 = vadd.f32 %v732_v63, %v3127_v51  ;;  %v734_v4 = vpop.f32.mrb[13].mxu1 }
 0x1c6   : > { %v1396_v6 = vmax.f32 %v1364_v58, %v1380_v61  ;;  %v735_v7 = vadd.f32 %v734_v4, %v3130_v52  ;;  %v736_v8 = vpop.f32.mrb[14].mxu1 }
 0x1c7   : > { %v884_v9 = vadd.f32 %v733_v3, %v3133_v56  ;;  %v737_v10 = vadd.f32 %v736_v8, %v3127_v51  ;;  %v738_v11 = vpop.f32.mrb[15].mxu1  ;;  %v928_v12 = vpack.c.bf16 %v915_v2, %v914_v0 }
 0x1c8   : > { %v3172_v13 = vpack.c.bf16 %v1396_v6, %v1395_v5  ;;  %v1365_v14 = vadd.f32 %v735_v7, %v3136_v59  ;;  %v739_v17 = vadd.f32 %v738_v11, %v3130_v52 }
 0x1c9   : > { %v900_v18 = vmul.f32 0.1, %v884_v9  ;;  %v885_v19 = vadd.f32 %v737_v10, %v3139_v62  ;;  %2136 = vmatprep.mubr.bf16.mxu0 %v928_v12 }
 0x1ca   : > { %v1381_v20 = vmul.f32 0.1, %v1365_v14  ;;  %v1366_v21 = vadd.f32 %v739_v17, %v3143_v1 }
 0x1cb   : > { %v901_v22 = vmul.f32 0.1, %v885_v19  ;;  %v916_v25 = vmax.f32 %v884_v9, %v900_v18 }
 0x1cc   : > { %v1382_v23 = vmul.f32 0.1, %v1366_v21  ;;  %v742_v24 = vpop.f32.mrb[16].mxu1  ;;  %v1397_v30 = vmax.f32 %v1365_v14, %v1381_v20 }
 0x1cd   : > { %v917_v27 = vmax.f32 %v885_v19, %v901_v22  ;;  %v743_v28 = vadd.f32 %v742_v24, %v3127_v51  ;;  %v744_v29 = vpop.f32.mrb[17].mxu1 }
 0x1ce   : > { %v1398_v31 = vmax.f32 %v1366_v21, %v1382_v23  ;;  %v745_v32 = vadd.f32 %v744_v29, %v3130_v52  ;;  %v746_v33 = vpop.f32.mrb[18].mxu1 }
 0x1cf   : > { %v886_v34 = vadd.f32 %v743_v28, %v3133_v56  ;;  %v747_v35 = vadd.f32 %v746_v33, %v3127_v51  ;;  %v748_v36 = vpop.f32.mrb[19].mxu1  ;;  %v929_v37 = vpack.c.bf16 %v917_v27, %v916_v25 }
 0x1d0   : > { %v3182_v39 = vpack.c.bf16 %v1398_v31, %v1397_v30  ;;  %v1367_v40 = vadd.f32 %v745_v32, %v3136_v59  ;;  %v749_v41 = vadd.f32 %v748_v36, %v3130_v52 }
 0x1d1   : > { %v902_v42 = vmul.f32 0.1, %v886_v34  ;;  %v887_v43 = vadd.f32 %v747_v35, %v3139_v62  ;;  %2137 = vmatmul.mubr.bf16.gmra.mrb[24].mxu0 %v929_v37 }
 0x1d2   : > { %v1383_v44 = vmul.f32 0.1, %v1367_v40  ;;  %v1368_v45 = vadd.f32 %v749_v41, %v3143_v1 }
 0x1d3   : > { %v903_v46 = vmul.f32 0.1, %v887_v43  ;;  %v918_v54 = vmax.f32 %v886_v34, %v902_v42 }
 0x1d4   : > { %v1384_v50 = vmul.f32 0.1, %v1368_v45  ;;  %v752_v53 = vpop.f32.mrb[20].mxu1  ;;  %v1399_v60 = vmax.f32 %v1367_v40, %v1383_v44 }
 0x1d5   : > { %v919_v55 = vmax.f32 %v887_v43, %v903_v46  ;;  %v753_v57 = vadd.f32 %v752_v53, %v3127_v51  ;;  %v754_v58 = vpop.f32.mrb[21].mxu1 }
 0x1d6   : > { %v1400_v61 = vmax.f32 %v1368_v45, %v1384_v50  ;;  %v755_v63 = vadd.f32 %v754_v58, %v3130_v52  ;;  %v756_v0 = vpop.f32.mrb[22].mxu1 }
 0x1d7   : > { %v888_v2 = vadd.f32 %v753_v57, %v3133_v56  ;;  %v757_v3 = vadd.f32 %v756_v0, %v3127_v51  ;;  %v758_v4 = vpop.f32.mrb[23].mxu1  ;;  %v930_v5 = vpack.c.bf16 %v919_v55, %v918_v54 }
 0x1d8   : > { %v1411_v6 = vpack.c.bf16 %v1400_v61, %v1399_v60  ;;  %v1369_v7 = vadd.f32 %v755_v63, %v3136_v59  ;;  %v759_v8 = vadd.f32 %v758_v4, %v3130_v52 }
 0x1d9   : > { %v904_v9 = vmul.f32 0.1, %v888_v2  ;;  %v889_v10 = vadd.f32 %v757_v3, %v3139_v62  ;;  %2140 = vmatprep.mubr.bf16.mxu0 %v930_v5 }
 0x1da   : > { %v1415_v11 = vmax.bf16 %v1411_v6, %v3154_v26  ;;  %v1385_v12 = vmul.f32 0.1, %v1369_v7  ;;  %v1370_v14 = vadd.f32 %v759_v8, %v3143_v1 }
 0x1db   : > { %v905_v17 = vmul.f32 0.1, %v889_v10  ;;  %v920_v20 = vmax.f32 %v888_v2, %v904_v9 }
 0x1dc   : > { %v1386_v18 = vmul.f32 0.1, %v1370_v14  ;;  %v762_v19 = vpop.f32.mrb[24].mxu1  ;;  %v1401_v24 = vmax.f32 %v1369_v7, %v1385_v12 }
 0x1dd   : > { %v921_v21 = vmax.f32 %v889_v10, %v905_v17  ;;  %v763_v22 = vadd.f32 %v762_v19, %v3127_v51  ;;  %v764_v23 = vpop.f32.mrb[25].mxu1 }
 0x1de   : > { %v1402_v25 = vmax.f32 %v1370_v14, %v1386_v18  ;;  %v765_v27 = vadd.f32 %v764_v23, %v3130_v52  ;;  %v766_v28 = vpop.f32.mrb[26].mxu1 }
 0x1df   : > { %v890_v29 = vadd.f32 %v763_v22, %v3133_v56  ;;  %v767_v26 = vadd.f32 %v766_v28, %v3127_v51  ;;  %v768_v30 = vpop.f32.mrb[27].mxu1  ;;  %v931_v31 = vpack.c.bf16 %v921_v21, %v920_v20 }
 0x1e0   : > { %v1412_v32 = vpack.c.bf16 %v1402_v25, %v1401_v24  ;;  %v1371_v33 = vadd.f32 %v765_v27, %v3136_v59  ;;  %v769_v34 = vadd.f32 %v768_v30, %v3130_v52 }
 0x1e1   : > { %v906_v35 = vmul.f32 0.1, %v890_v29  ;;  %v891_v36 = vadd.f32 %v767_v26, %v3139_v62  ;;  %2141 = vmatmul.mubr.bf16.gmra.mrb[28].mxu0 %v931_v31 }
 0x1e2   : > { %v1416_v37 = vmax.bf16 %v1412_v32, %v3162_v48  ;;  %v1387_v40 = vmul.f32 0.1, %v1371_v33  ;;  %v1372_v41 = vadd.f32 %v769_v34, %v3143_v1 }
 0x1e3   : > { %v907_v42 = vmul.f32 0.1, %v891_v36  ;;  %v922_v46 = vmax.f32 %v890_v29, %v906_v35 }
 0x1e4   : > { %v1419_v43 = vmax.bf16 %v1416_v37, %v1415_v11  ;;  %v1388_v44 = vmul.f32 0.1, %v1372_v41  ;;  %v772_v45 = vpop.f32.mrb[28].mxu1  ;;  %v1403_v55 = vmax.f32 %v1371_v33, %v1387_v40 }
 0x1e5   : > { %v923_v50 = vmax.f32 %v891_v36, %v907_v42  ;;  %v773_v53 = vadd.f32 %v772_v45, %v3127_v51  ;;  %v774_v54 = vpop.f32.mrb[29].mxu1 }
 0x1e6   : > { %v1404_v57 = vmax.f32 %v1372_v41, %v1388_v44  ;;  %v775_v58 = vadd.f32 %v774_v54, %v3130_v52  ;;  %v776_v60 = vpop.f32.mrb[30].mxu1 }
 0x1e7   : > { %v892_v61 = vadd.f32 %v773_v53, %v3133_v56  ;;  %v777_v48 = vadd.f32 %v776_v60, %v3127_v51  ;;  %v778_v63 = vpop.f32.mrb[31].mxu1  ;;  %v932_v0 = vpack.c.bf16 %v923_v50, %v922_v46 }
 0x1e8   : > { %v1413_v2 = vpack.c.bf16 %v1404_v57, %v1403_v55  ;;  %v1373_v3 = vadd.f32 %v775_v58, %v3136_v59  ;;  %v779_v4 = vadd.f32 %v778_v63, %v3130_v52 }
 0x1e9   : > { %v908_v5 = vmul.f32 0.1, %v892_v61  ;;  %v893_v6 = vadd.f32 %v777_v48, %v3139_v62  ;;  %2144 = vmatprep.mubr.bf16.mxu0 %v932_v0  ;;  %v2388_v62 = vld [vmem:[%s3344_s5] sm:$0xff]  }
 0x1ea   : > { %v1417_v7 = vmax.bf16 %v1413_v2, %v3172_v13  ;;  %v1389_v8 = vmul.f32 0.1, %v1373_v3  ;;  %v1374_v9 = vadd.f32 %v779_v4, %v3143_v1  ;;  %2148 = vmatprep.subr.bf16.mxu0 %v2388_v62  ;;  %v2389_v1 = vld [vmem:[%s3344_s5 + $0x8] sm:$0xff]   ;;  %v3227_v13 = vld [vmem:[%s3346_s7] ss:$0 sm:$0xff] }
 0x1eb   : > { %v909_v10 = vmul.f32 0.1, %v893_v6  ;;  %v924_v11 = vmax.f32 %v892_v61, %v908_v5  ;;  %2149 = vmatpush3.bf16.msra.mxu0 %v2388_v62 }
 0x1ec   : > { %v1390_v56 = vmul.f32 0.1, %v1374_v9  ;;  %v1405_v12 = vmax.f32 %v1373_v3, %v1389_v8  ;;  %2150 = vmatprep.subr.bf16.mxu0 %v2389_v1 }
 0x1ed   : > { %v925_v51 = vmax.f32 %v893_v6, %v909_v10 }
 0x1ee   : > { %v1406_v14 = vmax.f32 %v1374_v9, %v1390_v56 }
 0x1ef   : > { %v933_v17 = vpack.c.bf16 %v925_v51, %v924_v11  ;;  %2151 = vmatpush3.bf16.msra.mxu0 %v2389_v1 }
 0x1f0   : > { %v1414_v18 = vpack.c.bf16 %v1406_v14, %v1405_v12 }
 0x1f1   : > { %2145 = vmatmul.mubr.bf16.gmra.mrb[32].mxu0 %v933_v17 }
 0x1f2   : > { %v1418_v52 = vmax.bf16 %v1414_v18, %v3182_v39 }
 0x1f4   : > { %v1420_v59 = vmax.bf16 %v1418_v52, %v1417_v7 }
 0x1f6   : > { %v1421_v19 = vmax.bf16 %v1420_v59, %v1419_v43 }
 0x1f8   : > { %2185 = vmatmul.mubr.bf16.vlgmr.msra.gmra.mrb[32].mxu1 %v1421_v19 }
 0x1f9   : > { %2204 = vmatprep.mubr.msk.bf16.mxu1 %vm2731_vm4, %v2730_v38 }
 0x294   : > { %v2134_v39 = vpop.f32.mrb[20].mxu0 }
 0x295   : > { %v1048_v20 = vadd.f32 %v2134_v39, %v3227_v13  ;;  %v1039_v21 = vpop.f32.mrb[21].mxu0 }
 0x296   : > { %v1040_v22 = vadd.f32 %v3227_v13, %v1039_v21  ;;  %v2135_v23 = vpop.f32.mrb[22].mxu0 }
 0x297   : > { %v1993_v24 = vmul.f32 -1.442695, %v1048_v20  ;;  %v1051_v25 = vadd.f32 %v2135_v23, %v3227_v13  ;;  %v1042_v27 = vpop.f32.mrb[23].mxu0 }
 0x298   : > { %v1991_v28 = vmul.f32 -1.442695, %v1040_v22  ;;  %v1043_v29 = vadd.f32 %v3227_v13, %v1042_v27 }
 0x299   : > { %2398 = vpow2.f32 %v1993_v24  ;;  %v1994_v26 = vmul.f32 -1.442695, %v1051_v25 }
 0x29a   : > { %2400 = vpow2.f32 %v1991_v28  ;;  %v1992_v30 = vmul.f32 -1.442695, %v1043_v29 }
 0x29b   : > { %2402 = vpow2.f32 %v1994_v26 }
 0x29c   : > { %2404 = vpow2.f32 %v1992_v30 }
 0x2a3   : > { %v2399_v31 = vpop.eup %2398 }
 0x2a4   : > { %v2401_v32 = vpop.eup %2400  ;;  %v1152_v33 = vadd.f32 1.0, %v2399_v31  ;;  %v2138_v34 = vpop.f32.mrb[24].mxu0 }
 0x2a5   : > { %v2403_v35 = vpop.eup %2402  ;;  %v1150_v36 = vadd.f32 1.0, %v2401_v32  ;;  %v1064_v37 = vadd.f32 %v2138_v34, %v3227_v13  ;;  %v1055_v40 = vpop.f32.mrb[25].mxu0 }
 0x2a6   : > { %v2405_v41 = vpop.eup %2404  ;;  %2406 = vrcp.f32 %v1152_v33  ;;  %v1153_v42 = vadd.f32 1.0, %v2403_v35  ;;  %v1056_v43 = vadd.f32 %v3227_v13, %v1055_v40  ;;  %v2139_v44 = vpop.f32.mrb[26].mxu0 }
 0x2a7   : > { %2408 = vrcp.f32 %v1150_v36  ;;  %v1151_v45 = vadd.f32 1.0, %v2405_v41  ;;  %v1997_v46 = vmul.f32 -1.442695, %v1064_v37  ;;  %v1067_v50 = vadd.f32 %v2139_v44, %v3227_v13  ;;  %v1058_v53 = vpop.f32.mrb[27].mxu0 }
 0x2a8   : > { %2410 = vrcp.f32 %v1153_v42  ;;  %v1995_v54 = vmul.f32 -1.442695, %v1056_v43  ;;  %v1059_v55 = vadd.f32 %v3227_v13, %v1058_v53 }
 0x2a9   : > { %2412 = vrcp.f32 %v1151_v45  ;;  %v1998_v57 = vmul.f32 -1.442695, %v1067_v50 }
 0x2aa   : > { %2414 = vpow2.f32 %v1997_v46  ;;  %v1996_v58 = vmul.f32 -1.442695, %v1059_v55 }
 0x2ab   : > { %2416 = vpow2.f32 %v1995_v54 }
 0x2ac   : > { %2418 = vpow2.f32 %v1998_v57 }
 0x2ad   : > { %2420 = vpow2.f32 %v1996_v58 }
 0x2b0   : > { %v2407_v60 = vpop.eup %2406 }
 0x2b1   : > { %v2409_v61 = vpop.eup %2408  ;;  %v1200_v0 = vmul.f32 %v2407_v60, %v3070_v15 }
 0x2b2   : > { %v2411_v48 = vpop.eup %2410  ;;  %v1198_v5 = vmul.f32 %v2409_v61, %v3070_v15 }
 0x2b3   : > { %v2413_v63 = vpop.eup %2412  ;;  %v1201_v2 = vmul.f32 %v2411_v48, %v3073_v16 }
 0x2b4   : > { %v2415_v3 = vpop.eup %2414  ;;  %v2142_v4 = vpop.f32.mrb[28].mxu0  ;;  %v1199_v6 = vmul.f32 %v2413_v63, %v3073_v16 }
 0x2b5   : > { %v2417_v7 = vpop.eup %2416  ;;  %v1156_v8 = vadd.f32 1.0, %v2415_v3  ;;  %v1080_v9 = vadd.f32 %v2142_v4, %v3227_v13  ;;  %v1071_v10 = vpop.f32.mrb[29].mxu0  ;;  %v1215_v56 = vpack.c.bf16 %v1201_v2, %v1200_v0  ;;  %v3262_v4 = vld [vmem:[%s3049_s14] sm:$0xff] }
 0x2b6   : > { %v2419_v11 = vpop.eup %2418  ;;  %v1154_v51 = vadd.f32 1.0, %v2417_v7  ;;  %v1072_v12 = vadd.f32 %v3227_v13, %v1071_v10  ;;  %v2143_v14 = vpop.f32.mrb[30].mxu0  ;;  %v1214_v17 = vpack.c.bf16 %v1199_v6, %v1198_v5  ;;  %v3266_v6 = vld [vmem:[%s3049_s14 + $0x8] sm:$0xff] }
 0x2b7   : > { %v2421_v18 = vpop.eup %2420  ;;  %2422 = vrcp.f32 %v1156_v8  ;;  %v1157_v52 = vadd.f32 1.0, %v2419_v11  ;;  %v2001_v59 = vmul.f32 -1.442695, %v1080_v9  ;;  %v1083_v19 = vadd.f32 %v2143_v14, %v3227_v13  ;;  %v1074_v62 = vpop.f32.mrb[31].mxu0 }
 0x2b8   : > { %2424 = vrcp.f32 %v1154_v51  ;;  %v1155_v1 = vadd.f32 1.0, %v2421_v18  ;;  %v1999_v39 = vmul.f32 -1.442695, %v1072_v12  ;;  %v1075_v20 = vadd.f32 %v3227_v13, %v1074_v62  ;;  %2152 = vmatprep.mubr.msk.bf16.mxu0 %vm496_vm3, %v1214_v17 }
 0x2b9   : > { %2426 = vrcp.f32 %v1157_v52  ;;  %v2002_v21 = vmul.f32 -1.442695, %v1083_v19  ;;  %2153 = vmatmul.mubr.msk.bf16.vlgmr.msra.gmra.mrb[4].mxu0 %vm496_vm3, %v1215_v56 }
 0x2ba   : > { %2428 = vrcp.f32 %v1155_v1  ;;  %v2000_v22 = vmul.f32 -1.442695, %v1075_v20 }
 0x2bb   : > { %2430 = vpow2.f32 %v2001_v59 }
 0x2bc   : > { %2432 = vpow2.f32 %v1999_v39 }
 0x2bd   : > { %2434 = vpow2.f32 %v2002_v21 }
 0x2be   : > { %2436 = vpow2.f32 %v2000_v22 }
 0x2c1   : > { %v2423_v23 = vpop.eup %2422 }
 0x2c2   : > { %v2425_v24 = vpop.eup %2424  ;;  %v1204_v29 = vmul.f32 %v2423_v23, %v3070_v15 }
 0x2c3   : > { %v2427_v25 = vpop.eup %2426  ;;  %v1202_v33 = vmul.f32 %v2425_v24, %v3070_v15 }
 0x2c4   : > { %v2429_v27 = vpop.eup %2428  ;;  %v2146_v28 = vpop.f32.mrb[32].mxu0  ;;  %v1205_v26 = vmul.f32 %v2427_v25, %v3073_v16 }
 0x2c5   : > { %v2431_v30 = vpop.eup %2430  ;;  %v1096_v31 = vadd.f32 %v2146_v28, %v3227_v13  ;;  %v1087_v32 = vpop.f32.mrb[33].mxu0  ;;  %v1203_v34 = vmul.f32 %v2429_v27, %v3073_v16  ;;  %v2390_v27 = vld [vmem:[#allocation10 + $0x8] ss:$12 sps:$4 sm:$0xff]   ;;  %v2391_v28 = vld [vmem:[#allocation10 + $0x20] ss:$12 sps:$4 sm:$0xff]  }
 0x2c6   : > { %v2433_v35 = vpop.eup %2432  ;;  %v1160_v36 = vadd.f32 1.0, %v2431_v30  ;;  %v1088_v37 = vadd.f32 %v3227_v13, %v1087_v32  ;;  %v2147_v40 = vpop.f32.mrb[34].mxu0  ;;  %v1217_v41 = vpack.c.bf16 %v1205_v26, %v1204_v29  ;;  %2189 = vmatpush3.bf16.msra.mxu1 %v2390_v27  ;;  %v2392_v29 = vld [vmem:[#allocation10 + $0x38] ss:$12 sps:$4 sm:$0xff]   ;;  %v2393_v26 = vld [vmem:[#allocation10 + $0x50] ss:$12 sps:$4 sm:$0xff]  }
 0x2c7   : > { %v2435_v42 = vpop.eup %2434  ;;  %v1158_v43 = vadd.f32 1.0, %v2433_v35  ;;  %v1099_v44 = vadd.f32 %v2147_v40, %v3227_v13  ;;  %v1090_v45 = vpop.f32.mrb[35].mxu0  ;;  %v1216_v46 = vpack.c.bf16 %v1203_v34, %v1202_v33  ;;  %v2005_v54 = vmul.f32 -1.442695, %v1096_v31  ;;  %2190 = vmatprep.subr.bf16.mxu1 %v2730_v38  ;;  %v2394_v30 = vld [vmem:[#allocation10 + $0x68] ss:$12 sps:$4 sm:$0xff]  }
 0x2c8   : > { %v2437_v50 = vpop.eup %2436  ;;  %2438 = vrcp.f32 %v1160_v36  ;;  %v1161_v53 = vadd.f32 1.0, %v2435_v42  ;;  %v1091_v15 = vadd.f32 %v3227_v13, %v1090_v45  ;;  %v2003_v55 = vmul.f32 -1.442695, %v1088_v37  ;;  %v2395_v31 = vld [vmem:[#allocation10 + $0x80] ss:$12 sps:$4 sm:$0xff]  }
 0x2c9   : > { %2440 = vrcp.f32 %v1158_v43  ;;  %v1159_v16 = vadd.f32 1.0, %v2437_v50  ;;  %2156 = vmatprep.mubr.msk.bf16.mxu0 %vm496_vm3, %v1216_v46  ;;  %v2006_v57 = vmul.f32 -1.442695, %v1099_v44  ;;  %v2396_v32 = vld [vmem:[#allocation10 + $0x98] ss:$12 sps:$4 sm:$0xff]   ;;  %v561_v34 = vsub.s32 2, %v3120_v47 }
 0x2ca   : > { %2442 = vrcp.f32 %v1161_v53  ;;  %2157 = vmatmul.mubr.msk.bf16.gmra.mrb[8].mxu0 %vm496_vm3, %v1217_v41  ;;  %v2004_v58 = vmul.f32 -1.442695, %v1091_v15  ;;  %2191 = vmatpush3.bf16.msra.mxu1 %v2391_v28  ;;  %v2397_v33 = vld [vmem:[#allocation10 + $0xb0] ss:$12 sps:$4 sm:$0xff]  }
 0x2cb   : > { %2444 = vrcp.f32 %v1159_v16  ;;  %v3257_v60 = vpop.f32.mrb[32].mxu1  ;;  %2192 = vmatprep.subr.bf16.mxu1 %v2730_v38  ;;  %v3288_v35 = vrot.slane %v3123_v49, %v561_v34 }
 0x2cc   : > { %2446 = vpow2.f32 %v2005_v54  ;;  %v2186_v61 = vpop.f32.mrb[33].mxu1 }
 0x2cd   : > { %2448 = vpow2.f32 %v2003_v55  ;;  %v3259_v48 = vpop.f32.mrb[34].mxu1 }
 0x2ce   : > { %2450 = vpow2.f32 %v2006_v57  ;;  %v2187_v13 = vpop.f32.mrb[35].mxu1  ;;  %2193 = vmatpush3.bf16.msra.mxu1 %v2392_v29 }
 0x2cf   : > { %2452 = vpow2.f32 %v2004_v58  ;;  %2194 = vmatprep.subr.bf16.mxu1 %v2730_v38 }
 0x2d2   : > { %v2439_v63 = vpop.eup %2438  ;;  %2195 = vmatpush3.bf16.msra.mxu1 %v2393_v26 }
 0x2d3   : > { %v2441_v0 = vpop.eup %2440  ;;  %v1208_v5 = vmul.f32 %v3262_v4, %v2439_v63  ;;  %2196 = vmatprep.subr.bf16.mxu1 %v2730_v38 }
 0x2d4   : > { %v2443_v2 = vpop.eup %2442  ;;  %v1206_v9 = vmul.f32 %v3262_v4, %v2441_v0 }
 0x2d5   : > { %v2445_v3 = vpop.eup %2444  ;;  %v1209_v7 = vmul.f32 %v3266_v6, %v2443_v2 }
 0x2d6   : > { %v2447_v8 = vpop.eup %2446  ;;  %v1207_v10 = vmul.f32 %v3266_v6, %v2445_v3  ;;  %2197 = vmatpush3.bf16.msra.mxu1 %v2394_v30 }
 0x2d7   : > { %v2449_v56 = vpop.eup %2448  ;;  %v1164_v11 = vadd.f32 1.0, %v2447_v8  ;;  %v1219_v51 = vpack.c.bf16 %v1209_v7, %v1208_v5  ;;  %2198 = vmatprep.subr.bf16.mxu1 %v2730_v38 }
 0x2d8   : > { %v2451_v12 = vpop.eup %2450  ;;  %v1162_v14 = vadd.f32 1.0, %v2449_v56  ;;  %v1218_v17 = vpack.c.bf16 %v1207_v10, %v1206_v9 }
 0x2d9   : > { %v2453_v18 = vpop.eup %2452  ;;  %2454 = vrcp.f32 %v1164_v11  ;;  %v1165_v52 = vadd.f32 1.0, %v2451_v12 }
 0x2da   : > { %2456 = vrcp.f32 %v1162_v14  ;;  %v1163_v59 = vadd.f32 1.0, %v2453_v18  ;;  %2160 = vmatprep.mubr.msk.bf16.mxu0 %vm496_vm3, %v1218_v17  ;;  %2199 = vmatpush3.bf16.msra.mxu1 %v2395_v31 }
 0x2db   : > { %2458 = vrcp.f32 %v1165_v52  ;;  %2161 = vmatmul.mubr.msk.bf16.gmra.mrb[12].mxu0 %vm496_vm3, %v1219_v51  ;;  %2200 = vmatprep.subr.bf16.mxu1 %v2730_v38 }
 0x2dc   : > { %2460 = vrcp.f32 %v1163_v59 }
 0x2de   : > { %2201 = vmatpush3.bf16.msra.mxu1 %v2396_v32 }
 0x2df   : > { %2202 = vmatprep.subr.bf16.mxu1 %v2730_v38 }
 0x2e2   : > { %2203 = vmatpush3.bf16.msra.mxu1 %v2397_v33 }
 0x2e3   : > { %v2455_v19 = vpop.eup %2454 }
 0x2e4   : > { %v2457_v62 = vpop.eup %2456  ;;  %v1212_v20 = vmul.f32 %v3262_v4, %v2455_v19 }
 0x2e5   : > { %v2459_v1 = vpop.eup %2458  ;;  %v1210_v22 = vmul.f32 %v3262_v4, %v2457_v62 }
 0x2e6   : > { %v2461_v39 = vpop.eup %2460  ;;  %v1213_v21 = vmul.f32 %v3266_v6, %v2459_v1 }
 0x2e7   : > { %v1211_v23 = vmul.f32 %v3266_v6, %v2461_v39 }
 0x2e8   : > { %v1221_v24 = vpack.c.bf16 %v1213_v21, %v1212_v20 }
 0x2e9   : > { %v1220_v25 = vpack.c.bf16 %v1211_v23, %v1210_v22 }
 0x2eb   : > { %2164 = vmatprep.mubr.msk.bf16.mxu0 %vm496_vm3, %v1220_v25 }
 0x2ec   : > { %2165 = vmatmul.mubr.msk.bf16.gmra.mrb[16].mxu0 %vm496_vm3, %v1221_v24 }
 0x38c   : > { %v2154_v36 = vpop.f32.mrb[4].mxu0 }
 0x38d   : > { %v2208_v37 = vadd.f32 %v2154_v36, %v3288_v35  ;;  %v1296_v40 = vpop.f32.mrb[5].mxu0 }
 0x38e   : > { %v2209_v41 = vadd.f32 %v1296_v40, %v3288_v35  ;;  %v2155_v42 = vpop.f32.mrb[6].mxu0 }
 0x38f   : > { %v1564_v43 = vmul.f32 0.1, %v2208_v37  ;;  %v2210_v44 = vadd.f32 %v2155_v42, %v3288_v35  ;;  %v1299_v45 = vpop.f32.mrb[7].mxu0 }
 0x390   : > { %v1562_v46 = vmul.f32 0.1, %v2209_v41  ;;  %v2211_v38 = vadd.f32 %v1299_v45, %v3288_v35 }
 0x391   : > { %v1565_v50 = vmul.f32 0.1, %v2210_v44  ;;  %v1580_v47 = vmax.f32 %v2208_v37, %v1564_v43 }
 0x392   : > { %v1563_v53 = vmul.f32 0.1, %v2211_v38  ;;  %v1578_v49 = vmax.f32 %v2209_v41, %v1562_v46 }
 0x393   : > { %v1581_v54 = vmax.f32 %v2210_v44, %v1565_v50 }
 0x394   : > { %v1579_v15 = vmax.f32 %v2211_v38, %v1563_v53 }
 0x395   : > { %v1595_v16 = vpack.c.bf16 %v1581_v54, %v1580_v47 }
 0x396   : > { %v1594_v55 = vpack.c.bf16 %v1579_v15, %v1578_v49 }
 0x39d   : > { %v2158_v57 = vpop.f32.mrb[8].mxu0 }
 0x39e   : > { %v2212_v58 = vadd.f32 %v2158_v57, %v3288_v35  ;;  %v1312_v61 = vpop.f32.mrb[9].mxu0 }
 0x39f   : > { %v2213_v13 = vadd.f32 %v1312_v61, %v3288_v35  ;;  %v2159_v63 = vpop.f32.mrb[10].mxu0  ;;  %v2017_v61 = vld [vmem:[%s3346_s7 + $0x1] ss:$0 sm:$0xff] }
 0x3a0   : > { %v1568_v0 = vmul.f32 0.1, %v2212_v58  ;;  %v2214_v2 = vadd.f32 %v2159_v63, %v3288_v35  ;;  %v1315_v3 = vpop.f32.mrb[11].mxu0 }
 0x3a1   : > { %v1566_v5 = vmul.f32 0.1, %v2213_v13  ;;  %v2215_v7 = vadd.f32 %v1315_v3, %v3288_v35 }
 0x3a2   : > { %v1569_v8 = vmul.f32 0.1, %v2214_v2  ;;  %v1584_v10 = vmax.f32 %v2212_v58, %v1568_v0 }
 0x3a3   : > { %v1567_v9 = vmul.f32 0.1, %v2215_v7  ;;  %v1582_v11 = vmax.f32 %v2213_v13, %v1566_v5  ;;  %v1528_v13 = vadd.f32 %v2017_v61, %v3257_v60 }
 0x3a4   : > { %v1585_v56 = vmax.f32 %v2214_v2, %v1569_v8  ;;  %v2028_v8 = vld [vmem:[%s3346_s7 + $0x2] ss:$0 sm:$0xff] }
 0x3a5   : > { %v1583_v51 = vmax.f32 %v2215_v7, %v1567_v9  ;;  %v2026_v63 = vmul.f32 -1.442695, %v1528_v13 }
 0x3a6   : > { %v1597_v12 = vpack.c.bf16 %v1585_v56, %v1584_v10 }
 0x3a7   : > { %v1596_v14 = vpack.c.bf16 %v1583_v51, %v1582_v11  ;;  %2462 = vpow2.f32 %v2026_v63 }
 0x3ae   : > { %v2162_v17 = vpop.f32.mrb[12].mxu0 }
 0x3af   : > { %v2216_v18 = vadd.f32 %v2162_v17, %v3288_v35  ;;  %v1328_v52 = vpop.f32.mrb[13].mxu0 }
 0x3b0   : > { %v2217_v59 = vadd.f32 %v1328_v52, %v3288_v35  ;;  %v2163_v19 = vpop.f32.mrb[14].mxu0 }
 0x3b1   : > { %v1572_v62 = vmul.f32 0.1, %v2216_v18  ;;  %v2218_v1 = vadd.f32 %v2163_v19, %v3288_v35  ;;  %v1331_v39 = vpop.f32.mrb[15].mxu0  ;;  %v2463_v2 = vpop.eup %2462 }
 0x3b2   : > { %v1570_v20 = vmul.f32 0.1, %v2217_v59  ;;  %v2219_v21 = vadd.f32 %v1331_v39, %v3288_v35  ;;  %v1540_v5 = vadd.f32 1.0, %v2463_v2 }
 0x3b3   : > { %v1573_v22 = vmul.f32 0.1, %v2218_v1  ;;  %v1588_v24 = vmax.f32 %v2216_v18, %v1572_v62 }
 0x3b4   : > { %v1571_v23 = vmul.f32 0.1, %v2219_v21  ;;  %v1586_v27 = vmax.f32 %v2217_v59, %v1570_v20 }
 0x3b5   : > { %v1589_v25 = vmax.f32 %v2218_v1, %v1573_v22 }
 0x3b6   : > { %v1587_v28 = vmax.f32 %v2219_v21, %v1571_v23 }
 0x3b7   : > { %v1599_v29 = vpack.c.bf16 %v1589_v25, %v1588_v24 }
 0x3b8   : > { %v1598_v26 = vpack.c.bf16 %v1587_v28, %v1586_v27 }
 0x3b9   : > { %v1603_v30 = vmax.bf16 %v1599_v29, %v1595_v16 }
 0x3ba   : > { %v1602_v31 = vmax.bf16 %v1598_v26, %v1594_v55 }
 0x3bc   : > { %v1606_v32 = vmax.bf16 %v1603_v30, %v1602_v31 }
 0x3bf   : > { %v2166_v33 = vpop.f32.mrb[16].mxu0 }
 0x3c0   : > { %v2220_v34 = vadd.f32 %v2166_v33, %v3288_v35  ;;  %v1344_v36 = vpop.f32.mrb[17].mxu0 }
 0x3c1   : > { %v2221_v37 = vadd.f32 %v1344_v36, %v3288_v35  ;;  %v2167_v40 = vpop.f32.mrb[18].mxu0 }
 0x3c2   : > { %v1576_v41 = vmul.f32 0.1, %v2220_v34  ;;  %v2222_v42 = vadd.f32 %v2167_v40, %v3288_v35  ;;  %v1347_v43 = vpop.f32.mrb[19].mxu0 }
 0x3c3   : > { %v1574_v44 = vmul.f32 0.1, %v2221_v37  ;;  %v2223_v45 = vadd.f32 %v1347_v43, %v3288_v35  ;;  %v1531_v35 = vadd.f32 %v2017_v61, %v3259_v48 }
 0x3c4   : > { %v1577_v46 = vmul.f32 0.1, %v2222_v42  ;;  %v1592_v50 = vmax.f32 %v2220_v34, %v1576_v41 }
 0x3c5   : > { %v1575_v38 = vmul.f32 0.1, %v2223_v45  ;;  %v1590_v47 = vmax.f32 %v2221_v37, %v1574_v44  ;;  %v2027_v0 = vmul.f32 -1.442695, %v1531_v35 }
 0x3c6   : > { %v1593_v53 = vmax.f32 %v2222_v42, %v1577_v46 }
 0x3c7   : > { %v1591_v54 = vmax.f32 %v2223_v45, %v1575_v38  ;;  %2464 = vpow2.f32 %v2027_v0 }
 0x3c8   : > { %v1601_v49 = vpack.c.bf16 %v1593_v53, %v1592_v50  ;;  %2466 = vrcp.f32 %v1540_v5 }
 0x3c9   : > { %v1600_v15 = vpack.c.bf16 %v1591_v54, %v1590_v47 }
 0x3ca   : > { %v1605_v16 = vmax.bf16 %v1601_v49, %v1597_v12 }
 0x3cb   : > { %v1604_v55 = vmax.bf16 %v1600_v15, %v1596_v14 }
 0x3cd   : > { %v1607_v57 = vmax.bf16 %v1605_v16, %v1604_v55 }
 0x3cf   : > { %v1608_v58 = vmax.bf16 %v1607_v57, %v1606_v32 }
 0x3d1   : > { %2205 = vmatmul.mubr.bf16.vlgmr.msra.gmra.mrb[36].mxu1 %v1608_v58  ;;  %v2465_v3 = vpop.eup %2464 }
 0x3d2   : > { %v1541_v7 = vadd.f32 1.0, %v2465_v3  ;;  %v2467_v51 = vpop.eup %2466 }
 0x3d3   : > { %v1723_v14 = vsub.f32 1.0, %v2467_v51 }
 0x3d4   : > { %2468 = vrcp.f32 %v1541_v7 }
 0x3d5   : > { %v1725_v52 = vmul.f32 %v3262_v4, %v1723_v14 }
 0x3de   : > { %v2469_v12 = vpop.eup %2468 }
 0x3df   : > { %v1724_v17 = vsub.f32 1.0, %v2469_v12 }
 0x3e1   : > { %v1726_v1 = vmul.f32 %v3266_v6, %v1724_v17 }
 0x4a4   : > { %v1714_v9 = vpop.f32.mrb[36].mxu1 }
 0x4a5   : > { %v1715_v10 = vadd.f32 %v2028_v8, %v1714_v9  ;;  %v2206_v56 = vpop.f32.mrb[37].mxu1 }
 0x4a6   : > { %v1717_v60 = vpop.f32.mrb[38].mxu1 }
 0x4a7   : > { %2470 = vtanh.f32 %v1715_v10  ;;  %v1718_v48 = vadd.f32 %v2028_v8, %v1717_v60  ;;  %v2207_v11 = vpop.f32.mrb[39].mxu1 }
 0x4a9   : > { %2472 = vtanh.f32 %v1718_v48 }
 0x4b1   : > { %v2471_v18 = vpop.eup %2470 }
 0x4b2   : > { %v1727_v59 = vmul.f32 %v2471_v18, %v2467_v51 }
 0x4b3   : > { %v2473_v19 = vpop.eup %2472 }
 0x4b4   : > { %v1729_v62 = vadd.f32 %v1727_v59, %v1725_v52  ;;  %v1728_v39 = vmul.f32 %v2473_v19, %v2469_v12 }
 0x4b6   : > { %1731 = vxpose.xlu0.b32.start [1/2] (short) (narrow) %v1729_v62, 32  ;;  %v1730_v20 = vadd.f32 %v1728_v39, %v1726_v1 }
 0x4ba   : > { %1732 = vxpose.xlu0.b32.end [2/2] (short) (narrow) %v1730_v20, 32 }
 0x536   : > { %v1747_v21 = vpop.trf.xlu0 }
 0x537   : > { %1764 = vst.msk [vmem:[%s451_s22] sm:$0xff] %vm1763_vm5, %v1747_v21 }
 0x53a   : > { %v1748_v4 = vpop.trf.xlu0 }
 0x53b   : > { %1765 = vst.msk [vmem:[%s451_s22 + $0x8] sm:$0xff] %vm1763_vm5, %v1748_v4 }
 0x53e   : > { %v1749_v22 = vpop.trf.xlu0 }
 0x53f   : > { %1766 = vst.msk [vmem:[%s451_s22 + $0x10] sm:$0xff] %vm1763_vm5, %v1749_v22 }
 0x542   : > { %v1750_v23 = vpop.trf.xlu0 }
 0x543   : > { %1767 = vst.msk [vmem:[%s451_s22 + $0x18] sm:$0xff] %vm1763_vm5, %v1750_v23 }
 0x544 PF: > { %s26_s10 = sadd.s32 1, %s2714_s10   ;;  %s3383_s24 = smov %s3390_s27 }
 0x545   : > { %p23_p13 = scmp.ge.s32.totalorder %s26_s10, 4   ;;  %s3384_s27 = smov %s2698_s28 }
 0x546   : > { %s3385_s28 = smov %s2702_s29  ;;  %s3386_s29 = smov %s2954_s20 }
 0x547   : > { %s3387_s30 = smov %s2710_s9  ;;  %s3388_s9 = smov %s3383_s24 }
 0x548   :  { %25 = sbr.rel (!%p23_p13) target bundleno = 13 (0xd), region = 121 }
 0x54f   :  { %1795 = vsyncpa [#allocation3], 1 }
 0x550   :  { %1797 = vsyncpa [#allocation3 + $0x1], 1 }
 0x551   :  { %1798 = vsyncpa [#allocation5], 1 }
 0x552   :  { %1800 = vsyncpa [#allocation5 + $0x1], 1 }
 0x553   :  { %1801 = vsyncpa [#allocation8], 1 }
 0x554   :  { %1802 = vsyncpa [#allocation11], 1 }

// kernel: tpu_custom_call.1
= control target key start
LH: loop header
LB: loop body
LE: loop exit
PB: predicated region body
PF: predicated region fallthrough
CT: control target
= control target key end

     0   :  { %s3407_s0 = inlined_call_operand.hbm [shape: bf16[2,8,16,19], index: 0, kind: input, shape index: {}]   ;;  %s3408_s1 = inlined_call_operand.hbm [shape: f32[2,16,32], index: 1, kind: input, shape index: {}]   ;;  %s3409_s2 = inlined_call_operand.hbm [shape: bf16[19,384], index: 2, kind: input, shape index: {}]   ;;  %s3410_s3 = inlined_call_operand.hbm [shape: f32[1,384], index: 3, kind: input, shape index: {}]   ;;  %s3411_s4 = inlined_call_operand.hbm [shape: bf16[32,256], index: 4, kind: input, shape index: {}]   ;;  %s3412_s5 = inlined_call_operand.vmem [shape: bf16[32,128], index: 5, kind: input, shape index: {}]   ;;  %s3413_s6 = inlined_call_operand.hbm [shape: bf16[128,384], index: 6, kind: input, shape index: {}]   ;;  %s3414_s7 = inlined_call_operand.vmem [shape: f32[1,384], index: 7, kind: input, shape index: {}]   ;;  %s3415_s8 = inlined_call_operand.hbm [shape: f32[2,16,32], index: 8, kind: output, shape index: {}]  }
   0x1   :  { %3426 = sst [smem:[#allocation23_spill]] %s3407_s0 }
   0x2   :  { %3427 = sst [smem:[#allocation24_spill]] %s3409_s2 }
   0x3   :  { %3428 = sst [smem:[#allocation25_spill]] %s3410_s3 }
   0x4   :  { %3429 = sst [smem:[#allocation26_spill]] %s3411_s4 }
   0x5   :  { %3430 = sst [smem:[#allocation27_spill]] %s3415_s8 }
   0x6   :  { %13 = vsyncpa [#allocation3], 0 }
   0x7   :  { %15 = vsyncpa [#allocation3 + $0x1], 0 }
   0x8   :  { %16 = vsyncpa [#allocation6], 0 }
   0x9   :  { %18 = vsyncpa [#allocation6 + $0x1], 0 }
   0xa   :  { %19 = vsyncpa [#allocation9], 0 }
   0xb   :  { %20 = vsyncpa [#allocation12], 0 }
   0xc   :  { %21 = vsyncpa [#allocation4], 0 }
   0xd   :  { %23 = vsyncpa [#allocation4 + $0x1], 0  ;;  %s2792_s27 = smov 0   ;;  %s2794_s28 = smov 0  }
   0xe   :  { %s2796_s29 = smov 0   ;;  %s2798_s30 = smov 0  }
   0xf   :  { %s2800_s9 = smov 0   ;;  %s2802_s10 = smov 0  }
  0x10 LB: > { %3431 = sst [smem:[#allocation20_spill]] %s2706_s27  ;;  %s2823_s11 = sadd.s32 4294967295, %s2726_s10   ;;  %s2726_s10 = sphi %s2802_s10, %s29_s10   ;;  %s2722_s9 = sphi %s2800_s9, %s3468_s9   ;;  %s2718_s30 = sphi %s2798_s30, %s3467_s30   ;;  %s2714_s29 = sphi %s2796_s29, %s3466_s29   ;;  %s2710_s28 = sphi %s2794_s28, %s3465_s28   ;;  %s2706_s27 = sphi %s2792_s27, %s3464_s27  }
  0x11   : > { %3432 = sst [smem:[#allocation21_spill]] %s2718_s30  ;;  %s1894_s12 = sadd.s32 4294967294, %s2726_s10  }
  0x12   : > { %p63_p0 = scmp.ne.s32.totalorder %s2710_s28, %s2706_s27  ;;  %p3416_p1 = scmp.eq.s32.totalorder %s2823_s11, 0 }
  0x13   : > { %p249_p3 = scmp.eq.s32.totalorder %s1894_s12, 1  ;;  %p1895_p5 = scmp.ge.s32.totalorder %s2726_s10, 1 }
  0x14   : > { %p2832_p4 = por %p3416_p1, %p63_p0  ;;  %p256_p7 = scmp.lt.s32.totalorder %s2726_s10, 3 }
  0x15   : > { %p2837_p6 = por %p249_p3, %p63_p0  ;;  %s2728_s16 = smov [#allocation7]  }
  0x16   : > { %s3433_s13 = scalar_select %p2832_p4, 1, 0 }
  0x17   : > { %s3434_s14 = scalar_select %p2837_p6, 1, 0 }
  0x18   : > { %p2842_p8 = pnand %p1895_p5, %p256_p7  ;;  %s268_s17 = sshll.u32 %s2728_s16, 4  ;;  %s2846_s17 = int_to_ptr.vmem [resolvable:$true] %s268_s17 }
  0x19   : > { %3435 = sst [smem:[#allocation22_spill]] %s3434_s14  ;;  %s2729_s19 = smov [#allocation8]  }
  0x1a   : > { %s3436_s15 = scalar_select %p2842_p8, 1, 0 }
  0x1b   : > { %p2233_p9 = pneg %p2842_p8  ;;  %s282_s20 = sshll.u32 %s2729_s19, 4  ;;  %s2857_s20 = int_to_ptr.vmem [resolvable:$true] %s282_s20 }
  0x1c   : > { %s2730_s21 = smov [#allocation10]   ;;  %s3438_s2 = sld [smem:[#allocation24_spill]] }
  0x1d   : > { %p2853_p11 = pnand %p2233_p9, %p3416_p1  ;;  %s2859_s22 = sshll.u32 %s2730_s21, 4  ;;  %s293_s22 = int_to_ptr.vmem [resolvable:$true] %s2859_s22 }
  0x1f   : > { %p2869_p13 = pneg %p2853_p11 }
  0x22   : > { %s2456_s25 = scalar_lea.hbm %s3438_s2, 576 }
  0x23   : > { %p2457_p12 = scmp.ne.s32.totalorder %s3438_s2, %s2456_s25  ;;  %p2463_p5 = scmp.lt.u32.totalorder %s2456_s25, %s3438_s2 }
  0x25   : > { %p2459_p0 = pnand %p2869_p13, %p2457_p12 }
  0x27   : > { %p2460_p3 = pneg %p2459_p0 }
  0x29   : > { %p2465_p7 = pnand %p2463_p5, %p2460_p3 }
  0x2b   : > { %2468 = shalt.err (!%p2465_p7)
}
  0x2c   : > { %s2469_s23 = scalar_lea.vmem %s2846_s17, 576  ;;  %p2477_p2 = scmp.lt.s32.totalorder %s2846_s17, %s2846_s17 }
  0x2d   : > { %p2470_p9 = scmp.ne.s32.totalorder %s2846_s17, %s2469_s23  ;;  %p2478_p6 = scmp.lt.s32.totalorder %s2469_s23, %s2469_s23 }
  0x2f   : > { %p2472_p10 = pnand %p2470_p9, %p2869_p13  ;;  %p2479_p12 = por %p2478_p6, %p2477_p2 }
  0x31   : > { %p2473_p1 = pneg %p2472_p10 }
  0x33   : > { %p2480_p0 = pnand %p2479_p12, %p2473_p1 }
  0x35   : > { %2483 = shalt.err (!%p2480_p0)
}
  0x36   : > { %s3422_s24 = smov 192   ;;  %s3423_s25 = smov 12  }
  0x37   : > { %2236 = dma.hbm_to_vmem [thread:$0]  (!%p2853_p11), %s3438_s2, 576, %s2846_s17, [#allocation6], %s3422_s24, %s3422_s24, %s3423_s25  }
  0x38   : > { %s3440_s3 = sld [smem:[#allocation25_spill]] }
  0x3e   : > { %s2484_s23 = scalar_lea.hbm %s3440_s3, 48 }
  0x3f   : > { %p2485_p1 = scmp.ne.s32.totalorder %s3440_s3, %s2484_s23  ;;  %p2491_p10 = scmp.lt.u32.totalorder %s2484_s23, %s3440_s3 }
  0x41   : > { %p2487_p2 = pnand %p2485_p1, %p2869_p13 }
  0x43   : > { %p2488_p6 = pneg %p2487_p2 }
  0x45   : > { %p2493_p3 = pnand %p2491_p10, %p2488_p6 }
  0x47   : > { %2496 = shalt.err (!%p2493_p3)
}
  0x48   : > { %s2497_s17 = scalar_lea.vmem %s2857_s20, 48  ;;  %s2504_s27 = scalar_lea.vmem %s2857_s20, 64 }
  0x49   : > { %p2498_p5 = scmp.ne.s32.totalorder %s2857_s20, %s2497_s17  ;;  %p2505_p12 = scmp.lt.s32.totalorder %s2857_s20, %s2857_s20 }
  0x4a   : > { %p2506_p0 = scmp.lt.s32.totalorder %s2504_s27, %s2497_s17 }
  0x4b   : > { %p2500_p7 = pnand %p2498_p5, %p2869_p13 }
  0x4c   : > { %p2507_p1 = por %p2506_p0, %p2505_p12 }
  0x4d   : > { %p2501_p9 = pneg %p2500_p7 }
  0x4f   : > { %p2508_p2 = pnand %p2507_p1, %p2501_p9 }
  0x51   : > { %2511 = shalt.err (!%p2508_p2)
}
  0x52   : > { %2239 = dma.hbm_to_vmem [thread:$0]  (!%p2853_p11), %s3440_s3, 48, %s2857_s20, [#allocation9]  }
  0x53   : > { %s3441_s4 = sld [smem:[#allocation26_spill]] }
  0x59   : > { %s2512_s12 = scalar_lea.hbm %s3441_s4, 512 }
  0x5a   : > { %p2513_p6 = scmp.ne.s32.totalorder %s3441_s4, %s2512_s12  ;;  %p2519_p5 = scmp.lt.u32.totalorder %s2512_s12, %s3441_s4 }
  0x5c   : > { %p2515_p10 = pnand %p2513_p6, %p2869_p13 }
  0x5e   : > { %p2516_p3 = pneg %p2515_p10 }
  0x60   : > { %p2521_p7 = pnand %p2519_p5, %p2516_p3 }
  0x62   : > { %2524 = shalt.err (!%p2521_p7)
}
  0x63   : > { %s2525_s27 = scalar_lea.vmem %s293_s22, 512  ;;  %p2533_p1 = scmp.lt.s32.totalorder %s293_s22, %s293_s22 }
  0x64   : > { %p2526_p9 = scmp.ne.s32.totalorder %s293_s22, %s2525_s27  ;;  %p2534_p2 = scmp.lt.s32.totalorder %s2525_s27, %s2525_s27 }
  0x66   : > { %p2528_p12 = pnand %p2526_p9, %p2869_p13  ;;  %p2535_p4 = por %p2534_p2, %p2533_p1 }
  0x68   : > { %p2529_p0 = pneg %p2528_p12 }
  0x6a   : > { %p2536_p8 = pnand %p2535_p4, %p2529_p0 }
  0x6c   : > { %2539 = shalt.err (!%p2536_p8)
}
  0x6d   : > { %s3424_s20 = smov 128   ;;  %s3425_s8 = smov 8  }
  0x6e   : > { %2242 = dma.hbm_to_vmem [thread:$0]  (!%p2853_p11), %s3441_s4, 512, %s293_s22, [#allocation9], %s3424_s20, %s3424_s20, %s3425_s8  }
  0x6f   : > { %s2735_s26 = smov [#allocation11]   ;;  %s2540_s23 = scalar_lea.hbm %s3413_s6, 3072 }
  0x70   : > { %s308_s12 = sshll.u32 %s2735_s26, 4  ;;  %p2541_p4 = scmp.ne.s32.totalorder %s3413_s6, %s2540_s23  ;;  %s309_s12 = int_to_ptr.vmem [resolvable:$true] %s308_s12 }
  0x71   : > { %p2547_p10 = scmp.lt.u32.totalorder %s2540_s23, %s3413_s6 }
  0x72   : > { %p2543_p8 = pnand %p2541_p4, %p2869_p13 }
  0x74   : > { %p2544_p6 = pneg %p2543_p8 }
  0x76   : > { %p2549_p3 = pnand %p2547_p10, %p2544_p6 }
  0x78   : > { %2552 = shalt.err (!%p2549_p3)
}
  0x79   : > { %s2553_s22 = scalar_lea.vmem %s309_s12, 3072  ;;  %p2561_p12 = scmp.lt.s32.totalorder %s309_s12, %s309_s12 }
  0x7a   : > { %p2554_p5 = scmp.ne.s32.totalorder %s309_s12, %s2553_s22  ;;  %p2562_p0 = scmp.lt.s32.totalorder %s2553_s22, %s2553_s22 }
  0x7c   : > { %p2556_p7 = pnand %p2554_p5, %p2869_p13  ;;  %p2563_p1 = por %p2562_p0, %p2561_p12 }
  0x7e   : > { %p2557_p9 = pneg %p2556_p7 }
  0x80   : > { %p2564_p2 = pnand %p2563_p1, %p2557_p9 }
  0x82   : > { %2567 = shalt.err (!%p2564_p2)
}
  0x83   : > { %s3442_s30 = smov 12   ;;  %s3443_s14 = smov 192  }
  0x84   : > { %2245 = dma.hbm_to_vmem [thread:$0]  (!%p2853_p11), %s3413_s6, 3072, %s309_s12, [#allocation12], %s3443_s14, %s3443_s14, %s3442_s30  }
  0x85   : > { %s41_s16 = sadd.s32 1, %s2722_s9  ;;  %s50_s18 = sadd.s32 1, %s2714_s29 }
  0x86   : > { %p43_p13 = scmp.ge.s32.totalorder %s41_s16, 2  ;;  %p57_p4 = scmp.ne.s32.totalorder %s2714_s29, %s2710_s28 }
  0x87   : > { %p58_p8 = scmp.eq.s32.totalorder %s2726_s10, 0  ;;  %p2261_p6 = scmp.lt.s32.totalorder %s2726_s10, 2 }
  0x88   : > { %s3470_s16 = smov (%p43_p13, %s41_s16), 0  ;;  %p3444_p3 = scmp.eq.s32.totalorder %s2823_s11, 1 }
  0x89   : > { %p59_p10 = por %p58_p8, %p57_p4  ;;  %s45_s19 = ssub.s32 %s2722_s9, %s3470_s16 }
  0x8a   : > { %p2970_p5 = por %p3444_p3, %p57_p4  ;;  %s2977_s21 = sand.u32 1, %s2714_s29  }
  0x8b   : > { %p48_p11 = scmp.eq.s32.totalorder %s45_s19, 0  ;;  %s1901_s12 = sshll.u32 %s2977_s21, 6 }
  0x8c   : > { %s2010_s23 = sshll.u32 %s2722_s9, 10  ;;  %s3446_s0 = sld [smem:[#allocation23_spill]] }
  0x8d   : > { %s2982_s17 = scalar_select %p48_p11, %s2714_s29, %s50_s18  }
  0x8e   : > { %s329_s14 = scalar_lea.vmem [#allocation2], %s1901_s12  ;;  %p2991_p7 = pnand %p2261_p6, %p59_p10 }
  0x8f   : > { %s338_s24 = sshll.u32 %s329_s14, 4  ;;  %s326_s18 = scalar_lea.sflag [#allocation3], %s2977_s21  ;;  %s2995_s24 = int_to_ptr.vmem [resolvable:$true] %s338_s24 }
  0x90   : > { %p2570_p12 = pneg %p2991_p7 }
  0x92   : > { %s2987_s30 = scalar_lea.hbm %s3446_s0, %s2010_s23  ;;  %s2573_s27 = scalar_lea.hbm %s3446_s0, 2048 }
  0x93   : > { %s2568_s19 = scalar_lea.hbm %s2987_s30, 1024  ;;  %p2574_p2 = scmp.lt.u32.totalorder %s2987_s30, %s3446_s0 }
  0x94   : > { %p2569_p9 = scmp.ne.s32.totalorder %s2987_s30, %s2568_s19  ;;  %p2575_p13 = scmp.lt.u32.totalorder %s2573_s27, %s2568_s19 }
  0x95   : > { %p2577_p8 = scmp.lt.u32.totalorder %s2568_s19, %s2987_s30 }
  0x96   : > { %p2571_p0 = pnand %p2570_p12, %p2569_p9  ;;  %p2576_p4 = por %p2575_p13, %p2574_p2 }
  0x98   : > { %p2572_p1 = pneg %p2571_p0  ;;  %p2578_p6 = por %p2577_p8, %p2576_p4 }
  0x9a   : > { %p2579_p10 = pnand %p2578_p6, %p2572_p1 }
  0x9c   : > { %2582 = shalt.err (!%p2579_p10)
}
  0x9d   : > { %s2583_s20 = scalar_lea.vmem %s2995_s24, 1024  ;;  %s2736_s12 = smov [#allocation2]  }
  0x9e   : > { %p2584_p3 = scmp.ne.s32.totalorder %s2995_s24, %s2583_s20  ;;  %s2588_s23 = sshll.u32 %s2736_s12, 4  ;;  %s2589_s23 = int_to_ptr.vmem [resolvable:$false] %s2588_s23 }
  0x9f   : > { %s2590_s22 = scalar_lea.vmem %s2589_s23, 2048  ;;  %p2591_p0 = scmp.lt.s32.totalorder %s2995_s24, %s2589_s23 }
  0xa0   : > { %p2586_p11 = pnand %p2584_p3, %p2570_p12  ;;  %p2592_p2 = scmp.lt.s32.totalorder %s2590_s22, %s2583_s20 }
  0xa2   : > { %p2587_p9 = pneg %p2586_p11  ;;  %p2593_p13 = por %p2592_p2, %p2591_p0 }
  0xa4   : > { %p2594_p4 = pnand %p2593_p13, %p2587_p9 }
  0xa6   : > { %2597 = shalt.err (!%p2594_p4)
}
  0xa7   : > { %s2737_s19 = smov 64   ;;  %s2738_s27 = smov 4  }
  0xa8   : > { %2249 = dma.hbm_to_vmem [thread:$0]  (!%p2991_p7), %s2987_s30, 1024, %s2995_s24, %s326_s18, %s2737_s19, %s2737_s19, %s2738_s27  }
  0xa9   : > { %s348_s14 = sand.u32 1, %s2726_s10   ;;  %s1904_s12 = sshll.u32 %s2977_s21, 4 }
  0xaa   : > { %s2011_s23 = sshll.u32 %s2722_s9, 8  ;;  %s352_s20 = scalar_lea.vmem [#allocation5], %s1904_s12 }
  0xab   : > { %s361_s22 = sshll.u32 %s352_s20, 4  ;;  %s3031_s2 = scalar_lea.hbm %s3408_s1, %s2011_s23  ;;  %s3033_s22 = int_to_ptr.vmem [resolvable:$true] %s361_s22 }
  0xac   : > { %s3035_s3 = scalar_lea.sflag [#allocation6], %s348_s14  ;;  %s2598_s4 = scalar_lea.hbm %s3031_s2, 256 }
  0xad   : > { %p2599_p1 = scmp.ne.s32.totalorder %s3031_s2, %s2598_s4  ;;  %s2603_s0 = scalar_lea.hbm %s3408_s1, 512 }
  0xae   : > { %p2604_p10 = scmp.lt.u32.totalorder %s3031_s2, %s3408_s1  ;;  %p2605_p3 = scmp.lt.u32.totalorder %s2603_s0, %s2598_s4 }
  0xaf   : > { %p2601_p8 = pnand %p2599_p1, %p2570_p12  ;;  %p2607_p9 = scmp.lt.u32.totalorder %s2598_s4, %s3031_s2 }
  0xb0   : > { %p2606_p11 = por %p2605_p3, %p2604_p10 }
  0xb1   : > { %p2602_p6 = pneg %p2601_p8 }
  0xb2   : > { %p2608_p0 = por %p2607_p9, %p2606_p11 }
  0xb4   : > { %p2609_p2 = pnand %p2608_p0, %p2602_p6 }
  0xb6   : > { %2612 = shalt.err (!%p2609_p2)
}
  0xb7   : > { %s2613_s18 = scalar_lea.vmem %s3033_s22, 256  ;;  %s2739_s19 = smov [#allocation5]  }
  0xb8   : > { %p2614_p13 = scmp.ne.s32.totalorder %s3033_s22, %s2613_s18  ;;  %s2618_s27 = sshll.u32 %s2739_s19, 4  ;;  %s2619_s27 = int_to_ptr.vmem [resolvable:$false] %s2618_s27 }
  0xb9   : > { %s2620_s14 = scalar_lea.vmem %s2619_s27, 512  ;;  %p2621_p8 = scmp.lt.s32.totalorder %s3033_s22, %s2619_s27 }
  0xba   : > { %p2616_p4 = pnand %p2614_p13, %p2570_p12  ;;  %p2622_p10 = scmp.lt.s32.totalorder %s2620_s14, %s2613_s18 }
  0xbc   : > { %p2617_p1 = pneg %p2616_p4  ;;  %p2623_p3 = por %p2622_p10, %p2621_p8 }
  0xbe   : > { %p2624_p11 = pnand %p2623_p3, %p2617_p1 }
  0xc0   : > { %2627 = shalt.err (!%p2624_p11)
}
  0xc1   : > { %s3448_s4 = smov 8   ;;  %s3449_s12 = smov 128  }
  0xc2   : > { %2252 = dma.hbm_to_vmem [thread:$0]  (!%p2991_p7), %s3031_s2, 256, %s3033_s22, %s3035_s3, %s3449_s12, %s3449_s12, %s3448_s4  }
  0xc3   : > { %p3450_p12 = scmp.ne.s32.totalorder %s3436_s15, 0 }
  0xc4   : > { %s3067_s23 = sand.u32 (!%p3450_p12), 1, %s2710_s28   ;;  %p3451_p6 = scmp.ne.s32.totalorder (!%p3450_p12), %s3433_s13, 0 }
  0xc5   : > { %373 = sbr.rel (%p3450_p12) target bundleno = 1235 (0x4d3), region = 52  ;;  %s1908_s20 = sshll.u32 (!%p3450_p12), %s3067_s23, 6 }
  0xc6   : > { %s376_s21 = scalar_lea.sflag (!%p3450_p12), [#allocation3], %s3067_s23  ;;  %s3071_s30 = scalar_lea.vmem (!%p3450_p12), [#allocation2], %s1908_s20 }
  0xcc   : > { %2681 = dma.done.wait (%p3451_p6), %s376_s21, 1024  }
  0xcd   : > { %2683 = vsyncadd (%p3451_p6), %s376_s21, 4294966272  ;;  %s384_s2 = sand.u32 1, %s2823_s11   ;;  %s1909_s3 = sshll.u32 %s3067_s23, 4 }
  0xce   : > { %s385_s15 = scalar_lea.sflag [#allocation6], %s384_s2  ;;  %s3081_s25 = scalar_lea.vmem [#allocation5], %s1909_s3 }
  0xcf   : > { %2685 = dma.done.wait (%p3451_p6), %s385_s15, 256  }
  0xd0   : > { %2687 = vsyncadd (%p3451_p6), %s385_s15, 4294967040  ;;  %p3452_p7 = scmp.eq.s32.totalorder %s2823_s11, 0 }
  0xd2   : > { %2689 = dma.done.wait (%p3452_p7), [#allocation6], 576   ;;  %p3453_p9 = pmov %p3452_p7 }
  0xd3   : > { %p3454_p0 = pmov %p3452_p7 }
  0xd4   : > { %2691 = vsyncadd (%p3453_p9), [#allocation6], 4294966720 }
  0xd5   : > { %2693 = dma.done.wait (%p3454_p0), [#allocation9], 560   ;;  %p3455_p2 = pmov %p3454_p0 }
  0xd6   : > { %p3456_p13 = pmov %p3454_p0 }
  0xd7   : > { %2695 = vsyncadd (%p3455_p2), [#allocation9], 4294966736 }
  0xd8   : > { %2697 = dma.done.wait (%p3456_p13), [#allocation12], 3072   ;;  %p3457_p4 = pmov %p3454_p0 }
  0xd9   : > { %v2740_v0 = vmov 0   ;;  %vm648_vm0 = vcmask 1040384   ;;  %vm649_vm1 = vcmask 1041408   ;;  %v2741_v1 = vmov 65535   ;;  %v2331_v3 = vld [vmem:[#allocation7 + $0x4] ss:$12 sps:$4 sm:$0xff]  }
  0xda   : > { %2699 = vsyncadd (%p3457_p4), [#allocation12], 4294964224  ;;  %693 = vmatprep.mubr.bf16.mxu1 %v2740_v0  ;;  %525 = vmatprep.mubr.bf16.mxu0 %v2740_v0  ;;  %v650_v2 = vsel %vm648_vm0, 4294967295, %v2741_v1  ;;  %v2333_v4 = vld [vmem:[#allocation7] ss:$12 sps:$4 sm:$0xff]   ;;  %vm623_vm2 = vcmask 154624   ;;  %v544_v46 = vlaneseq }
  0xdb   : > { %v651_v5 = vsel %vm649_vm1, %v650_v2, 0  ;;  %661 = vmatprep.subr.bf16.mxu1 %v2331_v3  ;;  %v2334_v6 = vld [vmem:[#allocation10 + $0x4] ss:$8 sps:$4 sm:$0xff]   ;;  %v2336_v7 = vld [vmem:[#allocation10] ss:$8 sps:$4 sm:$0xff]   ;;  %v2342_v17 = vld [vmem:[%s3071_s30] sm:$0xff]  }
  0xdc   : > { %v540_v8 = vld [vmem:[#allocation7 + $0x18] sm:$0x33]  ;;  %662 = vmatpush1.bf16.msra.mxu1 %v2333_v4  ;;  %493 = vmatprep.subr.bf16.mxu0 %v2334_v6  ;;  %v3102_v15 = vld [vmem:[%s3081_s25] sm:$0xff]  ;;  %vm489_vm3 = vcmask 261120   ;;  %v2343_v21 = vld [vmem:[%s3071_s30 + $0x8] sm:$0xff]   ;;  %v2742_v38 = vmov 0.0  }
  0xdd   : > { %v1932_v9 = vcombine.high %v540_v8, %v540_v8  ;;  %v1931_v10 = vcombine.low %v540_v8, %v540_v8  ;;  %v2339_v11 = vld [vmem:[#allocation10 + $0x14] ss:$8 sps:$4 sm:$0xff]   ;;  %494 = vmatpush1.bf16.msra.mxu0 %v2336_v7  ;;  %v2341_v14 = vld [vmem:[#allocation10 + $0x10] ss:$8 sps:$4 sm:$0xff]   ;;  %v2350_v19 = vld [vmem:[#allocation7 + $0x8] ss:$12 sps:$4 sm:$0xff]  }
  0xde   : > { %v3105_v16 = vld [vmem:[%s3081_s25 + $0x8] sm:$0xff]  ;;  %495 = vmatprep.subr.bf16.mxu0 %v2339_v11  ;;  %v2351_v20 = vld [vmem:[#allocation7 + $0x20] ss:$0 sps:$4 sm:$0x33]   ;;  %v2344_v25 = vld [vmem:[%s3071_s30 + $0x10] sm:$0xff]   ;;  %vm2743_vm4 = vmmov 0  }
  0xdf   : > { %v656_v12 = vand.u32 %v1932_v9, %v651_v5  ;;  %v653_v13 = vand.u32 %v1931_v10, %v651_v5  ;;  %v464_v18 = vpack.c.bf16 %v3105_v16, %v3102_v15  ;;  %v659_v22 = vand.u32 %v2351_v20, %v651_v5  ;;  %v2352_v23 = vld [vmem:[#allocation11] ss:$12 sps:$4 sm:$0xff]   ;;  %v2353_v24 = vld [vmem:[#allocation11 + $0x18] ss:$12 sps:$4 sm:$0xff]   ;;  %v2354_v26 = vld [vmem:[#allocation11 + $0x30] ss:$12 sps:$4 sm:$0xff]  }
  0xe0   : > { %v2345_v27 = vld [vmem:[%s3071_s30 + $0x18] sm:$0xff]   ;;  %v2346_v28 = vld [vmem:[%s3071_s30 + $0x20] sm:$0xff]   ;;  %v2347_v29 = vld [vmem:[%s3071_s30 + $0x28] sm:$0xff]   ;;  %v3152_v47 = vshrl.u32 %v544_v46, 7  ;;  %s3458_s4 = sld [smem:[#allocation21_spill]]  ;;  %s441_s20 = scalar_lea.vmem [#allocation13], %s1909_s3 }
  0xe1   : > { %663 = vmatprep.subr.bf16.mxu1 %v656_v12  ;;  %496 = vmatpush1.bf16.msra.mxu0 %v2341_v14  ;;  %v2348_v30 = vld [vmem:[%s3071_s30 + $0x30] sm:$0xff]   ;;  %v2349_v31 = vld [vmem:[%s3071_s30 + $0x38] sm:$0xff]   ;;  %v2357_v34 = vld [vmem:[#allocation11 + $0x78] ss:$12 sps:$4 sm:$0xff]   ;;  %s1742_s21 = sshll.u32 %s441_s20, 4  ;;  %s3459_s15 = sld [smem:[#allocation27_spill]]  ;;  %s3356_s21 = int_to_ptr.vmem [resolvable:$true] %s1742_s21 }
  0xe2   : > { %664 = vmatpush1.bf16.msra.mxu1 %v653_v13  ;;  %2067 = vmatprep.subr.bf16.mxu0 %v2350_v19  ;;  %v2355_v32 = vld [vmem:[#allocation11 + $0x48] ss:$12 sps:$4 sm:$0xff]   ;;  %v2356_v33 = vld [vmem:[#allocation11 + $0x60] ss:$12 sps:$4 sm:$0xff]   ;;  %v2358_v35 = vld [vmem:[#allocation11 + $0x90] ss:$12 sps:$4 sm:$0xff]  }
  0xe3   : > { %v2359_v36 = vld [vmem:[#allocation11 + $0xa8] ss:$12 sps:$4 sm:$0xff]   ;;  %v2360_v37 = vld [vmem:[#allocation11 + $0x4] ss:$12 sps:$4 sm:$0xff]   ;;  %2139 = vmatprep.subr.bf16.mxu1 %v2742_v38  ;;  %v2363_v41 = vld [vmem:[#allocation11 + $0x4c] ss:$12 sps:$4 sm:$0xff]  }
  0xe4   : > { %1919 = vmatmul.mubr.msk.bf16.vlgmr.msra.gmra.mrb[0].mxu0 %vm489_vm3, %v464_v18  ;;  %v2361_v39 = vld [vmem:[#allocation11 + $0x1c] ss:$12 sps:$4 sm:$0xff]   ;;  %v2362_v40 = vld [vmem:[#allocation11 + $0x34] ss:$12 sps:$4 sm:$0xff]   ;;  %v2364_v42 = vld [vmem:[#allocation11 + $0x64] ss:$12 sps:$4 sm:$0xff]  }
  0xe5   : > { %1934 = vmatmul.mubr.msk.bf16.vlgmr.msra.gmra.mrb[0].mxu1 %vm623_vm2, %v2342_v17  ;;  %2071 = vmatprep.mubr.msk.bf16.mxu0 %vm623_vm2, %v2342_v17  ;;  %v2365_v43 = vld [vmem:[#allocation11 + $0x7c] ss:$12 sps:$4 sm:$0xff]   ;;  %v2366_v44 = vld [vmem:[#allocation11 + $0x94] ss:$12 sps:$4 sm:$0xff]   ;;  %v2367_v45 = vld [vmem:[#allocation11 + $0xac] ss:$12 sps:$4 sm:$0xff]  }
  0xe6   : > { %703 = vmatprep.mubr.bf16.mxu1 %v2740_v0  ;;  %2068 = vmatpush3.bf16.msra.mxu0 %v2350_v19  ;;  %v546_v48 = vsub.s32 0, %v3152_v47  ;;  %v3155_v49 = vld [vmem:[#allocation8] sm:$0x7]  ;;  %v550_v50 = vsub.s32 1, %v3152_v47  ;;  %s2012_s12 = sshll.u32 %s3458_s4, 8  ;;  %s1727_s3 = scalar_lea.sflag [#allocation4], %s3067_s23 }
  0xe7   : > { %2069 = vmatprep.subr.bf16.mxu0 %v659_v22  ;;  %2140 = vmatpush3.bf16.msra.mxu1 %v2360_v37  ;;  %s2628_s11 = scalar_lea.vmem %s3356_s21, 256  ;;  %s2744_s13 = smov [#allocation13]  }
  0xe8   : > { %2141 = vmatprep.subr.bf16.mxu1 %v2742_v38  ;;  %v3159_v51 = vrot.slane %v3155_v49, %v546_v48  ;;  %v3162_v52 = vrot.slane %v3155_v49, %v550_v50  ;;  %p2629_p1 = scmp.ne.s32.totalorder %s3356_s21, %s2628_s11  ;;  %s2632_s22 = sshll.u32 %s2744_s13, 4  ;;  %s2633_s22 = int_to_ptr.vmem [resolvable:$false] %s2632_s22 }
  0xe9   : > { %s2634_s0 = scalar_lea.vmem %s2633_s22, 512  ;;  %p2635_p3 = scmp.lt.s32.totalorder %s3356_s21, %s2633_s22 }
  0xea   : > { %2070 = vmatpush3.bf16.msra.mxu0 %v659_v22  ;;  %p2630_p8 = pnand %p2629_p1, %p2970_p5  ;;  %p2636_p11 = scmp.lt.s32.totalorder %s2634_s0, %s2628_s11 }
  0xeb   : > { %2087 = vmatprep.subr.bf16.mxu0 %v2352_v23  ;;  %2142 = vmatpush3.bf16.msra.mxu1 %v2361_v39 }
  0xec   : > { %2143 = vmatprep.subr.bf16.mxu1 %v2742_v38  ;;  %p2631_p10 = pneg %p2630_p8  ;;  %p2637_p12 = por %p2636_p11, %p2635_p3 }
  0xed   : > { %1935 = vmatmul.mubr.msk.bf16.gmra.mrb[4].mxu1 %vm623_vm2, %v2343_v21  ;;  %2072 = vmatmul.mubr.msk.bf16.vlgmr.msra.gmra.mrb[4].mxu0 %vm623_vm2, %v2343_v21 }
  0xee   : > { %713 = vmatprep.mubr.bf16.mxu1 %v2740_v0  ;;  %2088 = vmatpush3.bf16.msra.mxu0 %v2352_v23  ;;  %p2638_p6 = pnand %p2637_p12, %p2631_p10 }
  0xef   : > { %2075 = vmatprep.mubr.msk.bf16.mxu0 %vm623_vm2, %v2344_v25  ;;  %2089 = vmatprep.subr.bf16.mxu0 %v2353_v24 }
  0xf0   : > { %2144 = vmatpush3.bf16.msra.mxu1 %v2362_v40 }
  0xf1   : > { %2145 = vmatprep.subr.bf16.mxu1 %v2742_v38 }
  0xf2   : > { %2090 = vmatpush3.bf16.msra.mxu0 %v2353_v24 }
  0xf3   : > { %2091 = vmatprep.subr.bf16.mxu0 %v2354_v26 }
  0xf4   : > { %2146 = vmatpush3.bf16.msra.mxu1 %v2363_v41 }
  0xf5   : > { %1936 = vmatmul.mubr.msk.bf16.gmra.mrb[8].mxu1 %vm623_vm2, %v2344_v25  ;;  %2076 = vmatmul.mubr.msk.bf16.gmra.mrb[8].mxu0 %vm623_vm2, %v2345_v27 }
  0xf6   : > { %723 = vmatprep.mubr.bf16.mxu1 %v2740_v0  ;;  %2092 = vmatpush3.bf16.msra.mxu0 %v2354_v26 }
  0xf7   : > { %2079 = vmatprep.mubr.msk.bf16.mxu0 %vm623_vm2, %v2346_v28  ;;  %2093 = vmatprep.subr.bf16.mxu0 %v2355_v32 }
  0xf8   : > { %2147 = vmatprep.subr.bf16.mxu1 %v2742_v38 }
  0xf9   : > { %2148 = vmatpush3.bf16.msra.mxu1 %v2364_v42 }
  0xfa   : > { %2094 = vmatpush3.bf16.msra.mxu0 %v2355_v32  ;;  %2149 = vmatprep.subr.bf16.mxu1 %v2742_v38 }
  0xfb   : > { %2095 = vmatprep.subr.bf16.mxu0 %v2356_v33 }
  0xfd   : > { %1937 = vmatmul.mubr.msk.bf16.gmra.mrb[12].mxu1 %vm623_vm2, %v2345_v27  ;;  %2080 = vmatmul.mubr.msk.bf16.gmra.mrb[12].mxu0 %vm623_vm2, %v2347_v29 }
  0xfe   : > { %733 = vmatprep.mubr.bf16.mxu1 %v2740_v0  ;;  %2083 = vmatprep.mubr.msk.bf16.mxu0 %vm623_vm2, %v2348_v30 }
  0xff   : > { %2096 = vmatpush3.bf16.msra.mxu0 %v2356_v33  ;;  %2150 = vmatpush3.bf16.msra.mxu1 %v2365_v43 }
 0x100   : > { %2097 = vmatprep.subr.bf16.mxu0 %v2357_v34  ;;  %2151 = vmatprep.subr.bf16.mxu1 %v2742_v38 }
 0x103   : > { %2098 = vmatpush3.bf16.msra.mxu0 %v2357_v34  ;;  %2152 = vmatpush3.bf16.msra.mxu1 %v2366_v44 }
 0x104   : > { %2099 = vmatprep.subr.bf16.mxu0 %v2358_v35  ;;  %2153 = vmatprep.subr.bf16.mxu1 %v2742_v38 }
 0x105   : > { %1938 = vmatmul.mubr.msk.bf16.gmra.mrb[16].mxu1 %vm623_vm2, %v2346_v28  ;;  %2084 = vmatmul.mubr.msk.bf16.gmra.mrb[16].mxu0 %vm623_vm2, %v2349_v31 }
 0x106   : > { %743 = vmatprep.mubr.bf16.mxu1 %v2740_v0 }
 0x107   : > { %2100 = vmatpush3.bf16.msra.mxu0 %v2358_v35  ;;  %2154 = vmatpush3.bf16.msra.mxu1 %v2367_v45 }
 0x108   : > { %2101 = vmatprep.subr.bf16.mxu0 %v2359_v36  ;;  %2159 = vmatprep.subr.bf16.mxu1 %v2742_v38 }
 0x10b   : > { %2102 = vmatpush3.bf16.msra.mxu0 %v2359_v36 }
 0x10d   : > { %1939 = vmatmul.mubr.msk.bf16.gmra.mrb[20].mxu1 %vm623_vm2, %v2347_v29 }
 0x10e   : > { %753 = vmatprep.mubr.bf16.mxu1 %v2740_v0 }
 0x115   : > { %1940 = vmatmul.mubr.msk.bf16.gmra.mrb[24].mxu1 %vm623_vm2, %v2348_v30 }
 0x116   : > { %763 = vmatprep.mubr.bf16.mxu1 %v2740_v0 }
 0x11d   : > { %1941 = vmatmul.mubr.msk.bf16.gmra.mrb[28].mxu1 %vm623_vm2, %v2349_v31 }
 0x11e   : > { %2155 = vmatprep.mubr.msk.bf16.mxu1 %vm2743_vm4, %v2742_v38 }
 0x1b7   : > { %v3165_v56 = vpop.f32.mrb[0].mxu0 }
 0x1b8   : > { %v695_v53 = vpop.f32.mrb[0].mxu1  ;;  %v3168_v59 = vpop.f32.mrb[1].mxu0 }
 0x1b9   : > { %v696_v54 = vadd.f32 %v695_v53, %v3159_v51  ;;  %v697_v55 = vpop.f32.mrb[1].mxu1  ;;  %v3171_v62 = vpop.f32.mrb[2].mxu0 }
 0x1ba   : > { %v698_v57 = vadd.f32 %v697_v55, %v3162_v52  ;;  %v699_v58 = vpop.f32.mrb[2].mxu1  ;;  %v3175_v1 = vpop.f32.mrb[3].mxu0 }
 0x1bb   : > { %v700_v60 = vadd.f32 %v699_v58, %v3159_v51  ;;  %v701_v61 = vpop.f32.mrb[3].mxu1  ;;  %v871_v63 = vadd.f32 %v696_v54, %v3165_v56 }
 0x1bc   : > { %v702_v0 = vadd.f32 %v701_v61, %v3162_v52  ;;  %v1352_v2 = vadd.f32 %v698_v57, %v3168_v59 }
 0x1bd   : > { %v872_v3 = vadd.f32 %v700_v60, %v3171_v62  ;;  %v887_v4 = vmul.f32 0.1, %v871_v63 }
 0x1be   : > { %v1353_v5 = vadd.f32 %v702_v0, %v3175_v1  ;;  %v1368_v6 = vmul.f32 0.1, %v1352_v2 }
 0x1bf   : > { %v888_v7 = vmul.f32 0.1, %v872_v3  ;;  %v903_v12 = vmax.f32 %v871_v63, %v887_v4 }
 0x1c0   : > { %v705_v8 = vpop.f32.mrb[4].mxu1  ;;  %v1369_v9 = vmul.f32 0.1, %v1353_v5  ;;  %v1384_v18 = vmax.f32 %v1352_v2, %v1368_v6 }
 0x1c1   : > { %v706_v10 = vadd.f32 %v705_v8, %v3159_v51  ;;  %v707_v11 = vpop.f32.mrb[5].mxu1  ;;  %v904_v13 = vmax.f32 %v872_v3, %v888_v7 }
 0x1c2   : > { %v708_v14 = vadd.f32 %v707_v11, %v3162_v52  ;;  %v709_v17 = vpop.f32.mrb[6].mxu1  ;;  %v1385_v19 = vmax.f32 %v1353_v5, %v1369_v9 }
 0x1c3   : > { %v873_v20 = vadd.f32 %v706_v10, %v3165_v56  ;;  %v710_v21 = vadd.f32 %v709_v17, %v3159_v51  ;;  %v711_v22 = vpop.f32.mrb[7].mxu1  ;;  %v919_v23 = vpack.c.bf16 %v904_v13, %v903_v12 }
 0x1c4   : > { %v1354_v24 = vadd.f32 %v708_v14, %v3168_v59  ;;  %v712_v25 = vadd.f32 %v711_v22, %v3162_v52  ;;  %v3186_v26 = vpack.c.bf16 %v1385_v19, %v1384_v18 }
 0x1c5   : > { %v889_v27 = vmul.f32 0.1, %v873_v20  ;;  %v874_v28 = vadd.f32 %v710_v21, %v3171_v62  ;;  %2103 = vmatprep.mubr.bf16.mxu0 %v919_v23 }
 0x1c6   : > { %v1370_v29 = vmul.f32 0.1, %v1354_v24  ;;  %v1355_v30 = vadd.f32 %v712_v25, %v3175_v1 }
 0x1c7   : > { %v890_v31 = vmul.f32 0.1, %v874_v28  ;;  %v905_v34 = vmax.f32 %v873_v20, %v889_v27 }
 0x1c8   : > { %v1371_v32 = vmul.f32 0.1, %v1355_v30  ;;  %v715_v33 = vpop.f32.mrb[8].mxu1  ;;  %v1386_v39 = vmax.f32 %v1354_v24, %v1370_v29 }
 0x1c9   : > { %v906_v35 = vmax.f32 %v874_v28, %v890_v31  ;;  %v716_v36 = vadd.f32 %v715_v33, %v3159_v51  ;;  %v717_v37 = vpop.f32.mrb[9].mxu1 }
 0x1ca   : > { %v1387_v40 = vmax.f32 %v1355_v30, %v1371_v32  ;;  %v718_v41 = vadd.f32 %v717_v37, %v3162_v52  ;;  %v719_v42 = vpop.f32.mrb[10].mxu1 }
 0x1cb   : > { %v920_v43 = vpack.c.bf16 %v906_v35, %v905_v34  ;;  %v875_v44 = vadd.f32 %v716_v36, %v3165_v56  ;;  %v720_v45 = vadd.f32 %v719_v42, %v3159_v51  ;;  %v721_v46 = vpop.f32.mrb[11].mxu1 }
 0x1cc   : > { %v3194_v48 = vpack.c.bf16 %v1387_v40, %v1386_v39  ;;  %v1356_v50 = vadd.f32 %v718_v41, %v3168_v59  ;;  %v722_v53 = vadd.f32 %v721_v46, %v3162_v52 }
 0x1cd   : > { %v891_v54 = vmul.f32 0.1, %v875_v44  ;;  %v876_v55 = vadd.f32 %v720_v45, %v3171_v62  ;;  %2104 = vmatmul.mubr.bf16.vlgmr.msra.gmra.mrb[20].mxu0 %v920_v43 }
 0x1ce   : > { %v1372_v57 = vmul.f32 0.1, %v1356_v50  ;;  %v1357_v58 = vadd.f32 %v722_v53, %v3175_v1 }
 0x1cf   : > { %v892_v60 = vmul.f32 0.1, %v876_v55  ;;  %v907_v0 = vmax.f32 %v875_v44, %v891_v54 }
 0x1d0   : > { %v1373_v61 = vmul.f32 0.1, %v1357_v58  ;;  %v725_v63 = vpop.f32.mrb[12].mxu1  ;;  %v1388_v5 = vmax.f32 %v1356_v50, %v1372_v57 }
 0x1d1   : > { %v908_v2 = vmax.f32 %v876_v55, %v892_v60  ;;  %v726_v3 = vadd.f32 %v725_v63, %v3159_v51  ;;  %v727_v4 = vpop.f32.mrb[13].mxu1 }
 0x1d2   : > { %v1389_v6 = vmax.f32 %v1357_v58, %v1373_v61  ;;  %v728_v7 = vadd.f32 %v727_v4, %v3162_v52  ;;  %v729_v8 = vpop.f32.mrb[14].mxu1 }
 0x1d3   : > { %v877_v9 = vadd.f32 %v726_v3, %v3165_v56  ;;  %v730_v10 = vadd.f32 %v729_v8, %v3159_v51  ;;  %v731_v11 = vpop.f32.mrb[15].mxu1  ;;  %v921_v12 = vpack.c.bf16 %v908_v2, %v907_v0 }
 0x1d4   : > { %v3204_v13 = vpack.c.bf16 %v1389_v6, %v1388_v5  ;;  %v1358_v14 = vadd.f32 %v728_v7, %v3168_v59  ;;  %v732_v17 = vadd.f32 %v731_v11, %v3162_v52 }
 0x1d5   : > { %v893_v18 = vmul.f32 0.1, %v877_v9  ;;  %v878_v19 = vadd.f32 %v730_v10, %v3171_v62  ;;  %2107 = vmatprep.mubr.bf16.mxu0 %v921_v12 }
 0x1d6   : > { %v1374_v20 = vmul.f32 0.1, %v1358_v14  ;;  %v1359_v21 = vadd.f32 %v732_v17, %v3175_v1 }
 0x1d7   : > { %v894_v22 = vmul.f32 0.1, %v878_v19  ;;  %v909_v25 = vmax.f32 %v877_v9, %v893_v18 }
 0x1d8   : > { %v1375_v23 = vmul.f32 0.1, %v1359_v21  ;;  %v735_v24 = vpop.f32.mrb[16].mxu1  ;;  %v1390_v30 = vmax.f32 %v1358_v14, %v1374_v20 }
 0x1d9   : > { %v910_v27 = vmax.f32 %v878_v19, %v894_v22  ;;  %v736_v28 = vadd.f32 %v735_v24, %v3159_v51  ;;  %v737_v29 = vpop.f32.mrb[17].mxu1 }
 0x1da   : > { %v1391_v31 = vmax.f32 %v1359_v21, %v1375_v23  ;;  %v738_v32 = vadd.f32 %v737_v29, %v3162_v52  ;;  %v739_v33 = vpop.f32.mrb[18].mxu1 }
 0x1db   : > { %v879_v34 = vadd.f32 %v736_v28, %v3165_v56  ;;  %v740_v35 = vadd.f32 %v739_v33, %v3159_v51  ;;  %v741_v36 = vpop.f32.mrb[19].mxu1  ;;  %v922_v37 = vpack.c.bf16 %v910_v27, %v909_v25 }
 0x1dc   : > { %v3214_v39 = vpack.c.bf16 %v1391_v31, %v1390_v30  ;;  %v1360_v40 = vadd.f32 %v738_v32, %v3168_v59  ;;  %v742_v41 = vadd.f32 %v741_v36, %v3162_v52 }
 0x1dd   : > { %v895_v42 = vmul.f32 0.1, %v879_v34  ;;  %v880_v43 = vadd.f32 %v740_v35, %v3171_v62  ;;  %2108 = vmatmul.mubr.bf16.gmra.mrb[24].mxu0 %v922_v37 }
 0x1de   : > { %v1376_v44 = vmul.f32 0.1, %v1360_v40  ;;  %v1361_v45 = vadd.f32 %v742_v41, %v3175_v1 }
 0x1df   : > { %v896_v46 = vmul.f32 0.1, %v880_v43  ;;  %v911_v54 = vmax.f32 %v879_v34, %v895_v42 }
 0x1e0   : > { %v1377_v50 = vmul.f32 0.1, %v1361_v45  ;;  %v745_v53 = vpop.f32.mrb[20].mxu1  ;;  %v1392_v60 = vmax.f32 %v1360_v40, %v1376_v44 }
 0x1e1   : > { %v912_v55 = vmax.f32 %v880_v43, %v896_v46  ;;  %v746_v57 = vadd.f32 %v745_v53, %v3159_v51  ;;  %v747_v58 = vpop.f32.mrb[21].mxu1 }
 0x1e2   : > { %v1393_v61 = vmax.f32 %v1361_v45, %v1377_v50  ;;  %v748_v63 = vadd.f32 %v747_v58, %v3162_v52  ;;  %v749_v0 = vpop.f32.mrb[22].mxu1 }
 0x1e3   : > { %v881_v2 = vadd.f32 %v746_v57, %v3165_v56  ;;  %v750_v3 = vadd.f32 %v749_v0, %v3159_v51  ;;  %v751_v4 = vpop.f32.mrb[23].mxu1  ;;  %v923_v5 = vpack.c.bf16 %v912_v55, %v911_v54 }
 0x1e4   : > { %v1404_v6 = vpack.c.bf16 %v1393_v61, %v1392_v60  ;;  %v1362_v7 = vadd.f32 %v748_v63, %v3168_v59  ;;  %v752_v8 = vadd.f32 %v751_v4, %v3162_v52 }
 0x1e5   : > { %v897_v9 = vmul.f32 0.1, %v881_v2  ;;  %v882_v10 = vadd.f32 %v750_v3, %v3171_v62  ;;  %2111 = vmatprep.mubr.bf16.mxu0 %v923_v5 }
 0x1e6   : > { %v1408_v11 = vmax.bf16 %v1404_v6, %v3186_v26  ;;  %v1378_v12 = vmul.f32 0.1, %v1362_v7  ;;  %v1363_v14 = vadd.f32 %v752_v8, %v3175_v1 }
 0x1e7   : > { %v898_v17 = vmul.f32 0.1, %v882_v10  ;;  %v913_v20 = vmax.f32 %v881_v2, %v897_v9 }
 0x1e8   : > { %v1379_v18 = vmul.f32 0.1, %v1363_v14  ;;  %v755_v19 = vpop.f32.mrb[24].mxu1  ;;  %v1394_v24 = vmax.f32 %v1362_v7, %v1378_v12 }
 0x1e9   : > { %v914_v21 = vmax.f32 %v882_v10, %v898_v17  ;;  %v756_v22 = vadd.f32 %v755_v19, %v3159_v51  ;;  %v757_v23 = vpop.f32.mrb[25].mxu1 }
 0x1ea   : > { %v1395_v25 = vmax.f32 %v1363_v14, %v1379_v18  ;;  %v758_v27 = vadd.f32 %v757_v23, %v3162_v52  ;;  %v759_v28 = vpop.f32.mrb[26].mxu1 }
 0x1eb   : > { %v883_v29 = vadd.f32 %v756_v22, %v3165_v56  ;;  %v760_v26 = vadd.f32 %v759_v28, %v3159_v51  ;;  %v761_v30 = vpop.f32.mrb[27].mxu1  ;;  %v924_v31 = vpack.c.bf16 %v914_v21, %v913_v20 }
 0x1ec   : > { %v1405_v32 = vpack.c.bf16 %v1395_v25, %v1394_v24  ;;  %v1364_v33 = vadd.f32 %v758_v27, %v3168_v59  ;;  %v762_v34 = vadd.f32 %v761_v30, %v3162_v52 }
 0x1ed   : > { %v899_v35 = vmul.f32 0.1, %v883_v29  ;;  %v884_v36 = vadd.f32 %v760_v26, %v3171_v62  ;;  %2112 = vmatmul.mubr.bf16.gmra.mrb[28].mxu0 %v924_v31 }
 0x1ee   : > { %v1409_v37 = vmax.bf16 %v1405_v32, %v3194_v48  ;;  %v1380_v40 = vmul.f32 0.1, %v1364_v33  ;;  %v1365_v41 = vadd.f32 %v762_v34, %v3175_v1 }
 0x1ef   : > { %v900_v42 = vmul.f32 0.1, %v884_v36  ;;  %v915_v46 = vmax.f32 %v883_v29, %v899_v35 }
 0x1f0   : > { %v1412_v43 = vmax.bf16 %v1409_v37, %v1408_v11  ;;  %v1381_v44 = vmul.f32 0.1, %v1365_v41  ;;  %v765_v45 = vpop.f32.mrb[28].mxu1  ;;  %v1396_v55 = vmax.f32 %v1364_v33, %v1380_v40 }
 0x1f1   : > { %v916_v50 = vmax.f32 %v884_v36, %v900_v42  ;;  %v766_v53 = vadd.f32 %v765_v45, %v3159_v51  ;;  %v767_v54 = vpop.f32.mrb[29].mxu1 }
 0x1f2   : > { %v1397_v57 = vmax.f32 %v1365_v41, %v1381_v44  ;;  %v768_v58 = vadd.f32 %v767_v54, %v3162_v52  ;;  %v769_v60 = vpop.f32.mrb[30].mxu1 }
 0x1f3   : > { %v885_v61 = vadd.f32 %v766_v53, %v3165_v56  ;;  %v770_v48 = vadd.f32 %v769_v60, %v3159_v51  ;;  %v771_v63 = vpop.f32.mrb[31].mxu1  ;;  %v925_v0 = vpack.c.bf16 %v916_v50, %v915_v46 }
 0x1f4   : > { %v1406_v2 = vpack.c.bf16 %v1397_v57, %v1396_v55  ;;  %v1366_v3 = vadd.f32 %v768_v58, %v3168_v59  ;;  %v772_v4 = vadd.f32 %v771_v63, %v3162_v52 }
 0x1f5   : > { %v901_v5 = vmul.f32 0.1, %v885_v61  ;;  %v886_v6 = vadd.f32 %v770_v48, %v3171_v62  ;;  %2115 = vmatprep.mubr.bf16.mxu0 %v925_v0  ;;  %v2368_v62 = vld [vmem:[%s3412_s5] sm:$0xff]  }
 0x1f6   : > { %v1410_v7 = vmax.bf16 %v1406_v2, %v3204_v13  ;;  %v1382_v8 = vmul.f32 0.1, %v1366_v3  ;;  %v1367_v9 = vadd.f32 %v772_v4, %v3175_v1  ;;  %2119 = vmatprep.subr.bf16.mxu0 %v2368_v62  ;;  %v2369_v1 = vld [vmem:[%s3412_s5 + $0x8] sm:$0xff]   ;;  %v3259_v13 = vld [vmem:[%s3414_s7] ss:$0 sm:$0xff] }
 0x1f7   : > { %v902_v10 = vmul.f32 0.1, %v886_v6  ;;  %v917_v11 = vmax.f32 %v885_v61, %v901_v5  ;;  %2120 = vmatpush3.bf16.msra.mxu0 %v2368_v62 }
 0x1f8   : > { %v1383_v56 = vmul.f32 0.1, %v1367_v9  ;;  %v1398_v12 = vmax.f32 %v1366_v3, %v1382_v8  ;;  %2121 = vmatprep.subr.bf16.mxu0 %v2369_v1 }
 0x1f9   : > { %v918_v51 = vmax.f32 %v886_v6, %v902_v10 }
 0x1fa   : > { %v1399_v14 = vmax.f32 %v1367_v9, %v1383_v56 }
 0x1fb   : > { %v926_v17 = vpack.c.bf16 %v918_v51, %v917_v11  ;;  %2122 = vmatpush3.bf16.msra.mxu0 %v2369_v1 }
 0x1fc   : > { %v1407_v18 = vpack.c.bf16 %v1399_v14, %v1398_v12 }
 0x1fd   : > { %2116 = vmatmul.mubr.bf16.gmra.mrb[32].mxu0 %v926_v17 }
 0x1fe   : > { %v1411_v52 = vmax.bf16 %v1407_v18, %v3214_v39 }
 0x200   : > { %v1413_v59 = vmax.bf16 %v1411_v52, %v1410_v7 }
 0x202   : > { %v1414_v19 = vmax.bf16 %v1413_v59, %v1412_v43 }
 0x204   : > { %2156 = vmatmul.mubr.bf16.vlgmr.msra.gmra.mrb[32].mxu1 %v1414_v19 }
 0x205   : > { %2175 = vmatprep.mubr.msk.bf16.mxu1 %vm2743_vm4, %v2742_v38 }
 0x2a0   : > { %v2105_v39 = vpop.f32.mrb[20].mxu0 }
 0x2a1   : > { %v1041_v20 = vadd.f32 %v2105_v39, %v3259_v13  ;;  %v1032_v21 = vpop.f32.mrb[21].mxu0 }
 0x2a2   : > { %v1033_v22 = vadd.f32 %v3259_v13, %v1032_v21  ;;  %v2106_v23 = vpop.f32.mrb[22].mxu0 }
 0x2a3   : > { %v1961_v24 = vmul.f32 -1.442695, %v1041_v20  ;;  %v1044_v25 = vadd.f32 %v2106_v23, %v3259_v13  ;;  %v1035_v27 = vpop.f32.mrb[23].mxu0 }
 0x2a4   : > { %v1959_v28 = vmul.f32 -1.442695, %v1033_v22  ;;  %v1036_v29 = vadd.f32 %v3259_v13, %v1035_v27 }
 0x2a5   : > { %2378 = vpow2.f32 %v1961_v24  ;;  %v1962_v26 = vmul.f32 -1.442695, %v1044_v25 }
 0x2a6   : > { %2380 = vpow2.f32 %v1959_v28  ;;  %v1960_v30 = vmul.f32 -1.442695, %v1036_v29 }
 0x2a7   : > { %2382 = vpow2.f32 %v1962_v26 }
 0x2a8   : > { %2384 = vpow2.f32 %v1960_v30 }
 0x2af   : > { %v2379_v31 = vpop.eup %2378 }
 0x2b0   : > { %v2381_v32 = vpop.eup %2380  ;;  %v1145_v33 = vadd.f32 1.0, %v2379_v31  ;;  %v2109_v34 = vpop.f32.mrb[24].mxu0 }
 0x2b1   : > { %v2383_v35 = vpop.eup %2382  ;;  %v1143_v36 = vadd.f32 1.0, %v2381_v32  ;;  %v1057_v37 = vadd.f32 %v2109_v34, %v3259_v13  ;;  %v1048_v40 = vpop.f32.mrb[25].mxu0 }
 0x2b2   : > { %v2385_v41 = vpop.eup %2384  ;;  %2386 = vrcp.f32 %v1145_v33  ;;  %v1146_v42 = vadd.f32 1.0, %v2383_v35  ;;  %v1049_v43 = vadd.f32 %v3259_v13, %v1048_v40  ;;  %v2110_v44 = vpop.f32.mrb[26].mxu0 }
 0x2b3   : > { %2388 = vrcp.f32 %v1143_v36  ;;  %v1144_v45 = vadd.f32 1.0, %v2385_v41  ;;  %v1965_v46 = vmul.f32 -1.442695, %v1057_v37  ;;  %v1060_v50 = vadd.f32 %v2110_v44, %v3259_v13  ;;  %v1051_v53 = vpop.f32.mrb[27].mxu0 }
 0x2b4   : > { %2390 = vrcp.f32 %v1146_v42  ;;  %v1963_v54 = vmul.f32 -1.442695, %v1049_v43  ;;  %v1052_v55 = vadd.f32 %v3259_v13, %v1051_v53 }
 0x2b5   : > { %2392 = vrcp.f32 %v1144_v45  ;;  %v1966_v57 = vmul.f32 -1.442695, %v1060_v50 }
 0x2b6   : > { %2394 = vpow2.f32 %v1965_v46  ;;  %v1964_v58 = vmul.f32 -1.442695, %v1052_v55 }
 0x2b7   : > { %2396 = vpow2.f32 %v1963_v54 }
 0x2b8   : > { %2398 = vpow2.f32 %v1966_v57 }
 0x2b9   : > { %2400 = vpow2.f32 %v1964_v58 }
 0x2bc   : > { %v2387_v60 = vpop.eup %2386 }
 0x2bd   : > { %v2389_v61 = vpop.eup %2388  ;;  %v1193_v0 = vmul.f32 %v2387_v60, %v3102_v15 }
 0x2be   : > { %v2391_v48 = vpop.eup %2390  ;;  %v1191_v5 = vmul.f32 %v2389_v61, %v3102_v15 }
 0x2bf   : > { %v2393_v63 = vpop.eup %2392  ;;  %v1194_v2 = vmul.f32 %v2391_v48, %v3105_v16 }
 0x2c0   : > { %v2395_v3 = vpop.eup %2394  ;;  %v2113_v4 = vpop.f32.mrb[28].mxu0  ;;  %v1192_v6 = vmul.f32 %v2393_v63, %v3105_v16 }
 0x2c1   : > { %v2397_v7 = vpop.eup %2396  ;;  %v1149_v8 = vadd.f32 1.0, %v2395_v3  ;;  %v1073_v9 = vadd.f32 %v2113_v4, %v3259_v13  ;;  %v1064_v10 = vpop.f32.mrb[29].mxu0  ;;  %v1208_v56 = vpack.c.bf16 %v1194_v2, %v1193_v0  ;;  %v3294_v4 = vld [vmem:[%s3081_s25] sm:$0xff] }
 0x2c2   : > { %v2399_v11 = vpop.eup %2398  ;;  %v1147_v51 = vadd.f32 1.0, %v2397_v7  ;;  %v1065_v12 = vadd.f32 %v3259_v13, %v1064_v10  ;;  %v2114_v14 = vpop.f32.mrb[30].mxu0  ;;  %v1207_v17 = vpack.c.bf16 %v1192_v6, %v1191_v5  ;;  %v3298_v6 = vld [vmem:[%s3081_s25 + $0x8] sm:$0xff]  ;;  %s3354_s25 = scalar_lea.hbm %s3459_s15, %s2012_s12 }
 0x2c3   : > { %v2401_v18 = vpop.eup %2400  ;;  %2402 = vrcp.f32 %v1149_v8  ;;  %v1150_v52 = vadd.f32 1.0, %v2399_v11  ;;  %v1969_v59 = vmul.f32 -1.442695, %v1073_v9  ;;  %v1076_v19 = vadd.f32 %v2114_v14, %v3259_v13  ;;  %v1067_v62 = vpop.f32.mrb[31].mxu0 }
 0x2c4   : > { %2404 = vrcp.f32 %v1147_v51  ;;  %v1148_v1 = vadd.f32 1.0, %v2401_v18  ;;  %v1967_v39 = vmul.f32 -1.442695, %v1065_v12  ;;  %v1068_v20 = vadd.f32 %v3259_v13, %v1067_v62  ;;  %2123 = vmatprep.mubr.msk.bf16.mxu0 %vm489_vm3, %v1207_v17 }
 0x2c5   : > { %2406 = vrcp.f32 %v1150_v52  ;;  %v1970_v21 = vmul.f32 -1.442695, %v1076_v19  ;;  %2124 = vmatmul.mubr.msk.bf16.vlgmr.msra.gmra.mrb[4].mxu0 %vm489_vm3, %v1208_v56 }
 0x2c6   : > { %2408 = vrcp.f32 %v1148_v1  ;;  %v1968_v22 = vmul.f32 -1.442695, %v1068_v20 }
 0x2c7   : > { %2410 = vpow2.f32 %v1969_v59 }
 0x2c8   : > { %2412 = vpow2.f32 %v1967_v39 }
 0x2c9   : > { %2414 = vpow2.f32 %v1970_v21 }
 0x2ca   : > { %2416 = vpow2.f32 %v1968_v22 }
 0x2cd   : > { %v2403_v23 = vpop.eup %2402 }
 0x2ce   : > { %v2405_v24 = vpop.eup %2404  ;;  %v1197_v29 = vmul.f32 %v2403_v23, %v3102_v15 }
 0x2cf   : > { %v2407_v25 = vpop.eup %2406  ;;  %v1195_v33 = vmul.f32 %v2405_v24, %v3102_v15 }
 0x2d0   : > { %v2409_v27 = vpop.eup %2408  ;;  %v2117_v28 = vpop.f32.mrb[32].mxu0  ;;  %v1198_v26 = vmul.f32 %v2407_v25, %v3105_v16 }
 0x2d1   : > { %v2411_v30 = vpop.eup %2410  ;;  %v1089_v31 = vadd.f32 %v2117_v28, %v3259_v13  ;;  %v1080_v32 = vpop.f32.mrb[33].mxu0  ;;  %v1196_v34 = vmul.f32 %v2409_v27, %v3105_v16  ;;  %v2370_v27 = vld [vmem:[#allocation11 + $0x8] ss:$12 sps:$4 sm:$0xff]   ;;  %v2371_v28 = vld [vmem:[#allocation11 + $0x20] ss:$12 sps:$4 sm:$0xff]  }
 0x2d2   : > { %v2413_v35 = vpop.eup %2412  ;;  %v1153_v36 = vadd.f32 1.0, %v2411_v30  ;;  %v1081_v37 = vadd.f32 %v3259_v13, %v1080_v32  ;;  %v2118_v40 = vpop.f32.mrb[34].mxu0  ;;  %v1210_v41 = vpack.c.bf16 %v1198_v26, %v1197_v29  ;;  %2160 = vmatpush3.bf16.msra.mxu1 %v2370_v27  ;;  %v2372_v29 = vld [vmem:[#allocation11 + $0x38] ss:$12 sps:$4 sm:$0xff]   ;;  %v2373_v26 = vld [vmem:[#allocation11 + $0x50] ss:$12 sps:$4 sm:$0xff]  }
 0x2d3   : > { %v2415_v42 = vpop.eup %2414  ;;  %v1151_v43 = vadd.f32 1.0, %v2413_v35  ;;  %v1092_v44 = vadd.f32 %v2118_v40, %v3259_v13  ;;  %v1083_v45 = vpop.f32.mrb[35].mxu0  ;;  %v1209_v46 = vpack.c.bf16 %v1196_v34, %v1195_v33  ;;  %v1973_v54 = vmul.f32 -1.442695, %v1089_v31  ;;  %2161 = vmatprep.subr.bf16.mxu1 %v2742_v38  ;;  %v2374_v30 = vld [vmem:[#allocation11 + $0x68] ss:$12 sps:$4 sm:$0xff]  }
 0x2d4   : > { %v2417_v50 = vpop.eup %2416  ;;  %2418 = vrcp.f32 %v1153_v36  ;;  %v1154_v53 = vadd.f32 1.0, %v2415_v42  ;;  %v1084_v15 = vadd.f32 %v3259_v13, %v1083_v45  ;;  %v1971_v55 = vmul.f32 -1.442695, %v1081_v37  ;;  %v2375_v31 = vld [vmem:[#allocation11 + $0x80] ss:$12 sps:$4 sm:$0xff]  }
 0x2d5   : > { %2420 = vrcp.f32 %v1151_v43  ;;  %v1152_v16 = vadd.f32 1.0, %v2417_v50  ;;  %2127 = vmatprep.mubr.msk.bf16.mxu0 %vm489_vm3, %v1209_v46  ;;  %v1974_v57 = vmul.f32 -1.442695, %v1092_v44  ;;  %v2376_v32 = vld [vmem:[#allocation11 + $0x98] ss:$12 sps:$4 sm:$0xff]   ;;  %v554_v34 = vsub.s32 2, %v3152_v47 }
 0x2d6   : > { %2422 = vrcp.f32 %v1154_v53  ;;  %2128 = vmatmul.mubr.msk.bf16.gmra.mrb[8].mxu0 %vm489_vm3, %v1210_v41  ;;  %v1972_v58 = vmul.f32 -1.442695, %v1084_v15  ;;  %2162 = vmatpush3.bf16.msra.mxu1 %v2371_v28  ;;  %v2377_v33 = vld [vmem:[#allocation11 + $0xb0] ss:$12 sps:$4 sm:$0xff]  }
 0x2d7   : > { %2424 = vrcp.f32 %v1152_v16  ;;  %v3289_v60 = vpop.f32.mrb[32].mxu1  ;;  %2163 = vmatprep.subr.bf16.mxu1 %v2742_v38  ;;  %v3320_v35 = vrot.slane %v3155_v49, %v554_v34 }
 0x2d8   : > { %2426 = vpow2.f32 %v1973_v54  ;;  %v2157_v61 = vpop.f32.mrb[33].mxu1 }
 0x2d9   : > { %2428 = vpow2.f32 %v1971_v55  ;;  %v3291_v48 = vpop.f32.mrb[34].mxu1 }
 0x2da   : > { %2430 = vpow2.f32 %v1974_v57  ;;  %v2158_v13 = vpop.f32.mrb[35].mxu1  ;;  %2164 = vmatpush3.bf16.msra.mxu1 %v2372_v29 }
 0x2db   : > { %2432 = vpow2.f32 %v1972_v58  ;;  %2165 = vmatprep.subr.bf16.mxu1 %v2742_v38 }
 0x2de   : > { %v2419_v63 = vpop.eup %2418  ;;  %2166 = vmatpush3.bf16.msra.mxu1 %v2373_v26 }
 0x2df   : > { %v2421_v0 = vpop.eup %2420  ;;  %v1201_v5 = vmul.f32 %v3294_v4, %v2419_v63  ;;  %2167 = vmatprep.subr.bf16.mxu1 %v2742_v38 }
 0x2e0   : > { %v2423_v2 = vpop.eup %2422  ;;  %v1199_v9 = vmul.f32 %v3294_v4, %v2421_v0 }
 0x2e1   : > { %v2425_v3 = vpop.eup %2424  ;;  %v1202_v7 = vmul.f32 %v3298_v6, %v2423_v2 }
 0x2e2   : > { %v2427_v8 = vpop.eup %2426  ;;  %v1200_v10 = vmul.f32 %v3298_v6, %v2425_v3  ;;  %2168 = vmatpush3.bf16.msra.mxu1 %v2374_v30 }
 0x2e3   : > { %v2429_v56 = vpop.eup %2428  ;;  %v1157_v11 = vadd.f32 1.0, %v2427_v8  ;;  %v1212_v51 = vpack.c.bf16 %v1202_v7, %v1201_v5  ;;  %2169 = vmatprep.subr.bf16.mxu1 %v2742_v38 }
 0x2e4   : > { %v2431_v12 = vpop.eup %2430  ;;  %v1155_v14 = vadd.f32 1.0, %v2429_v56  ;;  %v1211_v17 = vpack.c.bf16 %v1200_v10, %v1199_v9 }
 0x2e5   : > { %v2433_v18 = vpop.eup %2432  ;;  %2434 = vrcp.f32 %v1157_v11  ;;  %v1158_v52 = vadd.f32 1.0, %v2431_v12 }
 0x2e6   : > { %2436 = vrcp.f32 %v1155_v14  ;;  %v1156_v59 = vadd.f32 1.0, %v2433_v18  ;;  %2131 = vmatprep.mubr.msk.bf16.mxu0 %vm489_vm3, %v1211_v17  ;;  %2170 = vmatpush3.bf16.msra.mxu1 %v2375_v31 }
 0x2e7   : > { %2438 = vrcp.f32 %v1158_v52  ;;  %2132 = vmatmul.mubr.msk.bf16.gmra.mrb[12].mxu0 %vm489_vm3, %v1212_v51  ;;  %2171 = vmatprep.subr.bf16.mxu1 %v2742_v38 }
 0x2e8   : > { %2440 = vrcp.f32 %v1156_v59 }
 0x2ea   : > { %2172 = vmatpush3.bf16.msra.mxu1 %v2376_v32 }
 0x2eb   : > { %2173 = vmatprep.subr.bf16.mxu1 %v2742_v38 }
 0x2ee   : > { %2174 = vmatpush3.bf16.msra.mxu1 %v2377_v33 }
 0x2ef   : > { %v2435_v19 = vpop.eup %2434 }
 0x2f0   : > { %v2437_v62 = vpop.eup %2436  ;;  %v1205_v20 = vmul.f32 %v3294_v4, %v2435_v19 }
 0x2f1   : > { %v2439_v1 = vpop.eup %2438  ;;  %v1203_v22 = vmul.f32 %v3294_v4, %v2437_v62 }
 0x2f2   : > { %v2441_v39 = vpop.eup %2440  ;;  %v1206_v21 = vmul.f32 %v3298_v6, %v2439_v1 }
 0x2f3   : > { %v1204_v23 = vmul.f32 %v3298_v6, %v2441_v39 }
 0x2f4   : > { %v1214_v24 = vpack.c.bf16 %v1206_v21, %v1205_v20 }
 0x2f5   : > { %v1213_v25 = vpack.c.bf16 %v1204_v23, %v1203_v22 }
 0x2f7   : > { %2135 = vmatprep.mubr.msk.bf16.mxu0 %vm489_vm3, %v1213_v25 }
 0x2f8   : > { %2136 = vmatmul.mubr.msk.bf16.gmra.mrb[16].mxu0 %vm489_vm3, %v1214_v24 }
 0x398   : > { %v2125_v36 = vpop.f32.mrb[4].mxu0 }
 0x399   : > { %v2179_v37 = vadd.f32 %v2125_v36, %v3320_v35  ;;  %v1289_v40 = vpop.f32.mrb[5].mxu0 }
 0x39a   : > { %v2180_v41 = vadd.f32 %v1289_v40, %v3320_v35  ;;  %v2126_v42 = vpop.f32.mrb[6].mxu0 }
 0x39b   : > { %v1557_v43 = vmul.f32 0.1, %v2179_v37  ;;  %v2181_v44 = vadd.f32 %v2126_v42, %v3320_v35  ;;  %v1292_v45 = vpop.f32.mrb[7].mxu0 }
 0x39c   : > { %v1555_v46 = vmul.f32 0.1, %v2180_v41  ;;  %v2182_v38 = vadd.f32 %v1292_v45, %v3320_v35 }
 0x39d   : > { %v1558_v50 = vmul.f32 0.1, %v2181_v44  ;;  %v1573_v47 = vmax.f32 %v2179_v37, %v1557_v43 }
 0x39e   : > { %v1556_v53 = vmul.f32 0.1, %v2182_v38  ;;  %v1571_v49 = vmax.f32 %v2180_v41, %v1555_v46 }
 0x39f   : > { %v1574_v54 = vmax.f32 %v2181_v44, %v1558_v50 }
 0x3a0   : > { %v1572_v15 = vmax.f32 %v2182_v38, %v1556_v53 }
 0x3a1   : > { %v1588_v16 = vpack.c.bf16 %v1574_v54, %v1573_v47 }
 0x3a2   : > { %v1587_v55 = vpack.c.bf16 %v1572_v15, %v1571_v49 }
 0x3a9   : > { %v2129_v57 = vpop.f32.mrb[8].mxu0 }
 0x3aa   : > { %v2183_v58 = vadd.f32 %v2129_v57, %v3320_v35  ;;  %v1305_v61 = vpop.f32.mrb[9].mxu0 }
 0x3ab   : > { %v2184_v13 = vadd.f32 %v1305_v61, %v3320_v35  ;;  %v2130_v63 = vpop.f32.mrb[10].mxu0  ;;  %v1985_v61 = vld [vmem:[%s3414_s7 + $0x1] ss:$0 sm:$0xff] }
 0x3ac   : > { %v1561_v0 = vmul.f32 0.1, %v2183_v58  ;;  %v2185_v2 = vadd.f32 %v2130_v63, %v3320_v35  ;;  %v1308_v3 = vpop.f32.mrb[11].mxu0 }
 0x3ad   : > { %v1559_v5 = vmul.f32 0.1, %v2184_v13  ;;  %v2186_v7 = vadd.f32 %v1308_v3, %v3320_v35 }
 0x3ae   : > { %v1562_v8 = vmul.f32 0.1, %v2185_v2  ;;  %v1577_v10 = vmax.f32 %v2183_v58, %v1561_v0 }
 0x3af   : > { %v1560_v9 = vmul.f32 0.1, %v2186_v7  ;;  %v1575_v11 = vmax.f32 %v2184_v13, %v1559_v5  ;;  %v1521_v13 = vadd.f32 %v1985_v61, %v3289_v60 }
 0x3b0   : > { %v1578_v56 = vmax.f32 %v2185_v2, %v1562_v8  ;;  %v1996_v8 = vld [vmem:[%s3414_s7 + $0x2] ss:$0 sm:$0xff] }
 0x3b1   : > { %v1576_v51 = vmax.f32 %v2186_v7, %v1560_v9  ;;  %v1994_v63 = vmul.f32 -1.442695, %v1521_v13 }
 0x3b2   : > { %v1590_v12 = vpack.c.bf16 %v1578_v56, %v1577_v10 }
 0x3b3   : > { %v1589_v14 = vpack.c.bf16 %v1576_v51, %v1575_v11  ;;  %2442 = vpow2.f32 %v1994_v63 }
 0x3ba   : > { %v2133_v17 = vpop.f32.mrb[12].mxu0 }
 0x3bb   : > { %v2187_v18 = vadd.f32 %v2133_v17, %v3320_v35  ;;  %v1321_v52 = vpop.f32.mrb[13].mxu0 }
 0x3bc   : > { %v2188_v59 = vadd.f32 %v1321_v52, %v3320_v35  ;;  %v2134_v19 = vpop.f32.mrb[14].mxu0 }
 0x3bd   : > { %v1565_v62 = vmul.f32 0.1, %v2187_v18  ;;  %v2189_v1 = vadd.f32 %v2134_v19, %v3320_v35  ;;  %v1324_v39 = vpop.f32.mrb[15].mxu0  ;;  %v2443_v2 = vpop.eup %2442 }
 0x3be   : > { %v1563_v20 = vmul.f32 0.1, %v2188_v59  ;;  %v2190_v21 = vadd.f32 %v1324_v39, %v3320_v35  ;;  %v1533_v5 = vadd.f32 1.0, %v2443_v2 }
 0x3bf   : > { %v1566_v22 = vmul.f32 0.1, %v2189_v1  ;;  %v1581_v24 = vmax.f32 %v2187_v18, %v1565_v62 }
 0x3c0   : > { %v1564_v23 = vmul.f32 0.1, %v2190_v21  ;;  %v1579_v27 = vmax.f32 %v2188_v59, %v1563_v20 }
 0x3c1   : > { %v1582_v25 = vmax.f32 %v2189_v1, %v1566_v22 }
 0x3c2   : > { %v1580_v28 = vmax.f32 %v2190_v21, %v1564_v23 }
 0x3c3   : > { %v1592_v29 = vpack.c.bf16 %v1582_v25, %v1581_v24 }
 0x3c4   : > { %v1591_v26 = vpack.c.bf16 %v1580_v28, %v1579_v27 }
 0x3c5   : > { %v1596_v30 = vmax.bf16 %v1592_v29, %v1588_v16 }
 0x3c6   : > { %v1595_v31 = vmax.bf16 %v1591_v26, %v1587_v55 }
 0x3c8   : > { %v1599_v32 = vmax.bf16 %v1596_v30, %v1595_v31 }
 0x3cb   : > { %v2137_v33 = vpop.f32.mrb[16].mxu0 }
 0x3cc   : > { %v2191_v34 = vadd.f32 %v2137_v33, %v3320_v35  ;;  %v1337_v36 = vpop.f32.mrb[17].mxu0 }
 0x3cd   : > { %v2192_v37 = vadd.f32 %v1337_v36, %v3320_v35  ;;  %v2138_v40 = vpop.f32.mrb[18].mxu0 }
 0x3ce   : > { %v1569_v41 = vmul.f32 0.1, %v2191_v34  ;;  %v2193_v42 = vadd.f32 %v2138_v40, %v3320_v35  ;;  %v1340_v43 = vpop.f32.mrb[19].mxu0 }
 0x3cf   : > { %v1567_v44 = vmul.f32 0.1, %v2192_v37  ;;  %v2194_v45 = vadd.f32 %v1340_v43, %v3320_v35  ;;  %v1524_v35 = vadd.f32 %v1985_v61, %v3291_v48 }
 0x3d0   : > { %v1570_v46 = vmul.f32 0.1, %v2193_v42  ;;  %v1585_v50 = vmax.f32 %v2191_v34, %v1569_v41 }
 0x3d1   : > { %v1568_v38 = vmul.f32 0.1, %v2194_v45  ;;  %v1583_v47 = vmax.f32 %v2192_v37, %v1567_v44  ;;  %v1995_v0 = vmul.f32 -1.442695, %v1524_v35 }
 0x3d2   : > { %v1586_v53 = vmax.f32 %v2193_v42, %v1570_v46 }
 0x3d3   : > { %v1584_v54 = vmax.f32 %v2194_v45, %v1568_v38  ;;  %2444 = vpow2.f32 %v1995_v0 }
 0x3d4   : > { %v1594_v49 = vpack.c.bf16 %v1586_v53, %v1585_v50  ;;  %2446 = vrcp.f32 %v1533_v5 }
 0x3d5   : > { %v1593_v15 = vpack.c.bf16 %v1584_v54, %v1583_v47 }
 0x3d6   : > { %v1598_v16 = vmax.bf16 %v1594_v49, %v1590_v12 }
 0x3d7   : > { %v1597_v55 = vmax.bf16 %v1593_v15, %v1589_v14 }
 0x3d9   : > { %v1600_v57 = vmax.bf16 %v1598_v16, %v1597_v55 }
 0x3db   : > { %v1601_v58 = vmax.bf16 %v1600_v57, %v1599_v32 }
 0x3dd   : > { %2176 = vmatmul.mubr.bf16.vlgmr.msra.gmra.mrb[36].mxu1 %v1601_v58  ;;  %v2445_v3 = vpop.eup %2444 }
 0x3de   : > { %v1534_v7 = vadd.f32 1.0, %v2445_v3  ;;  %v2447_v51 = vpop.eup %2446 }
 0x3df   : > { %v1716_v14 = vsub.f32 1.0, %v2447_v51 }
 0x3e0   : > { %2448 = vrcp.f32 %v1534_v7 }
 0x3e1   : > { %v1718_v52 = vmul.f32 %v3294_v4, %v1716_v14 }
 0x3ea   : > { %v2449_v12 = vpop.eup %2448 }
 0x3eb   : > { %v1717_v17 = vsub.f32 1.0, %v2449_v12 }
 0x3ed   : > { %v1719_v1 = vmul.f32 %v3298_v6, %v1717_v17 }
 0x4b0   : > { %v1707_v9 = vpop.f32.mrb[36].mxu1 }
 0x4b1   : > { %v1708_v60 = vadd.f32 %v1996_v8, %v1707_v9  ;;  %v2177_v10 = vpop.f32.mrb[37].mxu1 }
 0x4b2   : > { %v1710_v48 = vpop.f32.mrb[38].mxu1 }
 0x4b3   : > { %2450 = vtanh.f32 %v1708_v60  ;;  %v1711_v56 = vadd.f32 %v1996_v8, %v1710_v48  ;;  %v2178_v11 = vpop.f32.mrb[39].mxu1 }
 0x4b5   : > { %2452 = vtanh.f32 %v1711_v56 }
 0x4bd   : > { %v2451_v18 = vpop.eup %2450 }
 0x4be   : > { %v1720_v59 = vmul.f32 %v2451_v18, %v2447_v51 }
 0x4bf   : > { %v2453_v19 = vpop.eup %2452 }
 0x4c0   : > { %v1722_v62 = vadd.f32 %v1720_v59, %v1718_v52  ;;  %v1721_v39 = vmul.f32 %v2453_v19, %v2449_v12 }
 0x4c2   : > { %v1723_v4 = vadd.f32 %v1721_v39, %v1719_v1  ;;  %1724 = vst.msk [vmem:[%s441_s20] sm:$0xff] %vm489_vm3, %v1722_v62 }
 0x4c4   : > { %1725 = vst.msk [vmem:[%s441_s20 + $0x8] sm:$0xff] %vm489_vm3, %v1723_v4 }
 0x4c5   : > { %2641 = shalt.err (!%p2638_p6)
}
 0x4c6   : > { %s2642_s8 = scalar_lea.hbm %s3354_s25, 256  ;;  %s2646_s19 = scalar_lea.hbm %s3459_s15, 512 }
 0x4c7   : > { %p2643_p7 = scmp.ne.s32.totalorder %s3354_s25, %s2642_s8  ;;  %p2647_p2 = scmp.lt.u32.totalorder %s3354_s25, %s3459_s15 }
 0x4c8   : > { %p2648_p13 = scmp.lt.u32.totalorder %s2646_s19, %s2642_s8  ;;  %p2650_p1 = scmp.lt.u32.totalorder %s2642_s8, %s3354_s25 }
 0x4c9   : > { %p2644_p9 = pnand %p2643_p7, %p2970_p5 }
 0x4ca   : > { %p2649_p4 = por %p2648_p13, %p2647_p2 }
 0x4cb   : > { %p2645_p0 = pneg %p2644_p9 }
 0x4cc   : > { %p2651_p8 = por %p2650_p1, %p2649_p4 }
 0x4ce   : > { %p2652_p10 = pnand %p2651_p8, %p2645_p0 }
 0x4d0   : > { %2655 = shalt.err (!%p2652_p10)
}
 0x4d1   : > { %s2745_s4 = smov 128   ;;  %s2746_s12 = smov 8  }
 0x4d2   : > { %2231 = dma.vmem_to_hbm [thread:$0]  (%p2970_p5), %s3356_s21, 256, %s3354_s25, %s1727_s3, %s2745_s4, %s2745_s4, %s2746_s12  }
 0x4d3 PF: > { %s3460_s20 = sld [smem:[#allocation20_spill]]  ;;  %s3461_s30 = sld [smem:[#allocation22_spill]] }
 0x4d4   : > { %p3463_p11 = scmp.ge.s32.totalorder %s2726_s10, 2 }
 0x4d9   : > { %s1757_s2 = sand.u32 1, %s3460_s20   ;;  %p3462_p3 = scmp.ne.s32.totalorder %s3461_s30, 0 }
 0x4da   : > { %s1758_s11 = scalar_lea.sflag [#allocation4], %s1757_s2 }
 0x4db   : > { %p2254_p12 = pnand %p3463_p11, %p3462_p3 }
 0x4dd   : > { %2701 = dma.done.wait (!%p2254_p12), %s1758_s11, 256  }
 0x4de   : > { %2703 = vsyncadd (!%p2254_p12), %s1758_s11, 4294967040  ;;  %s29_s10 = sadd.s32 1, %s2726_s10   ;;  %s3464_s27 = smov %s2710_s28 }
 0x4df   : > { %p26_p6 = scmp.ge.s32.totalorder %s29_s10, 4   ;;  %s3465_s28 = smov %s2714_s29 }
 0x4e0   : > { %s3466_s29 = smov %s2982_s17  ;;  %s3467_s30 = smov %s2722_s9 }
 0x4e1   : > { %s3468_s9 = smov %s3470_s16  ;;  %28 = sbr.rel (!%p26_p6) target bundleno = 16 (0x10), region = 126 }
 0x4e8   :  { %1763 = vsyncpa [#allocation3], 1 }
 0x4e9   :  { %1765 = vsyncpa [#allocation3 + $0x1], 1 }
 0x4ea   :  { %1766 = vsyncpa [#allocation6], 1 }
 0x4eb   :  { %1768 = vsyncpa [#allocation6 + $0x1], 1 }
 0x4ec   :  { %1769 = vsyncpa [#allocation9], 1 }
 0x4ed   :  { %1770 = vsyncpa [#allocation12], 1 }
 0x4ee   :  { %1771 = vsyncpa [#allocation4], 1 }
 0x4ef   :  { %1773 = vsyncpa [#allocation4 + $0x1], 1 }

// kernel: tpu_custom_call.1
= control target key start
LH: loop header
LB: loop body
LE: loop exit
PB: predicated region body
PF: predicated region fallthrough
CT: control target
= control target key end

     0   :  { %s3339_s0 = inlined_call_operand.hbm [shape: bf16[2,8,16,19], index: 0, kind: input, shape index: {}]   ;;  %s3340_s1 = inlined_call_operand.hbm [shape: f32[2,16,32], index: 1, kind: input, shape index: {}]   ;;  %s3341_s2 = inlined_call_operand.hbm [shape: bf16[19,384], index: 2, kind: input, shape index: {}]   ;;  %s3342_s3 = inlined_call_operand.hbm [shape: f32[1,384], index: 3, kind: input, shape index: {}]   ;;  %s3343_s4 = inlined_call_operand.hbm [shape: bf16[32,256], index: 4, kind: input, shape index: {}]   ;;  %s3344_s5 = inlined_call_operand.vmem [shape: bf16[32,128], index: 5, kind: input, shape index: {}]   ;;  %s3345_s6 = inlined_call_operand.hbm [shape: bf16[128,384], index: 6, kind: input, shape index: {}]   ;;  %s3346_s7 = inlined_call_operand.vmem [shape: f32[1,384], index: 7, kind: input, shape index: {}]   ;;  %s3347_s8 = inlined_call_operand.vmem [shape: f32[2,32,16], index: 8, kind: output, shape index: {}]  }
   0x1   :  { %3358 = sst [smem:[#allocation18_spill]] %s3339_s0 }
   0x2   :  { %3359 = sst [smem:[#allocation19_spill]] %s3341_s2 }
   0x3   :  { %3360 = sst [smem:[#allocation20_spill]] %s3342_s3 }
   0x4   :  { %3361 = sst [smem:[#allocation21_spill]] %s3347_s8 }
   0x5   :  { %13 = vsyncpa [#allocation3], 0 }
   0x6   :  { %15 = vsyncpa [#allocation3 + $0x1], 0 }
   0x7   :  { %16 = vsyncpa [#allocation5], 0 }
   0x8   :  { %18 = vsyncpa [#allocation5 + $0x1], 0 }
   0x9   :  { %19 = vsyncpa [#allocation8], 0 }
   0xa   :  { %20 = vsyncpa [#allocation11], 0  ;;  %s2777_s27 = smov 0   ;;  %s2779_s28 = smov 0  }
   0xb   :  { %s2781_s29 = smov 0   ;;  %s2783_s30 = smov 0  }
   0xc   :  { %s2785_s9 = smov 0   ;;  %s2787_s10 = smov 0  }
   0xd LB: > { %3362 = sst [smem:[#allocation17_spill]] %s2706_s30  ;;  %s3350_s11 = sadd.s32 4294967295, %s2714_s10   ;;  %s2714_s10 = sphi %s2787_s10, %s26_s10   ;;  %s2710_s9 = sphi %s2785_s9, %s3388_s9   ;;  %s2706_s30 = sphi %s2783_s30, %s3387_s30   ;;  %s2702_s29 = sphi %s2781_s29, %s3386_s29   ;;  %s2698_s28 = sphi %s2779_s28, %s3385_s28   ;;  %s2694_s27 = sphi %s2777_s27, %s3384_s27  }
   0xe   : > { %p60_p0 = scmp.ne.s32.totalorder %s2698_s28, %s2694_s27  ;;  %p2809_p1 = scmp.eq.s32.totalorder %s3350_s11, 0 }
   0xf   : > { %p1926_p2 = scmp.ge.s32.totalorder %s2714_s10, 1  ;;  %p253_p3 = scmp.lt.s32.totalorder %s2714_s10, 3 }
  0x10   : > { %s3363_s12 = scalar_select %p2809_p1, 1, 0 }
  0x11   : > { %p2817_p4 = por %p2809_p1, %p60_p0  ;;  %p2821_p5 = pnand %p1926_p2, %p253_p3 }
  0x12   : > { %s2716_s15 = smov [#allocation6]   ;;  %s2717_s18 = smov [#allocation7]  }
  0x13   : > { %s3364_s13 = scalar_select %p2817_p4, 1, 0 }
  0x14   : > { %s3365_s14 = scalar_select %p2821_p5, 1, 0 }
  0x15   : > { %s265_s16 = sshll.u32 %s2716_s15, 4  ;;  %p2260_p6 = pneg %p2821_p5  ;;  %s2825_s16 = int_to_ptr.vmem [resolvable:$true] %s265_s16 }
  0x16   : > { %s279_s19 = sshll.u32 %s2717_s18, 4  ;;  %s2718_s20 = smov [#allocation9]   ;;  %s2835_s19 = int_to_ptr.vmem [resolvable:$true] %s279_s19 }
  0x17   : > { %p2831_p7 = pnand %p2260_p6, %p2809_p1  ;;  %s2837_s21 = sshll.u32 %s2718_s20, 4  ;;  %s290_s21 = int_to_ptr.vmem [resolvable:$true] %s2837_s21 }
  0x18   : > { %s3367_s2 = sld [smem:[#allocation19_spill]] }
  0x19   : > { %p2847_p9 = pneg %p2831_p7 }
  0x1e   : > { %s2476_s24 = scalar_lea.hbm %s3367_s2, 576 }
  0x1f   : > { %p2477_p8 = scmp.ne.s32.totalorder %s3367_s2, %s2476_s24  ;;  %p2483_p12 = scmp.lt.u32.totalorder %s2476_s24, %s3367_s2 }
  0x21   : > { %p2479_p10 = pnand %p2847_p9, %p2477_p8 }
  0x23   : > { %p2480_p11 = pneg %p2479_p10 }
  0x25   : > { %p2485_p13 = pnand %p2483_p12, %p2480_p11 }
  0x27   : > { %2488 = shalt.err (!%p2485_p13)
}
  0x28   : > { %s2489_s20 = scalar_lea.vmem %s2825_s16, 576  ;;  %p2497_p6 = scmp.lt.s32.totalorder %s2825_s16, %s2825_s16 }
  0x29   : > { %p2490_p0 = scmp.ne.s32.totalorder %s2825_s16, %s2489_s20  ;;  %p2498_p1 = scmp.lt.s32.totalorder %s2489_s20, %s2489_s20 }
  0x2b   : > { %p2492_p2 = pnand %p2490_p0, %p2847_p9  ;;  %p2499_p8 = por %p2498_p1, %p2497_p6 }
  0x2d   : > { %p2493_p3 = pneg %p2492_p2 }
  0x2f   : > { %p2500_p10 = pnand %p2499_p8, %p2493_p3 }
  0x31   : > { %2503 = shalt.err (!%p2500_p10)
}
  0x32   : > { %s3354_s22 = smov 192   ;;  %s3355_s23 = smov 12  }
  0x33   : > { %2263 = dma.hbm_to_vmem [thread:$0]  (!%p2831_p7), %s3367_s2, 576, %s2825_s16, [#allocation5], %s3354_s22, %s3354_s22, %s3355_s23  }
  0x34   : > { %s3369_s3 = sld [smem:[#allocation20_spill]] }
  0x3a   : > { %s2504_s18 = scalar_lea.hbm %s3369_s3, 48 }
  0x3b   : > { %p2505_p1 = scmp.ne.s32.totalorder %s3369_s3, %s2504_s18  ;;  %p2511_p13 = scmp.lt.u32.totalorder %s2504_s18, %s3369_s3 }
  0x3d   : > { %p2507_p11 = pnand %p2505_p1, %p2847_p9 }
  0x3f   : > { %p2508_p12 = pneg %p2507_p11 }
  0x41   : > { %p2513_p0 = pnand %p2511_p13, %p2508_p12 }
  0x43   : > { %2516 = shalt.err (!%p2513_p0)
}
  0x44   : > { %s2517_s16 = scalar_lea.vmem %s2835_s19, 48  ;;  %s2524_s11 = scalar_lea.vmem %s2835_s19, 64 }
  0x45   : > { %p2518_p2 = scmp.ne.s32.totalorder %s2835_s19, %s2517_s16  ;;  %p2525_p8 = scmp.lt.s32.totalorder %s2835_s19, %s2835_s19 }
  0x46   : > { %p2526_p10 = scmp.lt.s32.totalorder %s2524_s11, %s2517_s16 }
  0x47   : > { %p2520_p3 = pnand %p2518_p2, %p2847_p9 }
  0x48   : > { %p2527_p1 = por %p2526_p10, %p2525_p8 }
  0x49   : > { %p2521_p6 = pneg %p2520_p3 }
  0x4b   : > { %p2528_p11 = pnand %p2527_p1, %p2521_p6 }
  0x4d   : > { %2531 = shalt.err (!%p2528_p11)
}
  0x4e   : > { %2266 = dma.hbm_to_vmem [thread:$0]  (!%p2831_p7), %s3369_s3, 48, %s2835_s19, [#allocation8]  }
  0x4f   : > { %s2532_s26 = scalar_lea.hbm %s3343_s4, 512 }
  0x50   : > { %p2533_p12 = scmp.ne.s32.totalorder %s3343_s4, %s2532_s26  ;;  %p2539_p2 = scmp.lt.u32.totalorder %s2532_s26, %s3343_s4 }
  0x52   : > { %p2535_p13 = pnand %p2533_p12, %p2847_p9 }
  0x54   : > { %p2536_p0 = pneg %p2535_p13 }
  0x56   : > { %p2541_p3 = pnand %p2539_p2, %p2536_p0 }
  0x58   : > { %2544 = shalt.err (!%p2541_p3)
}
  0x59   : > { %s2545_s11 = scalar_lea.vmem %s290_s21, 512  ;;  %p2553_p1 = scmp.lt.s32.totalorder %s290_s21, %s290_s21 }
  0x5a   : > { %p2546_p6 = scmp.ne.s32.totalorder %s290_s21, %s2545_s11  ;;  %p2554_p11 = scmp.lt.s32.totalorder %s2545_s11, %s2545_s11 }
  0x5c   : > { %p2548_p8 = pnand %p2546_p6, %p2847_p9  ;;  %p2555_p4 = por %p2554_p11, %p2553_p1 }
  0x5e   : > { %p2549_p10 = pneg %p2548_p8 }
  0x60   : > { %p2556_p5 = pnand %p2555_p4, %p2549_p10 }
  0x62   : > { %2559 = shalt.err (!%p2556_p5)
}
  0x63   : > { %s3356_s19 = smov 128   ;;  %s3357_s8 = smov 8  }
  0x64   : > { %2269 = dma.hbm_to_vmem [thread:$0]  (!%p2831_p7), %s3343_s4, 512, %s290_s21, [#allocation8], %s3356_s19, %s3356_s19, %s3357_s8  }
  0x65   : > { %s2723_s25 = smov [#allocation10]   ;;  %s2560_s20 = scalar_lea.hbm %s3345_s6, 3072 }
  0x66   : > { %s305_s26 = sshll.u32 %s2723_s25, 4  ;;  %p2561_p4 = scmp.ne.s32.totalorder %s3345_s6, %s2560_s20  ;;  %s306_s26 = int_to_ptr.vmem [resolvable:$true] %s305_s26 }
  0x67   : > { %p2567_p13 = scmp.lt.u32.totalorder %s2560_s20, %s3345_s6 }
  0x68   : > { %p2563_p5 = pnand %p2561_p4, %p2847_p9 }
  0x6a   : > { %p2564_p12 = pneg %p2563_p5 }
  0x6c   : > { %p2569_p0 = pnand %p2567_p13, %p2564_p12 }
  0x6e   : > { %2572 = shalt.err (!%p2569_p0)
}
  0x6f   : > { %s2573_s21 = scalar_lea.vmem %s306_s26, 3072  ;;  %p2581_p8 = scmp.lt.s32.totalorder %s306_s26, %s306_s26 }
  0x70   : > { %p2574_p2 = scmp.ne.s32.totalorder %s306_s26, %s2573_s21  ;;  %p2582_p10 = scmp.lt.s32.totalorder %s2573_s21, %s2573_s21 }
  0x72   : > { %p2576_p3 = pnand %p2574_p2, %p2847_p9  ;;  %p2583_p1 = por %p2582_p10, %p2581_p8 }
  0x74   : > { %p2577_p6 = pneg %p2576_p3 }
  0x76   : > { %p2584_p11 = pnand %p2583_p1, %p2577_p6 }
  0x78   : > { %2587 = shalt.err (!%p2584_p11)
}
  0x79   : > { %s3370_s30 = smov 12   ;;  %s3371_s24 = smov 192  }
  0x7a   : > { %2272 = dma.hbm_to_vmem [thread:$0]  (!%p2831_p7), %s3345_s6, 3072, %s306_s26, [#allocation11], %s3371_s24, %s3371_s24, %s3370_s30  }
  0x7b   : > { %s38_s27 = sadd.s32 1, %s2710_s9  ;;  %s47_s25 = sadd.s32 1, %s2702_s29 }
  0x7c   : > { %p40_p9 = scmp.ge.s32.totalorder %s38_s27, 2  ;;  %p54_p4 = scmp.ne.s32.totalorder %s2702_s29, %s2698_s28 }
  0x7d   : > { %p55_p5 = scmp.eq.s32.totalorder %s2714_s10, 0  ;;  %p2284_p12 = scmp.lt.s32.totalorder %s2714_s10, 2 }
  0x7e   : > { %s3390_s27 = smov (%p40_p9, %s38_s27), 0  ;;  %s2947_s17 = sand.u32 1, %s2702_s29  }
  0x7f   : > { %p56_p13 = por %p55_p5, %p54_p4  ;;  %s42_s15 = ssub.s32 %s2710_s9, %s3390_s27 }
  0x80   : > { %p45_p0 = scmp.eq.s32.totalorder %s42_s15, 0  ;;  %s1932_s18 = sshll.u32 %s2947_s17, 6 }
  0x81   : > { %s2039_s26 = sshll.u32 %s2710_s9, 10  ;;  %s3372_s0 = sld [smem:[#allocation18_spill]] }
  0x82   : > { %s2954_s20 = scalar_select %p45_p0, %s2702_s29, %s47_s25  }
  0x83   : > { %s326_s30 = scalar_lea.vmem [#allocation2], %s1932_s18  ;;  %p2965_p7 = pnand %p2284_p12, %p56_p13 }
  0x84   : > { %s335_s24 = sshll.u32 %s326_s30, 4  ;;  %s323_s25 = scalar_lea.sflag [#allocation3], %s2947_s17  ;;  %s2961_s24 = int_to_ptr.vmem [resolvable:$true] %s335_s24 }
  0x85   : > { %p2590_p3 = pneg %p2965_p7 }
  0x87   : > { %s2959_s21 = scalar_lea.hbm %s3372_s0, %s2039_s26  ;;  %s2593_s16 = scalar_lea.hbm %s3372_s0, 2048 }
  0x88   : > { %s2588_s15 = scalar_lea.hbm %s2959_s21, 1024  ;;  %p2594_p10 = scmp.lt.u32.totalorder %s2959_s21, %s3372_s0 }
  0x89   : > { %p2589_p2 = scmp.ne.s32.totalorder %s2959_s21, %s2588_s15  ;;  %p2595_p1 = scmp.lt.u32.totalorder %s2593_s16, %s2588_s15 }
  0x8a   : > { %p2597_p9 = scmp.lt.u32.totalorder %s2588_s15, %s2959_s21 }
  0x8b   : > { %p2591_p6 = pnand %p2590_p3, %p2589_p2  ;;  %p2596_p11 = por %p2595_p1, %p2594_p10 }
  0x8d   : > { %p2592_p8 = pneg %p2591_p6  ;;  %p2598_p4 = por %p2597_p9, %p2596_p11 }
  0x8f   : > { %p2599_p5 = pnand %p2598_p4, %p2592_p8 }
  0x91   : > { %2602 = shalt.err (!%p2599_p5)
}
  0x92   : > { %s2603_s19 = scalar_lea.vmem %s2961_s24, 1024  ;;  %s2724_s18 = smov [#allocation2]  }
  0x93   : > { %p2604_p12 = scmp.ne.s32.totalorder %s2961_s24, %s2603_s19  ;;  %s2608_s26 = sshll.u32 %s2724_s18, 4  ;;  %s2609_s26 = int_to_ptr.vmem [resolvable:$false] %s2608_s26 }
  0x94   : > { %s2610_s11 = scalar_lea.vmem %s2609_s26, 2048  ;;  %p2611_p2 = scmp.lt.s32.totalorder %s2961_s24, %s2609_s26 }
  0x95   : > { %p2606_p13 = pnand %p2604_p12, %p2590_p3  ;;  %p2612_p6 = scmp.lt.s32.totalorder %s2610_s11, %s2603_s19 }
  0x97   : > { %p2607_p0 = pneg %p2606_p13  ;;  %p2613_p10 = por %p2612_p6, %p2611_p2 }
  0x99   : > { %p2614_p1 = pnand %p2613_p10, %p2607_p0 }
  0x9b   : > { %2617 = shalt.err (!%p2614_p1)
}
  0x9c   : > { %s2725_s15 = smov 64   ;;  %s2726_s16 = smov 4  }
  0x9d   : > { %2276 = dma.hbm_to_vmem [thread:$0]  (!%p2965_p7), %s2959_s21, 1024, %s2961_s24, %s323_s25, %s2725_s15, %s2725_s15, %s2726_s16  }
  0x9e   : > { %s1935_s30 = sshll.u32 %s2947_s17, 4  ;;  %s2040_s18 = sshll.u32 %s2710_s9, 8 }
  0x9f   : > { %s3003_s11 = scalar_lea.hbm %s3340_s1, %s2040_s18  ;;  %s349_s8 = scalar_lea.vmem [#allocation4], %s1935_s30 }
  0xa0   : > { %s358_s23 = sshll.u32 %s349_s8, 4  ;;  %s3374_s0 = sand.u32 1, %s2714_s10   ;;  %s3005_s23 = int_to_ptr.vmem [resolvable:$true] %s358_s23 }
  0xa1   : > { %s3009_s2 = scalar_lea.sflag [#allocation5], %s3374_s0  ;;  %s2618_s3 = scalar_lea.hbm %s3003_s11, 256 }
  0xa2   : > { %p2619_p8 = scmp.ne.s32.totalorder %s3003_s11, %s2618_s3  ;;  %s2623_s24 = scalar_lea.hbm %s3340_s1, 512 }
  0xa3   : > { %p2624_p4 = scmp.lt.u32.totalorder %s3003_s11, %s3340_s1  ;;  %p2625_p5 = scmp.lt.u32.totalorder %s2623_s24, %s2618_s3 }
  0xa4   : > { %p2621_p11 = pnand %p2619_p8, %p2590_p3  ;;  %p2627_p13 = scmp.lt.u32.totalorder %s2618_s3, %s3003_s11 }
  0xa5   : > { %p2626_p12 = por %p2625_p5, %p2624_p4 }
  0xa6   : > { %p2622_p9 = pneg %p2621_p11 }
  0xa7   : > { %p2628_p0 = por %p2627_p13, %p2626_p12 }
  0xa9   : > { %p2629_p2 = pnand %p2628_p0, %p2622_p9 }
  0xab   : > { %2632 = shalt.err (!%p2629_p2)
}
  0xac   : > { %s2633_s0 = scalar_lea.vmem %s3005_s23, 256  ;;  %s2727_s8 = smov [#allocation4]  }
  0xad   : > { %p2634_p6 = scmp.ne.s32.totalorder %s3005_s23, %s2633_s0  ;;  %s2638_s16 = sshll.u32 %s2727_s8, 4  ;;  %s2639_s16 = int_to_ptr.vmem [resolvable:$false] %s2638_s16 }
  0xae   : > { %s2640_s30 = scalar_lea.vmem %s2639_s16, 512  ;;  %p2641_p8 = scmp.lt.s32.totalorder %s3005_s23, %s2639_s16 }
  0xaf   : > { %p2636_p10 = pnand %p2634_p6, %p2590_p3  ;;  %p2642_p11 = scmp.lt.s32.totalorder %s2640_s30, %s2633_s0 }
  0xb1   : > { %p2637_p1 = pneg %p2636_p10  ;;  %p2643_p4 = por %p2642_p11, %p2641_p8 }
  0xb3   : > { %p2644_p5 = pnand %p2643_p4, %p2637_p1 }
  0xb5   : > { %2647 = shalt.err (!%p2644_p5)
}
  0xb6   : > { %s3375_s3 = smov 8   ;;  %s3376_s18 = smov 128  }
  0xb7   : > { %2279 = dma.hbm_to_vmem [thread:$0]  (!%p2965_p7), %s3003_s11, 256, %s3005_s23, %s3009_s2, %s3376_s18, %s3376_s18, %s3375_s3  }
  0xb8   : > { %p3377_p3 = scmp.ne.s32.totalorder %s3365_s14, 0 }
  0xb9   : > { %s372_s26 = sand.u32 (!%p3377_p3), 1, %s2698_s28   ;;  %p3378_p9 = scmp.ne.s32.totalorder (!%p3377_p3), %s3364_s13, 0 }
  0xba   : > { %370 = sbr.rel (%p3377_p3) target bundleno = 1348 (0x544), region = 52  ;;  %s1939_s19 = sshll.u32 (!%p3377_p3), %s372_s26, 6 }
  0xbb   : > { %s373_s17 = scalar_lea.sflag (!%p3377_p3), [#allocation3], %s372_s26  ;;  %s3041_s21 = scalar_lea.vmem (!%p3377_p3), [#allocation2], %s1939_s19 }
  0xc1   : > { %2673 = dma.done.wait (%p3378_p9), %s373_s17, 1024  }
  0xc2   : > { %2675 = vsyncadd (%p3378_p9), %s373_s17, 4294966272  ;;  %s3379_s22 = sadd.s32 4294967295, %s2714_s10   ;;  %s1940_s2 = sshll.u32 %s372_s26, 4 }
  0xc3   : > { %s381_s24 = sand.u32 1, %s3379_s22   ;;  %s3049_s14 = scalar_lea.vmem [#allocation4], %s1940_s2 }
  0xc4   : > { %s382_s23 = scalar_lea.sflag [#allocation5], %s381_s24 }
  0xc5   : > { %2677 = dma.done.wait (%p3378_p9), %s382_s23, 256  }
  0xc6   : > { %2679 = vsyncadd (%p3378_p9), %s382_s23, 4294967040  ;;  %p3380_p7 = scmp.ne.s32.totalorder %s3363_s12, 0 }
  0xc8   : > { %2681 = dma.done.wait (%p3380_p7), [#allocation5], 576  }
  0xc9   : > { %2683 = vsyncadd (%p3380_p7), [#allocation5], 4294966720 }
  0xca   : > { %2685 = dma.done.wait (%p3380_p7), [#allocation8], 560  }
  0xcb   : > { %2687 = vsyncadd (%p3380_p7), [#allocation8], 4294966736 }
  0xcc   : > { %2689 = dma.done.wait (%p3380_p7), [#allocation11], 3072  }
  0xcd   : > { %2691 = vsyncadd (%p3380_p7), [#allocation11], 4294964224  ;;  %v2728_v0 = vmov 0   ;;  %vm655_vm0 = vcmask 1040384   ;;  %vm656_vm1 = vcmask 1041408   ;;  %v2729_v1 = vmov 65535  }
  0xce   : > { %700 = vmatprep.mubr.bf16.mxu1 %v2728_v0  ;;  %532 = vmatprep.mubr.bf16.mxu0 %v2728_v0  ;;  %v657_v2 = vsel %vm655_vm0, 4294967295, %v2729_v1  ;;  %v2351_v3 = vld [vmem:[#allocation6 + $0x4] ss:$12 sps:$4 sm:$0xff]   ;;  %v2353_v4 = vld [vmem:[#allocation6] ss:$12 sps:$4 sm:$0xff]   ;;  %vm630_vm2 = vcmask 154624   ;;  %v551_v46 = vlaneseq }
  0xcf   : > { %v658_v5 = vsel %vm656_vm1, %v657_v2, 0  ;;  %668 = vmatprep.subr.bf16.mxu1 %v2351_v3  ;;  %v2354_v6 = vld [vmem:[#allocation9 + $0x4] ss:$8 sps:$4 sm:$0xff]   ;;  %v2356_v7 = vld [vmem:[#allocation9] ss:$8 sps:$4 sm:$0xff]   ;;  %v2362_v17 = vld [vmem:[%s3041_s21] sm:$0xff]  }
  0xd0   : > { %v547_v8 = vld [vmem:[#allocation6 + $0x18] sm:$0x33]  ;;  %669 = vmatpush1.bf16.msra.mxu1 %v2353_v4  ;;  %500 = vmatprep.subr.bf16.mxu0 %v2354_v6  ;;  %v3070_v15 = vld [vmem:[%s3049_s14] sm:$0xff]  ;;  %vm496_vm3 = vcmask 261120   ;;  %v2363_v21 = vld [vmem:[%s3041_s21 + $0x8] sm:$0xff]   ;;  %v2730_v38 = vmov 0.0  }
  0xd1   : > { %v1964_v9 = vcombine.high %v547_v8, %v547_v8  ;;  %v1963_v10 = vcombine.low %v547_v8, %v547_v8  ;;  %v2359_v11 = vld [vmem:[#allocation9 + $0x14] ss:$8 sps:$4 sm:$0xff]   ;;  %501 = vmatpush1.bf16.msra.mxu0 %v2356_v7  ;;  %v2361_v14 = vld [vmem:[#allocation9 + $0x10] ss:$8 sps:$4 sm:$0xff]   ;;  %v2370_v19 = vld [vmem:[#allocation6 + $0x8] ss:$12 sps:$4 sm:$0xff]  }
  0xd2   : > { %v3073_v16 = vld [vmem:[%s3049_s14 + $0x8] sm:$0xff]  ;;  %502 = vmatprep.subr.bf16.mxu0 %v2359_v11  ;;  %v2371_v20 = vld [vmem:[#allocation6 + $0x20] ss:$0 sps:$4 sm:$0x33]   ;;  %v2364_v25 = vld [vmem:[%s3041_s21 + $0x10] sm:$0xff]   ;;  %vm2731_vm4 = vmmov 0  }
  0xd3   : > { %v663_v12 = vand.u32 %v1964_v9, %v658_v5  ;;  %v660_v13 = vand.u32 %v1963_v10, %v658_v5  ;;  %v471_v18 = vpack.c.bf16 %v3073_v16, %v3070_v15  ;;  %v666_v22 = vand.u32 %v2371_v20, %v658_v5  ;;  %v2372_v23 = vld [vmem:[#allocation10] ss:$12 sps:$4 sm:$0xff]   ;;  %v2373_v24 = vld [vmem:[#allocation10 + $0x18] ss:$12 sps:$4 sm:$0xff]   ;;  %v2374_v26 = vld [vmem:[#allocation10 + $0x30] ss:$12 sps:$4 sm:$0xff]  }
  0xd4   : > { %v2365_v27 = vld [vmem:[%s3041_s21 + $0x18] sm:$0xff]   ;;  %v2366_v28 = vld [vmem:[%s3041_s21 + $0x20] sm:$0xff]   ;;  %v2367_v29 = vld [vmem:[%s3041_s21 + $0x28] sm:$0xff]   ;;  %v3120_v47 = vshrl.u32 %v551_v46, 7  ;;  %s3381_s18 = sld [smem:[#allocation17_spill]]  ;;  %vm1763_vm5 = vcmask 130048  }
  0xd5   : > { %670 = vmatprep.subr.bf16.mxu1 %v663_v12  ;;  %503 = vmatpush1.bf16.msra.mxu0 %v2361_v14  ;;  %v2368_v30 = vld [vmem:[%s3041_s21 + $0x30] sm:$0xff]   ;;  %v2369_v31 = vld [vmem:[%s3041_s21 + $0x38] sm:$0xff]   ;;  %v2377_v34 = vld [vmem:[#allocation10 + $0x78] ss:$12 sps:$4 sm:$0xff]   ;;  %s3382_s21 = sld [smem:[#allocation21_spill]] }
  0xd6   : > { %671 = vmatpush1.bf16.msra.mxu1 %v660_v13  ;;  %2096 = vmatprep.subr.bf16.mxu0 %v2370_v19  ;;  %v2375_v32 = vld [vmem:[#allocation10 + $0x48] ss:$12 sps:$4 sm:$0xff]   ;;  %v2376_v33 = vld [vmem:[#allocation10 + $0x60] ss:$12 sps:$4 sm:$0xff]   ;;  %v2378_v35 = vld [vmem:[#allocation10 + $0x90] ss:$12 sps:$4 sm:$0xff]  }
  0xd7   : > { %v2379_v36 = vld [vmem:[#allocation10 + $0xa8] ss:$12 sps:$4 sm:$0xff]   ;;  %v2380_v37 = vld [vmem:[#allocation10 + $0x4] ss:$12 sps:$4 sm:$0xff]   ;;  %2168 = vmatprep.subr.bf16.mxu1 %v2730_v38  ;;  %v2383_v41 = vld [vmem:[#allocation10 + $0x4c] ss:$12 sps:$4 sm:$0xff]  }
  0xd8   : > { %1951 = vmatmul.mubr.msk.bf16.vlgmr.msra.gmra.mrb[0].mxu0 %vm496_vm3, %v471_v18  ;;  %v2381_v39 = vld [vmem:[#allocation10 + $0x1c] ss:$12 sps:$4 sm:$0xff]   ;;  %v2382_v40 = vld [vmem:[#allocation10 + $0x34] ss:$12 sps:$4 sm:$0xff]   ;;  %v2384_v42 = vld [vmem:[#allocation10 + $0x64] ss:$12 sps:$4 sm:$0xff]  }
  0xd9   : > { %1966 = vmatmul.mubr.msk.bf16.vlgmr.msra.gmra.mrb[0].mxu1 %vm630_vm2, %v2362_v17  ;;  %2100 = vmatprep.mubr.msk.bf16.mxu0 %vm630_vm2, %v2362_v17  ;;  %v2385_v43 = vld [vmem:[#allocation10 + $0x7c] ss:$12 sps:$4 sm:$0xff]   ;;  %v2386_v44 = vld [vmem:[#allocation10 + $0x94] ss:$12 sps:$4 sm:$0xff]   ;;  %v2387_v45 = vld [vmem:[#allocation10 + $0xac] ss:$12 sps:$4 sm:$0xff]  }
  0xda   : > { %710 = vmatprep.mubr.bf16.mxu1 %v2728_v0  ;;  %2097 = vmatpush3.bf16.msra.mxu0 %v2370_v19  ;;  %v553_v48 = vsub.s32 0, %v3120_v47  ;;  %v3123_v49 = vld [vmem:[#allocation7] sm:$0x7]  ;;  %v557_v50 = vsub.s32 1, %v3120_v47  ;;  %p444_p12 = scmp.lt.s32.totalorder %s3381_s18, 1 }
  0xdb   : > { %2098 = vmatprep.subr.bf16.mxu0 %v666_v22  ;;  %2169 = vmatpush3.bf16.msra.mxu1 %v2380_v37 }
  0xdc   : > { %2170 = vmatprep.subr.bf16.mxu1 %v2730_v38  ;;  %v3127_v51 = vrot.slane %v3123_v49, %v553_v48  ;;  %v3130_v52 = vrot.slane %v3123_v49, %v557_v50  ;;  %s3392_s18 = smov (!%p444_p12, %s3381_s18), 1 }
  0xdd   : > { %s2041_s26 = sshll.u32 %s3392_s18, 5 }
  0xde   : > { %2099 = vmatpush3.bf16.msra.mxu0 %v666_v22  ;;  %s451_s22 = scalar_lea.vmem %s3382_s21, %s2041_s26 }
  0xdf   : > { %2116 = vmatprep.subr.bf16.mxu0 %v2372_v23  ;;  %2171 = vmatpush3.bf16.msra.mxu1 %v2381_v39 }
  0xe0   : > { %2172 = vmatprep.subr.bf16.mxu1 %v2730_v38 }
  0xe1   : > { %1967 = vmatmul.mubr.msk.bf16.gmra.mrb[4].mxu1 %vm630_vm2, %v2363_v21  ;;  %2101 = vmatmul.mubr.msk.bf16.vlgmr.msra.gmra.mrb[4].mxu0 %vm630_vm2, %v2363_v21 }
  0xe2   : > { %720 = vmatprep.mubr.bf16.mxu1 %v2728_v0  ;;  %2117 = vmatpush3.bf16.msra.mxu0 %v2372_v23 }
  0xe3   : > { %2104 = vmatprep.mubr.msk.bf16.mxu0 %vm630_vm2, %v2364_v25  ;;  %2118 = vmatprep.subr.bf16.mxu0 %v2373_v24 }
  0xe4   : > { %2173 = vmatpush3.bf16.msra.mxu1 %v2382_v40 }
  0xe5   : > { %2174 = vmatprep.subr.bf16.mxu1 %v2730_v38 }
  0xe6   : > { %2119 = vmatpush3.bf16.msra.mxu0 %v2373_v24 }
  0xe7   : > { %2120 = vmatprep.subr.bf16.mxu0 %v2374_v26 }
  0xe8   : > { %2175 = vmatpush3.bf16.msra.mxu1 %v2383_v41 }
  0xe9   : > { %1968 = vmatmul.mubr.msk.bf16.gmra.mrb[8].mxu1 %vm630_vm2, %v2364_v25  ;;  %2105 = vmatmul.mubr.msk.bf16.gmra.mrb[8].mxu0 %vm630_vm2, %v2365_v27 }
  0xea   : > { %730 = vmatprep.mubr.bf16.mxu1 %v2728_v0  ;;  %2121 = vmatpush3.bf16.msra.mxu0 %v2374_v26 }
  0xeb   : > { %2108 = vmatprep.mubr.msk.bf16.mxu0 %vm630_vm2, %v2366_v28  ;;  %2122 = vmatprep.subr.bf16.mxu0 %v2375_v32 }
  0xec   : > { %2176 = vmatprep.subr.bf16.mxu1 %v2730_v38 }
  0xed   : > { %2177 = vmatpush3.bf16.msra.mxu1 %v2384_v42 }
  0xee   : > { %2123 = vmatpush3.bf16.msra.mxu0 %v2375_v32  ;;  %2178 = vmatprep.subr.bf16.mxu1 %v2730_v38 }
  0xef   : > { %2124 = vmatprep.subr.bf16.mxu0 %v2376_v33 }
  0xf1   : > { %1969 = vmatmul.mubr.msk.bf16.gmra.mrb[12].mxu1 %vm630_vm2, %v2365_v27  ;;  %2109 = vmatmul.mubr.msk.bf16.gmra.mrb[12].mxu0 %vm630_vm2, %v2367_v29 }
  0xf2   : > { %740 = vmatprep.mubr.bf16.mxu1 %v2728_v0  ;;  %2112 = vmatprep.mubr.msk.bf16.mxu0 %vm630_vm2, %v2368_v30 }
  0xf3   : > { %2125 = vmatpush3.bf16.msra.mxu0 %v2376_v33  ;;  %2179 = vmatpush3.bf16.msra.mxu1 %v2385_v43 }
  0xf4   : > { %2126 = vmatprep.subr.bf16.mxu0 %v2377_v34  ;;  %2180 = vmatprep.subr.bf16.mxu1 %v2730_v38 }
  0xf7   : > { %2127 = vmatpush3.bf16.msra.mxu0 %v2377_v34  ;;  %2181 = vmatpush3.bf16.msra.mxu1 %v2386_v44 }
  0xf8   : > { %2128 = vmatprep.subr.bf16.mxu0 %v2378_v35  ;;  %2182 = vmatprep.subr.bf16.mxu1 %v2730_v38 }
  0xf9   : > { %1970 = vmatmul.mubr.msk.bf16.gmra.mrb[16].mxu1 %vm630_vm2, %v2366_v28  ;;  %2113 = vmatmul.mubr.msk.bf16.gmra.mrb[16].mxu0 %vm630_vm2, %v2369_v31 }
  0xfa   : > { %750 = vmatprep.mubr.bf16.mxu1 %v2728_v0 }
  0xfb   : > { %2129 = vmatpush3.bf16.msra.mxu0 %v2378_v35  ;;  %2183 = vmatpush3.bf16.msra.mxu1 %v2387_v45 }
  0xfc   : > { %2130 = vmatprep.subr.bf16.mxu0 %v2379_v36  ;;  %2188 = vmatprep.subr.bf16.mxu1 %v2730_v38 }
  0xff   : > { %2131 = vmatpush3.bf16.msra.mxu0 %v2379_v36 }
 0x101   : > { %1971 = vmatmul.mubr.msk.bf16.gmra.mrb[20].mxu1 %vm630_vm2, %v2367_v29 }
 0x102   : > { %760 = vmatprep.mubr.bf16.mxu1 %v2728_v0 }
 0x109   : > { %1972 = vmatmul.mubr.msk.bf16.gmra.mrb[24].mxu1 %vm630_vm2, %v2368_v30 }
 0x10a   : > { %770 = vmatprep.mubr.bf16.mxu1 %v2728_v0 }
 0x111   : > { %1973 = vmatmul.mubr.msk.bf16.gmra.mrb[28].mxu1 %vm630_vm2, %v2369_v31 }
 0x112   : > { %2184 = vmatprep.mubr.msk.bf16.mxu1 %vm2731_vm4, %v2730_v38 }
 0x1ab   : > { %v3133_v56 = vpop.f32.mrb[0].mxu0 }
 0x1ac   : > { %v702_v53 = vpop.f32.mrb[0].mxu1  ;;  %v3136_v59 = vpop.f32.mrb[1].mxu0 }
 0x1ad   : > { %v703_v54 = vadd.f32 %v702_v53, %v3127_v51  ;;  %v704_v55 = vpop.f32.mrb[1].mxu1  ;;  %v3139_v62 = vpop.f32.mrb[2].mxu0 }
 0x1ae   : > { %v705_v57 = vadd.f32 %v704_v55, %v3130_v52  ;;  %v706_v58 = vpop.f32.mrb[2].mxu1  ;;  %v3143_v1 = vpop.f32.mrb[3].mxu0 }
 0x1af   : > { %v707_v60 = vadd.f32 %v706_v58, %v3127_v51  ;;  %v708_v61 = vpop.f32.mrb[3].mxu1  ;;  %v878_v63 = vadd.f32 %v703_v54, %v3133_v56 }
 0x1b0   : > { %v709_v0 = vadd.f32 %v708_v61, %v3130_v52  ;;  %v1359_v2 = vadd.f32 %v705_v57, %v3136_v59 }
 0x1b1   : > { %v879_v3 = vadd.f32 %v707_v60, %v3139_v62  ;;  %v894_v4 = vmul.f32 0.1, %v878_v63 }
 0x1b2   : > { %v1360_v5 = vadd.f32 %v709_v0, %v3143_v1  ;;  %v1375_v6 = vmul.f32 0.1, %v1359_v2 }
 0x1b3   : > { %v895_v7 = vmul.f32 0.1, %v879_v3  ;;  %v910_v12 = vmax.f32 %v878_v63, %v894_v4 }
 0x1b4   : > { %v712_v8 = vpop.f32.mrb[4].mxu1  ;;  %v1376_v9 = vmul.f32 0.1, %v1360_v5  ;;  %v1391_v18 = vmax.f32 %v1359_v2, %v1375_v6 }
 0x1b5   : > { %v713_v10 = vadd.f32 %v712_v8, %v3127_v51  ;;  %v714_v11 = vpop.f32.mrb[5].mxu1  ;;  %v911_v13 = vmax.f32 %v879_v3, %v895_v7 }
 0x1b6   : > { %v715_v14 = vadd.f32 %v714_v11, %v3130_v52  ;;  %v716_v17 = vpop.f32.mrb[6].mxu1  ;;  %v1392_v19 = vmax.f32 %v1360_v5, %v1376_v9 }
 0x1b7   : > { %v880_v20 = vadd.f32 %v713_v10, %v3133_v56  ;;  %v717_v21 = vadd.f32 %v716_v17, %v3127_v51  ;;  %v718_v22 = vpop.f32.mrb[7].mxu1  ;;  %v926_v23 = vpack.c.bf16 %v911_v13, %v910_v12 }
 0x1b8   : > { %v1361_v24 = vadd.f32 %v715_v14, %v3136_v59  ;;  %v719_v25 = vadd.f32 %v718_v22, %v3130_v52  ;;  %v3154_v26 = vpack.c.bf16 %v1392_v19, %v1391_v18 }
 0x1b9   : > { %v896_v27 = vmul.f32 0.1, %v880_v20  ;;  %v881_v28 = vadd.f32 %v717_v21, %v3139_v62  ;;  %2132 = vmatprep.mubr.bf16.mxu0 %v926_v23 }
 0x1ba   : > { %v1377_v29 = vmul.f32 0.1, %v1361_v24  ;;  %v1362_v30 = vadd.f32 %v719_v25, %v3143_v1 }
 0x1bb   : > { %v897_v31 = vmul.f32 0.1, %v881_v28  ;;  %v912_v34 = vmax.f32 %v880_v20, %v896_v27 }
 0x1bc   : > { %v1378_v32 = vmul.f32 0.1, %v1362_v30  ;;  %v722_v33 = vpop.f32.mrb[8].mxu1  ;;  %v1393_v39 = vmax.f32 %v1361_v24, %v1377_v29 }
 0x1bd   : > { %v913_v35 = vmax.f32 %v881_v28, %v897_v31  ;;  %v723_v36 = vadd.f32 %v722_v33, %v3127_v51  ;;  %v724_v37 = vpop.f32.mrb[9].mxu1 }
 0x1be   : > { %v1394_v40 = vmax.f32 %v1362_v30, %v1378_v32  ;;  %v725_v41 = vadd.f32 %v724_v37, %v3130_v52  ;;  %v726_v42 = vpop.f32.mrb[10].mxu1 }
 0x1bf   : > { %v927_v43 = vpack.c.bf16 %v913_v35, %v912_v34  ;;  %v882_v44 = vadd.f32 %v723_v36, %v3133_v56  ;;  %v727_v45 = vadd.f32 %v726_v42, %v3127_v51  ;;  %v728_v46 = vpop.f32.mrb[11].mxu1 }
 0x1c0   : > { %v3162_v48 = vpack.c.bf16 %v1394_v40, %v1393_v39  ;;  %v1363_v50 = vadd.f32 %v725_v41, %v3136_v59  ;;  %v729_v53 = vadd.f32 %v728_v46, %v3130_v52 }
 0x1c1   : > { %v898_v54 = vmul.f32 0.1, %v882_v44  ;;  %v883_v55 = vadd.f32 %v727_v45, %v3139_v62  ;;  %2133 = vmatmul.mubr.bf16.vlgmr.msra.gmra.mrb[20].mxu0 %v927_v43 }
 0x1c2   : > { %v1379_v57 = vmul.f32 0.1, %v1363_v50  ;;  %v1364_v58 = vadd.f32 %v729_v53, %v3143_v1 }
 0x1c3   : > { %v899_v60 = vmul.f32 0.1, %v883_v55  ;;  %v914_v0 = vmax.f32 %v882_v44, %v898_v54 }
 0x1c4   : > { %v1380_v61 = vmul.f32 0.1, %v1364_v58  ;;  %v732_v63 = vpop.f32.mrb[12].mxu1  ;;  %v1395_v5 = vmax.f32 %v1363_v50, %v1379_v57 }
 0x1c5   : > { %v915_v2 = vmax.f32 %v883_v55, %v899_v60  ;;  %v733_v3 = vadd.f32 %v732_v63, %v3127_v51  ;;  %v734_v4 = vpop.f32.mrb[13].mxu1 }
 0x1c6   : > { %v1396_v6 = vmax.f32 %v1364_v58, %v1380_v61  ;;  %v735_v7 = vadd.f32 %v734_v4, %v3130_v52  ;;  %v736_v8 = vpop.f32.mrb[14].mxu1 }
 0x1c7   : > { %v884_v9 = vadd.f32 %v733_v3, %v3133_v56  ;;  %v737_v10 = vadd.f32 %v736_v8, %v3127_v51  ;;  %v738_v11 = vpop.f32.mrb[15].mxu1  ;;  %v928_v12 = vpack.c.bf16 %v915_v2, %v914_v0 }
 0x1c8   : > { %v3172_v13 = vpack.c.bf16 %v1396_v6, %v1395_v5  ;;  %v1365_v14 = vadd.f32 %v735_v7, %v3136_v59  ;;  %v739_v17 = vadd.f32 %v738_v11, %v3130_v52 }
 0x1c9   : > { %v900_v18 = vmul.f32 0.1, %v884_v9  ;;  %v885_v19 = vadd.f32 %v737_v10, %v3139_v62  ;;  %2136 = vmatprep.mubr.bf16.mxu0 %v928_v12 }
 0x1ca   : > { %v1381_v20 = vmul.f32 0.1, %v1365_v14  ;;  %v1366_v21 = vadd.f32 %v739_v17, %v3143_v1 }
 0x1cb   : > { %v901_v22 = vmul.f32 0.1, %v885_v19  ;;  %v916_v25 = vmax.f32 %v884_v9, %v900_v18 }
 0x1cc   : > { %v1382_v23 = vmul.f32 0.1, %v1366_v21  ;;  %v742_v24 = vpop.f32.mrb[16].mxu1  ;;  %v1397_v30 = vmax.f32 %v1365_v14, %v1381_v20 }
 0x1cd   : > { %v917_v27 = vmax.f32 %v885_v19, %v901_v22  ;;  %v743_v28 = vadd.f32 %v742_v24, %v3127_v51  ;;  %v744_v29 = vpop.f32.mrb[17].mxu1 }
 0x1ce   : > { %v1398_v31 = vmax.f32 %v1366_v21, %v1382_v23  ;;  %v745_v32 = vadd.f32 %v744_v29, %v3130_v52  ;;  %v746_v33 = vpop.f32.mrb[18].mxu1 }
 0x1cf   : > { %v886_v34 = vadd.f32 %v743_v28, %v3133_v56  ;;  %v747_v35 = vadd.f32 %v746_v33, %v3127_v51  ;;  %v748_v36 = vpop.f32.mrb[19].mxu1  ;;  %v929_v37 = vpack.c.bf16 %v917_v27, %v916_v25 }
 0x1d0   : > { %v3182_v39 = vpack.c.bf16 %v1398_v31, %v1397_v30  ;;  %v1367_v40 = vadd.f32 %v745_v32, %v3136_v59  ;;  %v749_v41 = vadd.f32 %v748_v36, %v3130_v52 }
 0x1d1   : > { %v902_v42 = vmul.f32 0.1, %v886_v34  ;;  %v887_v43 = vadd.f32 %v747_v35, %v3139_v62  ;;  %2137 = vmatmul.mubr.bf16.gmra.mrb[24].mxu0 %v929_v37 }
 0x1d2   : > { %v1383_v44 = vmul.f32 0.1, %v1367_v40  ;;  %v1368_v45 = vadd.f32 %v749_v41, %v3143_v1 }
 0x1d3   : > { %v903_v46 = vmul.f32 0.1, %v887_v43  ;;  %v918_v54 = vmax.f32 %v886_v34, %v902_v42 }
 0x1d4   : > { %v1384_v50 = vmul.f32 0.1, %v1368_v45  ;;  %v752_v53 = vpop.f32.mrb[20].mxu1  ;;  %v1399_v60 = vmax.f32 %v1367_v40, %v1383_v44 }
 0x1d5   : > { %v919_v55 = vmax.f32 %v887_v43, %v903_v46  ;;  %v753_v57 = vadd.f32 %v752_v53, %v3127_v51  ;;  %v754_v58 = vpop.f32.mrb[21].mxu1 }
 0x1d6   : > { %v1400_v61 = vmax.f32 %v1368_v45, %v1384_v50  ;;  %v755_v63 = vadd.f32 %v754_v58, %v3130_v52  ;;  %v756_v0 = vpop.f32.mrb[22].mxu1 }
 0x1d7   : > { %v888_v2 = vadd.f32 %v753_v57, %v3133_v56  ;;  %v757_v3 = vadd.f32 %v756_v0, %v3127_v51  ;;  %v758_v4 = vpop.f32.mrb[23].mxu1  ;;  %v930_v5 = vpack.c.bf16 %v919_v55, %v918_v54 }
 0x1d8   : > { %v1411_v6 = vpack.c.bf16 %v1400_v61, %v1399_v60  ;;  %v1369_v7 = vadd.f32 %v755_v63, %v3136_v59  ;;  %v759_v8 = vadd.f32 %v758_v4, %v3130_v52 }
 0x1d9   : > { %v904_v9 = vmul.f32 0.1, %v888_v2  ;;  %v889_v10 = vadd.f32 %v757_v3, %v3139_v62  ;;  %2140 = vmatprep.mubr.bf16.mxu0 %v930_v5 }
 0x1da   : > { %v1415_v11 = vmax.bf16 %v1411_v6, %v3154_v26  ;;  %v1385_v12 = vmul.f32 0.1, %v1369_v7  ;;  %v1370_v14 = vadd.f32 %v759_v8, %v3143_v1 }
 0x1db   : > { %v905_v17 = vmul.f32 0.1, %v889_v10  ;;  %v920_v20 = vmax.f32 %v888_v2, %v904_v9 }
 0x1dc   : > { %v1386_v18 = vmul.f32 0.1, %v1370_v14  ;;  %v762_v19 = vpop.f32.mrb[24].mxu1  ;;  %v1401_v24 = vmax.f32 %v1369_v7, %v1385_v12 }
 0x1dd   : > { %v921_v21 = vmax.f32 %v889_v10, %v905_v17  ;;  %v763_v22 = vadd.f32 %v762_v19, %v3127_v51  ;;  %v764_v23 = vpop.f32.mrb[25].mxu1 }
 0x1de   : > { %v1402_v25 = vmax.f32 %v1370_v14, %v1386_v18  ;;  %v765_v27 = vadd.f32 %v764_v23, %v3130_v52  ;;  %v766_v28 = vpop.f32.mrb[26].mxu1 }
 0x1df   : > { %v890_v29 = vadd.f32 %v763_v22, %v3133_v56  ;;  %v767_v26 = vadd.f32 %v766_v28, %v3127_v51  ;;  %v768_v30 = vpop.f32.mrb[27].mxu1  ;;  %v931_v31 = vpack.c.bf16 %v921_v21, %v920_v20 }
 0x1e0   : > { %v1412_v32 = vpack.c.bf16 %v1402_v25, %v1401_v24  ;;  %v1371_v33 = vadd.f32 %v765_v27, %v3136_v59  ;;  %v769_v34 = vadd.f32 %v768_v30, %v3130_v52 }
 0x1e1   : > { %v906_v35 = vmul.f32 0.1, %v890_v29  ;;  %v891_v36 = vadd.f32 %v767_v26, %v3139_v62  ;;  %2141 = vmatmul.mubr.bf16.gmra.mrb[28].mxu0 %v931_v31 }
 0x1e2   : > { %v1416_v37 = vmax.bf16 %v1412_v32, %v3162_v48  ;;  %v1387_v40 = vmul.f32 0.1, %v1371_v33  ;;  %v1372_v41 = vadd.f32 %v769_v34, %v3143_v1 }
 0x1e3   : > { %v907_v42 = vmul.f32 0.1, %v891_v36  ;;  %v922_v46 = vmax.f32 %v890_v29, %v906_v35 }
 0x1e4   : > { %v1419_v43 = vmax.bf16 %v1416_v37, %v1415_v11  ;;  %v1388_v44 = vmul.f32 0.1, %v1372_v41  ;;  %v772_v45 = vpop.f32.mrb[28].mxu1  ;;  %v1403_v55 = vmax.f32 %v1371_v33, %v1387_v40 }
 0x1e5   : > { %v923_v50 = vmax.f32 %v891_v36, %v907_v42  ;;  %v773_v53 = vadd.f32 %v772_v45, %v3127_v51  ;;  %v774_v54 = vpop.f32.mrb[29].mxu1 }
 0x1e6   : > { %v1404_v57 = vmax.f32 %v1372_v41, %v1388_v44  ;;  %v775_v58 = vadd.f32 %v774_v54, %v3130_v52  ;;  %v776_v60 = vpop.f32.mrb[30].mxu1 }
 0x1e7   : > { %v892_v61 = vadd.f32 %v773_v53, %v3133_v56  ;;  %v777_v48 = vadd.f32 %v776_v60, %v3127_v51  ;;  %v778_v63 = vpop.f32.mrb[31].mxu1  ;;  %v932_v0 = vpack.c.bf16 %v923_v50, %v922_v46 }
 0x1e8   : > { %v1413_v2 = vpack.c.bf16 %v1404_v57, %v1403_v55  ;;  %v1373_v3 = vadd.f32 %v775_v58, %v3136_v59  ;;  %v779_v4 = vadd.f32 %v778_v63, %v3130_v52 }
 0x1e9   : > { %v908_v5 = vmul.f32 0.1, %v892_v61  ;;  %v893_v6 = vadd.f32 %v777_v48, %v3139_v62  ;;  %2144 = vmatprep.mubr.bf16.mxu0 %v932_v0  ;;  %v2388_v62 = vld [vmem:[%s3344_s5] sm:$0xff]  }
 0x1ea   : > { %v1417_v7 = vmax.bf16 %v1413_v2, %v3172_v13  ;;  %v1389_v8 = vmul.f32 0.1, %v1373_v3  ;;  %v1374_v9 = vadd.f32 %v779_v4, %v3143_v1  ;;  %2148 = vmatprep.subr.bf16.mxu0 %v2388_v62  ;;  %v2389_v1 = vld [vmem:[%s3344_s5 + $0x8] sm:$0xff]   ;;  %v3227_v13 = vld [vmem:[%s3346_s7] ss:$0 sm:$0xff] }
 0x1eb   : > { %v909_v10 = vmul.f32 0.1, %v893_v6  ;;  %v924_v11 = vmax.f32 %v892_v61, %v908_v5  ;;  %2149 = vmatpush3.bf16.msra.mxu0 %v2388_v62 }
 0x1ec   : > { %v1390_v56 = vmul.f32 0.1, %v1374_v9  ;;  %v1405_v12 = vmax.f32 %v1373_v3, %v1389_v8  ;;  %2150 = vmatprep.subr.bf16.mxu0 %v2389_v1 }
 0x1ed   : > { %v925_v51 = vmax.f32 %v893_v6, %v909_v10 }
 0x1ee   : > { %v1406_v14 = vmax.f32 %v1374_v9, %v1390_v56 }
 0x1ef   : > { %v933_v17 = vpack.c.bf16 %v925_v51, %v924_v11  ;;  %2151 = vmatpush3.bf16.msra.mxu0 %v2389_v1 }
 0x1f0   : > { %v1414_v18 = vpack.c.bf16 %v1406_v14, %v1405_v12 }
 0x1f1   : > { %2145 = vmatmul.mubr.bf16.gmra.mrb[32].mxu0 %v933_v17 }
 0x1f2   : > { %v1418_v52 = vmax.bf16 %v1414_v18, %v3182_v39 }
 0x1f4   : > { %v1420_v59 = vmax.bf16 %v1418_v52, %v1417_v7 }
 0x1f6   : > { %v1421_v19 = vmax.bf16 %v1420_v59, %v1419_v43 }
 0x1f8   : > { %2185 = vmatmul.mubr.bf16.vlgmr.msra.gmra.mrb[32].mxu1 %v1421_v19 }
 0x1f9   : > { %2204 = vmatprep.mubr.msk.bf16.mxu1 %vm2731_vm4, %v2730_v38 }
 0x294   : > { %v2134_v39 = vpop.f32.mrb[20].mxu0 }
 0x295   : > { %v1048_v20 = vadd.f32 %v2134_v39, %v3227_v13  ;;  %v1039_v21 = vpop.f32.mrb[21].mxu0 }
 0x296   : > { %v1040_v22 = vadd.f32 %v3227_v13, %v1039_v21  ;;  %v2135_v23 = vpop.f32.mrb[22].mxu0 }
 0x297   : > { %v1993_v24 = vmul.f32 -1.442695, %v1048_v20  ;;  %v1051_v25 = vadd.f32 %v2135_v23, %v3227_v13  ;;  %v1042_v27 = vpop.f32.mrb[23].mxu0 }
 0x298   : > { %v1991_v28 = vmul.f32 -1.442695, %v1040_v22  ;;  %v1043_v29 = vadd.f32 %v3227_v13, %v1042_v27 }
 0x299   : > { %2398 = vpow2.f32 %v1993_v24  ;;  %v1994_v26 = vmul.f32 -1.442695, %v1051_v25 }
 0x29a   : > { %2400 = vpow2.f32 %v1991_v28  ;;  %v1992_v30 = vmul.f32 -1.442695, %v1043_v29 }
 0x29b   : > { %2402 = vpow2.f32 %v1994_v26 }
 0x29c   : > { %2404 = vpow2.f32 %v1992_v30 }
 0x2a3   : > { %v2399_v31 = vpop.eup %2398 }
 0x2a4   : > { %v2401_v32 = vpop.eup %2400  ;;  %v1152_v33 = vadd.f32 1.0, %v2399_v31  ;;  %v2138_v34 = vpop.f32.mrb[24].mxu0 }
 0x2a5   : > { %v2403_v35 = vpop.eup %2402  ;;  %v1150_v36 = vadd.f32 1.0, %v2401_v32  ;;  %v1064_v37 = vadd.f32 %v2138_v34, %v3227_v13  ;;  %v1055_v40 = vpop.f32.mrb[25].mxu0 }
 0x2a6   : > { %v2405_v41 = vpop.eup %2404  ;;  %2406 = vrcp.f32 %v1152_v33  ;;  %v1153_v42 = vadd.f32 1.0, %v2403_v35  ;;  %v1056_v43 = vadd.f32 %v3227_v13, %v1055_v40  ;;  %v2139_v44 = vpop.f32.mrb[26].mxu0 }
 0x2a7   : > { %2408 = vrcp.f32 %v1150_v36  ;;  %v1151_v45 = vadd.f32 1.0, %v2405_v41  ;;  %v1997_v46 = vmul.f32 -1.442695, %v1064_v37  ;;  %v1067_v50 = vadd.f32 %v2139_v44, %v3227_v13  ;;  %v1058_v53 = vpop.f32.mrb[27].mxu0 }
 0x2a8   : > { %2410 = vrcp.f32 %v1153_v42  ;;  %v1995_v54 = vmul.f32 -1.442695, %v1056_v43  ;;  %v1059_v55 = vadd.f32 %v3227_v13, %v1058_v53 }
 0x2a9   : > { %2412 = vrcp.f32 %v1151_v45  ;;  %v1998_v57 = vmul.f32 -1.442695, %v1067_v50 }
 0x2aa   : > { %2414 = vpow2.f32 %v1997_v46  ;;  %v1996_v58 = vmul.f32 -1.442695, %v1059_v55 }
 0x2ab   : > { %2416 = vpow2.f32 %v1995_v54 }
 0x2ac   : > { %2418 = vpow2.f32 %v1998_v57 }
 0x2ad   : > { %2420 = vpow2.f32 %v1996_v58 }
 0x2b0   : > { %v2407_v60 = vpop.eup %2406 }
 0x2b1   : > { %v2409_v61 = vpop.eup %2408  ;;  %v1200_v0 = vmul.f32 %v2407_v60, %v3070_v15 }
 0x2b2   : > { %v2411_v48 = vpop.eup %2410  ;;  %v1198_v5 = vmul.f32 %v2409_v61, %v3070_v15 }
 0x2b3   : > { %v2413_v63 = vpop.eup %2412  ;;  %v1201_v2 = vmul.f32 %v2411_v48, %v3073_v16 }
 0x2b4   : > { %v2415_v3 = vpop.eup %2414  ;;  %v2142_v4 = vpop.f32.mrb[28].mxu0  ;;  %v1199_v6 = vmul.f32 %v2413_v63, %v3073_v16 }
 0x2b5   : > { %v2417_v7 = vpop.eup %2416  ;;  %v1156_v8 = vadd.f32 1.0, %v2415_v3  ;;  %v1080_v9 = vadd.f32 %v2142_v4, %v3227_v13  ;;  %v1071_v10 = vpop.f32.mrb[29].mxu0  ;;  %v1215_v56 = vpack.c.bf16 %v1201_v2, %v1200_v0  ;;  %v3262_v4 = vld [vmem:[%s3049_s14] sm:$0xff] }
 0x2b6   : > { %v2419_v11 = vpop.eup %2418  ;;  %v1154_v51 = vadd.f32 1.0, %v2417_v7  ;;  %v1072_v12 = vadd.f32 %v3227_v13, %v1071_v10  ;;  %v2143_v14 = vpop.f32.mrb[30].mxu0  ;;  %v1214_v17 = vpack.c.bf16 %v1199_v6, %v1198_v5  ;;  %v3266_v6 = vld [vmem:[%s3049_s14 + $0x8] sm:$0xff] }
 0x2b7   : > { %v2421_v18 = vpop.eup %2420  ;;  %2422 = vrcp.f32 %v1156_v8  ;;  %v1157_v52 = vadd.f32 1.0, %v2419_v11  ;;  %v2001_v59 = vmul.f32 -1.442695, %v1080_v9  ;;  %v1083_v19 = vadd.f32 %v2143_v14, %v3227_v13  ;;  %v1074_v62 = vpop.f32.mrb[31].mxu0 }
 0x2b8   : > { %2424 = vrcp.f32 %v1154_v51  ;;  %v1155_v1 = vadd.f32 1.0, %v2421_v18  ;;  %v1999_v39 = vmul.f32 -1.442695, %v1072_v12  ;;  %v1075_v20 = vadd.f32 %v3227_v13, %v1074_v62  ;;  %2152 = vmatprep.mubr.msk.bf16.mxu0 %vm496_vm3, %v1214_v17 }
 0x2b9   : > { %2426 = vrcp.f32 %v1157_v52  ;;  %v2002_v21 = vmul.f32 -1.442695, %v1083_v19  ;;  %2153 = vmatmul.mubr.msk.bf16.vlgmr.msra.gmra.mrb[4].mxu0 %vm496_vm3, %v1215_v56 }
 0x2ba   : > { %2428 = vrcp.f32 %v1155_v1  ;;  %v2000_v22 = vmul.f32 -1.442695, %v1075_v20 }
 0x2bb   : > { %2430 = vpow2.f32 %v2001_v59 }
 0x2bc   : > { %2432 = vpow2.f32 %v1999_v39 }
 0x2bd   : > { %2434 = vpow2.f32 %v2002_v21 }
 0x2be   : > { %2436 = vpow2.f32 %v2000_v22 }
 0x2c1   : > { %v2423_v23 = vpop.eup %2422 }
 0x2c2   : > { %v2425_v24 = vpop.eup %2424  ;;  %v1204_v29 = vmul.f32 %v2423_v23, %v3070_v15 }
 0x2c3   : > { %v2427_v25 = vpop.eup %2426  ;;  %v1202_v33 = vmul.f32 %v2425_v24, %v3070_v15 }
 0x2c4   : > { %v2429_v27 = vpop.eup %2428  ;;  %v2146_v28 = vpop.f32.mrb[32].mxu0  ;;  %v1205_v26 = vmul.f32 %v2427_v25, %v3073_v16 }
 0x2c5   : > { %v2431_v30 = vpop.eup %2430  ;;  %v1096_v31 = vadd.f32 %v2146_v28, %v3227_v13  ;;  %v1087_v32 = vpop.f32.mrb[33].mxu0  ;;  %v1203_v34 = vmul.f32 %v2429_v27, %v3073_v16  ;;  %v2390_v27 = vld [vmem:[#allocation10 + $0x8] ss:$12 sps:$4 sm:$0xff]   ;;  %v2391_v28 = vld [vmem:[#allocation10 + $0x20] ss:$12 sps:$4 sm:$0xff]  }
 0x2c6   : > { %v2433_v35 = vpop.eup %2432  ;;  %v1160_v36 = vadd.f32 1.0, %v2431_v30  ;;  %v1088_v37 = vadd.f32 %v3227_v13, %v1087_v32  ;;  %v2147_v40 = vpop.f32.mrb[34].mxu0  ;;  %v1217_v41 = vpack.c.bf16 %v1205_v26, %v1204_v29  ;;  %2189 = vmatpush3.bf16.msra.mxu1 %v2390_v27  ;;  %v2392_v29 = vld [vmem:[#allocation10 + $0x38] ss:$12 sps:$4 sm:$0xff]   ;;  %v2393_v26 = vld [vmem:[#allocation10 + $0x50] ss:$12 sps:$4 sm:$0xff]  }
 0x2c7   : > { %v2435_v42 = vpop.eup %2434  ;;  %v1158_v43 = vadd.f32 1.0, %v2433_v35  ;;  %v1099_v44 = vadd.f32 %v2147_v40, %v3227_v13  ;;  %v1090_v45 = vpop.f32.mrb[35].mxu0  ;;  %v1216_v46 = vpack.c.bf16 %v1203_v34, %v1202_v33  ;;  %v2005_v54 = vmul.f32 -1.442695, %v1096_v31  ;;  %2190 = vmatprep.subr.bf16.mxu1 %v2730_v38  ;;  %v2394_v30 = vld [vmem:[#allocation10 + $0x68] ss:$12 sps:$4 sm:$0xff]  }
 0x2c8   : > { %v2437_v50 = vpop.eup %2436  ;;  %2438 = vrcp.f32 %v1160_v36  ;;  %v1161_v53 = vadd.f32 1.0, %v2435_v42  ;;  %v1091_v15 = vadd.f32 %v3227_v13, %v1090_v45  ;;  %v2003_v55 = vmul.f32 -1.442695, %v1088_v37  ;;  %v2395_v31 = vld [vmem:[#allocation10 + $0x80] ss:$12 sps:$4 sm:$0xff]  }
 0x2c9   : > { %2440 = vrcp.f32 %v1158_v43  ;;  %v1159_v16 = vadd.f32 1.0, %v2437_v50  ;;  %2156 = vmatprep.mubr.msk.bf16.mxu0 %vm496_vm3, %v1216_v46  ;;  %v2006_v57 = vmul.f32 -1.442695, %v1099_v44  ;;  %v2396_v32 = vld [vmem:[#allocation10 + $0x98] ss:$12 sps:$4 sm:$0xff]   ;;  %v561_v34 = vsub.s32 2, %v3120_v47 }
 0x2ca   : > { %2442 = vrcp.f32 %v1161_v53  ;;  %2157 = vmatmul.mubr.msk.bf16.gmra.mrb[8].mxu0 %vm496_vm3, %v1217_v41  ;;  %v2004_v58 = vmul.f32 -1.442695, %v1091_v15  ;;  %2191 = vmatpush3.bf16.msra.mxu1 %v2391_v28  ;;  %v2397_v33 = vld [vmem:[#allocation10 + $0xb0] ss:$12 sps:$4 sm:$0xff]  }
 0x2cb   : > { %2444 = vrcp.f32 %v1159_v16  ;;  %v3257_v60 = vpop.f32.mrb[32].mxu1  ;;  %2192 = vmatprep.subr.bf16.mxu1 %v2730_v38  ;;  %v3288_v35 = vrot.slane %v3123_v49, %v561_v34 }
 0x2cc   : > { %2446 = vpow2.f32 %v2005_v54  ;;  %v2186_v61 = vpop.f32.mrb[33].mxu1 }
 0x2cd   : > { %2448 = vpow2.f32 %v2003_v55  ;;  %v3259_v48 = vpop.f32.mrb[34].mxu1 }
 0x2ce   : > { %2450 = vpow2.f32 %v2006_v57  ;;  %v2187_v13 = vpop.f32.mrb[35].mxu1  ;;  %2193 = vmatpush3.bf16.msra.mxu1 %v2392_v29 }
 0x2cf   : > { %2452 = vpow2.f32 %v2004_v58  ;;  %2194 = vmatprep.subr.bf16.mxu1 %v2730_v38 }
 0x2d2   : > { %v2439_v63 = vpop.eup %2438  ;;  %2195 = vmatpush3.bf16.msra.mxu1 %v2393_v26 }
 0x2d3   : > { %v2441_v0 = vpop.eup %2440  ;;  %v1208_v5 = vmul.f32 %v3262_v4, %v2439_v63  ;;  %2196 = vmatprep.subr.bf16.mxu1 %v2730_v38 }
 0x2d4   : > { %v2443_v2 = vpop.eup %2442  ;;  %v1206_v9 = vmul.f32 %v3262_v4, %v2441_v0 }
 0x2d5   : > { %v2445_v3 = vpop.eup %2444  ;;  %v1209_v7 = vmul.f32 %v3266_v6, %v2443_v2 }
 0x2d6   : > { %v2447_v8 = vpop.eup %2446  ;;  %v1207_v10 = vmul.f32 %v3266_v6, %v2445_v3  ;;  %2197 = vmatpush3.bf16.msra.mxu1 %v2394_v30 }
 0x2d7   : > { %v2449_v56 = vpop.eup %2448  ;;  %v1164_v11 = vadd.f32 1.0, %v2447_v8  ;;  %v1219_v51 = vpack.c.bf16 %v1209_v7, %v1208_v5  ;;  %2198 = vmatprep.subr.bf16.mxu1 %v2730_v38 }
 0x2d8   : > { %v2451_v12 = vpop.eup %2450  ;;  %v1162_v14 = vadd.f32 1.0, %v2449_v56  ;;  %v1218_v17 = vpack.c.bf16 %v1207_v10, %v1206_v9 }
 0x2d9   : > { %v2453_v18 = vpop.eup %2452  ;;  %2454 = vrcp.f32 %v1164_v11  ;;  %v1165_v52 = vadd.f32 1.0, %v2451_v12 }
 0x2da   : > { %2456 = vrcp.f32 %v1162_v14  ;;  %v1163_v59 = vadd.f32 1.0, %v2453_v18  ;;  %2160 = vmatprep.mubr.msk.bf16.mxu0 %vm496_vm3, %v1218_v17  ;;  %2199 = vmatpush3.bf16.msra.mxu1 %v2395_v31 }
 0x2db   : > { %2458 = vrcp.f32 %v1165_v52  ;;  %2161 = vmatmul.mubr.msk.bf16.gmra.mrb[12].mxu0 %vm496_vm3, %v1219_v51  ;;  %2200 = vmatprep.subr.bf16.mxu1 %v2730_v38 }
 0x2dc   : > { %2460 = vrcp.f32 %v1163_v59 }
 0x2de   : > { %2201 = vmatpush3.bf16.msra.mxu1 %v2396_v32 }
 0x2df   : > { %2202 = vmatprep.subr.bf16.mxu1 %v2730_v38 }
 0x2e2   : > { %2203 = vmatpush3.bf16.msra.mxu1 %v2397_v33 }
 0x2e3   : > { %v2455_v19 = vpop.eup %2454 }
 0x2e4   : > { %v2457_v62 = vpop.eup %2456  ;;  %v1212_v20 = vmul.f32 %v3262_v4, %v2455_v19 }
 0x2e5   : > { %v2459_v1 = vpop.eup %2458  ;;  %v1210_v22 = vmul.f32 %v3262_v4, %v2457_v62 }
 0x2e6   : > { %v2461_v39 = vpop.eup %2460  ;;  %v1213_v21 = vmul.f32 %v3266_v6, %v2459_v1 }
 0x2e7   : > { %v1211_v23 = vmul.f32 %v3266_v6, %v2461_v39 }
 0x2e8   : > { %v1221_v24 = vpack.c.bf16 %v1213_v21, %v1212_v20 }
 0x2e9   : > { %v1220_v25 = vpack.c.bf16 %v1211_v23, %v1210_v22 }
 0x2eb   : > { %2164 = vmatprep.mubr.msk.bf16.mxu0 %vm496_vm3, %v1220_v25 }
 0x2ec   : > { %2165 = vmatmul.mubr.msk.bf16.gmra.mrb[16].mxu0 %vm496_vm3, %v1221_v24 }
 0x38c   : > { %v2154_v36 = vpop.f32.mrb[4].mxu0 }
 0x38d   : > { %v2208_v37 = vadd.f32 %v2154_v36, %v3288_v35  ;;  %v1296_v40 = vpop.f32.mrb[5].mxu0 }
 0x38e   : > { %v2209_v41 = vadd.f32 %v1296_v40, %v3288_v35  ;;  %v2155_v42 = vpop.f32.mrb[6].mxu0 }
 0x38f   : > { %v1564_v43 = vmul.f32 0.1, %v2208_v37  ;;  %v2210_v44 = vadd.f32 %v2155_v42, %v3288_v35  ;;  %v1299_v45 = vpop.f32.mrb[7].mxu0 }
 0x390   : > { %v1562_v46 = vmul.f32 0.1, %v2209_v41  ;;  %v2211_v38 = vadd.f32 %v1299_v45, %v3288_v35 }
 0x391   : > { %v1565_v50 = vmul.f32 0.1, %v2210_v44  ;;  %v1580_v47 = vmax.f32 %v2208_v37, %v1564_v43 }
 0x392   : > { %v1563_v53 = vmul.f32 0.1, %v2211_v38  ;;  %v1578_v49 = vmax.f32 %v2209_v41, %v1562_v46 }
 0x393   : > { %v1581_v54 = vmax.f32 %v2210_v44, %v1565_v50 }
 0x394   : > { %v1579_v15 = vmax.f32 %v2211_v38, %v1563_v53 }
 0x395   : > { %v1595_v16 = vpack.c.bf16 %v1581_v54, %v1580_v47 }
 0x396   : > { %v1594_v55 = vpack.c.bf16 %v1579_v15, %v1578_v49 }
 0x39d   : > { %v2158_v57 = vpop.f32.mrb[8].mxu0 }
 0x39e   : > { %v2212_v58 = vadd.f32 %v2158_v57, %v3288_v35  ;;  %v1312_v61 = vpop.f32.mrb[9].mxu0 }
 0x39f   : > { %v2213_v13 = vadd.f32 %v1312_v61, %v3288_v35  ;;  %v2159_v63 = vpop.f32.mrb[10].mxu0  ;;  %v2017_v61 = vld [vmem:[%s3346_s7 + $0x1] ss:$0 sm:$0xff] }
 0x3a0   : > { %v1568_v0 = vmul.f32 0.1, %v2212_v58  ;;  %v2214_v2 = vadd.f32 %v2159_v63, %v3288_v35  ;;  %v1315_v3 = vpop.f32.mrb[11].mxu0 }
 0x3a1   : > { %v1566_v5 = vmul.f32 0.1, %v2213_v13  ;;  %v2215_v7 = vadd.f32 %v1315_v3, %v3288_v35 }
 0x3a2   : > { %v1569_v8 = vmul.f32 0.1, %v2214_v2  ;;  %v1584_v10 = vmax.f32 %v2212_v58, %v1568_v0 }
 0x3a3   : > { %v1567_v9 = vmul.f32 0.1, %v2215_v7  ;;  %v1582_v11 = vmax.f32 %v2213_v13, %v1566_v5  ;;  %v1528_v13 = vadd.f32 %v2017_v61, %v3257_v60 }
 0x3a4   : > { %v1585_v56 = vmax.f32 %v2214_v2, %v1569_v8  ;;  %v2028_v8 = vld [vmem:[%s3346_s7 + $0x2] ss:$0 sm:$0xff] }
 0x3a5   : > { %v1583_v51 = vmax.f32 %v2215_v7, %v1567_v9  ;;  %v2026_v63 = vmul.f32 -1.442695, %v1528_v13 }
 0x3a6   : > { %v1597_v12 = vpack.c.bf16 %v1585_v56, %v1584_v10 }
 0x3a7   : > { %v1596_v14 = vpack.c.bf16 %v1583_v51, %v1582_v11  ;;  %2462 = vpow2.f32 %v2026_v63 }
 0x3ae   : > { %v2162_v17 = vpop.f32.mrb[12].mxu0 }
 0x3af   : > { %v2216_v18 = vadd.f32 %v2162_v17, %v3288_v35  ;;  %v1328_v52 = vpop.f32.mrb[13].mxu0 }
 0x3b0   : > { %v2217_v59 = vadd.f32 %v1328_v52, %v3288_v35  ;;  %v2163_v19 = vpop.f32.mrb[14].mxu0 }
 0x3b1   : > { %v1572_v62 = vmul.f32 0.1, %v2216_v18  ;;  %v2218_v1 = vadd.f32 %v2163_v19, %v3288_v35  ;;  %v1331_v39 = vpop.f32.mrb[15].mxu0  ;;  %v2463_v2 = vpop.eup %2462 }
 0x3b2   : > { %v1570_v20 = vmul.f32 0.1, %v2217_v59  ;;  %v2219_v21 = vadd.f32 %v1331_v39, %v3288_v35  ;;  %v1540_v5 = vadd.f32 1.0, %v2463_v2 }
 0x3b3   : > { %v1573_v22 = vmul.f32 0.1, %v2218_v1  ;;  %v1588_v24 = vmax.f32 %v2216_v18, %v1572_v62 }
 0x3b4   : > { %v1571_v23 = vmul.f32 0.1, %v2219_v21  ;;  %v1586_v27 = vmax.f32 %v2217_v59, %v1570_v20 }
 0x3b5   : > { %v1589_v25 = vmax.f32 %v2218_v1, %v1573_v22 }
 0x3b6   : > { %v1587_v28 = vmax.f32 %v2219_v21, %v1571_v23 }
 0x3b7   : > { %v1599_v29 = vpack.c.bf16 %v1589_v25, %v1588_v24 }
 0x3b8   : > { %v1598_v26 = vpack.c.bf16 %v1587_v28, %v1586_v27 }
 0x3b9   : > { %v1603_v30 = vmax.bf16 %v1599_v29, %v1595_v16 }
 0x3ba   : > { %v1602_v31 = vmax.bf16 %v1598_v26, %v1594_v55 }
 0x3bc   : > { %v1606_v32 = vmax.bf16 %v1603_v30, %v1602_v31 }
 0x3bf   : > { %v2166_v33 = vpop.f32.mrb[16].mxu0 }
 0x3c0   : > { %v2220_v34 = vadd.f32 %v2166_v33, %v3288_v35  ;;  %v1344_v36 = vpop.f32.mrb[17].mxu0 }
 0x3c1   : > { %v2221_v37 = vadd.f32 %v1344_v36, %v3288_v35  ;;  %v2167_v40 = vpop.f32.mrb[18].mxu0 }
 0x3c2   : > { %v1576_v41 = vmul.f32 0.1, %v2220_v34  ;;  %v2222_v42 = vadd.f32 %v2167_v40, %v3288_v35  ;;  %v1347_v43 = vpop.f32.mrb[19].mxu0 }
 0x3c3   : > { %v1574_v44 = vmul.f32 0.1, %v2221_v37  ;;  %v2223_v45 = vadd.f32 %v1347_v43, %v3288_v35  ;;  %v1531_v35 = vadd.f32 %v2017_v61, %v3259_v48 }
 0x3c4   : > { %v1577_v46 = vmul.f32 0.1, %v2222_v42  ;;  %v1592_v50 = vmax.f32 %v2220_v34, %v1576_v41 }
 0x3c5   : > { %v1575_v38 = vmul.f32 0.1, %v2223_v45  ;;  %v1590_v47 = vmax.f32 %v2221_v37, %v1574_v44  ;;  %v2027_v0 = vmul.f32 -1.442695, %v1531_v35 }
 0x3c6   : > { %v1593_v53 = vmax.f32 %v2222_v42, %v1577_v46 }
 0x3c7   : > { %v1591_v54 = vmax.f32 %v2223_v45, %v1575_v38  ;;  %2464 = vpow2.f32 %v2027_v0 }
 0x3c8   : > { %v1601_v49 = vpack.c.bf16 %v1593_v53, %v1592_v50  ;;  %2466 = vrcp.f32 %v1540_v5 }
 0x3c9   : > { %v1600_v15 = vpack.c.bf16 %v1591_v54, %v1590_v47 }
 0x3ca   : > { %v1605_v16 = vmax.bf16 %v1601_v49, %v1597_v12 }
 0x3cb   : > { %v1604_v55 = vmax.bf16 %v1600_v15, %v1596_v14 }
 0x3cd   : > { %v1607_v57 = vmax.bf16 %v1605_v16, %v1604_v55 }
 0x3cf   : > { %v1608_v58 = vmax.bf16 %v1607_v57, %v1606_v32 }
 0x3d1   : > { %2205 = vmatmul.mubr.bf16.vlgmr.msra.gmra.mrb[36].mxu1 %v1608_v58  ;;  %v2465_v3 = vpop.eup %2464 }
 0x3d2   : > { %v1541_v7 = vadd.f32 1.0, %v2465_v3  ;;  %v2467_v51 = vpop.eup %2466 }
 0x3d3   : > { %v1723_v14 = vsub.f32 1.0, %v2467_v51 }
 0x3d4   : > { %2468 = vrcp.f32 %v1541_v7 }
 0x3d5   : > { %v1725_v52 = vmul.f32 %v3262_v4, %v1723_v14 }
 0x3de   : > { %v2469_v12 = vpop.eup %2468 }
 0x3df   : > { %v1724_v17 = vsub.f32 1.0, %v2469_v12 }
 0x3e1   : > { %v1726_v1 = vmul.f32 %v3266_v6, %v1724_v17 }
 0x4a4   : > { %v1714_v9 = vpop.f32.mrb[36].mxu1 }
 0x4a5   : > { %v1715_v10 = vadd.f32 %v2028_v8, %v1714_v9  ;;  %v2206_v56 = vpop.f32.mrb[37].mxu1 }
 0x4a6   : > { %v1717_v60 = vpop.f32.mrb[38].mxu1 }
 0x4a7   : > { %2470 = vtanh.f32 %v1715_v10  ;;  %v1718_v48 = vadd.f32 %v2028_v8, %v1717_v60  ;;  %v2207_v11 = vpop.f32.mrb[39].mxu1 }
 0x4a9   : > { %2472 = vtanh.f32 %v1718_v48 }
 0x4b1   : > { %v2471_v18 = vpop.eup %2470 }
 0x4b2   : > { %v1727_v59 = vmul.f32 %v2471_v18, %v2467_v51 }
 0x4b3   : > { %v2473_v19 = vpop.eup %2472 }
 0x4b4   : > { %v1729_v62 = vadd.f32 %v1727_v59, %v1725_v52  ;;  %v1728_v39 = vmul.f32 %v2473_v19, %v2469_v12 }
 0x4b6   : > { %1731 = vxpose.xlu0.b32.start [1/2] (short) (narrow) %v1729_v62, 32  ;;  %v1730_v20 = vadd.f32 %v1728_v39, %v1726_v1 }
 0x4ba   : > { %1732 = vxpose.xlu0.b32.end [2/2] (short) (narrow) %v1730_v20, 32 }
 0x536   : > { %v1747_v21 = vpop.trf.xlu0 }
 0x537   : > { %1764 = vst.msk [vmem:[%s451_s22] sm:$0xff] %vm1763_vm5, %v1747_v21 }
 0x53a   : > { %v1748_v4 = vpop.trf.xlu0 }
 0x53b   : > { %1765 = vst.msk [vmem:[%s451_s22 + $0x8] sm:$0xff] %vm1763_vm5, %v1748_v4 }
 0x53e   : > { %v1749_v22 = vpop.trf.xlu0 }
 0x53f   : > { %1766 = vst.msk [vmem:[%s451_s22 + $0x10] sm:$0xff] %vm1763_vm5, %v1749_v22 }
 0x542   : > { %v1750_v23 = vpop.trf.xlu0 }
 0x543   : > { %1767 = vst.msk [vmem:[%s451_s22 + $0x18] sm:$0xff] %vm1763_vm5, %v1750_v23 }
 0x544 PF: > { %s26_s10 = sadd.s32 1, %s2714_s10   ;;  %s3383_s24 = smov %s3390_s27 }
 0x545   : > { %p23_p13 = scmp.ge.s32.totalorder %s26_s10, 4   ;;  %s3384_s27 = smov %s2698_s28 }
 0x546   : > { %s3385_s28 = smov %s2702_s29  ;;  %s3386_s29 = smov %s2954_s20 }
 0x547   : > { %s3387_s30 = smov %s2710_s9  ;;  %s3388_s9 = smov %s3383_s24 }
 0x548   :  { %25 = sbr.rel (!%p23_p13) target bundleno = 13 (0xd), region = 121 }
 0x54f   :  { %1795 = vsyncpa [#allocation3], 1 }
 0x550   :  { %1797 = vsyncpa [#allocation3 + $0x1], 1 }
 0x551   :  { %1798 = vsyncpa [#allocation5], 1 }
 0x552   :  { %1800 = vsyncpa [#allocation5 + $0x1], 1 }
 0x553   :  { %1801 = vsyncpa [#allocation8], 1 }
 0x554   :  { %1802 = vsyncpa [#allocation11], 1 }

// kernel: tpu_custom_call.1
= control target key start
LH: loop header
LB: loop body
LE: loop exit
PB: predicated region body
PF: predicated region fallthrough
CT: control target
= control target key end

     0   :  { %s3407_s0 = inlined_call_operand.hbm [shape: bf16[2,8,16,19], index: 0, kind: input, shape index: {}]   ;;  %s3408_s1 = inlined_call_operand.hbm [shape: f32[2,16,32], index: 1, kind: input, shape index: {}]   ;;  %s3409_s2 = inlined_call_operand.hbm [shape: bf16[19,384], index: 2, kind: input, shape index: {}]   ;;  %s3410_s3 = inlined_call_operand.hbm [shape: f32[1,384], index: 3, kind: input, shape index: {}]   ;;  %s3411_s4 = inlined_call_operand.hbm [shape: bf16[32,256], index: 4, kind: input, shape index: {}]   ;;  %s3412_s5 = inlined_call_operand.vmem [shape: bf16[32,128], index: 5, kind: input, shape index: {}]   ;;  %s3413_s6 = inlined_call_operand.hbm [shape: bf16[128,384], index: 6, kind: input, shape index: {}]   ;;  %s3414_s7 = inlined_call_operand.vmem [shape: f32[1,384], index: 7, kind: input, shape index: {}]   ;;  %s3415_s8 = inlined_call_operand.hbm [shape: f32[2,16,32], index: 8, kind: output, shape index: {}]  }
   0x1   :  { %3426 = sst [smem:[#allocation23_spill]] %s3407_s0 }
   0x2   :  { %3427 = sst [smem:[#allocation24_spill]] %s3409_s2 }
   0x3   :  { %3428 = sst [smem:[#allocation25_spill]] %s3410_s3 }
   0x4   :  { %3429 = sst [smem:[#allocation26_spill]] %s3411_s4 }
   0x5   :  { %3430 = sst [smem:[#allocation27_spill]] %s3415_s8 }
   0x6   :  { %13 = vsyncpa [#allocation3], 0 }
   0x7   :  { %15 = vsyncpa [#allocation3 + $0x1], 0 }
   0x8   :  { %16 = vsyncpa [#allocation6], 0 }
   0x9   :  { %18 = vsyncpa [#allocation6 + $0x1], 0 }
   0xa   :  { %19 = vsyncpa [#allocation9], 0 }
   0xb   :  { %20 = vsyncpa [#allocation12], 0 }
   0xc   :  { %21 = vsyncpa [#allocation4], 0 }
   0xd   :  { %23 = vsyncpa [#allocation4 + $0x1], 0  ;;  %s2792_s27 = smov 0   ;;  %s2794_s28 = smov 0  }
   0xe   :  { %s2796_s29 = smov 0   ;;  %s2798_s30 = smov 0  }
   0xf   :  { %s2800_s9 = smov 0   ;;  %s2802_s10 = smov 0  }
  0x10 LB: > { %3431 = sst [smem:[#allocation20_spill]] %s2706_s27  ;;  %s2823_s11 = sadd.s32 4294967295, %s2726_s10   ;;  %s2726_s10 = sphi %s2802_s10, %s29_s10   ;;  %s2722_s9 = sphi %s2800_s9, %s3468_s9   ;;  %s2718_s30 = sphi %s2798_s30, %s3467_s30   ;;  %s2714_s29 = sphi %s2796_s29, %s3466_s29   ;;  %s2710_s28 = sphi %s2794_s28, %s3465_s28   ;;  %s2706_s27 = sphi %s2792_s27, %s3464_s27  }
  0x11   : > { %3432 = sst [smem:[#allocation21_spill]] %s2718_s30  ;;  %s1894_s12 = sadd.s32 4294967294, %s2726_s10  }
  0x12   : > { %p63_p0 = scmp.ne.s32.totalorder %s2710_s28, %s2706_s27  ;;  %p3416_p1 = scmp.eq.s32.totalorder %s2823_s11, 0 }
  0x13   : > { %p249_p3 = scmp.eq.s32.totalorder %s1894_s12, 1  ;;  %p1895_p5 = scmp.ge.s32.totalorder %s2726_s10, 1 }
  0x14   : > { %p2832_p4 = por %p3416_p1, %p63_p0  ;;  %p256_p7 = scmp.lt.s32.totalorder %s2726_s10, 3 }
  0x15   : > { %p2837_p6 = por %p249_p3, %p63_p0  ;;  %s2728_s16 = smov [#allocation7]  }
  0x16   : > { %s3433_s13 = scalar_select %p2832_p4, 1, 0 }
  0x17   : > { %s3434_s14 = scalar_select %p2837_p6, 1, 0 }
  0x18   : > { %p2842_p8 = pnand %p1895_p5, %p256_p7  ;;  %s268_s17 = sshll.u32 %s2728_s16, 4  ;;  %s2846_s17 = int_to_ptr.vmem [resolvable:$true] %s268_s17 }
  0x19   : > { %3435 = sst [smem:[#allocation22_spill]] %s3434_s14  ;;  %s2729_s19 = smov [#allocation8]  }
  0x1a   : > { %s3436_s15 = scalar_select %p2842_p8, 1, 0 }
  0x1b   : > { %p2233_p9 = pneg %p2842_p8  ;;  %s282_s20 = sshll.u32 %s2729_s19, 4  ;;  %s2857_s20 = int_to_ptr.vmem [resolvable:$true] %s282_s20 }
  0x1c   : > { %s2730_s21 = smov [#allocation10]   ;;  %s3438_s2 = sld [smem:[#allocation24_spill]] }
  0x1d   : > { %p2853_p11 = pnand %p2233_p9, %p3416_p1  ;;  %s2859_s22 = sshll.u32 %s2730_s21, 4  ;;  %s293_s22 = int_to_ptr.vmem [resolvable:$true] %s2859_s22 }
  0x1f   : > { %p2869_p13 = pneg %p2853_p11 }
  0x22   : > { %s2456_s25 = scalar_lea.hbm %s3438_s2, 576 }
  0x23   : > { %p2457_p12 = scmp.ne.s32.totalorder %s3438_s2, %s2456_s25  ;;  %p2463_p5 = scmp.lt.u32.totalorder %s2456_s25, %s3438_s2 }
  0x25   : > { %p2459_p0 = pnand %p2869_p13, %p2457_p12 }
  0x27   : > { %p2460_p3 = pneg %p2459_p0 }
  0x29   : > { %p2465_p7 = pnand %p2463_p5, %p2460_p3 }
  0x2b   : > { %2468 = shalt.err (!%p2465_p7)
}
  0x2c   : > { %s2469_s23 = scalar_lea.vmem %s2846_s17, 576  ;;  %p2477_p2 = scmp.lt.s32.totalorder %s2846_s17, %s2846_s17 }
  0x2d   : > { %p2470_p9 = scmp.ne.s32.totalorder %s2846_s17, %s2469_s23  ;;  %p2478_p6 = scmp.lt.s32.totalorder %s2469_s23, %s2469_s23 }
  0x2f   : > { %p2472_p10 = pnand %p2470_p9, %p2869_p13  ;;  %p2479_p12 = por %p2478_p6, %p2477_p2 }
  0x31   : > { %p2473_p1 = pneg %p2472_p10 }
  0x33   : > { %p2480_p0 = pnand %p2479_p12, %p2473_p1 }
  0x35   : > { %2483 = shalt.err (!%p2480_p0)
}
  0x36   : > { %s3422_s24 = smov 192   ;;  %s3423_s25 = smov 12  }
  0x37   : > { %2236 = dma.hbm_to_vmem [thread:$0]  (!%p2853_p11), %s3438_s2, 576, %s2846_s17, [#allocation6], %s3422_s24, %s3422_s24, %s3423_s25  }
  0x38   : > { %s3440_s3 = sld [smem:[#allocation25_spill]] }
  0x3e   : > { %s2484_s23 = scalar_lea.hbm %s3440_s3, 48 }
  0x3f   : > { %p2485_p1 = scmp.ne.s32.totalorder %s3440_s3, %s2484_s23  ;;  %p2491_p10 = scmp.lt.u32.totalorder %s2484_s23, %s3440_s3 }
  0x41   : > { %p2487_p2 = pnand %p2485_p1, %p2869_p13 }
  0x43   : > { %p2488_p6 = pneg %p2487_p2 }
  0x45   : > { %p2493_p3 = pnand %p2491_p10, %p2488_p6 }
  0x47   : > { %2496 = shalt.err (!%p2493_p3)
}
  0x48   : > { %s2497_s17 = scalar_lea.vmem %s2857_s20, 48  ;;  %s2504_s27 = scalar_lea.vmem %s2857_s20, 64 }
  0x49   : > { %p2498_p5 = scmp.ne.s32.totalorder %s2857_s20, %s2497_s17  ;;  %p2505_p12 = scmp.lt.s32.totalorder %s2857_s20, %s2857_s20 }
  0x4a   : > { %p2506_p0 = scmp.lt.s32.totalorder %s2504_s27, %s2497_s17 }
  0x4b   : > { %p2500_p7 = pnand %p2498_p5, %p2869_p13 }
  0x4c   : > { %p2507_p1 = por %p2506_p0, %p2505_p12 }
  0x4d   : > { %p2501_p9 = pneg %p2500_p7 }
  0x4f   : > { %p2508_p2 = pnand %p2507_p1, %p2501_p9 }
  0x51   : > { %2511 = shalt.err (!%p2508_p2)
}
  0x52   : > { %2239 = dma.hbm_to_vmem [thread:$0]  (!%p2853_p11), %s3440_s3, 48, %s2857_s20, [#allocation9]  }
  0x53   : > { %s3441_s4 = sld [smem:[#allocation26_spill]] }
  0x59   : > { %s2512_s12 = scalar_lea.hbm %s3441_s4, 512 }
  0x5a   : > { %p2513_p6 = scmp.ne.s32.totalorder %s3441_s4, %s2512_s12  ;;  %p2519_p5 = scmp.lt.u32.totalorder %s2512_s12, %s3441_s4 }
  0x5c   : > { %p2515_p10 = pnand %p2513_p6, %p2869_p13 }
  0x5e   : > { %p2516_p3 = pneg %p2515_p10 }
  0x60   : > { %p2521_p7 = pnand %p2519_p5, %p2516_p3 }
  0x62   : > { %2524 = shalt.err (!%p2521_p7)
}
  0x63   : > { %s2525_s27 = scalar_lea.vmem %s293_s22, 512  ;;  %p2533_p1 = scmp.lt.s32.totalorder %s293_s22, %s293_s22 }
  0x64   : > { %p2526_p9 = scmp.ne.s32.totalorder %s293_s22, %s2525_s27  ;;  %p2534_p2 = scmp.lt.s32.totalorder %s2525_s27, %s2525_s27 }
  0x66   : > { %p2528_p12 = pnand %p2526_p9, %p2869_p13  ;;  %p2535_p4 = por %p2534_p2, %p2533_p1 }
  0x68   : > { %p2529_p0 = pneg %p2528_p12 }
  0x6a   : > { %p2536_p8 = pnand %p2535_p4, %p2529_p0 }
  0x6c   : > { %2539 = shalt.err (!%p2536_p8)
}
  0x6d   : > { %s3424_s20 = smov 128   ;;  %s3425_s8 = smov 8  }
  0x6e   : > { %2242 = dma.hbm_to_vmem [thread:$0]  (!%p2853_p11), %s3441_s4, 512, %s293_s22, [#allocation9], %s3424_s20, %s3424_s20, %s3425_s8  }
  0x6f   : > { %s2735_s26 = smov [#allocation11]   ;;  %s2540_s23 = scalar_lea.hbm %s3413_s6, 3072 }
  0x70   : > { %s308_s12 = sshll.u32 %s2735_s26, 4  ;;  %p2541_p4 = scmp.ne.s32.totalorder %s3413_s6, %s2540_s23  ;;  %s309_s12 = int_to_ptr.vmem [resolvable:$true] %s308_s12 }
  0x71   : > { %p2547_p10 = scmp.lt.u32.totalorder %s2540_s23, %s3413_s6 }
  0x72   : > { %p2543_p8 = pnand %p2541_p4, %p2869_p13 }
  0x74   : > { %p2544_p6 = pneg %p2543_p8 }
  0x76   : > { %p2549_p3 = pnand %p2547_p10, %p2544_p6 }
  0x78   : > { %2552 = shalt.err (!%p2549_p3)
}
  0x79   : > { %s2553_s22 = scalar_lea.vmem %s309_s12, 3072  ;;  %p2561_p12 = scmp.lt.s32.totalorder %s309_s12, %s309_s12 }
  0x7a   : > { %p2554_p5 = scmp.ne.s32.totalorder %s309_s12, %s2553_s22  ;;  %p2562_p0 = scmp.lt.s32.totalorder %s2553_s22, %s2553_s22 }
  0x7c   : > { %p2556_p7 = pnand %p2554_p5, %p2869_p13  ;;  %p2563_p1 = por %p2562_p0, %p2561_p12 }
  0x7e   : > { %p2557_p9 = pneg %p2556_p7 }
  0x80   : > { %p2564_p2 = pnand %p2563_p1, %p2557_p9 }
  0x82   : > { %2567 = shalt.err (!%p2564_p2)
}
  0x83   : > { %s3442_s30 = smov 12   ;;  %s3443_s14 = smov 192  }
  0x84   : > { %2245 = dma.hbm_to_vmem [thread:$0]  (!%p2853_p11), %s3413_s6, 3072, %s309_s12, [#allocation12], %s3443_s14, %s3443_s14, %s3442_s30  }
  0x85   : > { %s41_s16 = sadd.s32 1, %s2722_s9  ;;  %s50_s18 = sadd.s32 1, %s2714_s29 }
  0x86   : > { %p43_p13 = scmp.ge.s32.totalorder %s41_s16, 2  ;;  %p57_p4 = scmp.ne.s32.totalorder %s2714_s29, %s2710_s28 }
  0x87   : > { %p58_p8 = scmp.eq.s32.totalorder %s2726_s10, 0  ;;  %p2261_p6 = scmp.lt.s32.totalorder %s2726_s10, 2 }
  0x88   : > { %s3470_s16 = smov (%p43_p13, %s41_s16), 0  ;;  %p3444_p3 = scmp.eq.s32.totalorder %s2823_s11, 1 }
  0x89   : > { %p59_p10 = por %p58_p8, %p57_p4  ;;  %s45_s19 = ssub.s32 %s2722_s9, %s3470_s16 }
  0x8a   : > { %p2970_p5 = por %p3444_p3, %p57_p4  ;;  %s2977_s21 = sand.u32 1, %s2714_s29  }
  0x8b   : > { %p48_p11 = scmp.eq.s32.totalorder %s45_s19, 0  ;;  %s1901_s12 = sshll.u32 %s2977_s21, 6 }
  0x8c   : > { %s2010_s23 = sshll.u32 %s2722_s9, 10  ;;  %s3446_s0 = sld [smem:[#allocation23_spill]] }
  0x8d   : > { %s2982_s17 = scalar_select %p48_p11, %s2714_s29, %s50_s18  }
  0x8e   : > { %s329_s14 = scalar_lea.vmem [#allocation2], %s1901_s12  ;;  %p2991_p7 = pnand %p2261_p6, %p59_p10 }
  0x8f   : > { %s338_s24 = sshll.u32 %s329_s14, 4  ;;  %s326_s18 = scalar_lea.sflag [#allocation3], %s2977_s21  ;;  %s2995_s24 = int_to_ptr.vmem [resolvable:$true] %s338_s24 }
  0x90   : > { %p2570_p12 = pneg %p2991_p7 }
  0x92   : > { %s2987_s30 = scalar_lea.hbm %s3446_s0, %s2010_s23  ;;  %s2573_s27 = scalar_lea.hbm %s3446_s0, 2048 }
  0x93   : > { %s2568_s19 = scalar_lea.hbm %s2987_s30, 1024  ;;  %p2574_p2 = scmp.lt.u32.totalorder %s2987_s30, %s3446_s0 }
  0x94   : > { %p2569_p9 = scmp.ne.s32.totalorder %s2987_s30, %s2568_s19  ;;  %p2575_p13 = scmp.lt.u32.totalorder %s2573_s27, %s2568_s19 }
  0x95   : > { %p2577_p8 = scmp.lt.u32.totalorder %s2568_s19, %s2987_s30 }
  0x96   : > { %p2571_p0 = pnand %p2570_p12, %p2569_p9  ;;  %p2576_p4 = por %p2575_p13, %p2574_p2 }
  0x98   : > { %p2572_p1 = pneg %p2571_p0  ;;  %p2578_p6 = por %p2577_p8, %p2576_p4 }
  0x9a   : > { %p2579_p10 = pnand %p2578_p6, %p2572_p1 }
  0x9c   : > { %2582 = shalt.err (!%p2579_p10)
}
  0x9d   : > { %s2583_s20 = scalar_lea.vmem %s2995_s24, 1024  ;;  %s2736_s12 = smov [#allocation2]  }
  0x9e   : > { %p2584_p3 = scmp.ne.s32.totalorder %s2995_s24, %s2583_s20  ;;  %s2588_s23 = sshll.u32 %s2736_s12, 4  ;;  %s2589_s23 = int_to_ptr.vmem [resolvable:$false] %s2588_s23 }
  0x9f   : > { %s2590_s22 = scalar_lea.vmem %s2589_s23, 2048  ;;  %p2591_p0 = scmp.lt.s32.totalorder %s2995_s24, %s2589_s23 }
  0xa0   : > { %p2586_p11 = pnand %p2584_p3, %p2570_p12  ;;  %p2592_p2 = scmp.lt.s32.totalorder %s2590_s22, %s2583_s20 }
  0xa2   : > { %p2587_p9 = pneg %p2586_p11  ;;  %p2593_p13 = por %p2592_p2, %p2591_p0 }
  0xa4   : > { %p2594_p4 = pnand %p2593_p13, %p2587_p9 }
  0xa6   : > { %2597 = shalt.err (!%p2594_p4)
}
  0xa7   : > { %s2737_s19 = smov 64   ;;  %s2738_s27 = smov 4  }
  0xa8   : > { %2249 = dma.hbm_to_vmem [thread:$0]  (!%p2991_p7), %s2987_s30, 1024, %s2995_s24, %s326_s18, %s2737_s19, %s2737_s19, %s2738_s27  }
  0xa9   : > { %s348_s14 = sand.u32 1, %s2726_s10   ;;  %s1904_s12 = sshll.u32 %s2977_s21, 4 }
  0xaa   : > { %s2011_s23 = sshll.u32 %s2722_s9, 8  ;;  %s352_s20 = scalar_lea.vmem [#allocation5], %s1904_s12 }
  0xab   : > { %s361_s22 = sshll.u32 %s352_s20, 4  ;;  %s3031_s2 = scalar_lea.hbm %s3408_s1, %s2011_s23  ;;  %s3033_s22 = int_to_ptr.vmem [resolvable:$true] %s361_s22 }
  0xac   : > { %s3035_s3 = scalar_lea.sflag [#allocation6], %s348_s14  ;;  %s2598_s4 = scalar_lea.hbm %s3031_s2, 256 }
  0xad   : > { %p2599_p1 = scmp.ne.s32.totalorder %s3031_s2, %s2598_s4  ;;  %s2603_s0 = scalar_lea.hbm %s3408_s1, 512 }
  0xae   : > { %p2604_p10 = scmp.lt.u32.totalorder %s3031_s2, %s3408_s1  ;;  %p2605_p3 = scmp.lt.u32.totalorder %s2603_s0, %s2598_s4 }
  0xaf   : > { %p2601_p8 = pnand %p2599_p1, %p2570_p12  ;;  %p2607_p9 = scmp.lt.u32.totalorder %s2598_s4, %s3031_s2 }
  0xb0   : > { %p2606_p11 = por %p2605_p3, %p2604_p10 }
  0xb1   : > { %p2602_p6 = pneg %p2601_p8 }
  0xb2   : > { %p2608_p0 = por %p2607_p9, %p2606_p11 }
  0xb4   : > { %p2609_p2 = pnand %p2608_p0, %p2602_p6 }
  0xb6   : > { %2612 = shalt.err (!%p2609_p2)
}
  0xb7   : > { %s2613_s18 = scalar_lea.vmem %s3033_s22, 256  ;;  %s2739_s19 = smov [#allocation5]  }
  0xb8   : > { %p2614_p13 = scmp.ne.s32.totalorder %s3033_s22, %s2613_s18  ;;  %s2618_s27 = sshll.u32 %s2739_s19, 4  ;;  %s2619_s27 = int_to_ptr.vmem [resolvable:$false] %s2618_s27 }
  0xb9   : > { %s2620_s14 = scalar_lea.vmem %s2619_s27, 512  ;;  %p2621_p8 = scmp.lt.s32.totalorder %s3033_s22, %s2619_s27 }
  0xba   : > { %p2616_p4 = pnand %p2614_p13, %p2570_p12  ;;  %p2622_p10 = scmp.lt.s32.totalorder %s2620_s14, %s2613_s18 }
  0xbc   : > { %p2617_p1 = pneg %p2616_p4  ;;  %p2623_p3 = por %p2622_p10, %p2621_p8 }
  0xbe   : > { %p2624_p11 = pnand %p2623_p3, %p2617_p1 }
  0xc0   : > { %2627 = shalt.err (!%p2624_p11)
}
  0xc1   : > { %s3448_s4 = smov 8   ;;  %s3449_s12 = smov 128  }
  0xc2   : > { %2252 = dma.hbm_to_vmem [thread:$0]  (!%p2991_p7), %s3031_s2, 256, %s3033_s22, %s3035_s3, %s3449_s12, %s3449_s12, %s3448_s4  }
  0xc3   : > { %p3450_p12 = scmp.ne.s32.totalorder %s3436_s15, 0 }
  0xc4   : > { %s3067_s23 = sand.u32 (!%p3450_p12), 1, %s2710_s28   ;;  %p3451_p6 = scmp.ne.s32.totalorder (!%p3450_p12), %s3433_s13, 0 }
  0xc5   : > { %373 = sbr.rel (%p3450_p12) target bundleno = 1235 (0x4d3), region = 52  ;;  %s1908_s20 = sshll.u32 (!%p3450_p12), %s3067_s23, 6 }
  0xc6   : > { %s376_s21 = scalar_lea.sflag (!%p3450_p12), [#allocation3], %s3067_s23  ;;  %s3071_s30 = scalar_lea.vmem (!%p3450_p12), [#allocation2], %s1908_s20 }
  0xcc   : > { %2681 = dma.done.wait (%p3451_p6), %s376_s21, 1024  }
  0xcd   : > { %2683 = vsyncadd (%p3451_p6), %s376_s21, 4294966272  ;;  %s384_s2 = sand.u32 1, %s2823_s11   ;;  %s1909_s3 = sshll.u32 %s3067_s23, 4 }
  0xce   : > { %s385_s15 = scalar_lea.sflag [#allocation6], %s384_s2  ;;  %s3081_s25 = scalar_lea.vmem [#allocation5], %s1909_s3 }
  0xcf   : > { %2685 = dma.done.wait (%p3451_p6), %s385_s15, 256  }
  0xd0   : > { %2687 = vsyncadd (%p3451_p6), %s385_s15, 4294967040  ;;  %p3452_p7 = scmp.eq.s32.totalorder %s2823_s11, 0 }
  0xd2   : > { %2689 = dma.done.wait (%p3452_p7), [#allocation6], 576   ;;  %p3453_p9 = pmov %p3452_p7 }
  0xd3   : > { %p3454_p0 = pmov %p3452_p7 }
  0xd4   : > { %2691 = vsyncadd (%p3453_p9), [#allocation6], 4294966720 }
  0xd5   : > { %2693 = dma.done.wait (%p3454_p0), [#allocation9], 560   ;;  %p3455_p2 = pmov %p3454_p0 }
  0xd6   : > { %p3456_p13 = pmov %p3454_p0 }
  0xd7   : > { %2695 = vsyncadd (%p3455_p2), [#allocation9], 4294966736 }
  0xd8   : > { %2697 = dma.done.wait (%p3456_p13), [#allocation12], 3072   ;;  %p3457_p4 = pmov %p3454_p0 }
  0xd9   : > { %v2740_v0 = vmov 0   ;;  %vm648_vm0 = vcmask 1040384   ;;  %vm649_vm1 = vcmask 1041408   ;;  %v2741_v1 = vmov 65535   ;;  %v2331_v3 = vld [vmem:[#allocation7 + $0x4] ss:$12 sps:$4 sm:$0xff]  }
  0xda   : > { %2699 = vsyncadd (%p3457_p4), [#allocation12], 4294964224  ;;  %693 = vmatprep.mubr.bf16.mxu1 %v2740_v0  ;;  %525 = vmatprep.mubr.bf16.mxu0 %v2740_v0  ;;  %v650_v2 = vsel %vm648_vm0, 4294967295, %v2741_v1  ;;  %v2333_v4 = vld [vmem:[#allocation7] ss:$12 sps:$4 sm:$0xff]   ;;  %vm623_vm2 = vcmask 154624   ;;  %v544_v46 = vlaneseq }
  0xdb   : > { %v651_v5 = vsel %vm649_vm1, %v650_v2, 0  ;;  %661 = vmatprep.subr.bf16.mxu1 %v2331_v3  ;;  %v2334_v6 = vld [vmem:[#allocation10 + $0x4] ss:$8 sps:$4 sm:$0xff]   ;;  %v2336_v7 = vld [vmem:[#allocation10] ss:$8 sps:$4 sm:$0xff]   ;;  %v2342_v17 = vld [vmem:[%s3071_s30] sm:$0xff]  }
  0xdc   : > { %v540_v8 = vld [vmem:[#allocation7 + $0x18] sm:$0x33]  ;;  %662 = vmatpush1.bf16.msra.mxu1 %v2333_v4  ;;  %493 = vmatprep.subr.bf16.mxu0 %v2334_v6  ;;  %v3102_v15 = vld [vmem:[%s3081_s25] sm:$0xff]  ;;  %vm489_vm3 = vcmask 261120   ;;  %v2343_v21 = vld [vmem:[%s3071_s30 + $0x8] sm:$0xff]   ;;  %v2742_v38 = vmov 0.0  }
  0xdd   : > { %v1932_v9 = vcombine.high %v540_v8, %v540_v8  ;;  %v1931_v10 = vcombine.low %v540_v8, %v540_v8  ;;  %v2339_v11 = vld [vmem:[#allocation10 + $0x14] ss:$8 sps:$4 sm:$0xff]   ;;  %494 = vmatpush1.bf16.msra.mxu0 %v2336_v7  ;;  %v2341_v14 = vld [vmem:[#allocation10 + $0x10] ss:$8 sps:$4 sm:$0xff]   ;;  %v2350_v19 = vld [vmem:[#allocation7 + $0x8] ss:$12 sps:$4 sm:$0xff]  }
  0xde   : > { %v3105_v16 = vld [vmem:[%s3081_s25 + $0x8] sm:$0xff]  ;;  %495 = vmatprep.subr.bf16.mxu0 %v2339_v11  ;;  %v2351_v20 = vld [vmem:[#allocation7 + $0x20] ss:$0 sps:$4 sm:$0x33]   ;;  %v2344_v25 = vld [vmem:[%s3071_s30 + $0x10] sm:$0xff]   ;;  %vm2743_vm4 = vmmov 0  }
  0xdf   : > { %v656_v12 = vand.u32 %v1932_v9, %v651_v5  ;;  %v653_v13 = vand.u32 %v1931_v10, %v651_v5  ;;  %v464_v18 = vpack.c.bf16 %v3105_v16, %v3102_v15  ;;  %v659_v22 = vand.u32 %v2351_v20, %v651_v5  ;;  %v2352_v23 = vld [vmem:[#allocation11] ss:$12 sps:$4 sm:$0xff]   ;;  %v2353_v24 = vld [vmem:[#allocation11 + $0x18] ss:$12 sps:$4 sm:$0xff]   ;;  %v2354_v26 = vld [vmem:[#allocation11 + $0x30] ss:$12 sps:$4 sm:$0xff]  }
  0xe0   : > { %v2345_v27 = vld [vmem:[%s3071_s30 + $0x18] sm:$0xff]   ;;  %v2346_v28 = vld [vmem:[%s3071_s30 + $0x20] sm:$0xff]   ;;  %v2347_v29 = vld [vmem:[%s3071_s30 + $0x28] sm:$0xff]   ;;  %v3152_v47 = vshrl.u32 %v544_v46, 7  ;;  %s3458_s4 = sld [smem:[#allocation21_spill]]  ;;  %s441_s20 = scalar_lea.vmem [#allocation13], %s1909_s3 }
  0xe1   : > { %663 = vmatprep.subr.bf16.mxu1 %v656_v12  ;;  %496 = vmatpush1.bf16.msra.mxu0 %v2341_v14  ;;  %v2348_v30 = vld [vmem:[%s3071_s30 + $0x30] sm:$0xff]   ;;  %v2349_v31 = vld [vmem:[%s3071_s30 + $0x38] sm:$0xff]   ;;  %v2357_v34 = vld [vmem:[#allocation11 + $0x78] ss:$12 sps:$4 sm:$0xff]   ;;  %s1742_s21 = sshll.u32 %s441_s20, 4  ;;  %s3459_s15 = sld [smem:[#allocation27_spill]]  ;;  %s3356_s21 = int_to_ptr.vmem [resolvable:$true] %s1742_s21 }
  0xe2   : > { %664 = vmatpush1.bf16.msra.mxu1 %v653_v13  ;;  %2067 = vmatprep.subr.bf16.mxu0 %v2350_v19  ;;  %v2355_v32 = vld [vmem:[#allocation11 + $0x48] ss:$12 sps:$4 sm:$0xff]   ;;  %v2356_v33 = vld [vmem:[#allocation11 + $0x60] ss:$12 sps:$4 sm:$0xff]   ;;  %v2358_v35 = vld [vmem:[#allocation11 + $0x90] ss:$12 sps:$4 sm:$0xff]  }
  0xe3   : > { %v2359_v36 = vld [vmem:[#allocation11 + $0xa8] ss:$12 sps:$4 sm:$0xff]   ;;  %v2360_v37 = vld [vmem:[#allocation11 + $0x4] ss:$12 sps:$4 sm:$0xff]   ;;  %2139 = vmatprep.subr.bf16.mxu1 %v2742_v38  ;;  %v2363_v41 = vld [vmem:[#allocation11 + $0x4c] ss:$12 sps:$4 sm:$0xff]  }
  0xe4   : > { %1919 = vmatmul.mubr.msk.bf16.vlgmr.msra.gmra.mrb[0].mxu0 %vm489_vm3, %v464_v18  ;;  %v2361_v39 = vld [vmem:[#allocation11 + $0x1c] ss:$12 sps:$4 sm:$0xff]   ;;  %v2362_v40 = vld [vmem:[#allocation11 + $0x34] ss:$12 sps:$4 sm:$0xff]   ;;  %v2364_v42 = vld [vmem:[#allocation11 + $0x64] ss:$12 sps:$4 sm:$0xff]  }
  0xe5   : > { %1934 = vmatmul.mubr.msk.bf16.vlgmr.msra.gmra.mrb[0].mxu1 %vm623_vm2, %v2342_v17  ;;  %2071 = vmatprep.mubr.msk.bf16.mxu0 %vm623_vm2, %v2342_v17  ;;  %v2365_v43 = vld [vmem:[#allocation11 + $0x7c] ss:$12 sps:$4 sm:$0xff]   ;;  %v2366_v44 = vld [vmem:[#allocation11 + $0x94] ss:$12 sps:$4 sm:$0xff]   ;;  %v2367_v45 = vld [vmem:[#allocation11 + $0xac] ss:$12 sps:$4 sm:$0xff]  }
  0xe6   : > { %703 = vmatprep.mubr.bf16.mxu1 %v2740_v0  ;;  %2068 = vmatpush3.bf16.msra.mxu0 %v2350_v19  ;;  %v546_v48 = vsub.s32 0, %v3152_v47  ;;  %v3155_v49 = vld [vmem:[#allocation8] sm:$0x7]  ;;  %v550_v50 = vsub.s32 1, %v3152_v47  ;;  %s2012_s12 = sshll.u32 %s3458_s4, 8  ;;  %s1727_s3 = scalar_lea.sflag [#allocation4], %s3067_s23 }
  0xe7   : > { %2069 = vmatprep.subr.bf16.mxu0 %v659_v22  ;;  %2140 = vmatpush3.bf16.msra.mxu1 %v2360_v37  ;;  %s2628_s11 = scalar_lea.vmem %s3356_s21, 256  ;;  %s2744_s13 = smov [#allocation13]  }
  0xe8   : > { %2141 = vmatprep.subr.bf16.mxu1 %v2742_v38  ;;  %v3159_v51 = vrot.slane %v3155_v49, %v546_v48  ;;  %v3162_v52 = vrot.slane %v3155_v49, %v550_v50  ;;  %p2629_p1 = scmp.ne.s32.totalorder %s3356_s21, %s2628_s11  ;;  %s2632_s22 = sshll.u32 %s2744_s13, 4  ;;  %s2633_s22 = int_to_ptr.vmem [resolvable:$false] %s2632_s22 }
  0xe9   : > { %s2634_s0 = scalar_lea.vmem %s2633_s22, 512  ;;  %p2635_p3 = scmp.lt.s32.totalorder %s3356_s21, %s2633_s22 }
  0xea   : > { %2070 = vmatpush3.bf16.msra.mxu0 %v659_v22  ;;  %p2630_p8 = pnand %p2629_p1, %p2970_p5  ;;  %p2636_p11 = scmp.lt.s32.totalorder %s2634_s0, %s2628_s11 }
  0xeb   : > { %2087 = vmatprep.subr.bf16.mxu0 %v2352_v23  ;;  %2142 = vmatpush3.bf16.msra.mxu1 %v2361_v39 }
  0xec   : > { %2143 = vmatprep.subr.bf16.mxu1 %v2742_v38  ;;  %p2631_p10 = pneg %p2630_p8  ;;  %p2637_p12 = por %p2636_p11, %p2635_p3 }
  0xed   : > { %1935 = vmatmul.mubr.msk.bf16.gmra.mrb[4].mxu1 %vm623_vm2, %v2343_v21  ;;  %2072 = vmatmul.mubr.msk.bf16.vlgmr.msra.gmra.mrb[4].mxu0 %vm623_vm2, %v2343_v21 }
  0xee   : > { %713 = vmatprep.mubr.bf16.mxu1 %v2740_v0  ;;  %2088 = vmatpush3.bf16.msra.mxu0 %v2352_v23  ;;  %p2638_p6 = pnand %p2637_p12, %p2631_p10 }
  0xef   : > { %2075 = vmatprep.mubr.msk.bf16.mxu0 %vm623_vm2, %v2344_v25  ;;  %2089 = vmatprep.subr.bf16.mxu0 %v2353_v24 }
  0xf0   : > { %2144 = vmatpush3.bf16.msra.mxu1 %v2362_v40 }
  0xf1   : > { %2145 = vmatprep.subr.bf16.mxu1 %v2742_v38 }
  0xf2   : > { %2090 = vmatpush3.bf16.msra.mxu0 %v2353_v24 }
  0xf3   : > { %2091 = vmatprep.subr.bf16.mxu0 %v2354_v26 }
  0xf4   : > { %2146 = vmatpush3.bf16.msra.mxu1 %v2363_v41 }
  0xf5   : > { %1936 = vmatmul.mubr.msk.bf16.gmra.mrb[8].mxu1 %vm623_vm2, %v2344_v25  ;;  %2076 = vmatmul.mubr.msk.bf16.gmra.mrb[8].mxu0 %vm623_vm2, %v2345_v27 }
  0xf6   : > { %723 = vmatprep.mubr.bf16.mxu1 %v2740_v0  ;;  %2092 = vmatpush3.bf16.msra.mxu0 %v2354_v26 }
  0xf7   : > { %2079 = vmatprep.mubr.msk.bf16.mxu0 %vm623_vm2, %v2346_v28  ;;  %2093 = vmatprep.subr.bf16.mxu0 %v2355_v32 }
  0xf8   : > { %2147 = vmatprep.subr.bf16.mxu1 %v2742_v38 }
  0xf9   : > { %2148 = vmatpush3.bf16.msra.mxu1 %v2364_v42 }
  0xfa   : > { %2094 = vmatpush3.bf16.msra.mxu0 %v2355_v32  ;;  %2149 = vmatprep.subr.bf16.mxu1 %v2742_v38 }
  0xfb   : > { %2095 = vmatprep.subr.bf16.mxu0 %v2356_v33 }
  0xfd   : > { %1937 = vmatmul.mubr.msk.bf16.gmra.mrb[12].mxu1 %vm623_vm2, %v2345_v27  ;;  %2080 = vmatmul.mubr.msk.bf16.gmra.mrb[12].mxu0 %vm623_vm2, %v2347_v29 }
  0xfe   : > { %733 = vmatprep.mubr.bf16.mxu1 %v2740_v0  ;;  %2083 = vmatprep.mubr.msk.bf16.mxu0 %vm623_vm2, %v2348_v30 }
  0xff   : > { %2096 = vmatpush3.bf16.msra.mxu0 %v2356_v33  ;;  %2150 = vmatpush3.bf16.msra.mxu1 %v2365_v43 }
 0x100   : > { %2097 = vmatprep.subr.bf16.mxu0 %v2357_v34  ;;  %2151 = vmatprep.subr.bf16.mxu1 %v2742_v38 }
 0x103   : > { %2098 = vmatpush3.bf16.msra.mxu0 %v2357_v34  ;;  %2152 = vmatpush3.bf16.msra.mxu1 %v2366_v44 }
 0x104   : > { %2099 = vmatprep.subr.bf16.mxu0 %v2358_v35  ;;  %2153 = vmatprep.subr.bf16.mxu1 %v2742_v38 }
 0x105   : > { %1938 = vmatmul.mubr.msk.bf16.gmra.mrb[16].mxu1 %vm623_vm2, %v2346_v28  ;;  %2084 = vmatmul.mubr.msk.bf16.gmra.mrb[16].mxu0 %vm623_vm2, %v2349_v31 }
 0x106   : > { %743 = vmatprep.mubr.bf16.mxu1 %v2740_v0 }
 0x107   : > { %2100 = vmatpush3.bf16.msra.mxu0 %v2358_v35  ;;  %2154 = vmatpush3.bf16.msra.mxu1 %v2367_v45 }
 0x108   : > { %2101 = vmatprep.subr.bf16.mxu0 %v2359_v36  ;;  %2159 = vmatprep.subr.bf16.mxu1 %v2742_v38 }
 0x10b   : > { %2102 = vmatpush3.bf16.msra.mxu0 %v2359_v36 }
 0x10d   : > { %1939 = vmatmul.mubr.msk.bf16.gmra.mrb[20].mxu1 %vm623_vm2, %v2347_v29 }
 0x10e   : > { %753 = vmatprep.mubr.bf16.mxu1 %v2740_v0 }
 0x115   : > { %1940 = vmatmul.mubr.msk.bf16.gmra.mrb[24].mxu1 %vm623_vm2, %v2348_v30 }
 0x116   : > { %763 = vmatprep.mubr.bf16.mxu1 %v2740_v0 }
 0x11d   : > { %1941 = vmatmul.mubr.msk.bf16.gmra.mrb[28].mxu1 %vm623_vm2, %v2349_v31 }
 0x11e   : > { %2155 = vmatprep.mubr.msk.bf16.mxu1 %vm2743_vm4, %v2742_v38 }
 0x1b7   : > { %v3165_v56 = vpop.f32.mrb[0].mxu0 }
 0x1b8   : > { %v695_v53 = vpop.f32.mrb[0].mxu1  ;;  %v3168_v59 = vpop.f32.mrb[1].mxu0 }
 0x1b9   : > { %v696_v54 = vadd.f32 %v695_v53, %v3159_v51  ;;  %v697_v55 = vpop.f32.mrb[1].mxu1  ;;  %v3171_v62 = vpop.f32.mrb[2].mxu0 }
 0x1ba   : > { %v698_v57 = vadd.f32 %v697_v55, %v3162_v52  ;;  %v699_v58 = vpop.f32.mrb[2].mxu1  ;;  %v3175_v1 = vpop.f32.mrb[3].mxu0 }
 0x1bb   : > { %v700_v60 = vadd.f32 %v699_v58, %v3159_v51  ;;  %v701_v61 = vpop.f32.mrb[3].mxu1  ;;  %v871_v63 = vadd.f32 %v696_v54, %v3165_v56 }
 0x1bc   : > { %v702_v0 = vadd.f32 %v701_v61, %v3162_v52  ;;  %v1352_v2 = vadd.f32 %v698_v57, %v3168_v59 }
 0x1bd   : > { %v872_v3 = vadd.f32 %v700_v60, %v3171_v62  ;;  %v887_v4 = vmul.f32 0.1, %v871_v63 }
 0x1be   : > { %v1353_v5 = vadd.f32 %v702_v0, %v3175_v1  ;;  %v1368_v6 = vmul.f32 0.1, %v1352_v2 }
 0x1bf   : > { %v888_v7 = vmul.f32 0.1, %v872_v3  ;;  %v903_v12 = vmax.f32 %v871_v63, %v887_v4 }
 0x1c0   : > { %v705_v8 = vpop.f32.mrb[4].mxu1  ;;  %v1369_v9 = vmul.f32 0.1, %v1353_v5  ;;  %v1384_v18 = vmax.f32 %v1352_v2, %v1368_v6 }
 0x1c1   : > { %v706_v10 = vadd.f32 %v705_v8, %v3159_v51  ;;  %v707_v11 = vpop.f32.mrb[5].mxu1  ;;  %v904_v13 = vmax.f32 %v872_v3, %v888_v7 }
 0x1c2   : > { %v708_v14 = vadd.f32 %v707_v11, %v3162_v52  ;;  %v709_v17 = vpop.f32.mrb[6].mxu1  ;;  %v1385_v19 = vmax.f32 %v1353_v5, %v1369_v9 }
 0x1c3   : > { %v873_v20 = vadd.f32 %v706_v10, %v3165_v56  ;;  %v710_v21 = vadd.f32 %v709_v17, %v3159_v51  ;;  %v711_v22 = vpop.f32.mrb[7].mxu1  ;;  %v919_v23 = vpack.c.bf16 %v904_v13, %v903_v12 }
 0x1c4   : > { %v1354_v24 = vadd.f32 %v708_v14, %v3168_v59  ;;  %v712_v25 = vadd.f32 %v711_v22, %v3162_v52  ;;  %v3186_v26 = vpack.c.bf16 %v1385_v19, %v1384_v18 }
 0x1c5   : > { %v889_v27 = vmul.f32 0.1, %v873_v20  ;;  %v874_v28 = vadd.f32 %v710_v21, %v3171_v62  ;;  %2103 = vmatprep.mubr.bf16.mxu0 %v919_v23 }
 0x1c6   : > { %v1370_v29 = vmul.f32 0.1, %v1354_v24  ;;  %v1355_v30 = vadd.f32 %v712_v25, %v3175_v1 }
 0x1c7   : > { %v890_v31 = vmul.f32 0.1, %v874_v28  ;;  %v905_v34 = vmax.f32 %v873_v20, %v889_v27 }
 0x1c8   : > { %v1371_v32 = vmul.f32 0.1, %v1355_v30  ;;  %v715_v33 = vpop.f32.mrb[8].mxu1  ;;  %v1386_v39 = vmax.f32 %v1354_v24, %v1370_v29 }
 0x1c9   : > { %v906_v35 = vmax.f32 %v874_v28, %v890_v31  ;;  %v716_v36 = vadd.f32 %v715_v33, %v3159_v51  ;;  %v717_v37 = vpop.f32.mrb[9].mxu1 }
 0x1ca   : > { %v1387_v40 = vmax.f32 %v1355_v30, %v1371_v32  ;;  %v718_v41 = vadd.f32 %v717_v37, %v3162_v52  ;;  %v719_v42 = vpop.f32.mrb[10].mxu1 }
 0x1cb   : > { %v920_v43 = vpack.c.bf16 %v906_v35, %v905_v34  ;;  %v875_v44 = vadd.f32 %v716_v36, %v3165_v56  ;;  %v720_v45 = vadd.f32 %v719_v42, %v3159_v51  ;;  %v721_v46 = vpop.f32.mrb[11].mxu1 }
 0x1cc   : > { %v3194_v48 = vpack.c.bf16 %v1387_v40, %v1386_v39  ;;  %v1356_v50 = vadd.f32 %v718_v41, %v3168_v59  ;;  %v722_v53 = vadd.f32 %v721_v46, %v3162_v52 }
 0x1cd   : > { %v891_v54 = vmul.f32 0.1, %v875_v44  ;;  %v876_v55 = vadd.f32 %v720_v45, %v3171_v62  ;;  %2104 = vmatmul.mubr.bf16.vlgmr.msra.gmra.mrb[20].mxu0 %v920_v43 }
 0x1ce   : > { %v1372_v57 = vmul.f32 0.1, %v1356_v50  ;;  %v1357_v58 = vadd.f32 %v722_v53, %v3175_v1 }
 0x1cf   : > { %v892_v60 = vmul.f32 0.1, %v876_v55  ;;  %v907_v0 = vmax.f32 %v875_v44, %v891_v54 }
 0x1d0   : > { %v1373_v61 = vmul.f32 0.1, %v1357_v58  ;;  %v725_v63 = vpop.f32.mrb[12].mxu1  ;;  %v1388_v5 = vmax.f32 %v1356_v50, %v1372_v57 }
 0x1d1   : > { %v908_v2 = vmax.f32 %v876_v55, %v892_v60  ;;  %v726_v3 = vadd.f32 %v725_v63, %v3159_v51  ;;  %v727_v4 = vpop.f32.mrb[13].mxu1 }
 0x1d2   : > { %v1389_v6 = vmax.f32 %v1357_v58, %v1373_v61  ;;  %v728_v7 = vadd.f32 %v727_v4, %v3162_v52  ;;  %v729_v8 = vpop.f32.mrb[14].mxu1 }
 0x1d3   : > { %v877_v9 = vadd.f32 %v726_v3, %v3165_v56  ;;  %v730_v10 = vadd.f32 %v729_v8, %v3159_v51  ;;  %v731_v11 = vpop.f32.mrb[15].mxu1  ;;  %v921_v12 = vpack.c.bf16 %v908_v2, %v907_v0 }
 0x1d4   : > { %v3204_v13 = vpack.c.bf16 %v1389_v6, %v1388_v5  ;;  %v1358_v14 = vadd.f32 %v728_v7, %v3168_v59  ;;  %v732_v17 = vadd.f32 %v731_v11, %v3162_v52 }
 0x1d5   : > { %v893_v18 = vmul.f32 0.1, %v877_v9  ;;  %v878_v19 = vadd.f32 %v730_v10, %v3171_v62  ;;  %2107 = vmatprep.mubr.bf16.mxu0 %v921_v12 }
 0x1d6   : > { %v1374_v20 = vmul.f32 0.1, %v1358_v14  ;;  %v1359_v21 = vadd.f32 %v732_v17, %v3175_v1 }
 0x1d7   : > { %v894_v22 = vmul.f32 0.1, %v878_v19  ;;  %v909_v25 = vmax.f32 %v877_v9, %v893_v18 }
 0x1d8   : > { %v1375_v23 = vmul.f32 0.1, %v1359_v21  ;;  %v735_v24 = vpop.f32.mrb[16].mxu1  ;;  %v1390_v30 = vmax.f32 %v1358_v14, %v1374_v20 }
 0x1d9   : > { %v910_v27 = vmax.f32 %v878_v19, %v894_v22  ;;  %v736_v28 = vadd.f32 %v735_v24, %v3159_v51  ;;  %v737_v29 = vpop.f32.mrb[17].mxu1 }
 0x1da   : > { %v1391_v31 = vmax.f32 %v1359_v21, %v1375_v23  ;;  %v738_v32 = vadd.f32 %v737_v29, %v3162_v52  ;;  %v739_v33 = vpop.f32.mrb[18].mxu1 }
 0x1db   : > { %v879_v34 = vadd.f32 %v736_v28, %v3165_v56  ;;  %v740_v35 = vadd.f32 %v739_v33, %v3159_v51  ;;  %v741_v36 = vpop.f32.mrb[19].mxu1  ;;  %v922_v37 = vpack.c.bf16 %v910_v27, %v909_v25 }
 0x1dc   : > { %v3214_v39 = vpack.c.bf16 %v1391_v31, %v1390_v30  ;;  %v1360_v40 = vadd.f32 %v738_v32, %v3168_v59  ;;  %v742_v41 = vadd.f32 %v741_v36, %v3162_v52 }
 0x1dd   : > { %v895_v42 = vmul.f32 0.1, %v879_v34  ;;  %v880_v43 = vadd.f32 %v740_v35, %v3171_v62  ;;  %2108 = vmatmul.mubr.bf16.gmra.mrb[24].mxu0 %v922_v37 }
 0x1de   : > { %v1376_v44 = vmul.f32 0.1, %v1360_v40  ;;  %v1361_v45 = vadd.f32 %v742_v41, %v3175_v1 }
 0x1df   : > { %v896_v46 = vmul.f32 0.1, %v880_v43  ;;  %v911_v54 = vmax.f32 %v879_v34, %v895_v42 }
 0x1e0   : > { %v1377_v50 = vmul.f32 0.1, %v1361_v45  ;;  %v745_v53 = vpop.f32.mrb[20].mxu1  ;;  %v1392_v60 = vmax.f32 %v1360_v40, %v1376_v44 }
 0x1e1   : > { %v912_v55 = vmax.f32 %v880_v43, %v896_v46  ;;  %v746_v57 = vadd.f32 %v745_v53, %v3159_v51  ;;  %v747_v58 = vpop.f32.mrb[21].mxu1 }
 0x1e2   : > { %v1393_v61 = vmax.f32 %v1361_v45, %v1377_v50  ;;  %v748_v63 = vadd.f32 %v747_v58, %v3162_v52  ;;  %v749_v0 = vpop.f32.mrb[22].mxu1 }
 0x1e3   : > { %v881_v2 = vadd.f32 %v746_v57, %v3165_v56  ;;  %v750_v3 = vadd.f32 %v749_v0, %v3159_v51  ;;  %v751_v4 = vpop.f32.mrb[23].mxu1  ;;  %v923_v5 = vpack.c.bf16 %v912_v55, %v911_v54 }
 0x1e4   : > { %v1404_v6 = vpack.c.bf16 %v1393_v61, %v1392_v60  ;;  %v1362_v7 = vadd.f32 %v748_v63, %v3168_v59  ;;  %v752_v8 = vadd.f32 %v751_v4, %v3162_v52 }
 0x1e5   : > { %v897_v9 = vmul.f32 0.1, %v881_v2  ;;  %v882_v10 = vadd.f32 %v750_v3, %v3171_v62  ;;  %2111 = vmatprep.mubr.bf16.mxu0 %v923_v5 }
 0x1e6   : > { %v1408_v11 = vmax.bf16 %v1404_v6, %v3186_v26  ;;  %v1378_v12 = vmul.f32 0.1, %v1362_v7  ;;  %v1363_v14 = vadd.f32 %v752_v8, %v3175_v1 }
 0x1e7   : > { %v898_v17 = vmul.f32 0.1, %v882_v10  ;;  %v913_v20 = vmax.f32 %v881_v2, %v897_v9 }
 0x1e8   : > { %v1379_v18 = vmul.f32 0.1, %v1363_v14  ;;  %v755_v19 = vpop.f32.mrb[24].mxu1  ;;  %v1394_v24 = vmax.f32 %v1362_v7, %v1378_v12 }
 0x1e9   : > { %v914_v21 = vmax.f32 %v882_v10, %v898_v17  ;;  %v756_v22 = vadd.f32 %v755_v19, %v3159_v51  ;;  %v757_v23 = vpop.f32.mrb[25].mxu1 }
 0x1ea   : > { %v1395_v25 = vmax.f32 %v1363_v14, %v1379_v18  ;;  %v758_v27 = vadd.f32 %v757_v23, %v3162_v52  ;;  %v759_v28 = vpop.f32.mrb[26].mxu1 }
 0x1eb   : > { %v883_v29 = vadd.f32 %v756_v22, %v3165_v56  ;;  %v760_v26 = vadd.f32 %v759_v28, %v3159_v51  ;;  %v761_v30 = vpop.f32.mrb[27].mxu1  ;;  %v924_v31 = vpack.c.bf16 %v914_v21, %v913_v20 }
 0x1ec   : > { %v1405_v32 = vpack.c.bf16 %v1395_v25, %v1394_v24  ;;  %v1364_v33 = vadd.f32 %v758_v27, %v3168_v59  ;;  %v762_v34 = vadd.f32 %v761_v30, %v3162_v52 }
 0x1ed   : > { %v899_v35 = vmul.f32 0.1, %v883_v29  ;;  %v884_v36 = vadd.f32 %v760_v26, %v3171_v62  ;;  %2112 = vmatmul.mubr.bf16.gmra.mrb[28].mxu0 %v924_v31 }
 0x1ee   : > { %v1409_v37 = vmax.bf16 %v1405_v32, %v3194_v48  ;;  %v1380_v40 = vmul.f32 0.1, %v1364_v33  ;;  %v1365_v41 = vadd.f32 %v762_v34, %v3175_v1 }
 0x1ef   : > { %v900_v42 = vmul.f32 0.1, %v884_v36  ;;  %v915_v46 = vmax.f32 %v883_v29, %v899_v35 }
 0x1f0   : > { %v1412_v43 = vmax.bf16 %v1409_v37, %v1408_v11  ;;  %v1381_v44 = vmul.f32 0.1, %v1365_v41  ;;  %v765_v45 = vpop.f32.mrb[28].mxu1  ;;  %v1396_v55 = vmax.f32 %v1364_v33, %v1380_v40 }
 0x1f1   : > { %v916_v50 = vmax.f32 %v884_v36, %v900_v42  ;;  %v766_v53 = vadd.f32 %v765_v45, %v3159_v51  ;;  %v767_v54 = vpop.f32.mrb[29].mxu1 }
 0x1f2   : > { %v1397_v57 = vmax.f32 %v1365_v41, %v1381_v44  ;;  %v768_v58 = vadd.f32 %v767_v54, %v3162_v52  ;;  %v769_v60 = vpop.f32.mrb[30].mxu1 }
 0x1f3   : > { %v885_v61 = vadd.f32 %v766_v53, %v3165_v56  ;;  %v770_v48 = vadd.f32 %v769_v60, %v3159_v51  ;;  %v771_v63 = vpop.f32.mrb[31].mxu1  ;;  %v925_v0 = vpack.c.bf16 %v916_v50, %v915_v46 }
 0x1f4   : > { %v1406_v2 = vpack.c.bf16 %v1397_v57, %v1396_v55  ;;  %v1366_v3 = vadd.f32 %v768_v58, %v3168_v59  ;;  %v772_v4 = vadd.f32 %v771_v63, %v3162_v52 }
 0x1f5   : > { %v901_v5 = vmul.f32 0.1, %v885_v61  ;;  %v886_v6 = vadd.f32 %v770_v48, %v3171_v62  ;;  %2115 = vmatprep.mubr.bf16.mxu0 %v925_v0  ;;  %v2368_v62 = vld [vmem:[%s3412_s5] sm:$0xff]  }
 0x1f6   : > { %v1410_v7 = vmax.bf16 %v1406_v2, %v3204_v13  ;;  %v1382_v8 = vmul.f32 0.1, %v1366_v3  ;;  %v1367_v9 = vadd.f32 %v772_v4, %v3175_v1  ;;  %2119 = vmatprep.subr.bf16.mxu0 %v2368_v62  ;;  %v2369_v1 = vld [vmem:[%s3412_s5 + $0x8] sm:$0xff]   ;;  %v3259_v13 = vld [vmem:[%s3414_s7] ss:$0 sm:$0xff] }
 0x1f7   : > { %v902_v10 = vmul.f32 0.1, %v886_v6  ;;  %v917_v11 = vmax.f32 %v885_v61, %v901_v5  ;;  %2120 = vmatpush3.bf16.msra.mxu0 %v2368_v62 }
 0x1f8   : > { %v1383_v56 = vmul.f32 0.1, %v1367_v9  ;;  %v1398_v12 = vmax.f32 %v1366_v3, %v1382_v8  ;;  %2121 = vmatprep.subr.bf16.mxu0 %v2369_v1 }
 0x1f9   : > { %v918_v51 = vmax.f32 %v886_v6, %v902_v10 }
 0x1fa   : > { %v1399_v14 = vmax.f32 %v1367_v9, %v1383_v56 }
 0x1fb   : > { %v926_v17 = vpack.c.bf16 %v918_v51, %v917_v11  ;;  %2122 = vmatpush3.bf16.msra.mxu0 %v2369_v1 }
 0x1fc   : > { %v1407_v18 = vpack.c.bf16 %v1399_v14, %v1398_v12 }
 0x1fd   : > { %2116 = vmatmul.mubr.bf16.gmra.mrb[32].mxu0 %v926_v17 }
 0x1fe   : > { %v1411_v52 = vmax.bf16 %v1407_v18, %v3214_v39 }
 0x200   : > { %v1413_v59 = vmax.bf16 %v1411_v52, %v1410_v7 }
 0x202   : > { %v1414_v19 = vmax.bf16 %v1413_v59, %v1412_v43 }
 0x204   : > { %2156 = vmatmul.mubr.bf16.vlgmr.msra.gmra.mrb[32].mxu1 %v1414_v19 }
 0x205   : > { %2175 = vmatprep.mubr.msk.bf16.mxu1 %vm2743_vm4, %v2742_v38 }
 0x2a0   : > { %v2105_v39 = vpop.f32.mrb[20].mxu0 }
 0x2a1   : > { %v1041_v20 = vadd.f32 %v2105_v39, %v3259_v13  ;;  %v1032_v21 = vpop.f32.mrb[21].mxu0 }
 0x2a2   : > { %v1033_v22 = vadd.f32 %v3259_v13, %v1032_v21  ;;  %v2106_v23 = vpop.f32.mrb[22].mxu0 }
 0x2a3   : > { %v1961_v24 = vmul.f32 -1.442695, %v1041_v20  ;;  %v1044_v25 = vadd.f32 %v2106_v23, %v3259_v13  ;;  %v1035_v27 = vpop.f32.mrb[23].mxu0 }
 0x2a4   : > { %v1959_v28 = vmul.f32 -1.442695, %v1033_v22  ;;  %v1036_v29 = vadd.f32 %v3259_v13, %v1035_v27 }
 0x2a5   : > { %2378 = vpow2.f32 %v1961_v24  ;;  %v1962_v26 = vmul.f32 -1.442695, %v1044_v25 }
 0x2a6   : > { %2380 = vpow2.f32 %v1959_v28  ;;  %v1960_v30 = vmul.f32 -1.442695, %v1036_v29 }
 0x2a7   : > { %2382 = vpow2.f32 %v1962_v26 }
 0x2a8   : > { %2384 = vpow2.f32 %v1960_v30 }
 0x2af   : > { %v2379_v31 = vpop.eup %2378 }
 0x2b0   : > { %v2381_v32 = vpop.eup %2380  ;;  %v1145_v33 = vadd.f32 1.0, %v2379_v31  ;;  %v2109_v34 = vpop.f32.mrb[24].mxu0 }
 0x2b1   : > { %v2383_v35 = vpop.eup %2382  ;;  %v1143_v36 = vadd.f32 1.0, %v2381_v32  ;;  %v1057_v37 = vadd.f32 %v2109_v34, %v3259_v13  ;;  %v1048_v40 = vpop.f32.mrb[25].mxu0 }
 0x2b2   : > { %v2385_v41 = vpop.eup %2384  ;;  %2386 = vrcp.f32 %v1145_v33  ;;  %v1146_v42 = vadd.f32 1.0, %v2383_v35  ;;  %v1049_v43 = vadd.f32 %v3259_v13, %v1048_v40  ;;  %v2110_v44 = vpop.f32.mrb[26].mxu0 }
 0x2b3   : > { %2388 = vrcp.f32 %v1143_v36  ;;  %v1144_v45 = vadd.f32 1.0, %v2385_v41  ;;  %v1965_v46 = vmul.f32 -1.442695, %v1057_v37  ;;  %v1060_v50 = vadd.f32 %v2110_v44, %v3259_v13  ;;  %v1051_v53 = vpop.f32.mrb[27].mxu0 }
 0x2b4   : > { %2390 = vrcp.f32 %v1146_v42  ;;  %v1963_v54 = vmul.f32 -1.442695, %v1049_v43  ;;  %v1052_v55 = vadd.f32 %v3259_v13, %v1051_v53 }
 0x2b5   : > { %2392 = vrcp.f32 %v1144_v45  ;;  %v1966_v57 = vmul.f32 -1.442695, %v1060_v50 }
 0x2b6   : > { %2394 = vpow2.f32 %v1965_v46  ;;  %v1964_v58 = vmul.f32 -1.442695, %v1052_v55 }
 0x2b7   : > { %2396 = vpow2.f32 %v1963_v54 }
 0x2b8   : > { %2398 = vpow2.f32 %v1966_v57 }
 0x2b9   : > { %2400 = vpow2.f32 %v1964_v58 }
 0x2bc   : > { %v2387_v60 = vpop.eup %2386 }
 0x2bd   : > { %v2389_v61 = vpop.eup %2388  ;;  %v1193_v0 = vmul.f32 %v2387_v60, %v3102_v15 }
 0x2be   : > { %v2391_v48 = vpop.eup %2390  ;;  %v1191_v5 = vmul.f32 %v2389_v61, %v3102_v15 }
 0x2bf   : > { %v2393_v63 = vpop.eup %2392  ;;  %v1194_v2 = vmul.f32 %v2391_v48, %v3105_v16 }
 0x2c0   : > { %v2395_v3 = vpop.eup %2394  ;;  %v2113_v4 = vpop.f32.mrb[28].mxu0  ;;  %v1192_v6 = vmul.f32 %v2393_v63, %v3105_v16 }
 0x2c1   : > { %v2397_v7 = vpop.eup %2396  ;;  %v1149_v8 = vadd.f32 1.0, %v2395_v3  ;;  %v1073_v9 = vadd.f32 %v2113_v4, %v3259_v13  ;;  %v1064_v10 = vpop.f32.mrb[29].mxu0  ;;  %v1208_v56 = vpack.c.bf16 %v1194_v2, %v1193_v0  ;;  %v3294_v4 = vld [vmem:[%s3081_s25] sm:$0xff] }
 0x2c2   : > { %v2399_v11 = vpop.eup %2398  ;;  %v1147_v51 = vadd.f32 1.0, %v2397_v7  ;;  %v1065_v12 = vadd.f32 %v3259_v13, %v1064_v10  ;;  %v2114_v14 = vpop.f32.mrb[30].mxu0  ;;  %v1207_v17 = vpack.c.bf16 %v1192_v6, %v1191_v5  ;;  %v3298_v6 = vld [vmem:[%s3081_s25 + $0x8] sm:$0xff]  ;;  %s3354_s25 = scalar_lea.hbm %s3459_s15, %s2012_s12 }
 0x2c3   : > { %v2401_v18 = vpop.eup %2400  ;;  %2402 = vrcp.f32 %v1149_v8  ;;  %v1150_v52 = vadd.f32 1.0, %v2399_v11  ;;  %v1969_v59 = vmul.f32 -1.442695, %v1073_v9  ;;  %v1076_v19 = vadd.f32 %v2114_v14, %v3259_v13  ;;  %v1067_v62 = vpop.f32.mrb[31].mxu0 }
 0x2c4   : > { %2404 = vrcp.f32 %v1147_v51  ;;  %v1148_v1 = vadd.f32 1.0, %v2401_v18  ;;  %v1967_v39 = vmul.f32 -1.442695, %v1065_v12  ;;  %v1068_v20 = vadd.f32 %v3259_v13, %v1067_v62  ;;  %2123 = vmatprep.mubr.msk.bf16.mxu0 %vm489_vm3, %v1207_v17 }
 0x2c5   : > { %2406 = vrcp.f32 %v1150_v52  ;;  %v1970_v21 = vmul.f32 -1.442695, %v1076_v19  ;;  %2124 = vmatmul.mubr.msk.bf16.vlgmr.msra.gmra.mrb[4].mxu0 %vm489_vm3, %v1208_v56 }
 0x2c6   : > { %2408 = vrcp.f32 %v1148_v1  ;;  %v1968_v22 = vmul.f32 -1.442695, %v1068_v20 }
 0x2c7   : > { %2410 = vpow2.f32 %v1969_v59 }
 0x2c8   : > { %2412 = vpow2.f32 %v1967_v39 }
 0x2c9   : > { %2414 = vpow2.f32 %v1970_v21 }
 0x2ca   : > { %2416 = vpow2.f32 %v1968_v22 }
 0x2cd   : > { %v2403_v23 = vpop.eup %2402 }
 0x2ce   : > { %v2405_v24 = vpop.eup %2404  ;;  %v1197_v29 = vmul.f32 %v2403_v23, %v3102_v15 }
 0x2cf   : > { %v2407_v25 = vpop.eup %2406  ;;  %v1195_v33 = vmul.f32 %v2405_v24, %v3102_v15 }
 0x2d0   : > { %v2409_v27 = vpop.eup %2408  ;;  %v2117_v28 = vpop.f32.mrb[32].mxu0  ;;  %v1198_v26 = vmul.f32 %v2407_v25, %v3105_v16 }
 0x2d1   : > { %v2411_v30 = vpop.eup %2410  ;;  %v1089_v31 = vadd.f32 %v2117_v28, %v3259_v13  ;;  %v1080_v32 = vpop.f32.mrb[33].mxu0  ;;  %v1196_v34 = vmul.f32 %v2409_v27, %v3105_v16  ;;  %v2370_v27 = vld [vmem:[#allocation11 + $0x8] ss:$12 sps:$4 sm:$0xff]   ;;  %v2371_v28 = vld [vmem:[#allocation11 + $0x20] ss:$12 sps:$4 sm:$0xff]  }
 0x2d2   : > { %v2413_v35 = vpop.eup %2412  ;;  %v1153_v36 = vadd.f32 1.0, %v2411_v30  ;;  %v1081_v37 = vadd.f32 %v3259_v13, %v1080_v32  ;;  %v2118_v40 = vpop.f32.mrb[34].mxu0  ;;  %v1210_v41 = vpack.c.bf16 %v1198_v26, %v1197_v29  ;;  %2160 = vmatpush3.bf16.msra.mxu1 %v2370_v27  ;;  %v2372_v29 = vld [vmem:[#allocation11 + $0x38] ss:$12 sps:$4 sm:$0xff]   ;;  %v2373_v26 = vld [vmem:[#allocation11 + $0x50] ss:$12 sps:$4 sm:$0xff]  }
 0x2d3   : > { %v2415_v42 = vpop.eup %2414  ;;  %v1151_v43 = vadd.f32 1.0, %v2413_v35  ;;  %v1092_v44 = vadd.f32 %v2118_v40, %v3259_v13  ;;  %v1083_v45 = vpop.f32.mrb[35].mxu0  ;;  %v1209_v46 = vpack.c.bf16 %v1196_v34, %v1195_v33  ;;  %v1973_v54 = vmul.f32 -1.442695, %v1089_v31  ;;  %2161 = vmatprep.subr.bf16.mxu1 %v2742_v38  ;;  %v2374_v30 = vld [vmem:[#allocation11 + $0x68] ss:$12 sps:$4 sm:$0xff]  }
 0x2d4   : > { %v2417_v50 = vpop.eup %2416  ;;  %2418 = vrcp.f32 %v1153_v36  ;;  %v1154_v53 = vadd.f32 1.0, %v2415_v42  ;;  %v1084_v15 = vadd.f32 %v3259_v13, %v1083_v45  ;;  %v1971_v55 = vmul.f32 -1.442695, %v1081_v37  ;;  %v2375_v31 = vld [vmem:[#allocation11 + $0x80] ss:$12 sps:$4 sm:$0xff]  }
 0x2d5   : > { %2420 = vrcp.f32 %v1151_v43  ;;  %v1152_v16 = vadd.f32 1.0, %v2417_v50  ;;  %2127 = vmatprep.mubr.msk.bf16.mxu0 %vm489_vm3, %v1209_v46  ;;  %v1974_v57 = vmul.f32 -1.442695, %v1092_v44  ;;  %v2376_v32 = vld [vmem:[#allocation11 + $0x98] ss:$12 sps:$4 sm:$0xff]   ;;  %v554_v34 = vsub.s32 2, %v3152_v47 }
 0x2d6   : > { %2422 = vrcp.f32 %v1154_v53  ;;  %2128 = vmatmul.mubr.msk.bf16.gmra.mrb[8].mxu0 %vm489_vm3, %v1210_v41  ;;  %v1972_v58 = vmul.f32 -1.442695, %v1084_v15  ;;  %2162 = vmatpush3.bf16.msra.mxu1 %v2371_v28  ;;  %v2377_v33 = vld [vmem:[#allocation11 + $0xb0] ss:$12 sps:$4 sm:$0xff]  }
 0x2d7   : > { %2424 = vrcp.f32 %v1152_v16  ;;  %v3289_v60 = vpop.f32.mrb[32].mxu1  ;;  %2163 = vmatprep.subr.bf16.mxu1 %v2742_v38  ;;  %v3320_v35 = vrot.slane %v3155_v49, %v554_v34 }
 0x2d8   : > { %2426 = vpow2.f32 %v1973_v54  ;;  %v2157_v61 = vpop.f32.mrb[33].mxu1 }
 0x2d9   : > { %2428 = vpow2.f32 %v1971_v55  ;;  %v3291_v48 = vpop.f32.mrb[34].mxu1 }
 0x2da   : > { %2430 = vpow2.f32 %v1974_v57  ;;  %v2158_v13 = vpop.f32.mrb[35].mxu1  ;;  %2164 = vmatpush3.bf16.msra.mxu1 %v2372_v29 }
 0x2db   : > { %2432 = vpow2.f32 %v1972_v58  ;;  %2165 = vmatprep.subr.bf16.mxu1 %v2742_v38 }
 0x2de   : > { %v2419_v63 = vpop.eup %2418  ;;  %2166 = vmatpush3.bf16.msra.mxu1 %v2373_v26 }
 0x2df   : > { %v2421_v0 = vpop.eup %2420  ;;  %v1201_v5 = vmul.f32 %v3294_v4, %v2419_v63  ;;  %2167 = vmatprep.subr.bf16.mxu1 %v2742_v38 }
 0x2e0   : > { %v2423_v2 = vpop.eup %2422  ;;  %v1199_v9 = vmul.f32 %v3294_v4, %v2421_v0 }
 0x2e1   : > { %v2425_v3 = vpop.eup %2424  ;;  %v1202_v7 = vmul.f32 %v3298_v6, %v2423_v2 }
 0x2e2   : > { %v2427_v8 = vpop.eup %2426  ;;  %v1200_v10 = vmul.f32 %v3298_v6, %v2425_v3  ;;  %2168 = vmatpush3.bf16.msra.mxu1 %v2374_v30 }
 0x2e3   : > { %v2429_v56 = vpop.eup %2428  ;;  %v1157_v11 = vadd.f32 1.0, %v2427_v8  ;;  %v1212_v51 = vpack.c.bf16 %v1202_v7, %v1201_v5  ;;  %2169 = vmatprep.subr.bf16.mxu1 %v2742_v38 }
 0x2e4   : > { %v2431_v12 = vpop.eup %2430  ;;  %v1155_v14 = vadd.f32 1.0, %v2429_v56  ;;  %v1211_v17 = vpack.c.bf16 %v1200_v10, %v1199_v9 }
 0x2e5   : > { %v2433_v18 = vpop.eup %2432  ;;  %2434 = vrcp.f32 %v1157_v11  ;;  %v1158_v52 = vadd.f32 1.0, %v2431_v12 }
 0x2e6   : > { %2436 = vrcp.f32 %v1155_v14  ;;  %v1156_v59 = vadd.f32 1.0, %v2433_v18  ;;  %2131 = vmatprep.mubr.msk.bf16.mxu0 %vm489_vm3, %v1211_v17  ;;  %2170 = vmatpush3.bf16.msra.mxu1 %v2375_v31 }
 0x2e7   : > { %2438 = vrcp.f32 %v1158_v52  ;;  %2132 = vmatmul.mubr.msk.bf16.gmra.mrb[12].mxu0 %vm489_vm3, %v1212_v51  ;;  %2171 = vmatprep.subr.bf16.mxu1 %v2742_v38 }
 0x2e8   : > { %2440 = vrcp.f32 %v1156_v59 }
 0x2ea   : > { %2172 = vmatpush3.bf16.msra.mxu1 %v2376_v32 }
 0x2eb   : > { %2173 = vmatprep.subr.bf16.mxu1 %v2742_v38 }
 0x2ee   : > { %2174 = vmatpush3.bf16.msra.mxu1 %v2377_v33 }
 0x2ef   : > { %v2435_v19 = vpop.eup %2434 }
 0x2f0   : > { %v2437_v62 = vpop.eup %2436  ;;  %v1205_v20 = vmul.f32 %v3294_v4, %v2435_v19 }
 0x2f1   : > { %v2439_v1 = vpop.eup %2438  ;;  %v1203_v22 = vmul.f32 %v3294_v4, %v2437_v62 }
 0x2f2   : > { %v2441_v39 = vpop.eup %2440  ;;  %v1206_v21 = vmul.f32 %v3298_v6, %v2439_v1 }
 0x2f3   : > { %v1204_v23 = vmul.f32 %v3298_v6, %v2441_v39 }
 0x2f4   : > { %v1214_v24 = vpack.c.bf16 %v1206_v21, %v1205_v20 }
 0x2f5   : > { %v1213_v25 = vpack.c.bf16 %v1204_v23, %v1203_v22 }
 0x2f7   : > { %2135 = vmatprep.mubr.msk.bf16.mxu0 %vm489_vm3, %v1213_v25 }
 0x2f8   : > { %2136 = vmatmul.mubr.msk.bf16.gmra.mrb[16].mxu0 %vm489_vm3, %v1214_v24 }
 0x398   : > { %v2125_v36 = vpop.f32.mrb[4].mxu0 }
 0x399   : > { %v2179_v37 = vadd.f32 %v2125_v36, %v3320_v35  ;;  %v1289_v40 = vpop.f32.mrb[5].mxu0 }
 0x39a   : > { %v2180_v41 = vadd.f32 %v1289_v40, %v3320_v35  ;;  %v2126_v42 = vpop.f32.mrb[6].mxu0 }
 0x39b   : > { %v1557_v43 = vmul.f32 0.1, %v2179_v37  ;;  %v2181_v44 = vadd.f32 %v2126_v42, %v3320_v35  ;;  %v1292_v45 = vpop.f32.mrb[7].mxu0 }
 0x39c   : > { %v1555_v46 = vmul.f32 0.1, %v2180_v41  ;;  %v2182_v38 = vadd.f32 %v1292_v45, %v3320_v35 }
 0x39d   : > { %v1558_v50 = vmul.f32 0.1, %v2181_v44  ;;  %v1573_v47 = vmax.f32 %v2179_v37, %v1557_v43 }
 0x39e   : > { %v1556_v53 = vmul.f32 0.1, %v2182_v38  ;;  %v1571_v49 = vmax.f32 %v2180_v41, %v1555_v46 }
 0x39f   : > { %v1574_v54 = vmax.f32 %v2181_v44, %v1558_v50 }
 0x3a0   : > { %v1572_v15 = vmax.f32 %v2182_v38, %v1556_v53 }
 0x3a1   : > { %v1588_v16 = vpack.c.bf16 %v1574_v54, %v1573_v47 }
 0x3a2   : > { %v1587_v55 = vpack.c.bf16 %v1572_v15, %v1571_v49 }
 0x3a9   : > { %v2129_v57 = vpop.f32.mrb[8].mxu0 }
 0x3aa   : > { %v2183_v58 = vadd.f32 %v2129_v57, %v3320_v35  ;;  %v1305_v61 = vpop.f32.mrb[9].mxu0 }
 0x3ab   : > { %v2184_v13 = vadd.f32 %v1305_v61, %v3320_v35  ;;  %v2130_v63 = vpop.f32.mrb[10].mxu0  ;;  %v1985_v61 = vld [vmem:[%s3414_s7 + $0x1] ss:$0 sm:$0xff] }
 0x3ac   : > { %v1561_v0 = vmul.f32 0.1, %v2183_v58  ;;  %v2185_v2 = vadd.f32 %v2130_v63, %v3320_v35  ;;  %v1308_v3 = vpop.f32.mrb[11].mxu0 }
 0x3ad   : > { %v1559_v5 = vmul.f32 0.1, %v2184_v13  ;;  %v2186_v7 = vadd.f32 %v1308_v3, %v3320_v35 }
 0x3ae   : > { %v1562_v8 = vmul.f32 0.1, %v2185_v2  ;;  %v1577_v10 = vmax.f32 %v2183_v58, %v1561_v0 }
 0x3af   : > { %v1560_v9 = vmul.f32 0.1, %v2186_v7  ;;  %v1575_v11 = vmax.f32 %v2184_v13, %v1559_v5  ;;  %v1521_v13 = vadd.f32 %v1985_v61, %v3289_v60 }
 0x3b0   : > { %v1578_v56 = vmax.f32 %v2185_v2, %v1562_v8  ;;  %v1996_v8 = vld [vmem:[%s3414_s7 + $0x2] ss:$0 sm:$0xff] }
 0x3b1   : > { %v1576_v51 = vmax.f32 %v2186_v7, %v1560_v9  ;;  %v1994_v63 = vmul.f32 -1.442695, %v1521_v13 }
 0x3b2   : > { %v1590_v12 = vpack.c.bf16 %v1578_v56, %v1577_v10 }
 0x3b3   : > { %v1589_v14 = vpack.c.bf16 %v1576_v51, %v1575_v11  ;;  %2442 = vpow2.f32 %v1994_v63 }
 0x3ba   : > { %v2133_v17 = vpop.f32.mrb[12].mxu0 }
 0x3bb   : > { %v2187_v18 = vadd.f32 %v2133_v17, %v3320_v35  ;;  %v1321_v52 = vpop.f32.mrb[13].mxu0 }
 0x3bc   : > { %v2188_v59 = vadd.f32 %v1321_v52, %v3320_v35  ;;  %v2134_v19 = vpop.f32.mrb[14].mxu0 }
 0x3bd   : > { %v1565_v62 = vmul.f32 0.1, %v2187_v18  ;;  %v2189_v1 = vadd.f32 %v2134_v19, %v3320_v35  ;;  %v1324_v39 = vpop.f32.mrb[15].mxu0  ;;  %v2443_v2 = vpop.eup %2442 }
 0x3be   : > { %v1563_v20 = vmul.f32 0.1, %v2188_v59  ;;  %v2190_v21 = vadd.f32 %v1324_v39, %v3320_v35  ;;  %v1533_v5 = vadd.f32 1.0, %v2443_v2 }
 0x3bf   : > { %v1566_v22 = vmul.f32 0.1, %v2189_v1  ;;  %v1581_v24 = vmax.f32 %v2187_v18, %v1565_v62 }
 0x3c0   : > { %v1564_v23 = vmul.f32 0.1, %v2190_v21  ;;  %v1579_v27 = vmax.f32 %v2188_v59, %v1563_v20 }
 0x3c1   : > { %v1582_v25 = vmax.f32 %v2189_v1, %v1566_v22 }
 0x3c2   : > { %v1580_v28 = vmax.f32 %v2190_v21, %v1564_v23 }
 0x3c3   : > { %v1592_v29 = vpack.c.bf16 %v1582_v25, %v1581_v24 }
 0x3c4   : > { %v1591_v26 = vpack.c.bf16 %v1580_v28, %v1579_v27 }
 0x3c5   : > { %v1596_v30 = vmax.bf16 %v1592_v29, %v1588_v16 }
 0x3c6   : > { %v1595_v31 = vmax.bf16 %v1591_v26, %v1587_v55 }
 0x3c8   : > { %v1599_v32 = vmax.bf16 %v1596_v30, %v1595_v31 }
 0x3cb   : > { %v2137_v33 = vpop.f32.mrb[16].mxu0 }
 0x3cc   : > { %v2191_v34 = vadd.f32 %v2137_v33, %v3320_v35  ;;  %v1337_v36 = vpop.f32.mrb[17].mxu0 }
 0x3cd   : > { %v2192_v37 = vadd.f32 %v1337_v36, %v3320_v35  ;;  %v2138_v40 = vpop.f32.mrb[18].mxu0 }
 0x3ce   : > { %v1569_v41 = vmul.f32 0.1, %v2191_v34  ;;  %v2193_v42 = vadd.f32 %v2138_v40, %v3320_v35  ;;  %v1340_v43 = vpop.f32.mrb[19].mxu0 }
 0x3cf   : > { %v1567_v44 = vmul.f32 0.1, %v2192_v37  ;;  %v2194_v45 = vadd.f32 %v1340_v43, %v3320_v35  ;;  %v1524_v35 = vadd.f32 %v1985_v61, %v3291_v48 }
 0x3d0   : > { %v1570_v46 = vmul.f32 0.1, %v2193_v42  ;;  %v1585_v50 = vmax.f32 %v2191_v34, %v1569_v41 }
 0x3d1   : > { %v1568_v38 = vmul.f32 0.1, %v2194_v45  ;;  %v1583_v47 = vmax.f32 %v2192_v37, %v1567_v44  ;;  %v1995_v0 = vmul.f32 -1.442695, %v1524_v35 }
 0x3d2   : > { %v1586_v53 = vmax.f32 %v2193_v42, %v1570_v46 }
 0x3d3   : > { %v1584_v54 = vmax.f32 %v2194_v45, %v1568_v38  ;;  %2444 = vpow2.f32 %v1995_v0 }
 0x3d4   : > { %v1594_v49 = vpack.c.bf16 %v1586_v53, %v1585_v50  ;;  %2446 = vrcp.f32 %v1533_v5 }
 0x3d5   : > { %v1593_v15 = vpack.c.bf16 %v1584_v54, %v1583_v47 }
 0x3d6   : > { %v1598_v16 = vmax.bf16 %v1594_v49, %v1590_v12 }
 0x3d7   : > { %v1597_v55 = vmax.bf16 %v1593_v15, %v1589_v14 }
 0x3d9   : > { %v1600_v57 = vmax.bf16 %v1598_v16, %v1597_v55 }
 0x3db   : > { %v1601_v58 = vmax.bf16 %v1600_v57, %v1599_v32 }
 0x3dd   : > { %2176 = vmatmul.mubr.bf16.vlgmr.msra.gmra.mrb[36].mxu1 %v1601_v58  ;;  %v2445_v3 = vpop.eup %2444 }
 0x3de   : > { %v1534_v7 = vadd.f32 1.0, %v2445_v3  ;;  %v2447_v51 = vpop.eup %2446 }
 0x3df   : > { %v1716_v14 = vsub.f32 1.0, %v2447_v51 }
 0x3e0   : > { %2448 = vrcp.f32 %v1534_v7 }
 0x3e1   : > { %v1718_v52 = vmul.f32 %v3294_v4, %v1716_v14 }
 0x3ea   : > { %v2449_v12 = vpop.eup %2448 }
 0x3eb   : > { %v1717_v17 = vsub.f32 1.0, %v2449_v12 }
 0x3ed   : > { %v1719_v1 = vmul.f32 %v3298_v6, %v1717_v17 }
 0x4b0   : > { %v1707_v9 = vpop.f32.mrb[36].mxu1 }
 0x4b1   : > { %v1708_v60 = vadd.f32 %v1996_v8, %v1707_v9  ;;  %v2177_v10 = vpop.f32.mrb[37].mxu1 }
 0x4b2   : > { %v1710_v48 = vpop.f32.mrb[38].mxu1 }
 0x4b3   : > { %2450 = vtanh.f32 %v1708_v60  ;;  %v1711_v56 = vadd.f32 %v1996_v8, %v1710_v48  ;;  %v2178_v11 = vpop.f32.mrb[39].mxu1 }
 0x4b5   : > { %2452 = vtanh.f32 %v1711_v56 }
 0x4bd   : > { %v2451_v18 = vpop.eup %2450 }
 0x4be   : > { %v1720_v59 = vmul.f32 %v2451_v18, %v2447_v51 }
 0x4bf   : > { %v2453_v19 = vpop.eup %2452 }
 0x4c0   : > { %v1722_v62 = vadd.f32 %v1720_v59, %v1718_v52  ;;  %v1721_v39 = vmul.f32 %v2453_v19, %v2449_v12 }
 0x4c2   : > { %v1723_v4 = vadd.f32 %v1721_v39, %v1719_v1  ;;  %1724 = vst.msk [vmem:[%s441_s20] sm:$0xff] %vm489_vm3, %v1722_v62 }
 0x4c4   : > { %1725 = vst.msk [vmem:[%s441_s20 + $0x8] sm:$0xff] %vm489_vm3, %v1723_v4 }
 0x4c5   : > { %2641 = shalt.err (!%p2638_p6)
}
 0x4c6   : > { %s2642_s8 = scalar_lea.hbm %s3354_s25, 256  ;;  %s2646_s19 = scalar_lea.hbm %s3459_s15, 512 }
 0x4c7   : > { %p2643_p7 = scmp.ne.s32.totalorder %s3354_s25, %s2642_s8  ;;  %p2647_p2 = scmp.lt.u32.totalorder %s3354_s25, %s3459_s15 }
 0x4c8   : > { %p2648_p13 = scmp.lt.u32.totalorder %s2646_s19, %s2642_s8  ;;  %p2650_p1 = scmp.lt.u32.totalorder %s2642_s8, %s3354_s25 }
 0x4c9   : > { %p2644_p9 = pnand %p2643_p7, %p2970_p5 }
 0x4ca   : > { %p2649_p4 = por %p2648_p13, %p2647_p2 }
 0x4cb   : > { %p2645_p0 = pneg %p2644_p9 }
 0x4cc   : > { %p2651_p8 = por %p2650_p1, %p2649_p4 }
 0x4ce   : > { %p2652_p10 = pnand %p2651_p8, %p2645_p0 }
 0x4d0   : > { %2655 = shalt.err (!%p2652_p10)
}
 0x4d1   : > { %s2745_s4 = smov 128   ;;  %s2746_s12 = smov 8  }
 0x4d2   : > { %2231 = dma.vmem_to_hbm [thread:$0]  (%p2970_p5), %s3356_s21, 256, %s3354_s25, %s1727_s3, %s2745_s4, %s2745_s4, %s2746_s12  }
 0x4d3 PF: > { %s3460_s20 = sld [smem:[#allocation20_spill]]  ;;  %s3461_s30 = sld [smem:[#allocation22_spill]] }
 0x4d4   : > { %p3463_p11 = scmp.ge.s32.totalorder %s2726_s10, 2 }
 0x4d9   : > { %s1757_s2 = sand.u32 1, %s3460_s20   ;;  %p3462_p3 = scmp.ne.s32.totalorder %s3461_s30, 0 }
 0x4da   : > { %s1758_s11 = scalar_lea.sflag [#allocation4], %s1757_s2 }
 0x4db   : > { %p2254_p12 = pnand %p3463_p11, %p3462_p3 }
 0x4dd   : > { %2701 = dma.done.wait (!%p2254_p12), %s1758_s11, 256  }
 0x4de   : > { %2703 = vsyncadd (!%p2254_p12), %s1758_s11, 4294967040  ;;  %s29_s10 = sadd.s32 1, %s2726_s10   ;;  %s3464_s27 = smov %s2710_s28 }
 0x4df   : > { %p26_p6 = scmp.ge.s32.totalorder %s29_s10, 4   ;;  %s3465_s28 = smov %s2714_s29 }
 0x4e0   : > { %s3466_s29 = smov %s2982_s17  ;;  %s3467_s30 = smov %s2722_s9 }
 0x4e1   : > { %s3468_s9 = smov %s3470_s16  ;;  %28 = sbr.rel (!%p26_p6) target bundleno = 16 (0x10), region = 126 }
 0x4e8   :  { %1763 = vsyncpa [#allocation3], 1 }
 0x4e9   :  { %1765 = vsyncpa [#allocation3 + $0x1], 1 }
 0x4ea   :  { %1766 = vsyncpa [#allocation6], 1 }
 0x4eb   :  { %1768 = vsyncpa [#allocation6 + $0x1], 1 }
 0x4ec   :  { %1769 = vsyncpa [#allocation9], 1 }
 0x4ed   :  { %1770 = vsyncpa [#allocation12], 1 }
 0x4ee   :  { %1771 = vsyncpa [#allocation4], 1 }
 0x4ef   :  { %1773 = vsyncpa [#allocation4 + $0x1], 1 }

</bundles_post_ra>
